<compile_context>
chip_gen: v7x
topology: tpu7x:2x2x1
jax: 0.10.0
libtpu: 0.0.40
codegen_flags: <defaults>
</compile_context>

<pallas_src>
import jax
import jax.numpy as jnp
from jax.experimental import pallas as pl
from jax.experimental.pallas import tpu as pltpu

N_EMBD = 384
N_HEAD = 4
HEAD_SIZE = N_EMBD // N_HEAD   # 96
HEAD_PAD = 128                 # lane-aligned padded head width
BLOCK_SIZE = 64
LN_EPS = 1e-5


def _layernorm(h, gamma, beta):
    mu = jnp.mean(h, axis=-1, keepdims=True)
    var = jnp.mean((h - mu) ** 2, axis=-1, keepdims=True)
    return (h - mu) * jax.lax.rsqrt(var + LN_EPS) * gamma + beta


def block_kernel(x_ref,
                 wqkv_ref, wp_ref, bp_ref,
                 w1_ref, b1_ref, w2_ref, b2_ref,
                 g1_ref, be1_ref, g2_ref, be2_ref,
                 o_ref,
                 qkv_ref, sa_ref):
    Bb, T, C = x_ref.shape
    M = Bb * T
    HPH = N_HEAD * HEAD_PAD                       # 512

    x = x_ref[...].reshape(M, C)                  # f32 rows for residual / LN
    x_bf = x.astype(jnp.bfloat16)

    # ---- fused QKV projection: one (M, C) @ (C, 3*HPH) MXU matmul ----
    # (score scale 1/sqrt(96) already folded into the Q columns of wqkv).
    # Result goes to a VMEM scratch so its live range is bounded; the per-head
    # reads below are zero-cost lane-aligned ref slices.
    qkv_ref[...] = jnp.dot(x_bf, wqkv_ref[...],
                           preferred_element_type=jnp.float32).astype(jnp.bfloat16)

    # causal additive bias, built once at full (Bb, T, T) shape (hoisted out
    # of the head loop so no per-iteration broadcast_in_dim is emitted)
    row = jax.lax.broadcasted_iota(jnp.int32, (Bb, T, T), 1)
    col = jax.lax.broadcasted_iota(jnp.int32, (Bb, T, T), 2)
    causal_bias = jnp.where(row >= col, 0.0, -1e30).astype(jnp.float32)

    # ---- per-head causal attention, batched over the batch block ----
    for h in range(N_HEAD):
        c0 = h * HEAD_PAD
        q = qkv_ref[:, c0:c0 + HEAD_PAD].reshape(Bb, T, HEAD_PAD)                    # (Bb,T,128)
        k = qkv_ref[:, HPH + c0:HPH + c0 + HEAD_PAD].reshape(Bb, T, HEAD_PAD)        # (Bb,T,128)
        v = qkv_ref[:, 2 * HPH + c0:2 * HPH + c0 + HEAD_PAD].reshape(Bb, T, HEAD_PAD)

        # batched score matmul contracting on the shared feature dim
        wei = jnp.einsum('bqd,bkd->bqk', q, k,
                         preferred_element_type=jnp.float32)                         # (Bb,T,T)
        wei = wei + causal_bias
        wei = wei - jnp.max(wei, axis=-1, keepdims=True)
        p = jnp.exp(wei)
        # approx=True puts the reciprocal on the EUP slot (idle between exps)
        p = p * pl.reciprocal(jnp.sum(p, axis=-1, keepdims=True), approx=True)
        out_h = jnp.einsum('bqk,bkd->bqd', p.astype(jnp.bfloat16), v,
                           preferred_element_type=jnp.float32)                       # (Bb,T,128)
        # one lane-aligned store per head (no concatenate, no per-batch stores)
        sa_ref[:, c0:c0 + HEAD_PAD] = out_h.reshape(M, HEAD_PAD).astype(jnp.bfloat16)

    # ---- output projection on the fused row block ----
    sa_out = jnp.dot(sa_ref[...], wp_ref[...],
                     preferred_element_type=jnp.float32) + bp_ref[...]               # (M, C)

    # ---- x = ln1(x + sa) ----
    x1 = _layernorm(x + sa_out, g1_ref[...], be1_ref[...])

    # ---- feed-forward: Linear -> ReLU -> Linear ----
    hid = jnp.dot(x1.astype(jnp.bfloat16), w1_ref[...],
                  preferred_element_type=jnp.float32) + b1_ref[...]
    hid = jnp.maximum(hid, 0.0)
    ff = jnp.dot(hid.astype(jnp.bfloat16), w2_ref[...],
                 preferred_element_type=jnp.float32) + b2_ref[...]

    # ---- x = ln2(x + ff) ----
    out = _layernorm(x1 + ff, g2_ref[...], be2_ref[...])
    o_ref[...] = out.reshape(Bb, T, C).astype(o_ref.dtype)


def _choose_batch_block(B, T, max_rows=1024):
    """Batch block size per grid step.

    * capped at B//2 when B >= 2 so the 'parallel' grid axis has >= 2 steps
      (lets v7x shard the batch axis across both TensorCores);
    * capped so the fused row block (b_blk*T) stays <= max_rows, keeping the
      per-step working set inside the 48 MiB VMEM budget (safe for v7x's
      64 MiB per-TC VMEM, comfortable on v5e/v6e's 128 MiB).
    """
    cap_parallel = max(1, B // 2) if B >= 2 else 1
    cap_rows = max(1, max_rows // T)
    return max(1, min(cap_parallel, cap_rows))


def transformer_block(x, packed_params, *, max_rows=1024):
    B, T, C = x.shape
    b_blk = _choose_batch_block(B, T, max_rows)
    n_steps = pl.cdiv(B, b_blk)
    B_pad = n_steps * b_blk
    if B_pad != B:
        # handle non-divisor batch sizes by padding (padded rows are dropped)
        x = jnp.pad(x, ((0, B_pad - B), (0, 0), (0, 0)))

    def wspec(p):
        # weights are grid-invariant: constant index_map, no re-fetch per step
        return pl.BlockSpec(p.shape, lambda b, n=p.ndim: (0,) * n)

    in_specs = ([pl.BlockSpec((b_blk, T, C), lambda b: (b, 0, 0))]
                + [wspec(p) for p in packed_params])

    out = pl.pallas_call(
        block_kernel,
        out_shape=jax.ShapeDtypeStruct((B_pad, T, C), x.dtype),
        grid=(n_steps,),
        in_specs=in_specs,
        out_specs=pl.BlockSpec((b_blk, T, C), lambda b: (b, 0, 0)),
        scratch_shapes=[
            pltpu.VMEM((b_blk * T, 3 * N_HEAD * HEAD_PAD), jnp.bfloat16),  # fused QKV
            pltpu.VMEM((b_blk * T, N_HEAD * HEAD_PAD), jnp.bfloat16),      # head outputs
        ],
        compiler_params=pltpu.CompilerParams(
            dimension_semantics=("parallel",),
            vmem_limit_bytes=48 << 20,   # under v7x's 64 MiB per-TC VMEM
        ),
    )(x, *packed_params)
    return out[:B] if B_pad != B else out


def make_params(key):
    """Unpacked (PyTorch-layout, f32) parameters; weights are (in, out)."""
    ks = jax.random.split(key, 8)
    std = 0.02
    f32 = jnp.float32
    wq = jax.random.normal(ks[0], (N_EMBD, N_EMBD), f32) * std   # per-head q/k/v
    wk = jax.random.normal(ks[1], (N_EMBD, N_EMBD), f32) * std   # weights concatenated
    wv = jax.random.normal(ks[2], (N_EMBD, N_EMBD), f32) * std   # along the output dim
    wp = jax.random.normal(ks[3], (N_EMBD, N_EMBD), f32) * std
    bp = jax.random.normal(ks[4], (1, N_EMBD), f32) * std
    w1 = jax.random.normal(ks[5], (N_EMBD, 4 * N_EMBD), f32) * std
    b1 = jax.random.normal(ks[6], (1, 4 * N_EMBD), f32) * std
    w2 = jax.random.normal(ks[7], (4 * N_EMBD, N_EMBD), f32) * std
    b2 = jnp.zeros((1, N_EMBD), f32)
    g1 = jnp.ones((1, N_EMBD), f32)
    be1 = jnp.zeros((1, N_EMBD), f32)
    g2 = jnp.ones((1, N_EMBD), f32)
    be2 = jnp.zeros((1, N_EMBD), f32)
    return [wq, wk, wv, wp, bp, w1, b1, w2, b2, g1, be1, g2, be2]


def pack_params(params):
    """Kernel-side layout: fused QKV with 128-lane padded heads (scale folded
    into Wq), padded Wp, matmul weights cast to bf16, biases/LN params f32."""
    wq, wk, wv, wp, bp, w1, b1, w2, b2, g1, be1, g2, be2 = params
    bf = jnp.bfloat16
    f32 = jnp.float32
    scale = HEAD_SIZE ** -0.5

    def pad_head_cols(w):
        # (C, N_HEAD*HEAD_SIZE) -> (C, N_HEAD*HEAD_PAD): zero-pad each head to 128 lanes
        c = w.shape[0]
        w = w.reshape(c, N_HEAD, HEAD_SIZE)
        w = jnp.pad(w, ((0, 0), (0, 0), (0, HEAD_PAD - HEAD_SIZE)))
        return w.reshape(c, N_HEAD * HEAD_PAD)

    wqkv = jnp.concatenate(
        [pad_head_cols(wq * scale), pad_head_cols(wk), pad_head_cols(wv)],
        axis=1).astype(bf)                                   # (C, 3*512)

    wp_p = wp.reshape(N_HEAD, HEAD_SIZE, N_EMBD)
    wp_p = jnp.pad(wp_p, ((0, 0), (0, HEAD_PAD - HEAD_SIZE), (0, 0)))
    wp_p = wp_p.reshape(N_HEAD * HEAD_PAD, N_EMBD).astype(bf)  # (512, C)

    return [wqkv, wp_p, bp.astype(f32),
            w1.astype(bf), b1.astype(f32),
            w2.astype(bf), b2.astype(f32),
            g1.astype(f32), be1.astype(f32), g2.astype(f32), be2.astype(f32)]


def reference_block_f32(x, params):
    """Pure-JAX f32 reference mirroring the PyTorch forward (eval mode)."""
    wq, wk, wv, wp, bp, w1, b1, w2, b2, g1, be1, g2, be2 = params
    B, T, C = x.shape

    def ln(h, g, b):
        mu = jnp.mean(h, axis=-1, keepdims=True)
        var = jnp.mean((h - mu) ** 2, axis=-1, keepdims=True)
        return (h - mu) / jnp.sqrt(var + LN_EPS) * g[0] + b[0]

    q = (x @ wq).reshape(B, T, N_HEAD, HEAD_SIZE).transpose(0, 2, 1, 3)
    k = (x @ wk).reshape(B, T, N_HEAD, HEAD_SIZE).transpose(0, 2, 1, 3)
    v = (x @ wv).reshape(B, T, N_HEAD, HEAD_SIZE).transpose(0, 2, 1, 3)
    wei = jnp.einsum('bhqd,bhkd->bhqk', q, k) * HEAD_SIZE ** -0.5
    mask = jnp.tril(jnp.ones((T, T), bool))
    wei = jnp.where(mask, wei, -jnp.inf)
    wei = jax.nn.softmax(wei, axis=-1)
    o = jnp.einsum('bhqk,bhkd->bhqd', wei, v).transpose(0, 2, 1, 3).reshape(B, T, C)
    sa = o @ wp + bp[0]
    x1 = ln(x + sa, g1, be1)
    ff = jnp.maximum(x1 @ w1 + b1[0], 0.0) @ w2 + b2[0]
    return ln(x1 + ff, g2, be2)


def reference_block_mixed(x, params):
    """Pure-JAX reference with the kernel's precision policy:
    bf16 matmul operands, f32 accumulation, f32 softmax/LayerNorm/residuals."""
    wq, wk, wv, wp, bp, w1, b1, w2, b2, g1, be1, g2, be2 = params
    B, T, C = x.shape
    bf, f32 = jnp.bfloat16, jnp.float32
    scale = HEAD_SIZE ** -0.5

    def mm(a, b):
        return jnp.dot(a.astype(bf), b.astype(bf), preferred_element_type=f32)

    def ln(h, g, b):
        mu = jnp.mean(h, axis=-1, keepdims=True)
        var = jnp.mean((h - mu) ** 2, axis=-1, keepdims=True)
        return (h - mu) * jax.lax.rsqrt(var + LN_EPS) * g + b

    x2 = x.reshape(B * T, C)
    q = mm(x2, wq * scale).reshape(B, T, N_HEAD, HEAD_SIZE).astype(bf)
    k = mm(x2, wk).reshape(B, T, N_HEAD, HEAD_SIZE).astype(bf)
    v = mm(x2, wv).reshape(B, T, N_HEAD, HEAD_SIZE).astype(bf)
    wei = jnp.einsum('bqhd,bkhd->bhqk', q, k, preferred_element_type=f32)
    r = jnp.arange(T)[:, None]
    c = jnp.arange(T)[None, :]
    wei = wei + jnp.where(r >= c, 0.0, -1e30).astype(f32)
    wei = wei - jnp.max(wei, axis=-1, keepdims=True)
    p = jnp.exp(wei)
    p = p / jnp.sum(p, axis=-1, keepdims=True)
    o = jnp.einsum('bhqk,bkhd->bqhd', p.astype(bf), v,
                   preferred_element_type=f32).reshape(B * T, C)
    sa = mm(o, wp) + bp
    x1 = ln(x2 + sa, g1, be1)
    hid = jnp.maximum(mm(x1, w1) + b1, 0.0)
    ff = mm(hid, w2) + b2
    return ln(x1 + ff, g2, be2).reshape(B, T, C)


if __name__ == "__main__":
    key = jax.random.PRNGKey(0)
    kx, kp = jax.random.split(key)
    B, T = 2, BLOCK_SIZE                      # (2, 64, 384)
    x = jax.random.normal(kx, (B, T, N_EMBD), jnp.float32)
    params = make_params(kp)
    packed = pack_params(params)

    out = jax.block_until_ready(transformer_block(x, packed))
    assert out.shape == (B, T, N_EMBD)

    # check vs a reference with the same precision policy (bf16 matmuls, f32
    # accumulation); tolerance covers the EUP approx-reciprocal softmax denom
    ref_mixed = reference_block_mixed(x, params)
    assert jnp.allclose(out, ref_mixed, atol=1e-2, rtol=1e-2), \
        "mismatch vs mixed-precision reference"

    # sanity check vs the full-f32 PyTorch-equivalent reference
    ref_f32 = reference_block_f32(x, params)
    assert jnp.allclose(out, ref_f32, atol=7e-2, rtol=7e-2), \
        "mismatch vs f32 reference"

    print("KERNEL_OK")
</pallas_src>

<mosaic_0001>
module attributes {stable_mosaic.version = 11 : i64} {
  func.func @block_kernel(%arg0: i32, %arg1: memref<1x64x384xf32, #tpu.memory_space<vmem>>, %arg2: memref<384x1536xbf16, #tpu.memory_space<vmem>>, %arg3: memref<512x384xbf16, #tpu.memory_space<vmem>>, %arg4: memref<1x384xf32, #tpu.memory_space<vmem>>, %arg5: memref<384x1536xbf16, #tpu.memory_space<vmem>>, %arg6: memref<1x1536xf32, #tpu.memory_space<vmem>>, %arg7: memref<1536x384xbf16, #tpu.memory_space<vmem>>, %arg8: memref<1x384xf32, #tpu.memory_space<vmem>>, %arg9: memref<1x384xf32, #tpu.memory_space<vmem>>, %arg10: memref<1x384xf32, #tpu.memory_space<vmem>>, %arg11: memref<1x384xf32, #tpu.memory_space<vmem>>, %arg12: memref<1x384xf32, #tpu.memory_space<vmem>>, %arg13: memref<1x64x384xf32, #tpu.memory_space<vmem>>, %arg14: memref<64x1536xbf16, #tpu.memory_space<vmem>>, %arg15: memref<64x512xbf16, #tpu.memory_space<vmem>>) attributes {dimension_semantics = [#tpu.dimension_semantics<parallel>], iteration_bounds = array<i64: 2>, scalar_prefetch = 0 : i64, scratch_operands = 2 : i64, tpu.core_type = #tpu.core_type<tc>, window_params = [{transform_indices = @transform_0, window_bounds = array<i64: 1, 64, 384>}, {pipeline_mode = #tpu.pipeline_mode<synchronous>, transform_indices = @transform_1, window_bounds = array<i64: 384, 1536>}, {pipeline_mode = #tpu.pipeline_mode<synchronous>, transform_indices = @transform_2, window_bounds = array<i64: 512, 384>}, {pipeline_mode = #tpu.pipeline_mode<synchronous>, transform_indices = @transform_3, window_bounds = array<i64: 1, 384>}, {pipeline_mode = #tpu.pipeline_mode<synchronous>, transform_indices = @transform_4, window_bounds = array<i64: 384, 1536>}, {pipeline_mode = #tpu.pipeline_mode<synchronous>, transform_indices = @transform_5, window_bounds = array<i64: 1, 1536>}, {pipeline_mode = #tpu.pipeline_mode<synchronous>, transform_indices = @transform_6, window_bounds = array<i64: 1536, 384>}, {pipeline_mode = #tpu.pipeline_mode<synchronous>, transform_indices = @transform_7, window_bounds = array<i64: 1, 384>}, {pipeline_mode = #tpu.pipeline_mode<synchronous>, transform_indices = @transform_8, window_bounds = array<i64: 1, 384>}, {pipeline_mode = #tpu.pipeline_mode<synchronous>, transform_indices = @transform_9, window_bounds = array<i64: 1, 384>}, {pipeline_mode = #tpu.pipeline_mode<synchronous>, transform_indices = @transform_10, window_bounds = array<i64: 1, 384>}, {pipeline_mode = #tpu.pipeline_mode<synchronous>, transform_indices = @transform_11, window_bounds = array<i64: 1, 384>}, {transform_indices = @transform_12, window_bounds = array<i64: 1, 64, 384>}]} {
    %c0 = arith.constant 0 : index
    %c0_0 = arith.constant 0 : index
    %c0_1 = arith.constant 0 : index
    %0 = vector.load %arg1[%c0, %c0_0, %c0_1] : memref<1x64x384xf32, #tpu.memory_space<vmem>>, vector<1x64x384xf32>
    %1 = vector.shape_cast %0 : vector<1x64x384xf32> to vector<64x384xf32>
    %2 = arith.truncf %1 : vector<64x384xf32> to vector<64x384xbf16>
    %c0_2 = arith.constant 0 : index
    %c0_3 = arith.constant 0 : index
    %3 = vector.load %arg2[%c0_2, %c0_3] : memref<384x1536xbf16, #tpu.memory_space<vmem>>, vector<384x1536xbf16>
    %cst = arith.constant dense<0.000000e+00> : vector<64x1536xf32>
    %4 = tpu.matmul %2, %3, %cst {dimension_numbers = #tpu.dot_dimension_numbers<[1], [0], [0], [1], [0, 0, 1, 1], [], []>} : vector<64x384xbf16>, vector<384x1536xbf16>, vector<64x1536xf32> -> vector<64x1536xf32>
    %5 = arith.truncf %4 : vector<64x1536xf32> to vector<64x1536xbf16>
    %c0_4 = arith.constant 0 : index
    %c0_5 = arith.constant 0 : index
    %6 = vector.load %arg14[%c0_4, %c0_5] : memref<64x1536xbf16, #tpu.memory_space<vmem>>, vector<64x1536xbf16>
    tpu.vector_store %arg14[%c0_4, %c0_5], %5 {strides = array<i32>} : memref<64x1536xbf16, #tpu.memory_space<vmem>>, vector<64x1536xbf16>,
    %7 = tpu.iota {dimensions = array<i32: 1>} : vector<1x64x64xi32>
    %8 = tpu.iota {dimensions = array<i32: 2>} : vector<1x64x64xi32>
    %9 = arith.cmpi sge, %7, %8 : vector<1x64x64xi32>
    %cst_6 = arith.constant 0.000000e+00 : f32
    %cst_7 = arith.constant -1.000000e+30 : f32
    %10 = vector.broadcast %cst_6 : f32 to vector<1x64x64xf32>
    %11 = vector.broadcast %cst_7 : f32 to vector<1x64x64xf32>
    %12 = arith.select %9, %10, %11 : vector<1x64x64xi1>, vector<1x64x64xf32>
    %c0_8 = arith.constant 0 : index
    %c0_9 = arith.constant 0 : index
    %13 = vector.load %arg14[%c0_8, %c0_9] : memref<64x1536xbf16, #tpu.memory_space<vmem>>, vector<64x128xbf16>
    %14 = vector.shape_cast %13 : vector<64x128xbf16> to vector<1x64x128xbf16>
    %c0_10 = arith.constant 0 : index
    %c512 = arith.constant 512 : index
    %15 = vector.load %arg14[%c0_10, %c512] : memref<64x1536xbf16, #tpu.memory_space<vmem>>, vector<64x128xbf16>
    %16 = vector.shape_cast %15 : vector<64x128xbf16> to vector<1x64x128xbf16>
    %c0_11 = arith.constant 0 : index
    %c1024 = arith.constant 1024 : index
    %17 = vector.load %arg14[%c0_11, %c1024] : memref<64x1536xbf16, #tpu.memory_space<vmem>>, vector<64x128xbf16>
    %18 = vector.shape_cast %17 : vector<64x128xbf16> to vector<1x64x128xbf16>
    "tpu.trace_start"() <{level = 10 : i32, message = "bqd,bkd->bqk"}> : () -> ()
    %cst_12 = arith.constant dense<0.000000e+00> : vector<1x64x64xf32>
    %19 = tpu.matmul %14, %16, %cst_12 {dimension_numbers = #tpu.dot_dimension_numbers<[2], [2], [1], [1], [0, 0, 0, 1, 1, 1], [0], [0]>} : vector<1x64x128xbf16>, vector<1x64x128xbf16>, vector<1x64x64xf32> -> vector<1x64x64xf32>
    "tpu.trace_stop"() : () -> ()
    %20 = arith.addf %19, %12 : vector<1x64x64xf32>
    %cst_13 = arith.constant dense<0xFF800000> : vector<1x64xf32>
    %21 = vector.multi_reduction <maximumf>, %20, %cst_13 [2] : vector<1x64x64xf32> to vector<1x64xf32>
    %22 = vector.shape_cast %21 : vector<1x64xf32> to vector<1x64x1xf32>
    %23 = vector.broadcast %22 : vector<1x64x1xf32> to vector<1x64x64xf32>
    %24 = arith.subf %20, %23 : vector<1x64x64xf32>
    %25 = math.exp %24 : vector<1x64x64xf32>
    %cst_14 = arith.constant dense<0.000000e+00> : vector<1x64xf32>
    %26 = vector.multi_reduction <add>, %25, %cst_14 [2] : vector<1x64x64xf32> to vector<1x64xf32>
    %27 = vector.shape_cast %26 : vector<1x64xf32> to vector<1x64x1xf32>
    %28 = tpu.reciprocal %27 {approx = true} : vector<1x64x1xf32> -> vector<1x64x1xf32>
    %29 = vector.broadcast %28 : vector<1x64x1xf32> to vector<1x64x64xf32>
    %30 = arith.mulf %25, %29 : vector<1x64x64xf32>
    %31 = arith.truncf %30 : vector<1x64x64xf32> to vector<1x64x64xbf16>
    "tpu.trace_start"() <{level = 10 : i32, message = "bqk,bkd->bqd"}> : () -> ()
    %cst_15 = arith.constant dense<0.000000e+00> : vector<1x64x128xf32>
    %32 = tpu.matmul %31, %18, %cst_15 {dimension_numbers = #tpu.dot_dimension_numbers<[2], [1], [1], [2], [0, 0, 0, 1, 1, 2], [0], [0]>} : vector<1x64x64xbf16>, vector<1x64x128xbf16>, vector<1x64x128xf32> -> vector<1x64x128xf32>
    "tpu.trace_stop"() : () -> ()
    %33 = vector.shape_cast %32 : vector<1x64x128xf32> to vector<64x128xf32>
    %34 = arith.truncf %33 : vector<64x128xf32> to vector<64x128xbf16>
    %c0_16 = arith.constant 0 : index
    %c0_17 = arith.constant 0 : index
    %35 = vector.load %arg15[%c0_16, %c0_17] : memref<64x512xbf16, #tpu.memory_space<vmem>>, vector<64x128xbf16>
    tpu.vector_store %arg15[%c0_16, %c0_17], %34 {strides = array<i32>} : memref<64x512xbf16, #tpu.memory_space<vmem>>, vector<64x128xbf16>,
    %c0_18 = arith.constant 0 : index
    %c128 = arith.constant 128 : index
    %36 = vector.load %arg14[%c0_18, %c128] : memref<64x1536xbf16, #tpu.memory_space<vmem>>, vector<64x128xbf16>
    %37 = vector.shape_cast %36 : vector<64x128xbf16> to vector<1x64x128xbf16>
    %c0_19 = arith.constant 0 : index
    %c640 = arith.constant 640 : index
    %38 = vector.load %arg14[%c0_19, %c640] : memref<64x1536xbf16, #tpu.memory_space<vmem>>, vector<64x128xbf16>
    %39 = vector.shape_cast %38 : vector<64x128xbf16> to vector<1x64x128xbf16>
    %c0_20 = arith.constant 0 : index
    %c1152 = arith.constant 1152 : index
    %40 = vector.load %arg14[%c0_20, %c1152] : memref<64x1536xbf16, #tpu.memory_space<vmem>>, vector<64x128xbf16>
    %41 = vector.shape_cast %40 : vector<64x128xbf16> to vector<1x64x128xbf16>
    "tpu.trace_start"() <{level = 10 : i32, message = "bqd,bkd->bqk"}> : () -> ()
    %cst_21 = arith.constant dense<0.000000e+00> : vector<1x64x64xf32>
    %42 = tpu.matmul %37, %39, %cst_21 {dimension_numbers = #tpu.dot_dimension_numbers<[2], [2], [1], [1], [0, 0, 0, 1, 1, 1], [0], [0]>} : vector<1x64x128xbf16>, vector<1x64x128xbf16>, vector<1x64x64xf32> -> vector<1x64x64xf32>
    "tpu.trace_stop"() : () -> ()
    %43 = arith.addf %42, %12 : vector<1x64x64xf32>
    %cst_22 = arith.constant dense<0xFF800000> : vector<1x64xf32>
    %44 = vector.multi_reduction <maximumf>, %43, %cst_22 [2] : vector<1x64x64xf32> to vector<1x64xf32>
    %45 = vector.shape_cast %44 : vector<1x64xf32> to vector<1x64x1xf32>
    %46 = vector.broadcast %45 : vector<1x64x1xf32> to vector<1x64x64xf32>
    %47 = arith.subf %43, %46 : vector<1x64x64xf32>
    %48 = math.exp %47 : vector<1x64x64xf32>
    %cst_23 = arith.constant dense<0.000000e+00> : vector<1x64xf32>
    %49 = vector.multi_reduction <add>, %48, %cst_23 [2] : vector<1x64x64xf32> to vector<1x64xf32>
    %50 = vector.shape_cast %49 : vector<1x64xf32> to vector<1x64x1xf32>
    %51 = tpu.reciprocal %50 {approx = true} : vector<1x64x1xf32> -> vector<1x64x1xf32>
    %52 = vector.broadcast %51 : vector<1x64x1xf32> to vector<1x64x64xf32>
    %53 = arith.mulf %48, %52 : vector<1x64x64xf32>
    %54 = arith.truncf %53 : vector<1x64x64xf32> to vector<1x64x64xbf16>
    "tpu.trace_start"() <{level = 10 : i32, message = "bqk,bkd->bqd"}> : () -> ()
    %cst_24 = arith.constant dense<0.000000e+00> : vector<1x64x128xf32>
    %55 = tpu.matmul %54, %41, %cst_24 {dimension_numbers = #tpu.dot_dimension_numbers<[2], [1], [1], [2], [0, 0, 0, 1, 1, 2], [0], [0]>} : vector<1x64x64xbf16>, vector<1x64x128xbf16>, vector<1x64x128xf32> -> vector<1x64x128xf32>
    "tpu.trace_stop"() : () -> ()
    %56 = vector.shape_cast %55 : vector<1x64x128xf32> to vector<64x128xf32>
    %57 = arith.truncf %56 : vector<64x128xf32> to vector<64x128xbf16>
    %c0_25 = arith.constant 0 : index
    %c128_26 = arith.constant 128 : index
    %58 = vector.load %arg15[%c0_25, %c128_26] : memref<64x512xbf16, #tpu.memory_space<vmem>>, vector<64x128xbf16>
    tpu.vector_store %arg15[%c0_25, %c128_26], %57 {strides = array<i32>} : memref<64x512xbf16, #tpu.memory_space<vmem>>, vector<64x128xbf16>,
    %c0_27 = arith.constant 0 : index
    %c256 = arith.constant 256 : index
    %59 = vector.load %arg14[%c0_27, %c256] : memref<64x1536xbf16, #tpu.memory_space<vmem>>, vector<64x128xbf16>
    %60 = vector.shape_cast %59 : vector<64x128xbf16> to vector<1x64x128xbf16>
    %c0_28 = arith.constant 0 : index
    %c768 = arith.constant 768 : index
    %61 = vector.load %arg14[%c0_28, %c768] : memref<64x1536xbf16, #tpu.memory_space<vmem>>, vector<64x128xbf16>
    %62 = vector.shape_cast %61 : vector<64x128xbf16> to vector<1x64x128xbf16>
    %c0_29 = arith.constant 0 : index
    %c1280 = arith.constant 1280 : index
    %63 = vector.load %arg14[%c0_29, %c1280] : memref<64x1536xbf16, #tpu.memory_space<vmem>>, vector<64x128xbf16>
    %64 = vector.shape_cast %63 : vector<64x128xbf16> to vector<1x64x128xbf16>
    "tpu.trace_start"() <{level = 10 : i32, message = "bqd,bkd->bqk"}> : () -> ()
    %cst_30 = arith.constant dense<0.000000e+00> : vector<1x64x64xf32>
    %65 = tpu.matmul %60, %62, %cst_30 {dimension_numbers = #tpu.dot_dimension_numbers<[2], [2], [1], [1], [0, 0, 0, 1, 1, 1], [0], [0]>} : vector<1x64x128xbf16>, vector<1x64x128xbf16>, vector<1x64x64xf32> -> vector<1x64x64xf32>
    "tpu.trace_stop"() : () -> ()
    %66 = arith.addf %65, %12 : vector<1x64x64xf32>
    %cst_31 = arith.constant dense<0xFF800000> : vector<1x64xf32>
    %67 = vector.multi_reduction <maximumf>, %66, %cst_31 [2] : vector<1x64x64xf32> to vector<1x64xf32>
    %68 = vector.shape_cast %67 : vector<1x64xf32> to vector<1x64x1xf32>
    %69 = vector.broadcast %68 : vector<1x64x1xf32> to vector<1x64x64xf32>
    %70 = arith.subf %66, %69 : vector<1x64x64xf32>
    %71 = math.exp %70 : vector<1x64x64xf32>
    %cst_32 = arith.constant dense<0.000000e+00> : vector<1x64xf32>
    %72 = vector.multi_reduction <add>, %71, %cst_32 [2] : vector<1x64x64xf32> to vector<1x64xf32>
    %73 = vector.shape_cast %72 : vector<1x64xf32> to vector<1x64x1xf32>
    %74 = tpu.reciprocal %73 {approx = true} : vector<1x64x1xf32> -> vector<1x64x1xf32>
    %75 = vector.broadcast %74 : vector<1x64x1xf32> to vector<1x64x64xf32>
    %76 = arith.mulf %71, %75 : vector<1x64x64xf32>
    %77 = arith.truncf %76 : vector<1x64x64xf32> to vector<1x64x64xbf16>
    "tpu.trace_start"() <{level = 10 : i32, message = "bqk,bkd->bqd"}> : () -> ()
    %cst_33 = arith.constant dense<0.000000e+00> : vector<1x64x128xf32>
    %78 = tpu.matmul %77, %64, %cst_33 {dimension_numbers = #tpu.dot_dimension_numbers<[2], [1], [1], [2], [0, 0, 0, 1, 1, 2], [0], [0]>} : vector<1x64x64xbf16>, vector<1x64x128xbf16>, vector<1x64x128xf32> -> vector<1x64x128xf32>
    "tpu.trace_stop"() : () -> ()
    %79 = vector.shape_cast %78 : vector<1x64x128xf32> to vector<64x128xf32>
    %80 = arith.truncf %79 : vector<64x128xf32> to vector<64x128xbf16>
    %c0_34 = arith.constant 0 : index
    %c256_35 = arith.constant 256 : index
    %81 = vector.load %arg15[%c0_34, %c256_35] : memref<64x512xbf16, #tpu.memory_space<vmem>>, vector<64x128xbf16>
    tpu.vector_store %arg15[%c0_34, %c256_35], %80 {strides = array<i32>} : memref<64x512xbf16, #tpu.memory_space<vmem>>, vector<64x128xbf16>,
    %c0_36 = arith.constant 0 : index
    %c384 = arith.constant 384 : index
    %82 = vector.load %arg14[%c0_36, %c384] : memref<64x1536xbf16, #tpu.memory_space<vmem>>, vector<64x128xbf16>
    %83 = vector.shape_cast %82 : vector<64x128xbf16> to vector<1x64x128xbf16>
    %c0_37 = arith.constant 0 : index
    %c896 = arith.constant 896 : index
    %84 = vector.load %arg14[%c0_37, %c896] : memref<64x1536xbf16, #tpu.memory_space<vmem>>, vector<64x128xbf16>
    %85 = vector.shape_cast %84 : vector<64x128xbf16> to vector<1x64x128xbf16>
    %c0_38 = arith.constant 0 : index
    %c1408 = arith.constant 1408 : index
    %86 = vector.load %arg14[%c0_38, %c1408] : memref<64x1536xbf16, #tpu.memory_space<vmem>>, vector<64x128xbf16>
    %87 = vector.shape_cast %86 : vector<64x128xbf16> to vector<1x64x128xbf16>
    "tpu.trace_start"() <{level = 10 : i32, message = "bqd,bkd->bqk"}> : () -> ()
    %cst_39 = arith.constant dense<0.000000e+00> : vector<1x64x64xf32>
    %88 = tpu.matmul %83, %85, %cst_39 {dimension_numbers = #tpu.dot_dimension_numbers<[2], [2], [1], [1], [0, 0, 0, 1, 1, 1], [0], [0]>} : vector<1x64x128xbf16>, vector<1x64x128xbf16>, vector<1x64x64xf32> -> vector<1x64x64xf32>
    "tpu.trace_stop"() : () -> ()
    %89 = arith.addf %88, %12 : vector<1x64x64xf32>
    %cst_40 = arith.constant dense<0xFF800000> : vector<1x64xf32>
    %90 = vector.multi_reduction <maximumf>, %89, %cst_40 [2] : vector<1x64x64xf32> to vector<1x64xf32>
    %91 = vector.shape_cast %90 : vector<1x64xf32> to vector<1x64x1xf32>
    %92 = vector.broadcast %91 : vector<1x64x1xf32> to vector<1x64x64xf32>
    %93 = arith.subf %89, %92 : vector<1x64x64xf32>
    %94 = math.exp %93 : vector<1x64x64xf32>
    %cst_41 = arith.constant dense<0.000000e+00> : vector<1x64xf32>
    %95 = vector.multi_reduction <add>, %94, %cst_41 [2] : vector<1x64x64xf32> to vector<1x64xf32>
    %96 = vector.shape_cast %95 : vector<1x64xf32> to vector<1x64x1xf32>
    %97 = tpu.reciprocal %96 {approx = true} : vector<1x64x1xf32> -> vector<1x64x1xf32>
    %98 = vector.broadcast %97 : vector<1x64x1xf32> to vector<1x64x64xf32>
    %99 = arith.mulf %94, %98 : vector<1x64x64xf32>
    %100 = arith.truncf %99 : vector<1x64x64xf32> to vector<1x64x64xbf16>
    "tpu.trace_start"() <{level = 10 : i32, message = "bqk,bkd->bqd"}> : () -> ()
    %cst_42 = arith.constant dense<0.000000e+00> : vector<1x64x128xf32>
    %101 = tpu.matmul %100, %87, %cst_42 {dimension_numbers = #tpu.dot_dimension_numbers<[2], [1], [1], [2], [0, 0, 0, 1, 1, 2], [0], [0]>} : vector<1x64x64xbf16>, vector<1x64x128xbf16>, vector<1x64x128xf32> -> vector<1x64x128xf32>
    "tpu.trace_stop"() : () -> ()
    %102 = vector.shape_cast %101 : vector<1x64x128xf32> to vector<64x128xf32>
    %103 = arith.truncf %102 : vector<64x128xf32> to vector<64x128xbf16>
    %c0_43 = arith.constant 0 : index
    %c384_44 = arith.constant 384 : index
    %104 = vector.load %arg15[%c0_43, %c384_44] : memref<64x512xbf16, #tpu.memory_space<vmem>>, vector<64x128xbf16>
    tpu.vector_store %arg15[%c0_43, %c384_44], %103 {strides = array<i32>} : memref<64x512xbf16, #tpu.memory_space<vmem>>, vector<64x128xbf16>,
    %c0_45 = arith.constant 0 : index
    %c0_46 = arith.constant 0 : index
    %105 = vector.load %arg15[%c0_45, %c0_46] : memref<64x512xbf16, #tpu.memory_space<vmem>>, vector<64x512xbf16>
    %c0_47 = arith.constant 0 : index
    %c0_48 = arith.constant 0 : index
    %106 = vector.load %arg3[%c0_47, %c0_48] : memref<512x384xbf16, #tpu.memory_space<vmem>>, vector<512x384xbf16>
    %cst_49 = arith.constant dense<0.000000e+00> : vector<64x384xf32>
    %107 = tpu.matmul %105, %106, %cst_49 {dimension_numbers = #tpu.dot_dimension_numbers<[1], [0], [0], [1], [0, 0, 1, 1], [], []>} : vector<64x512xbf16>, vector<512x384xbf16>, vector<64x384xf32> -> vector<64x384xf32>
    %c0_50 = arith.constant 0 : index
    %c0_51 = arith.constant 0 : index
    %108 = vector.load %arg4[%c0_50, %c0_51] : memref<1x384xf32, #tpu.memory_space<vmem>>, vector<1x384xf32>
    %109 = vector.broadcast %108 : vector<1x384xf32> to vector<64x384xf32>
    %110 = arith.addf %107, %109 : vector<64x384xf32>
    %111 = arith.addf %1, %110 : vector<64x384xf32>
    %c0_52 = arith.constant 0 : index
    %c0_53 = arith.constant 0 : index
    %112 = vector.load %arg9[%c0_52, %c0_53] : memref<1x384xf32, #tpu.memory_space<vmem>>, vector<1x384xf32>
    %c0_54 = arith.constant 0 : index
    %c0_55 = arith.constant 0 : index
    %113 = vector.load %arg10[%c0_54, %c0_55] : memref<1x384xf32, #tpu.memory_space<vmem>>, vector<1x384xf32>
    %cst_56 = arith.constant dense<0.000000e+00> : vector<64xf32>
    %114 = vector.multi_reduction <add>, %111, %cst_56 [1] : vector<64x384xf32> to vector<64xf32>
    %115 = vector.shape_cast %114 : vector<64xf32> to vector<64x1xf32>
    %cst_57 = arith.constant 3.840000e+02 : f32
    %116 = vector.broadcast %cst_57 : f32 to vector<64x1xf32>
    %117 = arith.divf %115, %116 : vector<64x1xf32>
    %118 = vector.broadcast %117 : vector<64x1xf32> to vector<64x384xf32>
    %119 = arith.subf %111, %118 : vector<64x384xf32>
    %120 = arith.mulf %119, %119 : vector<64x384xf32>
    %cst_58 = arith.constant dense<0.000000e+00> : vector<64xf32>
    %121 = vector.multi_reduction <add>, %120, %cst_58 [1] : vector<64x384xf32> to vector<64xf32>
    %122 = vector.shape_cast %121 : vector<64xf32> to vector<64x1xf32>
    %cst_59 = arith.constant 3.840000e+02 : f32
    %123 = vector.broadcast %cst_59 : f32 to vector<64x1xf32>
    %124 = arith.divf %122, %123 : vector<64x1xf32>
    %125 = vector.broadcast %117 : vector<64x1xf32> to vector<64x384xf32>
    %126 = arith.subf %111, %125 : vector<64x384xf32>
    %cst_60 = arith.constant 9.99999974E-6 : f32
    %127 = vector.broadcast %cst_60 : f32 to vector<64x1xf32>
    %128 = arith.addf %124, %127 : vector<64x1xf32>
    %129 = math.rsqrt %128 : vector<64x1xf32>
    %130 = vector.broadcast %129 : vector<64x1xf32> to vector<64x384xf32>
    %131 = arith.mulf %126, %130 : vector<64x384xf32>
    %132 = vector.broadcast %112 : vector<1x384xf32> to vector<64x384xf32>
    %133 = arith.mulf %131, %132 : vector<64x384xf32>
    %134 = vector.broadcast %113 : vector<1x384xf32> to vector<64x384xf32>
    %135 = arith.addf %133, %134 : vector<64x384xf32>
    %136 = arith.truncf %135 : vector<64x384xf32> to vector<64x384xbf16>
    %c0_61 = arith.constant 0 : index
    %c0_62 = arith.constant 0 : index
    %137 = vector.load %arg5[%c0_61, %c0_62] : memref<384x1536xbf16, #tpu.memory_space<vmem>>, vector<384x1536xbf16>
    %cst_63 = arith.constant dense<0.000000e+00> : vector<64x1536xf32>
    %138 = tpu.matmul %136, %137, %cst_63 {dimension_numbers = #tpu.dot_dimension_numbers<[1], [0], [0], [1], [0, 0, 1, 1], [], []>} : vector<64x384xbf16>, vector<384x1536xbf16>, vector<64x1536xf32> -> vector<64x1536xf32>
    %c0_64 = arith.constant 0 : index
    %c0_65 = arith.constant 0 : index
    %139 = vector.load %arg6[%c0_64, %c0_65] : memref<1x1536xf32, #tpu.memory_space<vmem>>, vector<1x1536xf32>
    %140 = vector.broadcast %139 : vector<1x1536xf32> to vector<64x1536xf32>
    %141 = arith.addf %138, %140 : vector<64x1536xf32>
    %cst_66 = arith.constant 0.000000e+00 : f32
    %142 = vector.broadcast %cst_66 : f32 to vector<64x1536xf32>
    %143 = arith.maximumf %141, %142 : vector<64x1536xf32>
    %144 = arith.truncf %143 : vector<64x1536xf32> to vector<64x1536xbf16>
    %c0_67 = arith.constant 0 : index
    %c0_68 = arith.constant 0 : index
    %145 = vector.load %arg7[%c0_67, %c0_68] : memref<1536x384xbf16, #tpu.memory_space<vmem>>, vector<1536x384xbf16>
    %cst_69 = arith.constant dense<0.000000e+00> : vector<64x384xf32>
    %146 = tpu.matmul %144, %145, %cst_69 {dimension_numbers = #tpu.dot_dimension_numbers<[1], [0], [0], [1], [0, 0, 1, 1], [], []>} : vector<64x1536xbf16>, vector<1536x384xbf16>, vector<64x384xf32> -> vector<64x384xf32>
    %c0_70 = arith.constant 0 : index
    %c0_71 = arith.constant 0 : index
    %147 = vector.load %arg8[%c0_70, %c0_71] : memref<1x384xf32, #tpu.memory_space<vmem>>, vector<1x384xf32>
    %148 = vector.broadcast %147 : vector<1x384xf32> to vector<64x384xf32>
    %149 = arith.addf %146, %148 : vector<64x384xf32>
    %150 = arith.addf %135, %149 : vector<64x384xf32>
    %c0_72 = arith.constant 0 : index
    %c0_73 = arith.constant 0 : index
    %151 = vector.load %arg11[%c0_72, %c0_73] : memref<1x384xf32, #tpu.memory_space<vmem>>, vector<1x384xf32>
    %c0_74 = arith.constant 0 : index
    %c0_75 = arith.constant 0 : index
    %152 = vector.load %arg12[%c0_74, %c0_75] : memref<1x384xf32, #tpu.memory_space<vmem>>, vector<1x384xf32>
    %cst_76 = arith.constant dense<0.000000e+00> : vector<64xf32>
    %153 = vector.multi_reduction <add>, %150, %cst_76 [1] : vector<64x384xf32> to vector<64xf32>
    %154 = vector.shape_cast %153 : vector<64xf32> to vector<64x1xf32>
    %cst_77 = arith.constant 3.840000e+02 : f32
    %155 = vector.broadcast %cst_77 : f32 to vector<64x1xf32>
    %156 = arith.divf %154, %155 : vector<64x1xf32>
    %157 = vector.broadcast %156 : vector<64x1xf32> to vector<64x384xf32>
    %158 = arith.subf %150, %157 : vector<64x384xf32>
    %159 = arith.mulf %158, %158 : vector<64x384xf32>
    %cst_78 = arith.constant dense<0.000000e+00> : vector<64xf32>
    %160 = vector.multi_reduction <add>, %159, %cst_78 [1] : vector<64x384xf32> to vector<64xf32>
    %161 = vector.shape_cast %160 : vector<64xf32> to vector<64x1xf32>
    %cst_79 = arith.constant 3.840000e+02 : f32
    %162 = vector.broadcast %cst_79 : f32 to vector<64x1xf32>
    %163 = arith.divf %161, %162 : vector<64x1xf32>
    %164 = vector.broadcast %156 : vector<64x1xf32> to vector<64x384xf32>
    %165 = arith.subf %150, %164 : vector<64x384xf32>
    %cst_80 = arith.constant 9.99999974E-6 : f32
    %166 = vector.broadcast %cst_80 : f32 to vector<64x1xf32>
    %167 = arith.addf %163, %166 : vector<64x1xf32>
    %168 = math.rsqrt %167 : vector<64x1xf32>
    %169 = vector.broadcast %168 : vector<64x1xf32> to vector<64x384xf32>
    %170 = arith.mulf %165, %169 : vector<64x384xf32>
    %171 = vector.broadcast %151 : vector<1x384xf32> to vector<64x384xf32>
    %172 = arith.mulf %170, %171 : vector<64x384xf32>
    %173 = vector.broadcast %152 : vector<1x384xf32> to vector<64x384xf32>
    %174 = arith.addf %172, %173 : vector<64x384xf32>
    %175 = vector.shape_cast %174 : vector<64x384xf32> to vector<1x64x384xf32>
    %c0_81 = arith.constant 0 : index
    %c0_82 = arith.constant 0 : index
    %c0_83 = arith.constant 0 : index
    %176 = vector.load %arg13[%c0_81, %c0_82, %c0_83] : memref<1x64x384xf32, #tpu.memory_space<vmem>>, vector<1x64x384xf32>
    tpu.vector_store %arg13[%c0_81, %c0_82, %c0_83], %175 {strides = array<i32>} : memref<1x64x384xf32, #tpu.memory_space<vmem>>, vector<1x64x384xf32>,
    return
  }
  func.func @transform_0(%arg0: i32) -> (i32, i32, i32) {
    %c0_i32 = arith.constant 0 : i32
    %c0_i32_0 = arith.constant 0 : i32
    %c0_i32_1 = arith.constant 0 : i32
    return %arg0, %c0_i32, %c0_i32_0 : i32, i32, i32
  }
  func.func @transform_1(%arg0: i32) -> (i32, i32) {
    %c0_i32 = arith.constant 0 : i32
    %c0_i32_0 = arith.constant 0 : i32
    %c0_i32_1 = arith.constant 0 : i32
    return %c0_i32, %c0_i32_0 : i32, i32
  }
  func.func @transform_2(%arg0: i32) -> (i32, i32) {
    %c0_i32 = arith.constant 0 : i32
    %c0_i32_0 = arith.constant 0 : i32
    %c0_i32_1 = arith.constant 0 : i32
    return %c0_i32, %c0_i32_0 : i32, i32
  }
  func.func @transform_3(%arg0: i32) -> (i32, i32) {
    %c0_i32 = arith.constant 0 : i32
    %c0_i32_0 = arith.constant 0 : i32
    %c0_i32_1 = arith.constant 0 : i32
    return %c0_i32, %c0_i32_0 : i32, i32
  }
  func.func @transform_4(%arg0: i32) -> (i32, i32) {
    %c0_i32 = arith.constant 0 : i32
    %c0_i32_0 = arith.constant 0 : i32
    %c0_i32_1 = arith.constant 0 : i32
    return %c0_i32, %c0_i32_0 : i32, i32
  }
  func.func @transform_5(%arg0: i32) -> (i32, i32) {
    %c0_i32 = arith.constant 0 : i32
    %c0_i32_0 = arith.constant 0 : i32
    %c0_i32_1 = arith.constant 0 : i32
    return %c0_i32, %c0_i32_0 : i32, i32
  }
  func.func @transform_6(%arg0: i32) -> (i32, i32) {
    %c0_i32 = arith.constant 0 : i32
    %c0_i32_0 = arith.constant 0 : i32
    %c0_i32_1 = arith.constant 0 : i32
    return %c0_i32, %c0_i32_0 : i32, i32
  }
  func.func @transform_7(%arg0: i32) -> (i32, i32) {
    %c0_i32 = arith.constant 0 : i32
    %c0_i32_0 = arith.constant 0 : i32
    %c0_i32_1 = arith.constant 0 : i32
    return %c0_i32, %c0_i32_0 : i32, i32
  }
  func.func @transform_8(%arg0: i32) -> (i32, i32) {
    %c0_i32 = arith.constant 0 : i32
    %c0_i32_0 = arith.constant 0 : i32
    %c0_i32_1 = arith.constant 0 : i32
    return %c0_i32, %c0_i32_0 : i32, i32
  }
  func.func @transform_9(%arg0: i32) -> (i32, i32) {
    %c0_i32 = arith.constant 0 : i32
    %c0_i32_0 = arith.constant 0 : i32
    %c0_i32_1 = arith.constant 0 : i32
    return %c0_i32, %c0_i32_0 : i32, i32
  }
  func.func @transform_10(%arg0: i32) -> (i32, i32) {
    %c0_i32 = arith.constant 0 : i32
    %c0_i32_0 = arith.constant 0 : i32
    %c0_i32_1 = arith.constant 0 : i32
    return %c0_i32, %c0_i32_0 : i32, i32
  }
  func.func @transform_11(%arg0: i32) -> (i32, i32) {
    %c0_i32 = arith.constant 0 : i32
    %c0_i32_0 = arith.constant 0 : i32
    %c0_i32_1 = arith.constant 0 : i32
    return %c0_i32, %c0_i32_0 : i32, i32
  }
  func.func @transform_12(%arg0: i32) -> (i32, i32, i32) {
    %c0_i32 = arith.constant 0 : i32
    %c0_i32_0 = arith.constant 0 : i32
    %c0_i32_1 = arith.constant 0 : i32
    return %arg0, %c0_i32, %c0_i32_0 : i32, i32, i32
  }
}

</mosaic_0001>

<bundles_post_ra>
// kernel: tpu_custom_call.1
= control target key start
LH: loop header
LB: loop body
LE: loop exit
PB: predicated region body
PF: predicated region fallthrough
CT: control target
= control target key end

     0   :  { %s18418_s0 = inlined_call_operand.hbm [shape: f32[2,64,384], index: 0, kind: input, shape index: {}]   ;;  %s18419_s1 = inlined_call_operand.hbm [shape: bf16[384,1536], index: 1, kind: input, shape index: {}]   ;;  %s18420_s2 = inlined_call_operand.hbm [shape: bf16[512,384], index: 2, kind: input, shape index: {}]   ;;  %s18421_s3 = inlined_call_operand.hbm [shape: f32[1,384], index: 3, kind: input, shape index: {}]   ;;  %s18422_s4 = inlined_call_operand.hbm [shape: bf16[384,1536], index: 4, kind: input, shape index: {}]   ;;  %s18423_s5 = inlined_call_operand.hbm [shape: f32[1,1536], index: 5, kind: input, shape index: {}]   ;;  %s18424_s6 = inlined_call_operand.hbm [shape: bf16[1536,384], index: 6, kind: input, shape index: {}]   ;;  %s18425_s7 = inlined_call_operand.hbm [shape: f32[1,384], index: 7, kind: input, shape index: {}]   ;;  %s18426_s8 = inlined_call_operand.hbm [shape: f32[1,384], index: 8, kind: input, shape index: {}]   ;;  %s18427_s9 = inlined_call_operand.hbm [shape: f32[1,384], index: 9, kind: input, shape index: {}]   ;;  %s18428_s10 = inlined_call_operand.hbm [shape: f32[1,384], index: 10, kind: input, shape index: {}]   ;;  %s18429_s11 = inlined_call_operand.hbm [shape: f32[1,384], index: 11, kind: input, shape index: {}]   ;;  %s18430_s12 = inlined_call_operand.hbm [shape: f32[2,64,384], index: 12, kind: output, shape index: {}]  }
   0x1   :  { %18465 = sst [smem:[#allocation46_spill]] %s18418_s0 }
   0x2   :  { %18466 = sst [smem:[#allocation47_spill]] %s18419_s1 }
   0x3   :  { %18467 = sst [smem:[#allocation48_spill]] %s18420_s2 }
   0x4   :  { %18468 = sst [smem:[#allocation49_spill]] %s18421_s3 }
   0x5   :  { %18469 = sst [smem:[#allocation50_spill]] %s18430_s12 }
   0x6   :  { %17 = vsyncpa [#allocation5], 0 }
   0x7   :  { %19 = vsyncpa [#allocation5 + $0x1], 0 }
   0x8   :  { %20 = vsyncpa [#allocation8], 0 }
   0x9   :  { %21 = vsyncpa [#allocation11], 0 }
   0xa   :  { %22 = vsyncpa [#allocation14], 0 }
   0xb   :  { %23 = vsyncpa [#allocation17], 0 }
   0xc   :  { %24 = vsyncpa [#allocation20], 0 }
   0xd   :  { %25 = vsyncpa [#allocation23], 0 }
   0xe   :  { %26 = vsyncpa [#allocation6], 0 }
   0xf   :  { %28 = vsyncpa [#allocation6 + $0x1], 0  ;;  %s15845_s21 = smov 0   ;;  %s15847_s22 = smov 0  }
  0x10   :  { %s15849_s23 = smov 0   ;;  %s15851_s24 = smov 0  }
  0x11 LB: > { %s15757_s25 = smov [#allocation7]   ;;  %s15866_s27 = sadd.s32 4294967295, %s15755_s24   ;;  %s15755_s24 = sphi %s15851_s24, %s18556_s24   ;;  %s15751_s23 = sphi %s15849_s23, %s18555_s23   ;;  %s15747_s22 = sphi %s15847_s22, %s18554_s22   ;;  %s15743_s21 = sphi %s15845_s21, %s18553_s21  }
  0x12   : > { %s334_s26 = sshll.u32 %s15757_s25, 4  ;;  %18470 = sst [smem:[#allocation33_spill]] %s15866_s27  ;;  %s15871_s26 = int_to_ptr.vmem [resolvable:$true] %s334_s26 }
  0x13   : > { %p11663_p0 = scmp.ge.s32.totalorder %s15755_s24, 1  ;;  %p18438_p1 = scmp.eq.s32.totalorder %s15866_s27, 0 }
  0x14   : > { %p322_p2 = scmp.lt.s32.totalorder %s15755_s24, 3  ;;  %s15758_s29 = smov [#allocation10]  }
  0x15   : > { %s361_s30 = sshll.u32 %s15758_s29, 4  ;;  %s15759_s14 = smov [#allocation13]   ;;  %s15886_s30 = int_to_ptr.vmem [resolvable:$true] %s361_s30 }
  0x16   : > { %p15873_p3 = pnand %p11663_p0, %p322_p2  ;;  %s385_s15 = sshll.u32 %s15759_s14, 4  ;;  %s15888_s15 = int_to_ptr.vmem [resolvable:$true] %s385_s15 }
  0x17   : > { %s18474_s1 = sld [smem:[#allocation47_spill]] }
  0x18   : > { %s18471_s28 = scalar_select %p15873_p3, 1, 0 }
  0x19   : > { %p13648_p5 = pneg %p15873_p3 }
  0x1a   : > { %18472 = sst [smem:[#allocation34_spill]] %s18471_s28 }
  0x1b   : > { %p15882_p6 = pnand %p13648_p5, %p18438_p1 }
  0x1d   : > { %s15327_s18 = scalar_lea.hbm %s18474_s1, 36864  ;;  %p15898_p8 = pneg %p15882_p6 }
  0x1e   : > { %p15328_p7 = scmp.ne.s32.totalorder %s18474_s1, %s15327_s18  ;;  %p15334_p11 = scmp.lt.u32.totalorder %s15327_s18, %s18474_s1 }
  0x20   : > { %p15330_p9 = pnand %p15898_p8, %p15328_p7 }
  0x22   : > { %p15331_p10 = pneg %p15330_p9 }
  0x24   : > { %p15336_p12 = pnand %p15334_p11, %p15331_p10 }
  0x26   : > { %15339 = shalt.err (!%p15336_p12)
}
  0x27   : > { %s15340_s16 = scalar_lea.vmem %s15871_s26, 36864  ;;  %p15348_p5 = scmp.lt.s32.totalorder %s15871_s26, %s15871_s26 }
  0x28   : > { %p15341_p13 = scmp.ne.s32.totalorder %s15871_s26, %s15340_s16  ;;  %p15349_p4 = scmp.lt.s32.totalorder %s15340_s16, %s15340_s16 }
  0x2a   : > { %p15343_p0 = pnand %p15341_p13, %p15898_p8  ;;  %p15350_p7 = por %p15349_p4, %p15348_p5 }
  0x2c   : > { %p15344_p2 = pneg %p15343_p0 }
  0x2e   : > { %p15351_p9 = pnand %p15350_p7, %p15344_p2 }
  0x30   : > { %15354 = shalt.err (!%p15351_p9)
}
  0x31   : > { %s18437_s17 = smov 768   ;;  %s18440_s18 = smov 48  }
  0x32   : > { %13651 = dma.hbm_to_vmem [thread:$0]  (!%p15882_p6), %s18474_s1, 36864, %s15871_s26, [#allocation8], %s18437_s17, %s18437_s17, %s18440_s18  }
  0x33   : > { %s18476_s3 = sld [smem:[#allocation49_spill]] }
  0x39   : > { %s15355_s16 = scalar_lea.hbm %s18476_s3, 48 }
  0x3a   : > { %p15356_p4 = scmp.ne.s32.totalorder %s18476_s3, %s15355_s16  ;;  %p15362_p12 = scmp.lt.u32.totalorder %s15355_s16, %s18476_s3 }
  0x3c   : > { %p15358_p10 = pnand %p15356_p4, %p15898_p8 }
  0x3e   : > { %p15359_p11 = pneg %p15358_p10 }
  0x40   : > { %p15364_p13 = pnand %p15362_p12, %p15359_p11 }
  0x42   : > { %15367 = shalt.err (!%p15364_p13)
}
  0x43   : > { %s15368_s26 = scalar_lea.vmem %s15886_s30, 48  ;;  %s15375_s12 = scalar_lea.vmem %s15886_s30, 64 }
  0x44   : > { %p15369_p0 = scmp.ne.s32.totalorder %s15886_s30, %s15368_s26  ;;  %p15376_p7 = scmp.lt.s32.totalorder %s15886_s30, %s15886_s30 }
  0x45   : > { %p15377_p9 = scmp.lt.s32.totalorder %s15375_s12, %s15368_s26 }
  0x46   : > { %p15371_p2 = pnand %p15369_p0, %p15898_p8 }
  0x47   : > { %p15378_p4 = por %p15377_p9, %p15376_p7 }
  0x48   : > { %p15372_p5 = pneg %p15371_p2 }
  0x4a   : > { %p15379_p10 = pnand %p15378_p4, %p15372_p5 }
  0x4c   : > { %15382 = shalt.err (!%p15379_p10)
}
  0x4d   : > { %13657 = dma.hbm_to_vmem [thread:$0]  (!%p15882_p6), %s18476_s3, 48, %s15886_s30, [#allocation11]  }
  0x4e   : > { %s15383_s20 = scalar_lea.hbm %s18423_s5, 192 }
  0x4f   : > { %p15384_p11 = scmp.ne.s32.totalorder %s18423_s5, %s15383_s20  ;;  %p15390_p0 = scmp.lt.u32.totalorder %s15383_s20, %s18423_s5 }
  0x51   : > { %p15386_p12 = pnand %p15384_p11, %p15898_p8 }
  0x53   : > { %p15387_p13 = pneg %p15386_p12 }
  0x55   : > { %p15392_p2 = pnand %p15390_p0, %p15387_p13 }
  0x57   : > { %15395 = shalt.err (!%p15392_p2)
}
  0x58   : > { %s15396_s30 = scalar_lea.vmem %s15888_s15, 192  ;;  %p15404_p4 = scmp.lt.s32.totalorder %s15888_s15, %s15888_s15 }
  0x59   : > { %p15397_p5 = scmp.ne.s32.totalorder %s15888_s15, %s15396_s30  ;;  %p15405_p10 = scmp.lt.s32.totalorder %s15396_s30, %s15396_s30 }
  0x5b   : > { %p15399_p7 = pnand %p15397_p5, %p15898_p8  ;;  %p15406_p11 = por %p15405_p10, %p15404_p4 }
  0x5d   : > { %p15400_p9 = pneg %p15399_p7 }
  0x5f   : > { %p15407_p12 = pnand %p15406_p11, %p15400_p9 }
  0x61   : > { %15410 = shalt.err (!%p15407_p12)
}
  0x62   : > { %13663 = dma.hbm_to_vmem [thread:$0]  (!%p15882_p6), %s18423_s5, 192, %s15888_s15, [#allocation14]  }
  0x63   : > { %s15762_s27 = smov [#allocation16]   ;;  %s15763_s19 = smov [#allocation19]  }
  0x64   : > { %s409_s28 = sshll.u32 %s15762_s27, 4  ;;  %s431_s20 = sshll.u32 %s15763_s19, 4  ;;  %s410_s28 = int_to_ptr.vmem [resolvable:$true] %s409_s28  ;;  %s432_s20 = int_to_ptr.vmem [resolvable:$true] %s431_s20 }
  0x65   : > { %s15411_s16 = scalar_lea.hbm %s18425_s7, 48 }
  0x66   : > { %p15412_p13 = scmp.ne.s32.totalorder %s18425_s7, %s15411_s16  ;;  %p15418_p5 = scmp.lt.u32.totalorder %s15411_s16, %s18425_s7 }
  0x68   : > { %p15414_p0 = pnand %p15412_p13, %p15898_p8 }
  0x6a   : > { %p15415_p2 = pneg %p15414_p0 }
  0x6c   : > { %p15420_p7 = pnand %p15418_p5, %p15415_p2 }
  0x6e   : > { %15423 = shalt.err (!%p15420_p7)
}
  0x6f   : > { %s15424_s15 = scalar_lea.vmem %s410_s28, 48  ;;  %s15431_s0 = scalar_lea.vmem %s410_s28, 64 }
  0x70   : > { %p15425_p9 = scmp.ne.s32.totalorder %s410_s28, %s15424_s15  ;;  %p15432_p11 = scmp.lt.s32.totalorder %s410_s28, %s410_s28 }
  0x71   : > { %p15433_p12 = scmp.lt.s32.totalorder %s15431_s0, %s15424_s15 }
  0x72   : > { %p15427_p4 = pnand %p15425_p9, %p15898_p8 }
  0x73   : > { %p15434_p1 = por %p15433_p12, %p15432_p11 }
  0x74   : > { %p15428_p10 = pneg %p15427_p4 }
  0x76   : > { %p15435_p3 = pnand %p15434_p1, %p15428_p10 }
  0x78   : > { %15438 = shalt.err (!%p15435_p3)
}
  0x79   : > { %13669 = dma.hbm_to_vmem [thread:$0]  (!%p15882_p6), %s18425_s7, 48, %s410_s28, [#allocation17]  }
  0x7a   : > { %s15439_s14 = scalar_lea.hbm %s18427_s9, 48 }
  0x7b   : > { %p15440_p13 = scmp.ne.s32.totalorder %s18427_s9, %s15439_s14  ;;  %p15446_p3 = scmp.lt.u32.totalorder %s15439_s14, %s18427_s9 }
  0x7d   : > { %p15442_p0 = pnand %p15440_p13, %p15898_p8 }
  0x7f   : > { %p15443_p1 = pneg %p15442_p0 }
  0x81   : > { %p15448_p2 = pnand %p15446_p3, %p15443_p1 }
  0x83   : > { %15451 = shalt.err (!%p15448_p2)
}
  0x84   : > { %s15452_s15 = scalar_lea.vmem %s432_s20, 48  ;;  %s15459_s28 = scalar_lea.vmem %s432_s20, 64 }
  0x85   : > { %p15453_p5 = scmp.ne.s32.totalorder %s432_s20, %s15452_s15  ;;  %p15460_p4 = scmp.lt.s32.totalorder %s432_s20, %s432_s20 }
  0x86   : > { %p15461_p10 = scmp.lt.s32.totalorder %s15459_s28, %s15452_s15 }
  0x87   : > { %p15455_p7 = pnand %p15453_p5, %p15898_p8 }
  0x88   : > { %p15462_p11 = por %p15461_p10, %p15460_p4 }
  0x89   : > { %p15456_p9 = pneg %p15455_p7 }
  0x8b   : > { %p15463_p12 = pnand %p15462_p11, %p15456_p9 }
  0x8d   : > { %15466 = shalt.err (!%p15463_p12)
}
  0x8e   : > { %13675 = dma.hbm_to_vmem [thread:$0]  (!%p15882_p6), %s18427_s9, 48, %s432_s20, [#allocation20]  }
  0x8f   : > { %s15764_s19 = smov [#allocation9]   ;;  %s18477_s2 = sld [smem:[#allocation48_spill]] }
  0x90   : > { %s347_s17 = sshll.u32 %s15764_s19, 4  ;;  %s348_s17 = int_to_ptr.vmem [resolvable:$true] %s347_s17 }
  0x95   : > { %s15467_s16 = scalar_lea.hbm %s18477_s2, 12288 }
  0x96   : > { %p15468_p13 = scmp.ne.s32.totalorder %s18477_s2, %s15467_s16  ;;  %p15474_p3 = scmp.lt.u32.totalorder %s15467_s16, %s18477_s2 }
  0x98   : > { %p15470_p0 = pnand %p15468_p13, %p15898_p8 }
  0x9a   : > { %p15471_p1 = pneg %p15470_p0 }
  0x9c   : > { %p15476_p2 = pnand %p15474_p3, %p15471_p1 }
  0x9e   : > { %15479 = shalt.err (!%p15476_p2)
}
  0x9f   : > { %s15480_s20 = scalar_lea.vmem %s348_s17, 12288  ;;  %p15488_p4 = scmp.lt.s32.totalorder %s348_s17, %s348_s17 }
  0xa0   : > { %p15481_p5 = scmp.ne.s32.totalorder %s348_s17, %s15480_s20  ;;  %p15489_p10 = scmp.lt.s32.totalorder %s15480_s20, %s15480_s20 }
  0xa2   : > { %p15483_p7 = pnand %p15481_p5, %p15898_p8  ;;  %p15490_p11 = por %p15489_p10, %p15488_p4 }
  0xa4   : > { %p15484_p9 = pneg %p15483_p7 }
  0xa6   : > { %p15491_p12 = pnand %p15490_p11, %p15484_p9 }
  0xa8   : > { %15494 = shalt.err (!%p15491_p12)
}
  0xa9   : > { %s18441_s28 = smov 192   ;;  %s15766_s0 = smov 12  }
  0xaa   : > { %13654 = dma.hbm_to_vmem [thread:$0]  (!%p15882_p6), %s18477_s2, 12288, %s348_s17, [#allocation8], %s18441_s28, %s18441_s28, %s15766_s0  }
  0xab   : > { %s15767_s29 = smov [#allocation12]   ;;  %s15768_s16 = smov [#allocation15]  }
  0xac   : > { %s371_s14 = sshll.u32 %s15767_s29, 4  ;;  %s395_s26 = sshll.u32 %s15768_s16, 4  ;;  %s372_s14 = int_to_ptr.vmem [resolvable:$true] %s371_s14  ;;  %s16026_s26 = int_to_ptr.vmem [resolvable:$true] %s395_s26 }
  0xad   : > { %s15495_s15 = scalar_lea.hbm %s18422_s4, 36864 }
  0xae   : > { %p15496_p13 = scmp.ne.s32.totalorder %s18422_s4, %s15495_s15  ;;  %p15502_p3 = scmp.lt.u32.totalorder %s15495_s15, %s18422_s4 }
  0xb0   : > { %p15498_p0 = pnand %p15496_p13, %p15898_p8 }
  0xb2   : > { %p15499_p1 = pneg %p15498_p0 }
  0xb4   : > { %p15504_p2 = pnand %p15502_p3, %p15499_p1 }
  0xb6   : > { %15507 = shalt.err (!%p15504_p2)
}
  0xb7   : > { %s15508_s19 = scalar_lea.vmem %s372_s14, 36864  ;;  %p15516_p4 = scmp.lt.s32.totalorder %s372_s14, %s372_s14 }
  0xb8   : > { %p15509_p5 = scmp.ne.s32.totalorder %s372_s14, %s15508_s19  ;;  %p15517_p10 = scmp.lt.s32.totalorder %s15508_s19, %s15508_s19 }
  0xba   : > { %p15511_p7 = pnand %p15509_p5, %p15898_p8  ;;  %p15518_p11 = por %p15517_p10, %p15516_p4 }
  0xbc   : > { %p15512_p9 = pneg %p15511_p7 }
  0xbe   : > { %p15519_p12 = pnand %p15518_p11, %p15512_p9 }
  0xc0   : > { %15522 = shalt.err (!%p15519_p12)
}
  0xc1   : > { %s18478_s18 = smov 48   ;;  %s18479_s29 = smov 768  }
  0xc2   : > { %13660 = dma.hbm_to_vmem [thread:$0]  (!%p15882_p6), %s18422_s4, 36864, %s372_s14, [#allocation11], %s18479_s29, %s18479_s29, %s18478_s18  }
  0xc3   : > { %s15523_s20 = scalar_lea.hbm %s18424_s6, 36864 }
  0xc4   : > { %p15524_p13 = scmp.ne.s32.totalorder %s18424_s6, %s15523_s20  ;;  %p15530_p3 = scmp.lt.u32.totalorder %s15523_s20, %s18424_s6 }
  0xc6   : > { %p15526_p0 = pnand %p15524_p13, %p15898_p8 }
  0xc8   : > { %p15527_p1 = pneg %p15526_p0 }
  0xca   : > { %p15532_p2 = pnand %p15530_p3, %p15527_p1 }
  0xcc   : > { %15535 = shalt.err (!%p15532_p2)
}
  0xcd   : > { %s15536_s14 = scalar_lea.vmem %s16026_s26, 36864  ;;  %p15544_p4 = scmp.lt.s32.totalorder %s16026_s26, %s16026_s26 }
  0xce   : > { %p15537_p5 = scmp.ne.s32.totalorder %s16026_s26, %s15536_s14  ;;  %p15545_p10 = scmp.lt.s32.totalorder %s15536_s14, %s15536_s14 }
  0xd0   : > { %p15539_p7 = pnand %p15537_p5, %p15898_p8  ;;  %p15546_p11 = por %p15545_p10, %p15544_p4 }
  0xd2   : > { %p15540_p9 = pneg %p15539_p7 }
  0xd4   : > { %p15547_p12 = pnand %p15546_p11, %p15540_p9 }
  0xd6   : > { %15550 = shalt.err (!%p15547_p12)
}
  0xd7   : > { %s18480_s28 = smov 192   ;;  %s15769_s16 = smov [#allocation18]  }
  0xd8   : > { %13666 = dma.hbm_to_vmem [thread:$0]  (!%p15882_p6), %s18424_s6, 36864, %s16026_s26, [#allocation14], %s18480_s28, %s18480_s28, %s15766_s0  }
  0xd9   : > { %s420_s30 = sshll.u32 %s15769_s16, 4  ;;  %s15770_s12 = smov [#allocation21]   ;;  %s421_s30 = int_to_ptr.vmem [resolvable:$true] %s420_s30 }
  0xda   : > { %s442_s15 = sshll.u32 %s15770_s12, 4  ;;  %s15551_s17 = scalar_lea.hbm %s18426_s8, 48  ;;  %s16075_s15 = int_to_ptr.vmem [resolvable:$true] %s442_s15 }
  0xdb   : > { %p15552_p13 = scmp.ne.s32.totalorder %s18426_s8, %s15551_s17  ;;  %p15558_p3 = scmp.lt.u32.totalorder %s15551_s17, %s18426_s8 }
  0xdd   : > { %p15554_p0 = pnand %p15552_p13, %p15898_p8 }
  0xdf   : > { %p15555_p1 = pneg %p15554_p0 }
  0xe1   : > { %p15560_p2 = pnand %p15558_p3, %p15555_p1 }
  0xe3   : > { %15563 = shalt.err (!%p15560_p2)
}
  0xe4   : > { %s15564_s26 = scalar_lea.vmem %s421_s30, 48  ;;  %s15571_s28 = scalar_lea.vmem %s421_s30, 64 }
  0xe5   : > { %p15565_p5 = scmp.ne.s32.totalorder %s421_s30, %s15564_s26  ;;  %p15572_p4 = scmp.lt.s32.totalorder %s421_s30, %s421_s30 }
  0xe6   : > { %p15573_p10 = scmp.lt.s32.totalorder %s15571_s28, %s15564_s26 }
  0xe7   : > { %p15567_p7 = pnand %p15565_p5, %p15898_p8 }
  0xe8   : > { %p15574_p11 = por %p15573_p10, %p15572_p4 }
  0xe9   : > { %p15568_p9 = pneg %p15567_p7 }
  0xeb   : > { %p15575_p12 = pnand %p15574_p11, %p15568_p9 }
  0xed   : > { %15578 = shalt.err (!%p15575_p12)
}
  0xee   : > { %13672 = dma.hbm_to_vmem [thread:$0]  (!%p15882_p6), %s18426_s8, 48, %s421_s30, [#allocation17]  }
  0xef   : > { %s15579_s27 = scalar_lea.hbm %s18428_s10, 48 }
  0xf0   : > { %p15580_p13 = scmp.ne.s32.totalorder %s18428_s10, %s15579_s27  ;;  %p15586_p3 = scmp.lt.u32.totalorder %s15579_s27, %s18428_s10 }
  0xf2   : > { %p15582_p0 = pnand %p15580_p13, %p15898_p8 }
  0xf4   : > { %p15583_p1 = pneg %p15582_p0 }
  0xf6   : > { %p15588_p2 = pnand %p15586_p3, %p15583_p1 }
  0xf8   : > { %15591 = shalt.err (!%p15588_p2)
}
  0xf9   : > { %s15592_s30 = scalar_lea.vmem %s16075_s15, 48  ;;  %s15599_s0 = scalar_lea.vmem %s16075_s15, 64 }
  0xfa   : > { %p15593_p5 = scmp.ne.s32.totalorder %s16075_s15, %s15592_s30  ;;  %p15600_p4 = scmp.lt.s32.totalorder %s16075_s15, %s16075_s15 }
  0xfb   : > { %p15601_p10 = scmp.lt.s32.totalorder %s15599_s0, %s15592_s30 }
  0xfc   : > { %p15595_p7 = pnand %p15593_p5, %p15898_p8 }
  0xfd   : > { %p15602_p11 = por %p15601_p10, %p15600_p4 }
  0xfe   : > { %p15596_p9 = pneg %p15595_p7 }
 0x100   : > { %p15603_p12 = pnand %p15602_p11, %p15596_p9 }
 0x102   : > { %15606 = shalt.err (!%p15603_p12)
}
 0x103   : > { %13678 = dma.hbm_to_vmem [thread:$0]  (!%p15882_p6), %s18428_s10, 48, %s16075_s15, [#allocation20]  }
 0x104   : > { %s15771_s29 = smov [#allocation22]   ;;  %s15607_s27 = scalar_lea.hbm %s18429_s11, 48 }
 0x105   : > { %s453_s16 = sshll.u32 %s15771_s29, 4  ;;  %p15608_p13 = scmp.ne.s32.totalorder %s18429_s11, %s15607_s27  ;;  %s454_s16 = int_to_ptr.vmem [resolvable:$true] %s453_s16 }
 0x106   : > { %p15614_p3 = scmp.lt.u32.totalorder %s15607_s27, %s18429_s11 }
 0x107   : > { %p15610_p0 = pnand %p15608_p13, %p15898_p8 }
 0x109   : > { %p15611_p1 = pneg %p15610_p0 }
 0x10b   : > { %p15616_p2 = pnand %p15614_p3, %p15611_p1 }
 0x10d   : > { %15619 = shalt.err (!%p15616_p2)
}
 0x10e   : > { %s15620_s15 = scalar_lea.vmem %s454_s16, 48  ;;  %s15627_s30 = scalar_lea.vmem %s454_s16, 64 }
 0x10f   : > { %p15621_p5 = scmp.ne.s32.totalorder %s454_s16, %s15620_s15  ;;  %p15628_p4 = scmp.lt.s32.totalorder %s454_s16, %s454_s16 }
 0x110   : > { %p15629_p10 = scmp.lt.s32.totalorder %s15627_s30, %s15620_s15 }
 0x111   : > { %p15623_p7 = pnand %p15621_p5, %p15898_p8 }
 0x112   : > { %p15630_p11 = por %p15629_p10, %p15628_p4 }
 0x113   : > { %p15624_p9 = pneg %p15623_p7 }
 0x115   : > { %p15631_p12 = pnand %p15630_p11, %p15624_p9 }
 0x117   : > { %15634 = shalt.err (!%p15631_p12)
}
 0x118   : > { %s18481_s25 = sld [smem:[#allocation33_spill]]  ;;  %s11662_s28 = sadd.s32 4294967294, %s15755_s24  }
 0x119   : > { %13681 = dma.hbm_to_vmem [thread:$0]  (!%p15882_p6), %s18429_s11, 48, %s454_s16, [#allocation23]  }
 0x11a   : > { %s16139_s13 = sadd.s32 1, %s15755_s24   ;;  %s41_s29 = sadd.s32 1, %s15751_s23 }
 0x11b   : > { %s38_s12 = ssub.s32 %s15755_s24, %s16139_s13  ;;  %p48_p8 = scmp.ne.s32.totalorder %s15751_s23, %s15747_s22 }
 0x11c   : > { %p39_p13 = scmp.eq.s32.totalorder %s38_s12, 0  ;;  %p49_p0 = scmp.eq.s32.totalorder %s15755_s24, 0 }
 0x11d   : > { %p54_p1 = scmp.ne.s32.totalorder %s15747_s22, %s15743_s21  ;;  %p315_p9 = scmp.eq.s32.totalorder %s11662_s28, 1 }
 0x11e   : > { %p309_p3 = scmp.eq.s32.totalorder %s18481_s25, 1  ;;  %p50_p2 = por %p49_p0, %p48_p8 }
 0x11f   : > { %s16151_s20 = scalar_select %p39_p13, %s15751_s23, %s41_s29  }
 0x120   : > { %p18482_p5 = scmp.eq.s32.totalorder %s18481_s25, 0  ;;  %p16159_p6 = por %p309_p3, %p48_p8 }
 0x121   : > { %p13701_p4 = scmp.lt.s32.totalorder %s15755_s24, 2  ;;  %s464_s17 = sand.u32 1, %s15751_s23  }
 0x122   : > { %p16155_p7 = por %p18482_p5, %p54_p1  ;;  %p16165_p10 = por %p315_p9, %p54_p1 }
 0x123   : > { %s18484_s16 = scalar_select %p16159_p6, 1, 0 }
 0x124   : > { %s18485_s19 = scalar_select %p16165_p10, 1, 0 }
 0x125   : > { %s13596_s14 = smul.u32 192, %s464_s17  ;;  %p16169_p11 = pnand %p13701_p4, %p50_p2 }
 0x126   : > { %s13597_s15 = smul.u32 3072, %s15755_s24  ;;  %s18487_s26 = sld [smem:[#allocation46_spill]] }
 0x127   : > { %s468_s28 = scalar_lea.vmem [#allocation4], %s13596_s14  ;;  %s16181_s12 = scalar_lea.sflag [#allocation5], %s464_s17 }
 0x128   : > { %s475_s29 = sshll.u32 %s468_s28, 4  ;;  %p15637_p8 = pneg %p16169_p11  ;;  %s16179_s29 = int_to_ptr.vmem [resolvable:$true] %s475_s29 }
 0x12c   : > { %s16177_s25 = scalar_lea.hbm %s18487_s26, %s13597_s15  ;;  %s15640_s0 = scalar_lea.hbm %s18487_s26, 6144 }
 0x12d   : > { %s15635_s1 = scalar_lea.hbm %s16177_s25, 3072  ;;  %p15641_p1 = scmp.lt.u32.totalorder %s16177_s25, %s18487_s26 }
 0x12e   : > { %p15636_p12 = scmp.ne.s32.totalorder %s16177_s25, %s15635_s1  ;;  %p15642_p3 = scmp.lt.u32.totalorder %s15640_s0, %s15635_s1 }
 0x12f   : > { %p15644_p5 = scmp.lt.u32.totalorder %s15635_s1, %s16177_s25 }
 0x130   : > { %p15638_p13 = pnand %p15637_p8, %p15636_p12  ;;  %p15643_p2 = por %p15642_p3, %p15641_p1 }
 0x132   : > { %p15639_p0 = pneg %p15638_p13  ;;  %p15645_p9 = por %p15644_p5, %p15643_p2 }
 0x134   : > { %p15646_p4 = pnand %p15645_p9, %p15639_p0 }
 0x136   : > { %15649 = shalt.err (!%p15646_p4)
}
 0x137   : > { %s15650_s17 = scalar_lea.vmem %s16179_s29, 3072  ;;  %s15772_s14 = smov [#allocation4]  }
 0x138   : > { %p15651_p12 = scmp.ne.s32.totalorder %s16179_s29, %s15650_s17  ;;  %s15655_s28 = sshll.u32 %s15772_s14, 4  ;;  %s15656_s28 = int_to_ptr.vmem [resolvable:$false] %s15655_s28 }
 0x139   : > { %s15657_s2 = scalar_lea.vmem %s15656_s28, 6144  ;;  %p15658_p6 = scmp.lt.s32.totalorder %s16179_s29, %s15656_s28 }
 0x13a   : > { %p15653_p13 = pnand %p15651_p12, %p15637_p8  ;;  %p15659_p1 = scmp.lt.s32.totalorder %s15657_s2, %s15650_s17 }
 0x13c   : > { %p15654_p10 = pneg %p15653_p13  ;;  %p15660_p3 = por %p15659_p1, %p15658_p6 }
 0x13e   : > { %p15661_p2 = pnand %p15660_p3, %p15654_p10 }
 0x140   : > { %15664 = shalt.err (!%p15661_p2)
}
 0x141   : > { %s15773_s1 = smov 384   ;;  %s15774_s3 = smov 24  }
 0x142   : > { %13685 = dma.hbm_to_vmem [thread:$0]  (!%p16169_p11), %s16177_s25, 3072, %s16179_s29, %s16181_s12, %s15773_s1, %s15773_s1, %s15774_s3  }
 0x143   : > { %s18488_s15 = sld [smem:[#allocation34_spill]] }
 0x149   : > { %p18489_p8 = scmp.ne.s32.totalorder %s18488_s15, 0 }
 0x14b   : > { %487 = sbr.rel (%p18489_p8) target bundleno = 4402 (0x1132), region = 68 }
 0x152   : > { %s16212_s30 = sand.u32 1, %s15747_s22  }
 0x153   : > { %s13598_s0 = smul.u32 192, %s16212_s30  ;;  %s490_s17 = scalar_lea.sflag [#allocation5], %s16212_s30 }
 0x155   : > { %s16218_s14 = scalar_lea.vmem [#allocation4], %s13598_s0 }
 0x156   : > { %15710 = dma.done.wait (%p16155_p7), %s490_s17, 3072  }
 0x157   : > { %15712 = vsyncadd (%p16155_p7), %s490_s17, 4294964224  ;;  %s18490_s18 = sld [smem:[#allocation33_spill]] }
 0x15d   : > { %p18491_p6 = scmp.eq.s32.totalorder %s18490_s18, 0 }
 0x15f   : > { %15714 = dma.done.wait (%p18491_p6), [#allocation8], 49152   ;;  %p18492_p10 = pmov %p18491_p6 }
 0x160   : > { %p18493_p11 = pmov %p18491_p6 }
 0x161   : > { %15716 = vsyncadd (%p18492_p10), [#allocation8], 4294918144 }
 0x162   : > { %15718 = dma.done.wait (%p18493_p11), [#allocation11], 36912   ;;  %p18494_p0 = pmov %p18491_p6 }
 0x164   : > { %15720 = vsyncadd (%p18494_p0), [#allocation11], 4294930384  ;;  %p18495_p5 = pmov %p18494_p0 }
 0x165   : > { %p18496_p9 = pmov %p18494_p0 }
 0x166   : > { %15722 = dma.done.wait (%p18495_p5), [#allocation14], 37056  }
 0x167   : > { %15724 = vsyncadd (%p18496_p9), [#allocation14], 4294930240  ;;  %p18497_p7 = pmov %p18494_p0 }
 0x168   : > { %p18498_p4 = pmov %p18494_p0 }
 0x169   : > { %15726 = dma.done.wait (%p18497_p7), [#allocation17], 96  }
 0x16a   : > { %15728 = vsyncadd (%p18498_p4), [#allocation17], 4294967200  ;;  %p18499_p12 = pmov %p18494_p0 }
 0x16b   : > { %p18500_p13 = pmov %p18494_p0 }
 0x16c   : > { %15730 = dma.done.wait (%p18499_p12), [#allocation20], 96  }
 0x16d   : > { %15732 = vsyncadd (%p18500_p13), [#allocation20], 4294967200  ;;  %p18501_p1 = pmov %p18494_p0 }
 0x16e   : > { %p18502_p3 = pmov %p18494_p0 }
 0x16f   : > { %15734 = dma.done.wait (%p18501_p1), [#allocation23], 48  }
 0x170   : > { %15736 = vsyncadd (%p18502_p3), [#allocation23], 4294967248  ;;  %v18443_v0 = vmov 0   ;;  %v13767_v1 = vld [vmem:[#allocation7 + $0x4] ss:$48 sps:$4 sm:$0xff]   ;;  %v584_v34 = vld [vmem:[%s16218_s14 + $0x28] sm:$0xff] }
 0x171   : > { %2448 = vmatprep.mubr.bf16.mxu0 %v18443_v0  ;;  %v13769_v2 = vld [vmem:[#allocation7 + $0x604] ss:$48 sps:$4 sm:$0xff]   ;;  %2343 = vmatprep.subr.bf16.mxu1 %v13767_v1  ;;  %v13771_v3 = vld [vmem:[#allocation7] ss:$48 sps:$4 sm:$0xff]   ;;  %v580_v50 = vld [vmem:[%s16218_s14 + $0x8] sm:$0xff]  ;;  %vm3419_vm4 = vcmask 523264  }
 0x172   : > { %v13772_v4 = vld [vmem:[#allocation7 + $0x600] ss:$48 sps:$4 sm:$0xff]   ;;  %2416 = vmatprep.subr.bf16.mxu0 %v13769_v2  ;;  %v13773_v5 = vld [vmem:[#allocation7 + $0x64] ss:$48 sps:$4 sm:$0xff]   ;;  %2344 = vmatpush1.bf16.msra.mxu1 %v13771_v3  ;;  %v590_v58 = vld [vmem:[%s16218_s14 + $0x58] sm:$0xff]  ;;  %s18284_s27 = scalar_lea.vmem [#allocation24], %s13598_s0 }
 0x173   : > { %2417 = vmatpush1.bf16.msra.mxu0 %v13772_v4  ;;  %v13775_v6 = vld [vmem:[#allocation7 + $0x664] ss:$48 sps:$4 sm:$0xff]   ;;  %v13777_v7 = vld [vmem:[#allocation7 + $0x60] ss:$48 sps:$4 sm:$0xff]   ;;  %2345 = vmatprep.subr.bf16.mxu1 %v13773_v5  ;;  %v596_v4 = vld [vmem:[%s16218_s14 + $0x88] sm:$0xff]  ;;  %s13599_s25 = smul.u32 3072, %s18490_s18 }
 0x174   : > { %v13778_v8 = vld [vmem:[#allocation7 + $0x660] ss:$48 sps:$4 sm:$0xff]   ;;  %2418 = vmatprep.subr.bf16.mxu0 %v13775_v6  ;;  %v13779_v9 = vld [vmem:[#allocation7 + $0xc4] ss:$48 sps:$4 sm:$0xff]   ;;  %s11484_s29 = sshll.u32 %s18284_s27, 4  ;;  %s18549_s2 = sld [smem:[#allocation50_spill]]  ;;  %s18369_s29 = int_to_ptr.vmem [resolvable:$true] %s11484_s29 }
 0x175   : > { %v13781_v10 = vld [vmem:[#allocation7 + $0x6c4] ss:$48 sps:$4 sm:$0xff]   ;;  %v13783_v11 = vld [vmem:[#allocation7 + $0xc0] ss:$48 sps:$4 sm:$0xff]   ;;  %s11471_s3 = scalar_lea.sflag [#allocation6], %s16212_s30  ;;  %s15665_s15 = scalar_lea.vmem %s18369_s29, 3072 }
 0x176   : > { %v13784_v12 = vld [vmem:[#allocation7 + $0x6c0] ss:$48 sps:$4 sm:$0xff]   ;;  %2346 = vmatpush1.bf16.msra.mxu1 %v13777_v7  ;;  %v13785_v13 = vld [vmem:[#allocation7 + $0x124] ss:$48 sps:$4 sm:$0xff]   ;;  %p15666_p2 = scmp.ne.s32.totalorder %s18369_s29, %s15665_s15  ;;  %p18550_p8 = scmp.ne.s32.totalorder %s18484_s16, 0 }
 0x177   : > { %2419 = vmatpush1.bf16.msra.mxu0 %v13778_v8  ;;  %2347 = vmatprep.subr.bf16.mxu1 %v13779_v9  ;;  %v13787_v14 = vld [vmem:[#allocation7 + $0x724] ss:$48 sps:$4 sm:$0xff]   ;;  %v13789_v15 = vld [vmem:[#allocation7 + $0x120] ss:$48 sps:$4 sm:$0xff]   ;;  %s15777_s0 = smov [#allocation24]  }
 0x178   : > { %2420 = vmatprep.subr.bf16.mxu0 %v13781_v10  ;;  %v13790_v16 = vld [vmem:[#allocation7 + $0x720] ss:$48 sps:$4 sm:$0xff]   ;;  %v13791_v17 = vld [vmem:[#allocation7 + $0x184] ss:$48 sps:$4 sm:$0xff]   ;;  %p15667_p6 = pnand %p15666_p2, %p18550_p8  ;;  %s15669_s17 = sshll.u32 %s15777_s0, 4  ;;  %s15670_s17 = int_to_ptr.vmem [resolvable:$false] %s15669_s17 }
 0x179   : > { %v13793_v18 = vld [vmem:[#allocation7 + $0x784] ss:$48 sps:$4 sm:$0xff]   ;;  %v13795_v19 = vld [vmem:[#allocation7 + $0x180] ss:$48 sps:$4 sm:$0xff]   ;;  %p15672_p11 = scmp.lt.s32.totalorder %s18369_s29, %s15670_s17 }
 0x17a   : > { %2348 = vmatpush1.bf16.msra.mxu1 %v13783_v11  ;;  %v13796_v20 = vld [vmem:[#allocation7 + $0x780] ss:$48 sps:$4 sm:$0xff]   ;;  %v13797_v21 = vld [vmem:[#allocation7 + $0x1e4] ss:$48 sps:$4 sm:$0xff]   ;;  %s18367_s1 = scalar_lea.hbm %s18549_s2, %s13599_s25  ;;  %p15668_p10 = pneg %p15667_p6 }
 0x17b   : > { %2421 = vmatpush1.bf16.msra.mxu0 %v13784_v12  ;;  %2349 = vmatprep.subr.bf16.mxu1 %v13785_v13  ;;  %v13799_v22 = vld [vmem:[#allocation7 + $0x7e4] ss:$48 sps:$4 sm:$0xff]   ;;  %v13801_v23 = vld [vmem:[#allocation7 + $0x1e0] ss:$48 sps:$4 sm:$0xff]  }
 0x17c   : > { %2422 = vmatprep.subr.bf16.mxu0 %v13787_v14  ;;  %v13802_v24 = vld [vmem:[#allocation7 + $0x7e0] ss:$48 sps:$4 sm:$0xff]   ;;  %v13803_v25 = vld [vmem:[#allocation7 + $0x244] ss:$48 sps:$4 sm:$0xff]  }
 0x17d   : > { %v13805_v26 = vld [vmem:[#allocation7 + $0x844] ss:$48 sps:$4 sm:$0xff]   ;;  %v13807_v27 = vld [vmem:[#allocation7 + $0x240] ss:$48 sps:$4 sm:$0xff]  }
 0x17e   : > { %2350 = vmatpush1.bf16.msra.mxu1 %v13789_v15  ;;  %v13808_v28 = vld [vmem:[#allocation7 + $0x840] ss:$48 sps:$4 sm:$0xff]   ;;  %v13809_v29 = vld [vmem:[#allocation7 + $0x2a4] ss:$48 sps:$4 sm:$0xff]   ;;  %v582_v15 = vld [vmem:[%s16218_s14 + $0x18] sm:$0xff] }
 0x17f   : > { %2423 = vmatpush1.bf16.msra.mxu0 %v13790_v16  ;;  %2351 = vmatprep.subr.bf16.mxu1 %v13791_v17  ;;  %v13811_v30 = vld [vmem:[#allocation7 + $0x8a4] ss:$48 sps:$4 sm:$0xff]   ;;  %v13813_v31 = vld [vmem:[#allocation7 + $0x2a0] ss:$48 sps:$4 sm:$0xff]  }
 0x180   : > { %2424 = vmatprep.subr.bf16.mxu0 %v13793_v18  ;;  %v13814_v32 = vld [vmem:[#allocation7 + $0x8a0] ss:$48 sps:$4 sm:$0xff]   ;;  %v13815_v35 = vld [vmem:[#allocation7 + $0x304] ss:$48 sps:$4 sm:$0xff]   ;;  %v602_v18 = vld [vmem:[%s16218_s14 + $0xb8] sm:$0xff] }
 0x181   : > { %v581_v33 = vld [vmem:[%s16218_s14 + $0x10] sm:$0xff]  ;;  %v583_v51 = vld [vmem:[%s16218_s14 + $0x20] sm:$0xff] }
 0x182   : > { %2352 = vmatpush1.bf16.msra.mxu1 %v13795_v19  ;;  %v13819_v36 = vld [vmem:[#allocation7 + $0x14] ss:$48 sps:$4 sm:$0xff]   ;;  %v16251_v37 = vpack.c.bf16 %v584_v34, %v581_v33  ;;  %v13817_v38 = vld [vmem:[#allocation7 + $0x10] ss:$48 sps:$4 sm:$0xff]   ;;  %v16257_v54 = vpack.c.bf16 %v583_v51, %v580_v50  ;;  %v586_v19 = vld [vmem:[%s16218_s14 + $0x38] sm:$0xff] }
 0x183   : > { %2425 = vmatpush1.bf16.msra.mxu0 %v13796_v20  ;;  %2353 = vmatprep.subr.bf16.mxu1 %v13797_v21  ;;  %v13820_v39 = vld [vmem:[#allocation7 + $0x300] ss:$48 sps:$4 sm:$0xff]   ;;  %v13821_v40 = vld [vmem:[#allocation7 + $0x364] ss:$48 sps:$4 sm:$0xff]  }
 0x184   : > { %2426 = vmatprep.subr.bf16.mxu0 %v13799_v22  ;;  %v13825_v41 = vld [vmem:[#allocation7 + $0x74] ss:$48 sps:$4 sm:$0xff]   ;;  %v13823_v42 = vld [vmem:[#allocation7 + $0x70] ss:$48 sps:$4 sm:$0xff]   ;;  %2375 = vmatprep.mubr.bf16.mxu1 %v16257_v54 }
 0x185   : > { %v13826_v43 = vld [vmem:[#allocation7 + $0x360] ss:$48 sps:$4 sm:$0xff]   ;;  %v13827_v44 = vld [vmem:[#allocation7 + $0x3c4] ss:$48 sps:$4 sm:$0xff]  }
 0x186   : > { %2354 = vmatpush1.bf16.msra.mxu1 %v13801_v23  ;;  %v13831_v45 = vld [vmem:[#allocation7 + $0xd4] ss:$48 sps:$4 sm:$0xff]   ;;  %v13829_v46 = vld [vmem:[#allocation7 + $0xd0] ss:$48 sps:$4 sm:$0xff]  }
 0x187   : > { %2427 = vmatpush1.bf16.msra.mxu0 %v13802_v24  ;;  %2355 = vmatprep.subr.bf16.mxu1 %v13803_v25  ;;  %v13832_v47 = vld [vmem:[#allocation7 + $0x3c0] ss:$48 sps:$4 sm:$0xff]   ;;  %v13833_v48 = vld [vmem:[#allocation7 + $0x424] ss:$48 sps:$4 sm:$0xff]  }
 0x188   : > { %2428 = vmatprep.subr.bf16.mxu0 %v13805_v26  ;;  %v13837_v49 = vld [vmem:[#allocation7 + $0x134] ss:$48 sps:$4 sm:$0xff]   ;;  %v13835_v52 = vld [vmem:[#allocation7 + $0x130] ss:$48 sps:$4 sm:$0xff]  }
 0x189   : > { %v13838_v53 = vld [vmem:[#allocation7 + $0x420] ss:$48 sps:$4 sm:$0xff]   ;;  %v13839_v55 = vld [vmem:[#allocation7 + $0x484] ss:$48 sps:$4 sm:$0xff]  }
 0x18a   : > { %2356 = vmatpush1.bf16.msra.mxu1 %v13807_v27  ;;  %v13843_v56 = vld [vmem:[#allocation7 + $0x194] ss:$48 sps:$4 sm:$0xff]   ;;  %v13841_v59 = vld [vmem:[#allocation7 + $0x190] ss:$48 sps:$4 sm:$0xff]  }
 0x18b   : > { %2429 = vmatpush1.bf16.msra.mxu0 %v13808_v28  ;;  %2357 = vmatprep.subr.bf16.mxu1 %v13809_v29  ;;  %v587_v57 = vld [vmem:[%s16218_s14 + $0x40] sm:$0xff]  ;;  %v593_v3 = vld [vmem:[%s16218_s14 + $0x70] sm:$0xff]  ;;  %v588_v28 = vld [vmem:[%s16218_s14 + $0x48] sm:$0xff] }
 0x18c   : > { %2430 = vmatprep.subr.bf16.mxu0 %v13811_v30  ;;  %v13844_v60 = vld [vmem:[#allocation7 + $0x480] ss:$48 sps:$4 sm:$0xff]   ;;  %v13845_v61 = vld [vmem:[#allocation7 + $0x4e4] ss:$48 sps:$4 sm:$0xff]   ;;  %v16262_v62 = vpack.c.bf16 %v590_v58, %v587_v57  ;;  %v16268_v7 = vpack.c.bf16 %v596_v4, %v593_v3  ;;  %v592_v30 = vld [vmem:[%s16218_s14 + $0x68] sm:$0xff] }
 0x18d   : > { %v13849_v63 = vld [vmem:[#allocation7 + $0x1f4] ss:$48 sps:$4 sm:$0xff]   ;;  %v13847_v1 = vld [vmem:[#allocation7 + $0x1f0] ss:$48 sps:$4 sm:$0xff]   ;;  %v13956_v57 = vld [vmem:[#allocation7 + $0x8] ss:$48 sps:$4 sm:$0xff]  }
 0x18e   : > { %2358 = vmatpush1.bf16.msra.mxu1 %v13813_v31  ;;  %v13850_v2 = vld [vmem:[#allocation7 + $0x4e0] ss:$48 sps:$4 sm:$0xff]   ;;  %v13851_v5 = vld [vmem:[#allocation7 + $0x544] ss:$48 sps:$4 sm:$0xff]   ;;  %v13958_v58 = vld [vmem:[#allocation7 + $0xc] ss:$48 sps:$4 sm:$0xff]  }
 0x18f   : > { %2431 = vmatpush1.bf16.msra.mxu0 %v13814_v32  ;;  %2359 = vmatprep.subr.bf16.mxu1 %v13815_v35  ;;  %v13855_v6 = vld [vmem:[#allocation7 + $0x254] ss:$48 sps:$4 sm:$0xff]   ;;  %v13853_v8 = vld [vmem:[#allocation7 + $0x250] ss:$48 sps:$4 sm:$0xff]   ;;  %v13968_v4 = vld [vmem:[#allocation7 + $0xc8] ss:$48 sps:$4 sm:$0xff]  }
 0x190   : > { %2635 = vmatprep.subr.bf16.mxu0 %v13819_v36  ;;  %v13856_v9 = vld [vmem:[#allocation7 + $0x540] ss:$48 sps:$4 sm:$0xff]   ;;  %v13857_v10 = vld [vmem:[#allocation7 + $0x5a4] ss:$48 sps:$4 sm:$0xff]  }
 0x191   : > { %v13861_v11 = vld [vmem:[#allocation7 + $0x2b4] ss:$48 sps:$4 sm:$0xff]   ;;  %v13859_v12 = vld [vmem:[#allocation7 + $0x2b0] ss:$48 sps:$4 sm:$0xff]  }
 0x192   : > { %2449 = vmatmul.mubr.bf16.vlgmr.msra.gmra.mrb[0].mxu0 %v16251_v37  ;;  %2360 = vmatpush1.bf16.msra.mxu1 %v13820_v39  ;;  %v13862_v13 = vld [vmem:[#allocation7 + $0x5a0] ss:$48 sps:$4 sm:$0xff]   ;;  %v13865_v16 = vld [vmem:[#allocation7 + $0x314] ss:$48 sps:$4 sm:$0xff]   ;;  %v594_v39 = vld [vmem:[%s16218_s14 + $0x78] sm:$0xff] }
 0x193   : > { %2636 = vmatpush1.bf16.msra.mxu0 %v13817_v38  ;;  %2361 = vmatprep.subr.bf16.mxu1 %v13821_v40  ;;  %v579_v14 = vld [vmem:[%s16218_s14] sm:$0xff]  ;;  %v589_v20 = vld [vmem:[%s16218_s14 + $0x50] sm:$0xff] }
 0x194   : > { %2637 = vmatprep.subr.bf16.mxu0 %v13825_v41  ;;  %2458 = vmatprep.mubr.bf16.mxu0 %v18443_v0  ;;  %v599_v17 = vld [vmem:[%s16218_s14 + $0xa0] sm:$0xff]  ;;  %v16280_v22 = vpack.c.bf16 %v582_v15, %v579_v14  ;;  %v16282_v24 = vpack.c.bf16 %v589_v20, %v586_v19  ;;  %v585_v27 = vld [vmem:[%s16218_s14 + $0x30] sm:$0xff]  ;;  %v598_v41 = vld [vmem:[%s16218_s14 + $0x98] sm:$0xff] }
 0x195   : > { %v16278_v21 = vpack.c.bf16 %v602_v18, %v599_v17  ;;  %v13863_v23 = vld [vmem:[#allocation7 + $0x310] ss:$48 sps:$4 sm:$0xff]   ;;  %v13868_v25 = vld [vmem:[#allocation7 + $0x374] ss:$48 sps:$4 sm:$0xff]   ;;  %v16292_v32 = vpack.c.bf16 %v588_v28, %v585_v27  ;;  %v13988_v14 = vld [vmem:[#allocation7 + $0x1ec] ss:$48 sps:$4 sm:$0xff]  }
 0x196   : > { %2362 = vmatpush1.bf16.msra.mxu1 %v13826_v43  ;;  %v13866_v26 = vld [vmem:[#allocation7 + $0x370] ss:$48 sps:$4 sm:$0xff]   ;;  %v13871_v29 = vld [vmem:[#allocation7 + $0x3d4] ss:$48 sps:$4 sm:$0xff]   ;;  %v13986_v17 = vld [vmem:[#allocation7 + $0x1e8] ss:$48 sps:$4 sm:$0xff]  }
 0x197   : > { %2638 = vmatpush1.bf16.msra.mxu0 %v13823_v42  ;;  %2363 = vmatprep.subr.bf16.mxu1 %v13827_v44  ;;  %v595_v31 = vld [vmem:[%s16218_s14 + $0x80] sm:$0xff]  ;;  %v601_v42 = vld [vmem:[%s16218_s14 + $0xb0] sm:$0xff]  ;;  %v13994_v20 = vld [vmem:[#allocation7 + $0x24c] ss:$48 sps:$4 sm:$0xff]  }
 0x198   : > { %2639 = vmatprep.subr.bf16.mxu0 %v13831_v45  ;;  %v13869_v33 = vld [vmem:[#allocation7 + $0x3d0] ss:$48 sps:$4 sm:$0xff]   ;;  %v16294_v34 = vpack.c.bf16 %v595_v31, %v592_v30  ;;  %v13874_v35 = vld [vmem:[#allocation7 + $0x434] ss:$48 sps:$4 sm:$0xff]   ;;  %v16304_v45 = vpack.c.bf16 %v601_v42, %v598_v41  ;;  %v13998_v27 = vld [vmem:[#allocation7 + $0x2a8] ss:$48 sps:$4 sm:$0xff]  }
 0x199   : > { %v13872_v36 = vld [vmem:[#allocation7 + $0x430] ss:$48 sps:$4 sm:$0xff]   ;;  %v13877_v40 = vld [vmem:[#allocation7 + $0x494] ss:$48 sps:$4 sm:$0xff]   ;;  %v14000_v28 = vld [vmem:[#allocation7 + $0x2ac] ss:$48 sps:$4 sm:$0xff]  }
 0x19a   : > { %2364 = vmatpush1.bf16.msra.mxu1 %v13832_v47  ;;  %2459 = vmatmul.mubr.bf16.gmra.mrb[4].mxu0 %v16262_v62  ;;  %v591_v38 = vld [vmem:[%s16218_s14 + $0x60] sm:$0xff] }
 0x19b   : > { %2640 = vmatpush1.bf16.msra.mxu0 %v13829_v46  ;;  %2365 = vmatprep.subr.bf16.mxu1 %v13833_v48  ;;  %v16302_v43 = vpack.c.bf16 %v594_v39, %v591_v38  ;;  %v13875_v44 = vld [vmem:[#allocation7 + $0x490] ss:$48 sps:$4 sm:$0xff]   ;;  %v13880_v46 = vld [vmem:[#allocation7 + $0x4f4] ss:$48 sps:$4 sm:$0xff]   ;;  %v14010_v39 = vld [vmem:[#allocation7 + $0x368] ss:$48 sps:$4 sm:$0xff]  }
 0x19c   : > { %2641 = vmatprep.subr.bf16.mxu0 %v13837_v49  ;;  %2468 = vmatprep.mubr.bf16.mxu0 %v18443_v0  ;;  %v13878_v47 = vld [vmem:[#allocation7 + $0x4f0] ss:$48 sps:$4 sm:$0xff]   ;;  %v600_v49 = vld [vmem:[%s16218_s14 + $0xa8] sm:$0xff]  ;;  %v13883_v50 = vld [vmem:[#allocation7 + $0x554] ss:$48 sps:$4 sm:$0xff]  }
 0x19d   : > { %v597_v48 = vld [vmem:[%s16218_s14 + $0x90] sm:$0xff] }
 0x19e   : > { %2366 = vmatpush1.bf16.msra.mxu1 %v13838_v53  ;;  %v16310_v51 = vpack.c.bf16 %v600_v49, %v597_v48  ;;  %v13886_v53 = vld [vmem:[#allocation7 + $0x5b4] ss:$48 sps:$4 sm:$0xff]   ;;  %v13899_v15 = vld [vmem:[#allocation7 + $0x790] ss:$48 sps:$4 sm:$0xff]   ;;  %v14016_v49 = vld [vmem:[#allocation7 + $0x428] ss:$48 sps:$4 sm:$0xff]  }
 0x19f   : > { %2642 = vmatpush1.bf16.msra.mxu0 %v13835_v52  ;;  %2367 = vmatprep.subr.bf16.mxu1 %v13839_v55  ;;  %v13881_v52 = vld [vmem:[#allocation7 + $0x550] ss:$48 sps:$4 sm:$0xff]   ;;  %v13895_v3 = vld [vmem:[#allocation7 + $0x6d4] ss:$48 sps:$4 sm:$0xff]  }
 0x1a0   : > { %2643 = vmatprep.subr.bf16.mxu0 %v13843_v56  ;;  %v13884_v55 = vld [vmem:[#allocation7 + $0x5b0] ss:$48 sps:$4 sm:$0xff]   ;;  %v13889_v56 = vld [vmem:[#allocation7 + $0x614] ss:$48 sps:$4 sm:$0xff]  }
 0x1a1   : > { %v13902_v18 = vld [vmem:[#allocation7 + $0x7f0] ss:$48 sps:$4 sm:$0xff]   ;;  %v13907_v19 = vld [vmem:[#allocation7 + $0x854] ss:$48 sps:$4 sm:$0xff]  }
 0x1a2   : > { %2368 = vmatpush1.bf16.msra.mxu1 %v13844_v60  ;;  %2469 = vmatmul.mubr.bf16.gmra.mrb[8].mxu0 %v16268_v7  ;;  %v13964_v60 = vld [vmem:[#allocation7 + $0x6c] ss:$48 sps:$4 sm:$0xff]   ;;  %v13908_v30 = vld [vmem:[#allocation7 + $0x8b0] ss:$48 sps:$4 sm:$0xff]   ;;  %v13913_v31 = vld [vmem:[#allocation7 + $0x24] ss:$48 sps:$4 sm:$0xff]  }
 0x1a3   : > { %2644 = vmatpush1.bf16.msra.mxu0 %v13841_v59  ;;  %2369 = vmatprep.subr.bf16.mxu1 %v13845_v61  ;;  %v13887_v59 = vld [vmem:[#allocation7 + $0x610] ss:$48 sps:$4 sm:$0xff]   ;;  %v13892_v61 = vld [vmem:[#allocation7 + $0x674] ss:$48 sps:$4 sm:$0xff]  }
 0x1a4   : > { %2645 = vmatprep.subr.bf16.mxu0 %v13849_v63  ;;  %2478 = vmatprep.mubr.bf16.mxu0 %v18443_v0  ;;  %v13962_v63 = vld [vmem:[#allocation7 + $0x68] ss:$48 sps:$4 sm:$0xff]   ;;  %v13916_v38 = vld [vmem:[#allocation7 + $0x84] ss:$48 sps:$4 sm:$0xff]   ;;  %v13914_v41 = vld [vmem:[#allocation7 + $0x80] ss:$48 sps:$4 sm:$0xff]  }
 0x1a5   : > { %v13919_v42 = vld [vmem:[#allocation7 + $0xe4] ss:$48 sps:$4 sm:$0xff]  }
 0x1a6   : > { %2370 = vmatpush1.bf16.msra.mxu1 %v13850_v2  ;;  %v13890_v2 = vld [vmem:[#allocation7 + $0x670] ss:$48 sps:$4 sm:$0xff]   ;;  %v13922_v48 = vld [vmem:[#allocation7 + $0x144] ss:$48 sps:$4 sm:$0xff]  }
 0x1a7   : > { %2646 = vmatpush1.bf16.msra.mxu0 %v13847_v1  ;;  %2371 = vmatprep.subr.bf16.mxu1 %v13851_v5  ;;  %v13970_v1 = vld [vmem:[#allocation7 + $0xcc] ss:$48 sps:$4 sm:$0xff]  }
 0x1a8   : > { %2647 = vmatprep.subr.bf16.mxu0 %v13855_v6  ;;  %v13976_v5 = vld [vmem:[#allocation7 + $0x12c] ss:$48 sps:$4 sm:$0xff]   ;;  %v13893_v6 = vld [vmem:[#allocation7 + $0x6d0] ss:$48 sps:$4 sm:$0xff]  }
 0x1aa   : > { %2372 = vmatpush1.bf16.msra.mxu1 %v13856_v9  ;;  %2479 = vmatmul.mubr.bf16.gmra.mrb[12].mxu0 %v16278_v21  ;;  %v13974_v9 = vld [vmem:[#allocation7 + $0x128] ss:$48 sps:$4 sm:$0xff]  }
 0x1ab   : > { %2648 = vmatpush1.bf16.msra.mxu0 %v13853_v8  ;;  %2373 = vmatprep.subr.bf16.mxu1 %v13857_v10  ;;  %v13898_v8 = vld [vmem:[#allocation7 + $0x734] ss:$48 sps:$4 sm:$0xff]   ;;  %v13896_v10 = vld [vmem:[#allocation7 + $0x730] ss:$48 sps:$4 sm:$0xff]  }
 0x1ac   : > { %2649 = vmatprep.subr.bf16.mxu0 %v13861_v11  ;;  %2667 = vmatprep.mubr.bf16.mxu0 %v16257_v54  ;;  %v13982_v11 = vld [vmem:[#allocation7 + $0x18c] ss:$48 sps:$4 sm:$0xff]  }
 0x1ae   : > { %2374 = vmatpush1.bf16.msra.mxu1 %v13862_v13  ;;  %v13980_v13 = vld [vmem:[#allocation7 + $0x188] ss:$48 sps:$4 sm:$0xff]  }
 0x1af   : > { %2650 = vmatpush1.bf16.msra.mxu0 %v13859_v12  ;;  %2489 = vmatprep.subr.bf16.mxu1 %v13958_v58  ;;  %v13901_v12 = vld [vmem:[#allocation7 + $0x794] ss:$48 sps:$4 sm:$0xff]  }
 0x1b0   : > { %2651 = vmatprep.subr.bf16.mxu0 %v13865_v16  ;;  %v13904_v16 = vld [vmem:[#allocation7 + $0x7f4] ss:$48 sps:$4 sm:$0xff]  }
 0x1b1   : > { %2376 = vmatmul.mubr.bf16.vlgmr.msra.gmra.mrb[0].mxu1 %v16280_v22  ;;  %v13928_v58 = vld [vmem:[#allocation7 + $0x204] ss:$48 sps:$4 sm:$0xff]  }
 0x1b2   : > { %2385 = vmatprep.mubr.bf16.mxu1 %v16282_v24  ;;  %2490 = vmatpush1.bf16.msra.mxu1 %v13956_v57  ;;  %v13923_v57 = vld [vmem:[#allocation7 + $0x1a0] ss:$48 sps:$4 sm:$0xff]  }
 0x1b3   : > { %2652 = vmatpush1.bf16.msra.mxu0 %v13863_v23  ;;  %2491 = vmatprep.subr.bf16.mxu1 %v13964_v60  ;;  %v13992_v23 = vld [vmem:[#allocation7 + $0x248] ss:$48 sps:$4 sm:$0xff]   ;;  %v13926_v60 = vld [vmem:[#allocation7 + $0x200] ss:$48 sps:$4 sm:$0xff]  }
 0x1b4   : > { %2653 = vmatprep.subr.bf16.mxu0 %v13868_v25  ;;  %v13905_v25 = vld [vmem:[#allocation7 + $0x850] ss:$48 sps:$4 sm:$0xff]  }
 0x1b6   : > { %2492 = vmatpush1.bf16.msra.mxu1 %v13962_v63  ;;  %v14027_v63 = vld [vmem:[#allocation7 + $0x54c] ss:$48 sps:$4 sm:$0xff]  }
 0x1b7   : > { %2654 = vmatpush1.bf16.msra.mxu0 %v13866_v26  ;;  %2493 = vmatprep.subr.bf16.mxu1 %v13970_v1  ;;  %v13910_v26 = vld [vmem:[#allocation7 + $0x8b4] ss:$48 sps:$4 sm:$0xff]   ;;  %v13929_v1 = vld [vmem:[#allocation7 + $0x260] ss:$48 sps:$4 sm:$0xff]  }
 0x1b8   : > { %2655 = vmatprep.subr.bf16.mxu0 %v13871_v29  ;;  %v14006_v29 = vld [vmem:[#allocation7 + $0x30c] ss:$48 sps:$4 sm:$0xff]  }
 0x1b9   : > { %2386 = vmatmul.mubr.bf16.gmra.mrb[4].mxu1 %v16292_v32 }
 0x1ba   : > { %2395 = vmatprep.mubr.bf16.mxu1 %v16294_v34  ;;  %2494 = vmatpush1.bf16.msra.mxu1 %v13968_v4  ;;  %v14030_v4 = vld [vmem:[#allocation7 + $0x5ac] ss:$48 sps:$4 sm:$0xff]  }
 0x1bb   : > { %2656 = vmatpush1.bf16.msra.mxu0 %v13869_v33  ;;  %2495 = vmatprep.subr.bf16.mxu1 %v13976_v5  ;;  %v14004_v33 = vld [vmem:[#allocation7 + $0x308] ss:$48 sps:$4 sm:$0xff]   ;;  %v13932_v5 = vld [vmem:[#allocation7 + $0x2c0] ss:$48 sps:$4 sm:$0xff]  }
 0x1bc   : > { %2657 = vmatprep.subr.bf16.mxu0 %v13874_v35  ;;  %v13911_v35 = vld [vmem:[#allocation7 + $0x20] ss:$48 sps:$4 sm:$0xff]  }
 0x1be   : > { %2496 = vmatpush1.bf16.msra.mxu1 %v13974_v9  ;;  %v14033_v9 = vld [vmem:[#allocation7 + $0x60c] ss:$48 sps:$4 sm:$0xff]  }
 0x1bf   : > { %2658 = vmatpush1.bf16.msra.mxu0 %v13872_v36  ;;  %2497 = vmatprep.subr.bf16.mxu1 %v13982_v11  ;;  %v14012_v36 = vld [vmem:[#allocation7 + $0x36c] ss:$48 sps:$4 sm:$0xff]   ;;  %v14031_v11 = vld [vmem:[#allocation7 + $0x608] ss:$48 sps:$4 sm:$0xff]  }
 0x1c0   : > { %2659 = vmatprep.subr.bf16.mxu0 %v13877_v40  ;;  %v14015_v40 = vld [vmem:[#allocation7 + $0x3cc] ss:$48 sps:$4 sm:$0xff]  }
 0x1c1   : > { %2396 = vmatmul.mubr.bf16.gmra.mrb[8].mxu1 %v16302_v43 }
 0x1c2   : > { %2405 = vmatprep.mubr.bf16.mxu1 %v16304_v45  ;;  %2498 = vmatpush1.bf16.msra.mxu1 %v13980_v13  ;;  %v14036_v13 = vld [vmem:[#allocation7 + $0x66c] ss:$48 sps:$4 sm:$0xff]  }
 0x1c3   : > { %2660 = vmatpush1.bf16.msra.mxu0 %v13875_v44  ;;  %2499 = vmatprep.subr.bf16.mxu1 %v13988_v14  ;;  %v14013_v44 = vld [vmem:[#allocation7 + $0x3c8] ss:$48 sps:$4 sm:$0xff]   ;;  %v13938_v14 = vld [vmem:[#allocation7 + $0x380] ss:$48 sps:$4 sm:$0xff]  }
 0x1c4   : > { %2661 = vmatprep.subr.bf16.mxu0 %v13880_v46  ;;  %v14018_v46 = vld [vmem:[#allocation7 + $0x42c] ss:$48 sps:$4 sm:$0xff]  }
 0x1c6   : > { %2500 = vmatpush1.bf16.msra.mxu1 %v13986_v17  ;;  %v14039_v17 = vld [vmem:[#allocation7 + $0x6cc] ss:$48 sps:$4 sm:$0xff]  }
 0x1c7   : > { %2662 = vmatpush1.bf16.msra.mxu0 %v13878_v47  ;;  %2501 = vmatprep.subr.bf16.mxu1 %v13994_v20  ;;  %v13917_v47 = vld [vmem:[#allocation7 + $0xe0] ss:$48 sps:$4 sm:$0xff]   ;;  %v13946_v20 = vld [vmem:[#allocation7 + $0x444] ss:$48 sps:$4 sm:$0xff]  }
 0x1c8   : > { %2663 = vmatprep.subr.bf16.mxu0 %v13883_v50  ;;  %v14021_v50 = vld [vmem:[#allocation7 + $0x48c] ss:$48 sps:$4 sm:$0xff]  }
 0x1c9   : > { %2406 = vmatmul.mubr.bf16.gmra.mrb[12].mxu1 %v16310_v51 }
 0x1ca   : > { %2521 = vmatprep.mubr.bf16.mxu1 %v16257_v54  ;;  %2502 = vmatpush1.bf16.msra.mxu1 %v13992_v23  ;;  %v14042_v23 = vld [vmem:[#allocation7 + $0x72c] ss:$48 sps:$4 sm:$0xff]  }
 0x1cb   : > { %2664 = vmatpush1.bf16.msra.mxu0 %v13881_v52  ;;  %2503 = vmatprep.subr.bf16.mxu1 %v14000_v28  ;;  %v13920_v52 = vld [vmem:[#allocation7 + $0x140] ss:$48 sps:$4 sm:$0xff]   ;;  %v14045_v28 = vld [vmem:[#allocation7 + $0x78c] ss:$48 sps:$4 sm:$0xff]  }
 0x1cc   : > { %2665 = vmatprep.subr.bf16.mxu0 %v13886_v53  ;;  %v13925_v53 = vld [vmem:[#allocation7 + $0x1a4] ss:$48 sps:$4 sm:$0xff]  }
 0x1ce   : > { %2504 = vmatpush1.bf16.msra.mxu1 %v13998_v27  ;;  %v13949_v27 = vld [vmem:[#allocation7 + $0x4a4] ss:$48 sps:$4 sm:$0xff]  }
 0x1cf   : > { %2666 = vmatpush1.bf16.msra.mxu0 %v13884_v55  ;;  %2505 = vmatprep.subr.bf16.mxu1 %v14006_v29  ;;  %v14019_v55 = vld [vmem:[#allocation7 + $0x488] ss:$48 sps:$4 sm:$0xff]   ;;  %v13947_v29 = vld [vmem:[#allocation7 + $0x4a0] ss:$48 sps:$4 sm:$0xff]  }
 0x1d0   : > { %2708 = vmatprep.subr.bf16.mxu0 %v13889_v56  ;;  %v14024_v56 = vld [vmem:[#allocation7 + $0x4ec] ss:$48 sps:$4 sm:$0xff]  }
 0x1d2   : > { %2668 = vmatmul.mubr.bf16.vlgmr.msra.gmra.mrb[16].mxu0 %v16280_v22  ;;  %2506 = vmatpush1.bf16.msra.mxu1 %v14004_v33  ;;  %v14048_v33 = vld [vmem:[#allocation7 + $0x7ec] ss:$48 sps:$4 sm:$0xff]  }
 0x1d3   : > { %2709 = vmatpush1.bf16.msra.mxu0 %v13887_v59  ;;  %2677 = vmatprep.mubr.bf16.mxu0 %v16282_v24  ;;  %v14022_v59 = vld [vmem:[#allocation7 + $0x4e8] ss:$48 sps:$4 sm:$0xff]  }
 0x1d4   : > { %2710 = vmatprep.subr.bf16.mxu0 %v13892_v61  ;;  %2507 = vmatprep.subr.bf16.mxu1 %v14012_v36  ;;  %v13931_v61 = vld [vmem:[#allocation7 + $0x264] ss:$48 sps:$4 sm:$0xff]   ;;  %v13950_v36 = vld [vmem:[#allocation7 + $0x500] ss:$48 sps:$4 sm:$0xff]  }
 0x1d6   : > { %2508 = vmatpush1.bf16.msra.mxu1 %v14010_v39  ;;  %v13955_v39 = vld [vmem:[#allocation7 + $0x564] ss:$48 sps:$4 sm:$0xff]  }
 0x1d7   : > { %2711 = vmatpush1.bf16.msra.mxu0 %v13890_v2  ;;  %2509 = vmatprep.subr.bf16.mxu1 %v14015_v40  ;;  %v14025_v2 = vld [vmem:[#allocation7 + $0x548] ss:$48 sps:$4 sm:$0xff]  }
 0x1d8   : > { %2712 = vmatprep.subr.bf16.mxu0 %v13895_v3  ;;  %v13934_v3 = vld [vmem:[#allocation7 + $0x2c4] ss:$48 sps:$4 sm:$0xff]   ;;  %v14049_v40 = vld [vmem:[#allocation7 + $0x848] ss:$48 sps:$4 sm:$0xff]  }
 0x1da   : > { %2678 = vmatmul.mubr.bf16.gmra.mrb[20].mxu0 %v16292_v32  ;;  %2510 = vmatpush1.bf16.msra.mxu1 %v14013_v44  ;;  %v13961_v44 = vld [vmem:[#allocation7 + $0x5c4] ss:$48 sps:$4 sm:$0xff]  }
 0x1db   : > { %2713 = vmatpush1.bf16.msra.mxu0 %v13893_v6  ;;  %2687 = vmatprep.mubr.bf16.mxu0 %v16294_v34  ;;  %v14028_v6 = vld [vmem:[#allocation7 + $0x5a8] ss:$48 sps:$4 sm:$0xff]  }
 0x1dc   : > { %2714 = vmatprep.subr.bf16.mxu0 %v13898_v8  ;;  %2511 = vmatprep.subr.bf16.mxu1 %v14018_v46  ;;  %v13937_v8 = vld [vmem:[#allocation7 + $0x324] ss:$48 sps:$4 sm:$0xff]   ;;  %v14052_v46 = vld [vmem:[#allocation7 + $0x8a8] ss:$48 sps:$4 sm:$0xff]  }
 0x1de   : > { %2512 = vmatpush1.bf16.msra.mxu1 %v14016_v49  ;;  %v13967_v49 = vld [vmem:[#allocation7 + $0x624] ss:$48 sps:$4 sm:$0xff]  }
 0x1df   : > { %2715 = vmatpush1.bf16.msra.mxu0 %v13896_v10  ;;  %2513 = vmatprep.subr.bf16.mxu1 %v14021_v50  ;;  %v13935_v10 = vld [vmem:[#allocation7 + $0x320] ss:$48 sps:$4 sm:$0xff]   ;;  %v14055_v50 = vld [vmem:[#allocation7 + $0x18] ss:$48 sps:$4 sm:$0xff]  }
 0x1e0   : > { %2716 = vmatprep.subr.bf16.mxu0 %v13901_v12  ;;  %v13940_v12 = vld [vmem:[#allocation7 + $0x384] ss:$48 sps:$4 sm:$0xff]  }
 0x1e2   : > { %2688 = vmatmul.mubr.bf16.gmra.mrb[24].mxu0 %v16302_v43  ;;  %2514 = vmatpush1.bf16.msra.mxu1 %v14019_v55  ;;  %v13973_v55 = vld [vmem:[#allocation7 + $0x684] ss:$48 sps:$4 sm:$0xff]  }
 0x1e3   : > { %2717 = vmatpush1.bf16.msra.mxu0 %v13899_v15  ;;  %2697 = vmatprep.mubr.bf16.mxu0 %v16304_v45  ;;  %v14034_v15 = vld [vmem:[#allocation7 + $0x668] ss:$48 sps:$4 sm:$0xff]  }
 0x1e4   : > { %2718 = vmatprep.subr.bf16.mxu0 %v13904_v16  ;;  %2515 = vmatprep.subr.bf16.mxu1 %v14024_v56  ;;  %v13943_v16 = vld [vmem:[#allocation7 + $0x3e4] ss:$48 sps:$4 sm:$0xff]   ;;  %v14058_v56 = vld [vmem:[#allocation7 + $0x78] ss:$48 sps:$4 sm:$0xff]  }
 0x1e6   : > { %2516 = vmatpush1.bf16.msra.mxu1 %v14022_v59  ;;  %v13979_v59 = vld [vmem:[#allocation7 + $0x6e4] ss:$48 sps:$4 sm:$0xff]  }
 0x1e7   : > { %2719 = vmatpush1.bf16.msra.mxu0 %v13902_v18  ;;  %2517 = vmatprep.subr.bf16.mxu1 %v14027_v63  ;;  %v13941_v18 = vld [vmem:[#allocation7 + $0x3e0] ss:$48 sps:$4 sm:$0xff]  }
 0x1e8   : > { %2720 = vmatprep.subr.bf16.mxu0 %v13907_v19  ;;  %v14037_v19 = vld [vmem:[#allocation7 + $0x6c8] ss:$48 sps:$4 sm:$0xff]   ;;  %v13977_v63 = vld [vmem:[#allocation7 + $0x6e0] ss:$48 sps:$4 sm:$0xff]  }
 0x1ea   : > { %2698 = vmatmul.mubr.bf16.gmra.mrb[28].mxu0 %v16310_v51  ;;  %2518 = vmatpush1.bf16.msra.mxu1 %v14025_v2  ;;  %v14064_v2 = vld [vmem:[#allocation7 + $0x138] ss:$48 sps:$4 sm:$0xff]  }
 0x1eb   : > { %2721 = vmatpush1.bf16.msra.mxu0 %v13905_v25  ;;  %2740 = vmatprep.mubr.bf16.mxu0 %v18443_v0  ;;  %v13944_v25 = vld [vmem:[#allocation7 + $0x440] ss:$48 sps:$4 sm:$0xff]  }
 0x1ec   : > { %2722 = vmatprep.subr.bf16.mxu0 %v13910_v26  ;;  %2519 = vmatprep.subr.bf16.mxu1 %v14030_v4  ;;  %v14040_v26 = vld [vmem:[#allocation7 + $0x728] ss:$48 sps:$4 sm:$0xff]   ;;  %v13983_v4 = vld [vmem:[#allocation7 + $0x740] ss:$48 sps:$4 sm:$0xff]  }
 0x1ee   : > { %2520 = vmatpush1.bf16.msra.mxu1 %v14028_v6  ;;  %v14067_v6 = vld [vmem:[#allocation7 + $0x198] ss:$48 sps:$4 sm:$0xff]  }
 0x1ef   : > { %2723 = vmatpush1.bf16.msra.mxu0 %v13908_v30  ;;  %2562 = vmatprep.subr.bf16.mxu1 %v14033_v9  ;;  %v14043_v30 = vld [vmem:[#allocation7 + $0x788] ss:$48 sps:$4 sm:$0xff]   ;;  %v13989_v9 = vld [vmem:[#allocation7 + $0x7a0] ss:$48 sps:$4 sm:$0xff]  }
 0x1f0   : > { %2927 = vmatprep.subr.bf16.mxu0 %v13913_v31  ;;  %v13952_v31 = vld [vmem:[#allocation7 + $0x504] ss:$48 sps:$4 sm:$0xff]  }
 0x1f1   : > { %2522 = vmatmul.mubr.bf16.vlgmr.msra.gmra.mrb[16].mxu1 %v16280_v22 }
 0x1f2   : > { %2741 = vmatmul.mubr.bf16.vlgmr.msra.gmra.mrb[16].mxu0 %v16251_v37  ;;  %2563 = vmatpush1.bf16.msra.mxu1 %v14031_v11  ;;  %v14070_v11 = vld [vmem:[#allocation7 + $0x1f8] ss:$48 sps:$4 sm:$0xff]  }
 0x1f3   : > { %2750 = vmatprep.mubr.bf16.mxu0 %v18443_v0  ;;  %2928 = vmatpush1.bf16.msra.mxu0 %v13911_v35  ;;  %v14046_v35 = vld [vmem:[#allocation7 + $0x7e8] ss:$48 sps:$4 sm:$0xff]  }
 0x1f4   : > { %2929 = vmatprep.subr.bf16.mxu0 %v13916_v38  ;;  %2531 = vmatprep.mubr.bf16.mxu1 %v16282_v24  ;;  %v14051_v38 = vld [vmem:[#allocation7 + $0x84c] ss:$48 sps:$4 sm:$0xff]  }
 0x1f5   : > { %2564 = vmatprep.subr.bf16.mxu1 %v14036_v13  ;;  %v14003_v13 = vld [vmem:[#allocation7 + $0x864] ss:$48 sps:$4 sm:$0xff]  }
 0x1f6   : > { %2565 = vmatpush1.bf16.msra.mxu1 %v14034_v15  ;;  %v14001_v15 = vld [vmem:[#allocation7 + $0x860] ss:$48 sps:$4 sm:$0xff]  }
 0x1f7   : > { %2930 = vmatpush1.bf16.msra.mxu0 %v13914_v41  ;;  %2566 = vmatprep.subr.bf16.mxu1 %v14039_v17  ;;  %v14054_v41 = vld [vmem:[#allocation7 + $0x8ac] ss:$48 sps:$4 sm:$0xff]   ;;  %v14009_v17 = vld [vmem:[#allocation7 + $0x8c4] ss:$48 sps:$4 sm:$0xff]  }
 0x1f8   : > { %2931 = vmatprep.subr.bf16.mxu0 %v13919_v42  ;;  %v13953_v42 = vld [vmem:[#allocation7 + $0x560] ss:$48 sps:$4 sm:$0xff]  }
 0x1f9   : > { %2532 = vmatmul.mubr.bf16.gmra.mrb[20].mxu1 %v16292_v32 }
 0x1fa   : > { %2751 = vmatmul.mubr.bf16.gmra.mrb[20].mxu0 %v16262_v62  ;;  %2567 = vmatpush1.bf16.msra.mxu1 %v14037_v19  ;;  %v14007_v19 = vld [vmem:[#allocation7 + $0x8c0] ss:$48 sps:$4 sm:$0xff]  }
 0x1fb   : > { %2760 = vmatprep.mubr.bf16.mxu0 %v18443_v0  ;;  %2932 = vmatpush1.bf16.msra.mxu0 %v13917_v47  ;;  %v14057_v47 = vld [vmem:[#allocation7 + $0x1c] ss:$48 sps:$4 sm:$0xff]  }
 0x1fc   : > { %2933 = vmatprep.subr.bf16.mxu0 %v13922_v48  ;;  %2541 = vmatprep.mubr.bf16.mxu1 %v16294_v34  ;;  %v13959_v48 = vld [vmem:[#allocation7 + $0x5c0] ss:$48 sps:$4 sm:$0xff]  }
 0x1fd   : > { %2568 = vmatprep.subr.bf16.mxu1 %v14042_v23  ;;  %v14081_v23 = vld [vmem:[#allocation7 + $0x31c] ss:$48 sps:$4 sm:$0xff]  }
 0x1fe   : > { %2569 = vmatpush1.bf16.msra.mxu1 %v14040_v26  ;;  %v14084_v26 = vld [vmem:[#allocation7 + $0x37c] ss:$48 sps:$4 sm:$0xff]  }
 0x1ff   : > { %2934 = vmatpush1.bf16.msra.mxu0 %v13920_v52  ;;  %2570 = vmatprep.subr.bf16.mxu1 %v14045_v28  ;;  %v14060_v52 = vld [vmem:[#allocation7 + $0x7c] ss:$48 sps:$4 sm:$0xff]  }
 0x200   : > { %2935 = vmatprep.subr.bf16.mxu0 %v13925_v53  ;;  %v13965_v53 = vld [vmem:[#allocation7 + $0x620] ss:$48 sps:$4 sm:$0xff]   ;;  %v14087_v28 = vld [vmem:[#allocation7 + $0x3dc] ss:$48 sps:$4 sm:$0xff]  }
 0x201   : > { %2542 = vmatmul.mubr.bf16.gmra.mrb[24].mxu1 %v16302_v43 }
 0x202   : > { %2761 = vmatmul.mubr.bf16.gmra.mrb[24].mxu0 %v16268_v7  ;;  %2571 = vmatpush1.bf16.msra.mxu1 %v14043_v30  ;;  %v14090_v30 = vld [vmem:[#allocation7 + $0x43c] ss:$48 sps:$4 sm:$0xff]  }
 0x203   : > { %2770 = vmatprep.mubr.bf16.mxu0 %v18443_v0  ;;  %2936 = vmatpush1.bf16.msra.mxu0 %v13923_v57  ;;  %v14063_v57 = vld [vmem:[#allocation7 + $0xdc] ss:$48 sps:$4 sm:$0xff]  }
 0x204   : > { %2937 = vmatprep.subr.bf16.mxu0 %v13928_v58  ;;  %2551 = vmatprep.mubr.bf16.mxu1 %v16304_v45  ;;  %v13971_v58 = vld [vmem:[#allocation7 + $0x680] ss:$48 sps:$4 sm:$0xff]  }
 0x205   : > { %2572 = vmatprep.subr.bf16.mxu1 %v14048_v33  ;;  %v14093_v33 = vld [vmem:[#allocation7 + $0x49c] ss:$48 sps:$4 sm:$0xff]  }
 0x206   : > { %2573 = vmatpush1.bf16.msra.mxu1 %v14046_v35  ;;  %v14091_v35 = vld [vmem:[#allocation7 + $0x498] ss:$48 sps:$4 sm:$0xff]  }
 0x207   : > { %2938 = vmatpush1.bf16.msra.mxu0 %v13926_v60  ;;  %2574 = vmatprep.subr.bf16.mxu1 %v14051_v38  ;;  %v14061_v60 = vld [vmem:[#allocation7 + $0xd8] ss:$48 sps:$4 sm:$0xff]  }
 0x208   : > { %2939 = vmatprep.subr.bf16.mxu0 %v13931_v61  ;;  %v14066_v61 = vld [vmem:[#allocation7 + $0x13c] ss:$48 sps:$4 sm:$0xff]   ;;  %v14094_v38 = vld [vmem:[#allocation7 + $0x4f8] ss:$48 sps:$4 sm:$0xff]  }
 0x209   : > { %2552 = vmatmul.mubr.bf16.gmra.mrb[28].mxu1 %v16310_v51 }
 0x20a   : > { %2771 = vmatmul.mubr.bf16.gmra.mrb[28].mxu0 %v16278_v21  ;;  %2575 = vmatpush1.bf16.msra.mxu1 %v14049_v40  ;;  %v14099_v40 = vld [vmem:[#allocation7 + $0x55c] ss:$48 sps:$4 sm:$0xff]  }
 0x20b   : > { %2940 = vmatpush1.bf16.msra.mxu0 %v13929_v1  ;;  %2959 = vmatprep.mubr.bf16.mxu0 %v16257_v54  ;;  %v13985_v1 = vld [vmem:[#allocation7 + $0x744] ss:$48 sps:$4 sm:$0xff]  }
 0x20c   : > { %2941 = vmatprep.subr.bf16.mxu0 %v13934_v3  ;;  %2576 = vmatprep.subr.bf16.mxu1 %v14054_v41  ;;  %v14069_v3 = vld [vmem:[#allocation7 + $0x19c] ss:$48 sps:$4 sm:$0xff]  }
 0x20d   : > { %2594 = vmatprep.mubr.bf16.mxu1 %v18443_v0 }
 0x20e   : > { %2577 = vmatpush1.bf16.msra.mxu1 %v14052_v46 }
 0x20f   : > { %2942 = vmatpush1.bf16.msra.mxu0 %v13932_v5  ;;  %2781 = vmatprep.subr.bf16.mxu1 %v14057_v47  ;;  %v13991_v5 = vld [vmem:[#allocation7 + $0x7a4] ss:$48 sps:$4 sm:$0xff]   ;;  %v14102_v47 = vld [vmem:[#allocation7 + $0x5bc] ss:$48 sps:$4 sm:$0xff]  }
 0x210   : > { %2943 = vmatprep.subr.bf16.mxu0 %v13937_v8  ;;  %v14072_v8 = vld [vmem:[#allocation7 + $0x1fc] ss:$48 sps:$4 sm:$0xff]  }
 0x211   : > { %2595 = vmatmul.mubr.bf16.vlgmr.msra.gmra.mrb[16].mxu1 %v16251_v37 }
 0x212   : > { %2782 = vmatpush1.bf16.msra.mxu1 %v14055_v50  ;;  %2604 = vmatprep.mubr.bf16.mxu1 %v18443_v0  ;;  %v14105_v50 = vld [vmem:[#allocation7 + $0x61c] ss:$48 sps:$4 sm:$0xff]  }
 0x213   : > { %2944 = vmatpush1.bf16.msra.mxu0 %v13935_v10  ;;  %2783 = vmatprep.subr.bf16.mxu1 %v14060_v52  ;;  %v13997_v10 = vld [vmem:[#allocation7 + $0x804] ss:$48 sps:$4 sm:$0xff]   ;;  %v14108_v52 = vld [vmem:[#allocation7 + $0x67c] ss:$48 sps:$4 sm:$0xff]  }
 0x214   : > { %2945 = vmatprep.subr.bf16.mxu0 %v13940_v12  ;;  %v13995_v12 = vld [vmem:[#allocation7 + $0x800] ss:$48 sps:$4 sm:$0xff]  }
 0x216   : > { %2784 = vmatpush1.bf16.msra.mxu1 %v14058_v56  ;;  %v14109_v56 = vld [vmem:[#allocation7 + $0x6d8] ss:$48 sps:$4 sm:$0xff]  }
 0x217   : > { %2946 = vmatpush1.bf16.msra.mxu0 %v13938_v14  ;;  %2785 = vmatprep.subr.bf16.mxu1 %v14063_v57  ;;  %v14075_v14 = vld [vmem:[#allocation7 + $0x25c] ss:$48 sps:$4 sm:$0xff]  }
 0x218   : > { %2947 = vmatprep.subr.bf16.mxu0 %v13943_v16  ;;  %v14073_v16 = vld [vmem:[#allocation7 + $0x258] ss:$48 sps:$4 sm:$0xff]   ;;  %v14111_v57 = vld [vmem:[#allocation7 + $0x6dc] ss:$48 sps:$4 sm:$0xff]  }
 0x219   : > { %2605 = vmatmul.mubr.bf16.gmra.mrb[20].mxu1 %v16262_v62 }
 0x21a   : > { %2786 = vmatpush1.bf16.msra.mxu1 %v14061_v60  ;;  %2614 = vmatprep.mubr.bf16.mxu1 %v18443_v0 }
 0x21b   : > { %2948 = vmatpush1.bf16.msra.mxu0 %v13941_v18  ;;  %2787 = vmatprep.subr.bf16.mxu1 %v14066_v61  ;;  %v14078_v18 = vld [vmem:[#allocation7 + $0x2bc] ss:$48 sps:$4 sm:$0xff]   ;;  %v14112_v61 = vld [vmem:[#allocation7 + $0x738] ss:$48 sps:$4 sm:$0xff]  }
 0x21c   : > { %2949 = vmatprep.subr.bf16.mxu0 %v13946_v20  ;;  %v14076_v20 = vld [vmem:[#allocation7 + $0x2b8] ss:$48 sps:$4 sm:$0xff]  }
 0x21e   : > { %2788 = vmatpush1.bf16.msra.mxu1 %v14064_v2  ;;  %v14115_v2 = vld [vmem:[#allocation7 + $0x798] ss:$48 sps:$4 sm:$0xff]  }
 0x21f   : > { %2950 = vmatpush1.bf16.msra.mxu0 %v13944_v25  ;;  %2789 = vmatprep.subr.bf16.mxu1 %v14069_v3  ;;  %v14079_v25 = vld [vmem:[#allocation7 + $0x318] ss:$48 sps:$4 sm:$0xff]   ;;  %v14117_v3 = vld [vmem:[#allocation7 + $0x79c] ss:$48 sps:$4 sm:$0xff]  }
 0x220   : > { %2951 = vmatprep.subr.bf16.mxu0 %v13949_v27  ;;  %v14082_v27 = vld [vmem:[#allocation7 + $0x378] ss:$48 sps:$4 sm:$0xff]  }
 0x221   : > { %2615 = vmatmul.mubr.bf16.gmra.mrb[24].mxu1 %v16268_v7 }
 0x222   : > { %2790 = vmatpush1.bf16.msra.mxu1 %v14067_v6  ;;  %2624 = vmatprep.mubr.bf16.mxu1 %v18443_v0 }
 0x223   : > { %2952 = vmatpush1.bf16.msra.mxu0 %v13947_v29  ;;  %2791 = vmatprep.subr.bf16.mxu1 %v14072_v8  ;;  %v14085_v29 = vld [vmem:[#allocation7 + $0x3d8] ss:$48 sps:$4 sm:$0xff]  }
 0x224   : > { %2953 = vmatprep.subr.bf16.mxu0 %v13952_v31  ;;  %v14088_v31 = vld [vmem:[#allocation7 + $0x438] ss:$48 sps:$4 sm:$0xff]  }
 0x225   : > { %v14118_v8 = vld [vmem:[#allocation7 + $0x7f8] ss:$48 sps:$4 sm:$0xff]  }
 0x226   : > { %2792 = vmatpush1.bf16.msra.mxu1 %v14070_v11  ;;  %v14123_v11 = vld [vmem:[#allocation7 + $0x85c] ss:$48 sps:$4 sm:$0xff]  }
 0x227   : > { %2954 = vmatpush1.bf16.msra.mxu0 %v13950_v36  ;;  %2793 = vmatprep.subr.bf16.mxu1 %v14075_v14  ;;  %v14096_v36 = vld [vmem:[#allocation7 + $0x4fc] ss:$48 sps:$4 sm:$0xff]  }
 0x228   : > { %2955 = vmatprep.subr.bf16.mxu0 %v13955_v39  ;;  %v14097_v39 = vld [vmem:[#allocation7 + $0x558] ss:$48 sps:$4 sm:$0xff]  }
 0x229   : > { %2625 = vmatmul.mubr.bf16.gmra.mrb[28].mxu1 %v16278_v21 }
 0x22a   : > { %2794 = vmatpush1.bf16.msra.mxu1 %v14073_v16  ;;  %2813 = vmatprep.mubr.bf16.mxu1 %v16257_v54 }
 0x22b   : > { %2956 = vmatpush1.bf16.msra.mxu0 %v13953_v42  ;;  %2795 = vmatprep.subr.bf16.mxu1 %v14078_v18 }
 0x22c   : > { %2957 = vmatprep.subr.bf16.mxu0 %v13961_v44 }
 0x22e   : > { %2796 = vmatpush1.bf16.msra.mxu1 %v14076_v20 }
 0x22f   : > { %2958 = vmatpush1.bf16.msra.mxu0 %v13959_v48  ;;  %2797 = vmatprep.subr.bf16.mxu1 %v14081_v23  ;;  %v14100_v48 = vld [vmem:[#allocation7 + $0x5b8] ss:$48 sps:$4 sm:$0xff]  }
 0x230   : > { %3000 = vmatprep.subr.bf16.mxu0 %v13967_v49  ;;  %v14103_v49 = vld [vmem:[#allocation7 + $0x618] ss:$48 sps:$4 sm:$0xff]  }
 0x232   : > { %2960 = vmatmul.mubr.bf16.vlgmr.msra.gmra.mrb[32].mxu0 %v16280_v22  ;;  %2798 = vmatpush1.bf16.msra.mxu1 %v14079_v25 }
 0x233   : > { %3001 = vmatpush1.bf16.msra.mxu0 %v13965_v53  ;;  %2969 = vmatprep.mubr.bf16.mxu0 %v16282_v24  ;;  %v14106_v53 = vld [vmem:[#allocation7 + $0x678] ss:$48 sps:$4 sm:$0xff]  }
 0x234   : > { %3002 = vmatprep.subr.bf16.mxu0 %v13973_v55  ;;  %2799 = vmatprep.subr.bf16.mxu1 %v14084_v26  ;;  %v14126_v26 = vld [vmem:[#allocation7 + $0x8bc] ss:$48 sps:$4 sm:$0xff]  }
 0x236   : > { %2800 = vmatpush1.bf16.msra.mxu1 %v14082_v27 }
 0x237   : > { %3003 = vmatpush1.bf16.msra.mxu0 %v13971_v58  ;;  %2801 = vmatprep.subr.bf16.mxu1 %v14087_v28  ;;  %v14124_v28 = vld [vmem:[#allocation7 + $0x8b8] ss:$48 sps:$4 sm:$0xff]  }
 0x238   : > { %3004 = vmatprep.subr.bf16.mxu0 %v13979_v59  ;;  %v14114_v59 = vld [vmem:[#allocation7 + $0x73c] ss:$48 sps:$4 sm:$0xff]  }
 0x23a   : > { %2970 = vmatmul.mubr.bf16.gmra.mrb[36].mxu0 %v16292_v32  ;;  %2802 = vmatpush1.bf16.msra.mxu1 %v14085_v29 }
 0x23b   : > { %3005 = vmatpush1.bf16.msra.mxu0 %v13977_v63  ;;  %2979 = vmatprep.mubr.bf16.mxu0 %v16294_v34 }
 0x23c   : > { %3006 = vmatprep.subr.bf16.mxu0 %v13985_v1  ;;  %2803 = vmatprep.subr.bf16.mxu1 %v14090_v30 }
 0x23e   : > { %2804 = vmatpush1.bf16.msra.mxu1 %v14088_v31  ;;  %v14127_v31 = vld [vmem:[#allocation7 + $0x28] ss:$48 sps:$4 sm:$0xff]  }
 0x23f   : > { %3007 = vmatpush1.bf16.msra.mxu0 %v13983_v4  ;;  %2805 = vmatprep.subr.bf16.mxu1 %v14093_v33  ;;  %v14129_v33 = vld [vmem:[#allocation7 + $0x2c] ss:$48 sps:$4 sm:$0xff]  }
 0x240   : > { %3008 = vmatprep.subr.bf16.mxu0 %v13991_v5  ;;  %v14120_v5 = vld [vmem:[#allocation7 + $0x7fc] ss:$48 sps:$4 sm:$0xff]  }
 0x242   : > { %2980 = vmatmul.mubr.bf16.gmra.mrb[40].mxu0 %v16302_v43  ;;  %2806 = vmatpush1.bf16.msra.mxu1 %v14091_v35 }
 0x243   : > { %3009 = vmatpush1.bf16.msra.mxu0 %v13989_v9  ;;  %2989 = vmatprep.mubr.bf16.mxu0 %v16304_v45 }
 0x244   : > { %3010 = vmatprep.subr.bf16.mxu0 %v13997_v10  ;;  %2807 = vmatprep.subr.bf16.mxu1 %v14096_v36  ;;  %v14121_v10 = vld [vmem:[#allocation7 + $0x858] ss:$48 sps:$4 sm:$0xff]  }
 0x246   : > { %2808 = vmatpush1.bf16.msra.mxu1 %v14094_v38 }
 0x247   : > { %3011 = vmatpush1.bf16.msra.mxu0 %v13995_v12  ;;  %2809 = vmatprep.subr.bf16.mxu1 %v14099_v40 }
 0x248   : > { %3012 = vmatprep.subr.bf16.mxu0 %v14003_v13 }
 0x24a   : > { %2990 = vmatmul.mubr.bf16.gmra.mrb[44].mxu0 %v16310_v51  ;;  %2810 = vmatpush1.bf16.msra.mxu1 %v14097_v39 }
 0x24b   : > { %3013 = vmatpush1.bf16.msra.mxu0 %v14001_v15  ;;  %3032 = vmatprep.mubr.bf16.mxu0 %v18443_v0 }
 0x24c   : > { %3014 = vmatprep.subr.bf16.mxu0 %v14009_v17  ;;  %2811 = vmatprep.subr.bf16.mxu1 %v14102_v47  ;;  %v14130_v47 = vld [vmem:[#allocation7 + $0x88] ss:$48 sps:$4 sm:$0xff]  }
 0x24e   : > { %2812 = vmatpush1.bf16.msra.mxu1 %v14100_v48 }
 0x24f   : > { %3015 = vmatpush1.bf16.msra.mxu0 %v14007_v19  ;;  %2854 = vmatprep.subr.bf16.mxu1 %v14105_v50 }
 0x251   : > { %2814 = vmatmul.mubr.bf16.vlgmr.msra.gmra.mrb[32].mxu1 %v16280_v22 }
 0x252   : > { %3033 = vmatmul.mubr.bf16.vlgmr.msra.gmra.mrb[32].mxu0 %v16251_v37  ;;  %2855 = vmatpush1.bf16.msra.mxu1 %v14103_v49  ;;  %v14135_v49 = vld [vmem:[#allocation7 + $0xec] ss:$48 sps:$4 sm:$0xff]  }
 0x253   : > { %3042 = vmatprep.mubr.bf16.mxu0 %v18443_v0  ;;  %2823 = vmatprep.mubr.bf16.mxu1 %v16282_v24 }
 0x254   : > { %2856 = vmatprep.subr.bf16.mxu1 %v14108_v52  ;;  %v14133_v52 = vld [vmem:[#allocation7 + $0xe8] ss:$48 sps:$4 sm:$0xff]  }
 0x256   : > { %2857 = vmatpush1.bf16.msra.mxu1 %v14106_v53 }
 0x257   : > { %2858 = vmatprep.subr.bf16.mxu1 %v14111_v57 }
 0x259   : > { %2824 = vmatmul.mubr.bf16.gmra.mrb[36].mxu1 %v16292_v32 }
 0x25a   : > { %3043 = vmatmul.mubr.bf16.gmra.mrb[36].mxu0 %v16262_v62  ;;  %2859 = vmatpush1.bf16.msra.mxu1 %v14109_v56 }
 0x25b   : > { %3052 = vmatprep.mubr.bf16.mxu0 %v18443_v0  ;;  %2833 = vmatprep.mubr.bf16.mxu1 %v16294_v34 }
 0x25c   : > { %2860 = vmatprep.subr.bf16.mxu1 %v14114_v59 }
 0x25e   : > { %2861 = vmatpush1.bf16.msra.mxu1 %v14112_v61 }
 0x25f   : > { %2862 = vmatprep.subr.bf16.mxu1 %v14117_v3 }
 0x261   : > { %2834 = vmatmul.mubr.bf16.gmra.mrb[40].mxu1 %v16302_v43 }
 0x262   : > { %3053 = vmatmul.mubr.bf16.gmra.mrb[40].mxu0 %v16268_v7  ;;  %2863 = vmatpush1.bf16.msra.mxu1 %v14115_v2 }
 0x263   : > { %3062 = vmatprep.mubr.bf16.mxu0 %v18443_v0  ;;  %2843 = vmatprep.mubr.bf16.mxu1 %v16304_v45 }
 0x264   : > { %2864 = vmatprep.subr.bf16.mxu1 %v14120_v5  ;;  %v14139_v5 = vld [vmem:[#allocation7 + $0x1a8] ss:$48 sps:$4 sm:$0xff]  }
 0x265   : > { %v2450_v41 = vpop.f32.mrb[0].mxu0 }
 0x266   : > { %v2452_v42 = vpop.f32.mrb[1].mxu0  ;;  %2865 = vmatpush1.bf16.msra.mxu1 %v14118_v8  ;;  %v14144_v8 = vld [vmem:[#allocation7 + $0x20c] ss:$48 sps:$4 sm:$0xff]  }
 0x267   : > { %v2454_v44 = vpop.f32.mrb[2].mxu0  ;;  %2866 = vmatprep.subr.bf16.mxu1 %v14123_v11 }
 0x268   : > { %v16360_v46 = vpop.f32.mrb[3].mxu0 }
 0x269   : > { %2844 = vmatmul.mubr.bf16.gmra.mrb[44].mxu1 %v16310_v51 }
 0x26a   : > { %3063 = vmatmul.mubr.bf16.gmra.mrb[44].mxu0 %v16278_v21  ;;  %2867 = vmatpush1.bf16.msra.mxu1 %v14121_v10 }
 0x26b   : > { %2886 = vmatprep.mubr.bf16.mxu1 %v18443_v0  ;;  %2868 = vmatprep.subr.bf16.mxu1 %v14126_v26 }
 0x26d   : > { %v2460_v55 = vpop.f32.mrb[4].mxu0 }
 0x26e   : > { %v2462_v58 = vpop.f32.mrb[5].mxu0  ;;  %2869 = vmatpush1.bf16.msra.mxu1 %v14124_v28  ;;  %v14150_v28 = vld [vmem:[#allocation7 + $0x2cc] ss:$48 sps:$4 sm:$0xff]  }
 0x26f   : > { %v2464_v60 = vpop.f32.mrb[6].mxu0  ;;  %3073 = vmatprep.subr.bf16.mxu1 %v14129_v33  ;;  %v14154_v33 = vld [vmem:[#allocation7 + $0x388] ss:$48 sps:$4 sm:$0xff]  }
 0x270   : > { %v2466_v63 = vpop.f32.mrb[7].mxu0 }
 0x271   : > { %2887 = vmatmul.mubr.bf16.vlgmr.msra.gmra.mrb[32].mxu1 %v16251_v37 }
 0x272   : > { %3074 = vmatpush1.bf16.msra.mxu1 %v14127_v31  ;;  %2896 = vmatprep.mubr.bf16.mxu1 %v18443_v0  ;;  %v14156_v31 = vld [vmem:[#allocation7 + $0x38c] ss:$48 sps:$4 sm:$0xff]  }
 0x275   : > { %v16367_v1 = vpop.f32.mrb[8].mxu0 }
 0x276   : > { %v16369_v4 = vpop.f32.mrb[9].mxu0 }
 0x277   : > { %v16371_v6 = vpop.f32.mrb[10].mxu0 }
 0x278   : > { %v16373_v9 = vpop.f32.mrb[11].mxu0 }
 0x279   : > { %2897 = vmatmul.mubr.bf16.gmra.mrb[36].mxu1 %v16262_v62 }
 0x27a   : > { %2906 = vmatprep.mubr.bf16.mxu1 %v18443_v0 }
 0x27d   : > { %v16377_v12 = vpop.f32.mrb[12].mxu0 }
 0x27e   : > { %v16379_v14 = vpop.f32.mrb[13].mxu0 }
 0x27f   : > { %v16381_v17 = vpop.f32.mrb[14].mxu0 }
 0x280   : > { %v16385_v20 = vpop.f32.mrb[15].mxu0 }
 0x281   : > { %2907 = vmatmul.mubr.bf16.gmra.mrb[40].mxu1 %v16268_v7 }
 0x282   : > { %2916 = vmatprep.mubr.bf16.mxu1 %v18443_v0 }
 0x284   : > { %v2377_v13 = vpop.f32.mrb[0].mxu1 }
 0x285   : > { %v2451_v15 = vadd.f32 %v2450_v41, %v2377_v13  ;;  %v2379_v16 = vpop.f32.mrb[1].mxu1 }
 0x286   : > { %v16383_v18 = vadd.f32 %v2452_v42, %v2379_v16  ;;  %v2381_v19 = vpop.f32.mrb[2].mxu1 }
 0x287   : > { %v2455_v23 = vadd.f32 %v2454_v44, %v2381_v19  ;;  %v2383_v25 = vpop.f32.mrb[3].mxu1  ;;  %v14132_v44 = vld [vmem:[#allocation7 + $0x8c] ss:$48 sps:$4 sm:$0xff]   ;;  %v14142_v19 = vld [vmem:[#allocation7 + $0x208] ss:$48 sps:$4 sm:$0xff]  }
 0x288   : > { %v16390_v27 = vadd.f32 %v16360_v46, %v2383_v25  ;;  %3075 = vmatprep.subr.bf16.mxu1 %v14132_v44  ;;  %v14145_v25 = vld [vmem:[#allocation7 + $0x268] ss:$48 sps:$4 sm:$0xff]   ;;  %v14165_v44 = vld [vmem:[#allocation7 + $0x4ac] ss:$48 sps:$4 sm:$0xff]  }
 0x289   : > { %v3219_v29 = vpack.c.bf16 %v2455_v23, %v2451_v15  ;;  %3076 = vmatpush1.bf16.msra.mxu1 %v14130_v47  ;;  %v14163_v47 = vld [vmem:[#allocation7 + $0x4a8] ss:$48 sps:$4 sm:$0xff]  }
 0x28a   : > { %v3220_v30 = vpack.c.bf16 %v16390_v27, %v16383_v18  ;;  %3077 = vmatprep.subr.bf16.mxu1 %v14135_v49  ;;  %2917 = vmatmul.mubr.bf16.gmra.mrb[44].mxu1 %v16278_v21  ;;  %v14168_v49 = vld [vmem:[#allocation7 + $0x50c] ss:$48 sps:$4 sm:$0xff]  }
 0x28b   : > { %13060 = vmatprep.mubr.bf16.mxu0 %v3219_v29  ;;  %v14153_v29 = vld [vmem:[#allocation7 + $0x32c] ss:$48 sps:$4 sm:$0xff]   ;;  %3105 = vmatprep.mubr.bf16.mxu1 %v16257_v54  ;;  %v14166_v54 = vld [vmem:[#allocation7 + $0x508] ss:$48 sps:$4 sm:$0xff]  }
 0x28c   : > { %v2387_v35 = vpop.f32.mrb[4].mxu1 }
 0x28d   : > { %v16394_v36 = vadd.f32 %v2460_v55, %v2387_v35  ;;  %v2389_v38 = vpop.f32.mrb[5].mxu1  ;;  %v14138_v55 = vld [vmem:[#allocation7 + $0x14c] ss:$48 sps:$4 sm:$0xff]   ;;  %3078 = vmatpush1.bf16.msra.mxu1 %v14133_v52 }
 0x28e   : > { %v16396_v39 = vadd.f32 %v2462_v58, %v2389_v38  ;;  %v2391_v40 = vpop.f32.mrb[6].mxu1  ;;  %3079 = vmatprep.subr.bf16.mxu1 %v14138_v55  ;;  %v14159_v35 = vld [vmem:[#allocation7 + $0x3ec] ss:$48 sps:$4 sm:$0xff]   ;;  %v14157_v38 = vld [vmem:[#allocation7 + $0x3e8] ss:$48 sps:$4 sm:$0xff]  }
 0x28f   : > { %v16399_v41 = vadd.f32 %v2464_v60, %v2391_v40  ;;  %v2393_v42 = vpop.f32.mrb[7].mxu1  ;;  %v14162_v40 = vld [vmem:[#allocation7 + $0x44c] ss:$48 sps:$4 sm:$0xff]  }
 0x290   : > { %v16402_v46 = vadd.f32 %v2466_v63, %v2393_v42  ;;  %v14136_v63 = vld [vmem:[#allocation7 + $0x148] ss:$48 sps:$4 sm:$0xff]   ;;  %v14171_v52 = vld [vmem:[#allocation7 + $0x56c] ss:$48 sps:$4 sm:$0xff]  }
 0x291   : > { %v3231_v48 = vpack.c.bf16 %v16399_v41, %v16394_v36  ;;  %3080 = vmatpush1.bf16.msra.mxu1 %v14136_v63  ;;  %v14160_v42 = vld [vmem:[#allocation7 + $0x448] ss:$48 sps:$4 sm:$0xff]   ;;  %v14174_v55 = vld [vmem:[#allocation7 + $0x5cc] ss:$48 sps:$4 sm:$0xff]  }
 0x292   : > { %v3232_v50 = vpack.c.bf16 %v16402_v46, %v16396_v39 }
 0x294   : > { %v2397_v53 = vpop.f32.mrb[8].mxu1 }
 0x295   : > { %v16409_v56 = vadd.f32 %v16367_v1, %v2397_v53  ;;  %v2399_v57 = vpop.f32.mrb[9].mxu1  ;;  %v14141_v1 = vld [vmem:[#allocation7 + $0x1ac] ss:$48 sps:$4 sm:$0xff]   ;;  %v14169_v53 = vld [vmem:[#allocation7 + $0x568] ss:$48 sps:$4 sm:$0xff]  }
 0x296   : > { %v16412_v58 = vadd.f32 %v16369_v4, %v2399_v57  ;;  %v2401_v59 = vpop.f32.mrb[10].mxu1  ;;  %3081 = vmatprep.subr.bf16.mxu1 %v14141_v1  ;;  %v14177_v1 = vld [vmem:[#allocation7 + $0x62c] ss:$48 sps:$4 sm:$0xff]  }
 0x297   : > { %v16416_v60 = vadd.f32 %v16371_v6, %v2401_v59  ;;  %v2403_v61 = vpop.f32.mrb[11].mxu1  ;;  %3082 = vmatpush1.bf16.msra.mxu1 %v14139_v5 }
 0x298   : > { %v16420_v2 = vadd.f32 %v16373_v9, %v2403_v61  ;;  %3083 = vmatprep.subr.bf16.mxu1 %v14144_v8  ;;  %v14172_v61 = vld [vmem:[#allocation7 + $0x5c8] ss:$48 sps:$4 sm:$0xff]  }
 0x299   : > { %v3243_v3 = vpack.c.bf16 %v16416_v60, %v16409_v56 }
 0x29a   : > { %v3244_v4 = vpack.c.bf16 %v16420_v2, %v16412_v58 }
 0x29b   : > { %3084 = vmatpush1.bf16.msra.mxu1 %v14142_v19 }
 0x29c   : > { %v2407_v6 = vpop.f32.mrb[12].mxu1 }
 0x29d   : > { %v16427_v10 = vadd.f32 %v16377_v12, %v2407_v6  ;;  %v2409_v11 = vpop.f32.mrb[13].mxu1  ;;  %v14147_v12 = vld [vmem:[#allocation7 + $0x26c] ss:$48 sps:$4 sm:$0xff]  }
 0x29e   : > { %v16430_v9 = vadd.f32 %v16379_v14, %v2409_v11  ;;  %v2411_v13 = vpop.f32.mrb[14].mxu1  ;;  %3085 = vmatprep.subr.bf16.mxu1 %v14147_v12  ;;  %v14175_v11 = vld [vmem:[#allocation7 + $0x628] ss:$48 sps:$4 sm:$0xff]  }
 0x29f   : > { %v16434_v15 = vadd.f32 %v16381_v17, %v2411_v13  ;;  %v2413_v16 = vpop.f32.mrb[15].mxu1  ;;  %v14148_v17 = vld [vmem:[#allocation7 + $0x2c8] ss:$48 sps:$4 sm:$0xff]   ;;  %3086 = vmatpush1.bf16.msra.mxu1 %v14145_v25  ;;  %v14180_v13 = vld [vmem:[#allocation7 + $0x68c] ss:$48 sps:$4 sm:$0xff]  }
 0x2a0   : > { %v16438_v23 = vadd.f32 %v16385_v20, %v2413_v16  ;;  %3087 = vmatprep.subr.bf16.mxu1 %v14150_v28  ;;  %v14151_v20 = vld [vmem:[#allocation7 + $0x328] ss:$48 sps:$4 sm:$0xff]   ;;  %v14183_v28 = vld [vmem:[#allocation7 + $0x6ec] ss:$48 sps:$4 sm:$0xff]  }
 0x2a1   : > { %v3255_v14 = vpack.c.bf16 %v16434_v15, %v16427_v10  ;;  %v14178_v12 = vld [vmem:[#allocation7 + $0x688] ss:$48 sps:$4 sm:$0xff]   ;;  %v3315_v15 = vlaneseq }
 0x2a2   : > { %v3256_v26 = vpack.c.bf16 %v16438_v23, %v16430_v9 }
 0x2a3   : > { %3088 = vmatpush1.bf16.msra.mxu1 %v14148_v17  ;;  %v16495_v23 = vshrl.u32 %v3315_v15, 7 }
 0x2a4   : > { %3089 = vmatprep.subr.bf16.mxu1 %v14153_v29 }
 0x2a5   : > { %18503 = vst [vmem:[#allocation35_spill] sm:$0xff] %v16495_v23 }
 0x2a7   : > { %3090 = vmatpush1.bf16.msra.mxu1 %v14151_v20 }
 0x2a8   : > { %3091 = vmatprep.subr.bf16.mxu1 %v14156_v31  ;;  %v14181_v31 = vld [vmem:[#allocation7 + $0x6e8] ss:$48 sps:$4 sm:$0xff]  }
 0x2ab   : > { %3092 = vmatpush1.bf16.msra.mxu1 %v14154_v33  ;;  %v14186_v33 = vld [vmem:[#allocation7 + $0x74c] ss:$48 sps:$4 sm:$0xff]  }
 0x2ac   : > { %3093 = vmatprep.subr.bf16.mxu1 %v14159_v35 }
 0x2af   : > { %3094 = vmatpush1.bf16.msra.mxu1 %v14157_v38 }
 0x2b0   : > { %3095 = vmatprep.subr.bf16.mxu1 %v14162_v40  ;;  %v14184_v40 = vld [vmem:[#allocation7 + $0x748] ss:$48 sps:$4 sm:$0xff]  }
 0x2b3   : > { %3096 = vmatpush1.bf16.msra.mxu1 %v14160_v42 }
 0x2b4   : > { %3097 = vmatprep.subr.bf16.mxu1 %v14165_v44 }
 0x2b7   : > { %3098 = vmatpush1.bf16.msra.mxu1 %v14163_v47 }
 0x2b8   : > { %3099 = vmatprep.subr.bf16.mxu1 %v14168_v49  ;;  %v14187_v49 = vld [vmem:[#allocation7 + $0x7a8] ss:$48 sps:$4 sm:$0xff]  }
 0x2bb   : > { %3100 = vmatpush1.bf16.msra.mxu1 %v14166_v54  ;;  %v14192_v54 = vld [vmem:[#allocation7 + $0x80c] ss:$48 sps:$4 sm:$0xff]  }
 0x2bc   : > { %3101 = vmatprep.subr.bf16.mxu1 %v14171_v52 }
 0x2bf   : > { %3102 = vmatpush1.bf16.msra.mxu1 %v14169_v53 }
 0x2c0   : > { %3103 = vmatprep.subr.bf16.mxu1 %v14174_v55  ;;  %v14190_v55 = vld [vmem:[#allocation7 + $0x808] ss:$48 sps:$4 sm:$0xff]  }
 0x2c3   : > { %3104 = vmatpush1.bf16.msra.mxu1 %v14172_v61 }
 0x2c4   : > { %3146 = vmatprep.subr.bf16.mxu1 %v14177_v1  ;;  %v14198_v1 = vld [vmem:[#allocation7 + $0x8cc] ss:$48 sps:$4 sm:$0xff]  }
 0x2c5   : > { %v2742_v57 = vpop.f32.mrb[16].mxu0 }
 0x2c6   : > { %v2744_v59 = vpop.f32.mrb[17].mxu0  ;;  %3106 = vmatmul.mubr.bf16.vlgmr.msra.gmra.mrb[48].mxu1 %v16280_v22  ;;  %v14189_v22 = vld [vmem:[#allocation7 + $0x7ac] ss:$48 sps:$4 sm:$0xff]  }
 0x2c7   : > { %v2746_v63 = vpop.f32.mrb[18].mxu0  ;;  %3147 = vmatpush1.bf16.msra.mxu1 %v14175_v11  ;;  %3115 = vmatprep.mubr.bf16.mxu1 %v16282_v24  ;;  %v15776_v11 = vmov -1e+30  }
 0x2c8   : > { %v3223_v5 = vpack.c.bf16 %v2746_v63, %v2742_v57  ;;  %v2748_v6 = vpop.f32.mrb[19].mxu0  ;;  %3148 = vmatprep.subr.bf16.mxu1 %v14180_v13  ;;  %v14193_v63 = vld [vmem:[#allocation7 + $0x868] ss:$48 sps:$4 sm:$0xff]  }
 0x2c9   : > { %v16446_v8 = vpack.c.bf16 %v2748_v6, %v2744_v59  ;;  %v3319_v6 = vadd.s32 24, %v16495_v23 }
 0x2ca   : > { %13052 = vmatprep.subr.bf16.mxu0 %v3223_v5 }
 0x2cb   : > { %13053 = vmatpush3.bf16.xpose.msra.mxu0 %v3223_v5  ;;  %3149 = vmatpush1.bf16.msra.mxu1 %v14178_v12  ;;  %v14196_v5 = vld [vmem:[#allocation7 + $0x8c8] ss:$48 sps:$4 sm:$0xff]  }
 0x2cc   : > { %3150 = vmatprep.subr.bf16.mxu1 %v14183_v28 }
 0x2cd   : > { %v2752_v16 = vpop.f32.mrb[20].mxu0 }
 0x2ce   : > { %v2754_v19 = vpop.f32.mrb[21].mxu0  ;;  %3116 = vmatmul.mubr.bf16.gmra.mrb[52].mxu1 %v16292_v32  ;;  %v14195_v32 = vld [vmem:[#allocation7 + $0x86c] ss:$48 sps:$4 sm:$0xff]  }
 0x2cf   : > { %v2756_v25 = vpop.f32.mrb[22].mxu0  ;;  %3151 = vmatpush1.bf16.msra.mxu1 %v14181_v31  ;;  %3125 = vmatprep.mubr.bf16.mxu1 %v16294_v34 }
 0x2d0   : > { %v3235_v17 = vpack.c.bf16 %v2756_v25, %v2752_v16  ;;  %v2758_v29 = vpop.f32.mrb[23].mxu0  ;;  %3152 = vmatprep.subr.bf16.mxu1 %v14186_v33  ;;  %v3320_v25 = vadd.s32 32, %v16495_v23  ;;  %v3322_v33 = vadd.s32 48, %v16495_v23 }
 0x2d1   : > { %v3236_v20 = vpack.c.bf16 %v2758_v29, %v2754_v19 }
 0x2d2   : > { %13054 = vmatprep.subr.bf16.mxu0 %v3235_v17 }
 0x2d3   : > { %13055 = vmatpush3.bf16.xpose.msra.mxu0 %v3235_v17  ;;  %3153 = vmatpush1.bf16.msra.mxu1 %v14184_v40 }
 0x2d4   : > { %3154 = vmatprep.subr.bf16.mxu1 %v14189_v22 }
 0x2d5   : > { %v2762_v35 = vpop.f32.mrb[24].mxu0 }
 0x2d6   : > { %v2764_v38 = vpop.f32.mrb[25].mxu0  ;;  %3126 = vmatmul.mubr.bf16.gmra.mrb[56].mxu1 %v16302_v43 }
 0x2d7   : > { %v2766_v42 = vpop.f32.mrb[26].mxu0  ;;  %3155 = vmatpush1.bf16.msra.mxu1 %v14187_v49  ;;  %3135 = vmatprep.mubr.bf16.mxu1 %v16304_v45 }
 0x2d8   : > { %v3247_v44 = vpack.c.bf16 %v2766_v42, %v2762_v35  ;;  %v2768_v47 = vpop.f32.mrb[27].mxu0  ;;  %3156 = vmatprep.subr.bf16.mxu1 %v14192_v54  ;;  %v3321_v35 = vadd.s32 40, %v16495_v23 }
 0x2d9   : > { %v3248_v24 = vpack.c.bf16 %v2768_v47, %v2764_v38  ;;  %v3323_v47 = vadd.s32 56, %v16495_v23 }
 0x2da   : > { %13056 = vmatprep.subr.bf16.mxu0 %v3247_v44 }
 0x2db   : > { %13057 = vmatpush3.bf16.xpose.msra.mxu0 %v3247_v44  ;;  %3157 = vmatpush1.bf16.msra.mxu1 %v14190_v55 }
 0x2dc   : > { %3158 = vmatprep.subr.bf16.mxu1 %v14195_v32 }
 0x2dd   : > { %v2772_v52 = vpop.f32.mrb[28].mxu0 }
 0x2de   : > { %v2774_v53 = vpop.f32.mrb[29].mxu0  ;;  %3136 = vmatmul.mubr.bf16.gmra.mrb[60].mxu1 %v16310_v51 }
 0x2df   : > { %v2776_v57 = vpop.f32.mrb[30].mxu0  ;;  %3159 = vmatpush1.bf16.msra.mxu1 %v14193_v63  ;;  %3178 = vmatprep.mubr.bf16.mxu1 %v18443_v0 }
 0x2e0   : > { %v3259_v59 = vpack.c.bf16 %v2776_v57, %v2772_v52  ;;  %v2778_v61 = vpop.f32.mrb[31].mxu0  ;;  %3160 = vmatprep.subr.bf16.mxu1 %v14198_v1 }
 0x2e1   : > { %v3260_v34 = vpack.c.bf16 %v2778_v61, %v2774_v53 }
 0x2e2   : > { %13058 = vmatprep.subr.bf16.mxu0 %v3259_v59 }
 0x2e3   : > { %13059 = vmatpush3.bf16.xpose.msra.mxu0 %v3259_v59  ;;  %3161 = vmatpush1.bf16.msra.mxu1 %v14196_v5 }
 0x2e4   : > { %13084 = vmatprep.subr.bf16.mxu0 %v16446_v8 }
 0x2e6   : > { %3179 = vmatmul.mubr.bf16.vlgmr.msra.gmra.mrb[48].mxu1 %v16251_v37 }
 0x2e7   : > { %3188 = vmatprep.mubr.bf16.mxu1 %v18443_v0 }
 0x2ea   : > { %13061 = vmatmul.mubr.bf16.vlgmr.msra.gmra.mrb[48].mxu0 %v3231_v48 }
 0x2eb   : > { %13064 = vmatprep.mubr.bf16.mxu0 %v3243_v3  ;;  %13085 = vmatpush3.bf16.xpose.msra.mxu0 %v16446_v8  ;;  %v3317_v8 = vadd.s32 8, %v16495_v23 }
 0x2ec   : > { %13086 = vmatprep.subr.bf16.mxu0 %v3236_v20 }
 0x2ee   : > { %3189 = vmatmul.mubr.bf16.gmra.mrb[52].mxu1 %v16262_v62 }
 0x2ef   : > { %3198 = vmatprep.mubr.bf16.mxu1 %v18443_v0 }
 0x2f2   : > { %13065 = vmatmul.mubr.bf16.gmra.mrb[52].mxu0 %v3255_v14  ;;  %v3318_v14 = vadd.s32 16, %v16495_v23 }
 0x2f3   : > { %13087 = vmatpush3.bf16.xpose.msra.mxu0 %v3236_v20  ;;  %13092 = vmatprep.mubr.bf16.mxu0 %v3220_v30 }
 0x2f4   : > { %13088 = vmatprep.subr.bf16.mxu0 %v3248_v24 }
 0x2f6   : > { %3199 = vmatmul.mubr.bf16.gmra.mrb[56].mxu1 %v16268_v7 }
 0x2f7   : > { %3208 = vmatprep.mubr.bf16.mxu1 %v18443_v0 }
 0x2fb   : > { %13089 = vmatpush3.bf16.xpose.msra.mxu0 %v3248_v24 }
 0x2fc   : > { %13090 = vmatprep.subr.bf16.mxu0 %v3260_v34 }
 0x2fe   : > { %3209 = vmatmul.mubr.bf16.gmra.mrb[60].mxu1 %v16278_v21 }
 0x303   : > { %13091 = vmatpush3.bf16.xpose.msra.mxu0 %v3260_v34 }
 0x30a   : > { %13093 = vmatmul.mubr.bf16.vlgmr.msra.gmra.mrb[56].mxu0 %v3232_v50 }
 0x30b   : > { %13096 = vmatprep.mubr.bf16.mxu0 %v3244_v4 }
 0x312   : > { %13097 = vmatmul.mubr.bf16.gmra.mrb[60].mxu0 %v3256_v26  ;;  %v3325_v26 = vand.u32 127, %v3315_v15 }
 0x314   : > { %vm3328_vm0 = vcmp.ge.s32.totalorder %v3318_v14, %v3325_v26  ;;  %vm3326_vm1 = vcmp.ge.s32.totalorder %v16495_v23, %v3325_v26  ;;  %vm3329_vm2 = vcmp.ge.s32.totalorder %v3319_v6, %v3325_v26  ;;  %vm3327_vm3 = vcmp.ge.s32.totalorder %v3317_v8, %v3325_v26 }
 0x315   : > { %v16501_v13 = vsel %vm3328_vm0, 0.0, %v15776_v11  ;;  %v16503_v16 = vsel %vm3326_vm1, 0.0, %v15776_v11  ;;  %v16505_v12 = vsel %vm3329_vm2, 0.0, %v15776_v11  ;;  %v16511_v29 = vsel %vm3327_vm3, 0.0, %v15776_v11 }
 0x316   : > { %vm3330_vm5 = vcmp.ge.s32.totalorder %v3320_v25, %v3325_v26  ;;  %vm3332_vm6 = vcmp.ge.s32.totalorder %v3322_v33, %v3325_v26  ;;  %vm3331_vm7 = vcmp.ge.s32.totalorder %v3321_v35, %v3325_v26  ;;  %vm3333_vm8 = vcmp.ge.s32.totalorder %v3323_v47, %v3325_v26 }
 0x317   : > { %v16531_v49 = vsel %vm3330_vm5, 0.0, %v15776_v11  ;;  %v16535_v53 = vsel %vm3332_vm6, 0.0, %v15776_v11  ;;  %v16537_v57 = vsel %vm3331_vm7, 0.0, %v15776_v11  ;;  %v16542_v61 = vsel %vm3333_vm8, 0.0, %v15776_v11 }
 0x325   : > { %v3034_v37 = vpop.f32.mrb[32].mxu0 }
 0x326   : > { %v3036_v62 = vpop.f32.mrb[33].mxu0 }
 0x327   : > { %v3038_v7 = vpop.f32.mrb[34].mxu0 }
 0x328   : > { %v3227_v43 = vpack.c.bf16 %v3038_v7, %v3034_v37  ;;  %v3040_v45 = vpop.f32.mrb[35].mxu0 }
 0x329   : > { %v16486_v51 = vpack.c.bf16 %v3040_v45, %v3036_v62 }
 0x32a   : > { %13068 = vmatprep.subr.bf16.mxu1 %v3227_v43 }
 0x32b   : > { %13069 = vmatpush3.bf16.msra.mxu1 %v3227_v43 }
 0x32d   : > { %v3044_v21 = vpop.f32.mrb[36].mxu0 }
 0x32e   : > { %v3046_v18 = vpop.f32.mrb[37].mxu0 }
 0x32f   : > { %v3048_v27 = vpop.f32.mrb[38].mxu0 }
 0x330   : > { %v3239_v30 = vpack.c.bf16 %v3048_v27, %v3044_v21  ;;  %v3050_v36 = vpop.f32.mrb[39].mxu0 }
 0x331   : > { %v16488_v39 = vpack.c.bf16 %v3050_v36, %v3046_v18 }
 0x332   : > { %13070 = vmatprep.subr.bf16.mxu1 %v3239_v30 }
 0x333   : > { %13071 = vmatpush3.bf16.msra.mxu1 %v3239_v30 }
 0x335   : > { %v3054_v41 = vpop.f32.mrb[40].mxu0 }
 0x336   : > { %v3056_v46 = vpop.f32.mrb[41].mxu0 }
 0x337   : > { %v3058_v48 = vpop.f32.mrb[42].mxu0 }
 0x338   : > { %v3251_v50 = vpack.c.bf16 %v3058_v48, %v3054_v41  ;;  %v3060_v56 = vpop.f32.mrb[43].mxu0 }
 0x339   : > { %v16490_v58 = vpack.c.bf16 %v3060_v56, %v3056_v46 }
 0x33a   : > { %13072 = vmatprep.subr.bf16.mxu1 %v3251_v50 }
 0x33b   : > { %13073 = vmatpush3.bf16.msra.mxu1 %v3251_v50 }
 0x33d   : > { %v3064_v60 = vpop.f32.mrb[44].mxu0 }
 0x33e   : > { %v3066_v2 = vpop.f32.mrb[45].mxu0 }
 0x33f   : > { %v3068_v3 = vpop.f32.mrb[46].mxu0 }
 0x340   : > { %v3263_v4 = vpack.c.bf16 %v3068_v3, %v3064_v60  ;;  %v3070_v10 = vpop.f32.mrb[47].mxu0 }
 0x341   : > { %v16492_v9 = vpack.c.bf16 %v3070_v10, %v3066_v2 }
 0x342   : > { %13074 = vmatprep.subr.bf16.mxu1 %v3263_v4 }
 0x343   : > { %13075 = vmatpush3.bf16.msra.mxu1 %v3263_v4 }
 0x344   : > { %13100 = vmatprep.subr.bf16.mxu1 %v16486_v51 }
 0x3bd   : > { %v13062_v19 = vpop.f32.mrb[48].mxu0 }
 0x3be   : > { %v16509_v28 = vadd.f32 %v13062_v19, %v16501_v13  ;;  %v3388_v17 = vpop.f32.mrb[49].mxu0 }
 0x3bf   : > { %v16514_v20 = vadd.f32 %v3388_v17, %v16503_v16  ;;  %v13063_v31 = vpop.f32.mrb[50].mxu0  ;;  %v16601_v17 = vpop.f32.mrb[16].mxu1 }
 0x3c0   : > { %v16519_v38 = vadd.f32 %v13063_v31, %v16505_v12  ;;  %v3391_v40 = vpop.f32.mrb[51].mxu0  ;;  %v3426_v42 = vsel %vm3419_vm4, %v16509_v28, -inf  ;;  %v16603_v31 = vpop.f32.mrb[17].mxu1 }
 0x3c1   : > { %v16524_v22 = vadd.f32 %v3391_v40, %v16511_v29  ;;  %3427 = vmax.xlane.f32.xlu1 %v3426_v42  ;;  %v3420_v44 = vsel %vm3419_vm4, %v16514_v20, -inf  ;;  %v16605_v33 = vpop.f32.mrb[18].mxu1 }
 0x3c2   : > { %3421 = vmax.xlane.f32.xlu0 %v3420_v44  ;;  %v3429_v24 = vsel %vm3419_vm4, %v16519_v38, -inf  ;;  %v16609_v40 = vpop.f32.mrb[19].mxu1 }
 0x3c3   : > { %v3423_v52 = vsel %vm3419_vm4, %v16524_v22, -inf  ;;  %v16613_v44 = vpop.f32.mrb[20].mxu1 }
 0x3c4   : > { %v16615_v47 = vpop.f32.mrb[21].mxu1 }
 0x3c5   : > { %3430 = vmax.xlane.f32.xlu1 %v3429_v24  ;;  %v13066_v54 = vpop.f32.mrb[52].mxu0  ;;  %18504 = vst [vmem:[#allocation36_spill] sm:$0xff] %v16615_v47  ;;  %v16617_v24 = vpop.f32.mrb[22].mxu1 }
 0x3c6   : > { %3424 = vmax.xlane.f32.xlu0 %v3423_v52  ;;  %v3404_v55 = vpop.f32.mrb[53].mxu0  ;;  %v16545_v63 = vadd.f32 %v13066_v54, %v16535_v53  ;;  %v16621_v52 = vpop.f32.mrb[23].mxu1 }
 0x3c7   : > { %v16540_v32 = vadd.f32 %v3404_v55, %v16531_v49  ;;  %v13067_v59 = vpop.f32.mrb[54].mxu0  ;;  %18505 = vst [vmem:[#allocation37_spill] sm:$0xff] %v16621_v52 }
 0x3c8   : > { %v3407_v34 = vpop.f32.mrb[55].mxu0  ;;  %v16553_v37 = vadd.f32 %v13067_v59, %v16542_v61  ;;  %v3438_v7 = vsel %vm3419_vm4, %v16545_v63, -inf  ;;  %v16625_v59 = vpop.f32.mrb[24].mxu1 }
 0x3c9   : > { %v16548_v1 = vadd.f32 %v3407_v34, %v16537_v57  ;;  %v3432_v5 = vsel %vm3419_vm4, %v16540_v32, -inf  ;;  %v16627_v34 = vpop.f32.mrb[25].mxu1 }
 0x3ca   : > { %3433 = vmax.xlane.f32.xlu0 %v3432_v5  ;;  %v3441_v43 = vsel %vm3419_vm4, %v16553_v37, -inf  ;;  %18506 = vst [vmem:[#allocation38_spill] sm:$0xff] %v16627_v34  ;;  %v16629_v5 = vpop.f32.mrb[26].mxu1 }
 0x3cb   : > { %v3435_v62 = vsel %vm3419_vm4, %v16548_v1, -inf }
 0x3cc   : > { %3436 = vmax.xlane.f32.xlu1 %v3435_v62 }
 0x3ce   : > { %3439 = vmax.xlane.f32.xlu0 %v3438_v7  ;;  %v16633_v7 = vpop.f32.mrb[27].mxu1 }
 0x3cf   : > { %18507 = vst [vmem:[#allocation39_spill] sm:$0xff] %v16633_v7 }
 0x3d0   : > { %3442 = vmax.xlane.f32.xlu1 %v3441_v43 }
 0x3dd   : > { %v13094_v45 = vpop.f32.mrb[56].mxu0 }
 0x3de   : > { %v3643_v21 = vpop.f32.mrb[57].mxu0  ;;  %v16565_v36 = vadd.f32 %v13094_v45, %v16501_v13  ;;  %v16637_v45 = vpop.f32.mrb[28].mxu1 }
 0x3df   : > { %v16562_v18 = vadd.f32 %v3643_v21, %v16503_v16  ;;  %v13095_v27 = vpop.f32.mrb[58].mxu0  ;;  %v16639_v21 = vpop.f32.mrb[29].mxu1 }
 0x3e0   : > { %v3646_v30 = vpop.f32.mrb[59].mxu0  ;;  %v16573_v48 = vadd.f32 %v13095_v27, %v16505_v12  ;;  %v3680_v60 = vsel %vm3419_vm4, %v16565_v36, -inf  ;;  %18508 = vst [vmem:[#allocation40_spill] sm:$0xff] %v16639_v21  ;;  %v16641_v27 = vpop.f32.mrb[30].mxu1 }
 0x3e1   : > { %v16568_v41 = vadd.f32 %v3646_v30, %v16511_v29  ;;  %v3674_v46 = vsel %vm3419_vm4, %v16562_v18, -inf }
 0x3e2   : > { %3675 = vmax.xlane.f32.xlu0 %v3674_v46  ;;  %v3683_v10 = vsel %vm3419_vm4, %v16573_v48, -inf  ;;  %v16645_v46 = vpop.f32.mrb[31].mxu1 }
 0x3e3   : > { %v3677_v50 = vsel %vm3419_vm4, %v16568_v41, -inf  ;;  %18509 = vst [vmem:[#allocation41_spill] sm:$0xff] %v16645_v46 }
 0x3e4   : > { %3678 = vmax.xlane.f32.xlu1 %v3677_v50 }
 0x3e5   : > { %v13098_v56 = vpop.f32.mrb[60].mxu0 }
 0x3e6   : > { %3681 = vmax.xlane.f32.xlu0 %v3680_v60  ;;  %v3659_v2 = vpop.f32.mrb[61].mxu0  ;;  %v16585_v14 = vadd.f32 %v13098_v56, %v16535_v53  ;;  %v2888_v56 = vpop.f32.mrb[32].mxu1 }
 0x3e7   : > { %v16580_v3 = vadd.f32 %v3659_v2, %v16531_v49  ;;  %v13099_v4 = vpop.f32.mrb[62].mxu0  ;;  %v2890_v60 = vpop.f32.mrb[33].mxu1 }
 0x3e8   : > { %3684 = vmax.xlane.f32.xlu1 %v3683_v10  ;;  %v3662_v15 = vpop.f32.mrb[63].mxu0  ;;  %v16593_v8 = vadd.f32 %v13099_v4, %v16542_v61  ;;  %v3692_v19 = vsel %vm3419_vm4, %v16585_v14, -inf  ;;  %v2892_v2 = vpop.f32.mrb[34].mxu1 }
 0x3e9   : > { %v16588_v26 = vadd.f32 %v3662_v15, %v16537_v57  ;;  %v3686_v6 = vsel %vm3419_vm4, %v16580_v3, -inf  ;;  %v16649_v4 = vpack.c.bf16 %v2892_v2, %v2888_v56  ;;  %v2894_v10 = vpop.f32.mrb[35].mxu1 }
 0x3ea   : > { %3687 = vmax.xlane.f32.xlu0 %v3686_v6  ;;  %v3695_v25 = vsel %vm3419_vm4, %v16593_v8, -inf  ;;  %v16651_v15 = vpack.c.bf16 %v2894_v10, %v2890_v60  ;;  %v2898_v6 = vpop.f32.mrb[36].mxu1 }
 0x3eb   : > { %v3689_v11 = vsel %vm3419_vm4, %v16588_v26, -inf }
 0x3ec   : > { %3690 = vmax.xlane.f32.xlu1 %v3689_v11  ;;  %v2900_v11 = vpop.f32.mrb[37].mxu1 }
 0x3ee   : > { %3693 = vmax.xlane.f32.xlu0 %v3692_v19  ;;  %v2902_v19 = vpop.f32.mrb[38].mxu1 }
 0x3ef   : > { %v2904_v0 = vpop.f32.mrb[39].mxu1 }
 0x3f0   : > { %3696 = vmax.xlane.f32.xlu1 %v3695_v25  ;;  %v16653_v25 = vpack.c.bf16 %v2902_v19, %v2898_v6  ;;  %v16655_v43 = vpack.c.bf16 %v2904_v0, %v2900_v11  ;;  %v2908_v55 = vpop.f32.mrb[40].mxu1 }
 0x3f1   : > { %v2910_v42 = vpop.f32.mrb[41].mxu1 }
 0x3f2   : > { %v2912_v30 = vpop.f32.mrb[42].mxu1 }
 0x3f3   : > { %v16657_v50 = vpack.c.bf16 %v2912_v30, %v2908_v55  ;;  %v2914_v62 = vpop.f32.mrb[43].mxu1 }
 0x3f4   : > { %v16659_v54 = vpack.c.bf16 %v2914_v62, %v2910_v42  ;;  %v2918_v56 = vpop.f32.mrb[44].mxu1 }
 0x3f5   : > { %v2920_v2 = vpop.f32.mrb[45].mxu1 }
 0x3f6   : > { %v2922_v60 = vpop.f32.mrb[46].mxu1 }
 0x3f7   : > { %v16661_v10 = vpack.c.bf16 %v2922_v60, %v2918_v56  ;;  %v2924_v35 = vpop.f32.mrb[47].mxu1 }
 0x3f8   : > { %v16663_v23 = vpack.c.bf16 %v2924_v35, %v2920_v2 }
 0x44e   : > { %v3428_v6 = vpop.xlane.xlu1 %3427 }
 0x44f   : > { %v3446_v0 = vsub.f32 %v16509_v28, %v3428_v6  ;;  %v3422_v11 = vpop.xlane.xlu0 %3421 }
 0x450   : > { %v3444_v19 = vsub.f32 %v16514_v20, %v3422_v11 }
 0x451   : > { %v3456_v21 = vmul.f32 1.442695, %v3446_v0 }
 0x452   : > { %v3452_v55 = vmul.f32 1.442695, %v3444_v19  ;;  %v3431_v30 = vpop.xlane.xlu1 %3430 }
 0x453   : > { %v3447_v42 = vsub.f32 %v16519_v38, %v3431_v30  ;;  %v3425_v62 = vpop.xlane.xlu0 %3424 }
 0x454   : > { %15143 = vpow2.f32 %v3452_v55  ;;  %v3445_v46 = vsub.f32 %v16524_v22, %v3425_v62 }
 0x455   : > { %15145 = vpow2.f32 %v3456_v21  ;;  %v3458_v56 = vmul.f32 1.442695, %v3447_v42 }
 0x456   : > { %v3454_v60 = vmul.f32 1.442695, %v3445_v46 }
 0x457   : > { %v3434_v35 = vpop.xlane.xlu0 %3433 }
 0x458   : > { %15147 = vpow2.f32 %v3454_v60  ;;  %v3448_v2 = vsub.f32 %v16540_v32, %v3434_v35 }
 0x459   : > { %v3437_v28 = vpop.xlane.xlu1 %3436  ;;  %15149 = vpow2.f32 %v3458_v56 }
 0x45a   : > { %v3460_v6 = vmul.f32 1.442695, %v3448_v2  ;;  %v3449_v20 = vsub.f32 %v16548_v1, %v3437_v28 }
 0x45b   : > { %v3440_v0 = vpop.xlane.xlu0 %3439 }
 0x45c   : > { %15151 = vpow2.f32 %v3460_v6  ;;  %v3462_v11 = vmul.f32 1.442695, %v3449_v20  ;;  %v3450_v38 = vsub.f32 %v16545_v63, %v3440_v0  ;;  %v3180_v0 = vpop.f32.mrb[48].mxu1 }
 0x45d   : > { %v3443_v19 = vpop.xlane.xlu1 %3442 }
 0x45e   : > { %v16672_v55 = vpop.eup %15143  ;;  %15153 = vpow2.f32 %v3462_v11  ;;  %v3464_v22 = vmul.f32 1.442695, %v3450_v38  ;;  %v3451_v21 = vsub.f32 %v16553_v37, %v3443_v19  ;;  %v3182_v11 = vpop.f32.mrb[49].mxu1 }
 0x45f   : > { %v3468_v32 = vsel %vm3419_vm4, %v16672_v55, 0.0  ;;  %v16677_v46 = vpop.eup %15145 }
 0x460   : > { %15155 = vpow2.f32 %v3464_v22  ;;  %v3466_v30 = vmul.f32 1.442695, %v3451_v21  ;;  %3469 = vadd.xlane.f32.xlu0 %v3468_v32  ;;  %v3474_v42 = vsel %vm3419_vm4, %v16677_v46, 0.0  ;;  %v3184_v22 = vpop.f32.mrb[50].mxu1 }
 0x461   : > { %v3229_v32 = vpack.c.bf16 %v3184_v22, %v3180_v0 }
 0x462   : > { %v16679_v1 = vpop.eup %15147  ;;  %15157 = vpow2.f32 %v3466_v30  ;;  %v3186_v30 = vpop.f32.mrb[51].mxu1 }
 0x463   : > { %v3471_v63 = vsel %vm3419_vm4, %v16679_v1, 0.0  ;;  %v16685_v62 = vpop.eup %15149  ;;  %13132 = vmatprep.subr.bf16.mxu0 %v3229_v32 }
 0x464   : > { %3472 = vadd.xlane.f32.xlu1 %v3471_v63  ;;  %3475 = vadd.xlane.f32.xlu0 %v3474_v42  ;;  %v3477_v56 = vsel %vm3419_vm4, %v16685_v62, 0.0  ;;  %v16706_v42 = vpack.c.bf16 %v3186_v30, %v3182_v11 }
 0x465   : > { %13133 = vmatpush3.bf16.msra.mxu0 %v3229_v32 }
 0x466   : > { %v16687_v37 = vpop.eup %15151 }
 0x467   : > { %v3480_v60 = vsel %vm3419_vm4, %v16687_v37, 0.0 }
 0x468   : > { %v16693_v35 = vpop.eup %15153  ;;  %3478 = vadd.xlane.f32.xlu1 %v3477_v56  ;;  %3481 = vadd.xlane.f32.xlu0 %v3480_v60 }
 0x469   : > { %v3483_v28 = vsel %vm3419_vm4, %v16693_v35, 0.0 }
 0x46a   : > { %v16695_v2 = vpop.eup %15155 }
 0x46b   : > { %v3486_v6 = vsel %vm3419_vm4, %v16695_v2, 0.0 }
 0x46c   : > { %v16701_v20 = vpop.eup %15157  ;;  %3484 = vadd.xlane.f32.xlu1 %v3483_v28  ;;  %3487 = vadd.xlane.f32.xlu0 %v3486_v6  ;;  %v3190_v28 = vpop.f32.mrb[52].mxu1 }
 0x46d   : > { %v3489_v19 = vsel %vm3419_vm4, %v16701_v20, 0.0  ;;  %v3192_v34 = vpop.f32.mrb[53].mxu1 }
 0x46e   : > { %v3194_v52 = vpop.f32.mrb[54].mxu1 }
 0x46f   : > { %v3676_v38 = vpop.xlane.xlu0 %3675  ;;  %v3196_v0 = vpop.f32.mrb[55].mxu1 }
 0x470   : > { %v3698_v21 = vsub.f32 %v16562_v18, %v3676_v38  ;;  %3490 = vadd.xlane.f32.xlu1 %v3489_v19  ;;  %v3241_v38 = vpack.c.bf16 %v3194_v52, %v3190_v28  ;;  %v3200_v22 = vpop.f32.mrb[56].mxu1 }
 0x471   : > { %v3679_v63 = vpop.xlane.xlu1 %3678 }
 0x472   : > { %v3706_v56 = vmul.f32 1.442695, %v3698_v21  ;;  %v3699_v60 = vsub.f32 %v16568_v41, %v3679_v63  ;;  %v3202_v41 = vpop.f32.mrb[57].mxu1  ;;  %13134 = vmatprep.subr.bf16.mxu0 %v3241_v38 }
 0x473   : > { %v3682_v6 = vpop.xlane.xlu0 %3681  ;;  %v3204_v63 = vpop.f32.mrb[58].mxu1  ;;  %13135 = vmatpush3.bf16.msra.mxu0 %v3241_v38 }
 0x474   : > { %15159 = vpow2.f32 %v3706_v56  ;;  %v3708_v7 = vmul.f32 1.442695, %v3699_v60  ;;  %v3700_v47 = vsub.f32 %v16565_v36, %v3682_v6  ;;  %v3253_v36 = vpack.c.bf16 %v3204_v63, %v3200_v22  ;;  %v3206_v60 = vpop.f32.mrb[59].mxu1 }
 0x475   : > { %v3685_v18 = vpop.xlane.xlu1 %3684 }
 0x476   : > { %15161 = vpow2.f32 %v3708_v7  ;;  %v3710_v19 = vmul.f32 1.442695, %v3700_v47  ;;  %v3701_v11 = vsub.f32 %v16573_v48, %v3685_v18  ;;  %v3210_v47 = vpop.f32.mrb[60].mxu1  ;;  %13136 = vmatprep.subr.bf16.mxu0 %v3253_v36 }
 0x477   : > { %v3688_v21 = vpop.xlane.xlu0 %3687  ;;  %v3212_v48 = vpop.f32.mrb[61].mxu1  ;;  %13137 = vmatpush3.bf16.msra.mxu0 %v3253_v36 }
 0x478   : > { %15163 = vpow2.f32 %v3710_v19  ;;  %v3712_v30 = vmul.f32 1.442695, %v3701_v11  ;;  %v3702_v32 = vsub.f32 %v16580_v3, %v3688_v21  ;;  %v3214_v19 = vpop.f32.mrb[62].mxu1 }
 0x479   : > { %v3691_v56 = vpop.xlane.xlu1 %3690  ;;  %v3265_v11 = vpack.c.bf16 %v3214_v19, %v3210_v47  ;;  %v3216_v19 = vpop.f32.mrb[63].mxu1 }
 0x47a   : > { %15165 = vpow2.f32 %v3712_v30  ;;  %v3714_v52 = vmul.f32 1.442695, %v3702_v32  ;;  %v3703_v7 = vsub.f32 %v16588_v26, %v3691_v56  ;;  %v16717_v30 = vpack.c.bf16 %v3196_v0, %v3192_v34 }
 0x47b   : > { %v3694_v28 = vpop.xlane.xlu0 %3693  ;;  %13138 = vmatprep.subr.bf16.mxu0 %v3265_v11  ;;  %v16730_v34 = vpack.c.bf16 %v3206_v60, %v3202_v41 }
 0x47c   : > { %15167 = vpow2.f32 %v3714_v52  ;;  %v3716_v6 = vmul.f32 1.442695, %v3703_v7  ;;  %v3704_v18 = vsub.f32 %v16585_v14, %v3694_v28  ;;  %13139 = vmatpush3.bf16.msra.mxu0 %v3265_v11 }
 0x47d   : > { %v3697_v3 = vpop.xlane.xlu1 %3696  ;;  %13148 = vmatprep.subr.bf16.mxu0 %v16651_v15 }
 0x47e   : > { %v16714_v38 = vpop.eup %15159  ;;  %15169 = vpow2.f32 %v3716_v6  ;;  %v3718_v22 = vmul.f32 1.442695, %v3704_v18  ;;  %v3705_v21 = vsub.f32 %v16593_v8, %v3697_v3  ;;  %v16752_v3 = vpack.c.bf16 %v3216_v19, %v3212_v48 }
 0x47f   : > { %v3722_v26 = vsel %vm3419_vm4, %v16714_v38, 0.0 }
 0x480   : > { %v16721_v32 = vpop.eup %15161  ;;  %15171 = vpow2.f32 %v3718_v22  ;;  %v3720_v14 = vmul.f32 1.442695, %v3705_v21  ;;  %3723 = vadd.xlane.f32.xlu0 %v3722_v26 }
 0x481   : > { %v3725_v63 = vsel %vm3419_vm4, %v16721_v32, 0.0 }
 0x482   : > { %v16726_v56 = vpop.eup %15163  ;;  %15173 = vpow2.f32 %v3720_v14  ;;  %3726 = vadd.xlane.f32.xlu1 %v3725_v63 }
 0x483   : > { %v3728_v8 = vsel %vm3419_vm4, %v16726_v56, 0.0 }
 0x484   : > { %v16732_v0 = vpop.eup %15165  ;;  %3729 = vadd.xlane.f32.xlu0 %v3728_v8 }
 0x485   : > { %v3731_v36 = vsel %vm3419_vm4, %v16732_v0, 0.0 }
 0x486   : > { %v16736_v52 = vpop.eup %15167  ;;  %3732 = vadd.xlane.f32.xlu1 %v3731_v36 }
 0x487   : > { %v3734_v7 = vsel %vm3419_vm4, %v16736_v52, 0.0 }
 0x488   : > { %v16740_v47 = vpop.eup %15169  ;;  %3735 = vadd.xlane.f32.xlu0 %v3734_v7 }
 0x489   : > { %v3737_v28 = vsel %vm3419_vm4, %v16740_v47, 0.0 }
 0x48a   : > { %v16744_v41 = vpop.eup %15171  ;;  %3738 = vadd.xlane.f32.xlu1 %v3737_v28 }
 0x48b   : > { %v3740_v60 = vsel %vm3419_vm4, %v16744_v41, 0.0 }
 0x48c   : > { %v16748_v6 = vpop.eup %15173  ;;  %3741 = vadd.xlane.f32.xlu0 %v3740_v60 }
 0x48d   : > { %v3743_v18 = vsel %vm3419_vm4, %v16748_v6, 0.0 }
 0x48e   : > { %3744 = vadd.xlane.f32.xlu1 %v3743_v18 }
 0x4ed   : > { %v3470_v11 = vpop.xlane.xlu0 %3469 }
 0x4ee   : > { %15175 = vrcp.f32 %v3470_v11 }
 0x4f1   : > { %v3473_v22 = vpop.xlane.xlu1 %3472  ;;  %v3476_v21 = vpop.xlane.xlu0 %3475 }
 0x4f2   : > { %15177 = vrcp.f32 %v3473_v22 }
 0x4f3   : > { %15179 = vrcp.f32 %v3476_v21 }
 0x4f5   : > { %v3479_v26 = vpop.xlane.xlu1 %3478  ;;  %v3482_v14 = vpop.xlane.xlu0 %3481 }
 0x4f6   : > { %15181 = vrcp.f32 %v3479_v26 }
 0x4f7   : > { %15183 = vrcp.f32 %v3482_v14 }
 0x4f8   : > { %v15176_v36 = vpop.eup %15175 }
 0x4f9   : > { %v3485_v63 = vpop.xlane.xlu1 %3484  ;;  %v3488_v8 = vpop.xlane.xlu0 %3487  ;;  %v3500_v48 = vmul.f32 %v15176_v36, %v16672_v55 }
 0x4fa   : > { %15185 = vrcp.f32 %v3485_v63 }
 0x4fb   : > { %15187 = vrcp.f32 %v3488_v8 }
 0x4fc   : > { %v15178_v7 = vpop.eup %15177 }
 0x4fd   : > { %v3491_v28 = vpop.xlane.xlu1 %3490  ;;  %v3501_v60 = vmul.f32 %v15178_v7, %v16679_v1  ;;  %v15180_v18 = vpop.eup %15179 }
 0x4fe   : > { %15189 = vrcp.f32 %v3491_v28  ;;  %v3502_v22 = vmul.f32 %v15180_v18, %v16677_v46 }
 0x4ff   : > { %v3508_v19 = vpack.c.bf16 %v3501_v60, %v3500_v48 }
 0x500   : > { %v15182_v11 = vpop.eup %15181 }
 0x501   : > { %v3503_v21 = vmul.f32 %v15182_v11, %v16685_v62  ;;  %13076 = vmatprep.mubr.msk.bf16.mxu1 %vm3419_vm4, %v3508_v19  ;;  %v15184_v26 = vpop.eup %15183 }
 0x502   : > { %v3504_v8 = vmul.f32 %v15184_v26, %v16687_v37 }
 0x503   : > { %v3509_v14 = vpack.c.bf16 %v3503_v21, %v3502_v22 }
 0x504   : > { %v15186_v63 = vpop.eup %15185 }
 0x505   : > { %13077 = vmatmul.mubr.msk.bf16.vlgmr.msra.gmra.mrb[64].mxu1 %vm3419_vm4, %v3509_v14  ;;  %v3505_v55 = vmul.f32 %v15186_v63, %v16693_v35  ;;  %v15188_v1 = vpop.eup %15187 }
 0x506   : > { %13101 = vmatpush3.bf16.msra.mxu1 %v16486_v51  ;;  %v3506_v62 = vmul.f32 %v15188_v1, %v16695_v2 }
 0x507   : > { %13102 = vmatprep.subr.bf16.mxu1 %v16488_v39  ;;  %v3510_v36 = vpack.c.bf16 %v3505_v55, %v3504_v8 }
 0x508   : > { %v15190_v46 = vpop.eup %15189 }
 0x509   : > { %13080 = vmatprep.mubr.msk.bf16.mxu1 %vm3419_vm4, %v3510_v36  ;;  %v3507_v7 = vmul.f32 %v15190_v46, %v16701_v20 }
 0x50a   : > { %13103 = vmatpush3.bf16.msra.mxu1 %v16488_v39 }
 0x50b   : > { %13104 = vmatprep.subr.bf16.mxu1 %v16490_v58  ;;  %v3511_v37 = vpack.c.bf16 %v3507_v7, %v3506_v62 }
 0x50d   : > { %13081 = vmatmul.mubr.msk.bf16.gmra.mrb[68].mxu1 %vm3419_vm4, %v3511_v37  ;;  %v3724_v35 = vpop.xlane.xlu0 %3723 }
 0x50e   : > { %13105 = vmatpush3.bf16.msra.mxu1 %v16490_v58  ;;  %15191 = vrcp.f32 %v3724_v35 }
 0x50f   : > { %13106 = vmatprep.subr.bf16.mxu1 %v16492_v9  ;;  %v3727_v51 = vpop.xlane.xlu1 %3726 }
 0x510   : > { %15193 = vrcp.f32 %v3727_v51 }
 0x511   : > { %v3730_v28 = vpop.xlane.xlu0 %3729 }
 0x512   : > { %13107 = vmatpush3.bf16.msra.mxu1 %v16492_v9  ;;  %15195 = vrcp.f32 %v3730_v28 }
 0x513   : > { %13116 = vmatprep.subr.bf16.mxu1 %v16649_v4  ;;  %v3733_v39 = vpop.xlane.xlu1 %3732 }
 0x514   : > { %15197 = vrcp.f32 %v3733_v39 }
 0x515   : > { %v3736_v2 = vpop.xlane.xlu0 %3735 }
 0x516   : > { %15199 = vrcp.f32 %v3736_v2 }
 0x517   : > { %v3739_v20 = vpop.xlane.xlu1 %3738 }
 0x518   : > { %v15192_v48 = vpop.eup %15191  ;;  %15201 = vrcp.f32 %v3739_v20 }
 0x519   : > { %v3742_v60 = vpop.xlane.xlu0 %3741  ;;  %v3754_v19 = vmul.f32 %v15192_v48, %v16714_v38 }
 0x51a   : > { %v15194_v58 = vpop.eup %15193  ;;  %15203 = vrcp.f32 %v3742_v60 }
 0x51b   : > { %v3745_v18 = vpop.xlane.xlu1 %3744  ;;  %v3755_v11 = vmul.f32 %v15194_v58, %v16721_v32 }
 0x51c   : > { %v15196_v22 = vpop.eup %15195  ;;  %15205 = vrcp.f32 %v3745_v18 }
 0x51d   : > { %v3762_v9 = vpack.c.bf16 %v3755_v11, %v3754_v19  ;;  %v3756_v26 = vmul.f32 %v15196_v22, %v16726_v56 }
 0x51e   : > { %v15198_v21 = vpop.eup %15197 }
 0x51f   : > { %v3757_v14 = vmul.f32 %v15198_v21, %v16732_v0  ;;  %13108 = vmatprep.mubr.msk.bf16.mxu1 %vm3419_vm4, %v3762_v9 }
 0x520   : > { %v15200_v63 = vpop.eup %15199 }
 0x521   : > { %v3763_v8 = vpack.c.bf16 %v3757_v14, %v3756_v26  ;;  %v3758_v1 = vmul.f32 %v15200_v63, %v16736_v52  ;;  %v18510_v52 = vpack.c.bf16 %v16605_v33, %v16601_v17  ;;  %v18513_v17 = vpack.c.bf16 %v16641_v27, %v16637_v45 }
 0x522   : > { %v15202_v55 = vpop.eup %15201 }
 0x523   : > { %13109 = vmatmul.mubr.msk.bf16.vlgmr.msra.gmra.mrb[72].mxu1 %vm3419_vm4, %v3763_v8  ;;  %v3759_v38 = vmul.f32 %v15202_v55, %v16740_v47 }
 0x524   : > { %v15204_v32 = vpop.eup %15203  ;;  %13117 = vmatpush3.bf16.xpose.msra.mxu1 %v16649_v4  ;;  %v18511_v4 = vpack.c.bf16 %v16617_v24, %v16613_v44 }
 0x525   : > { %13118 = vmatprep.subr.bf16.mxu1 %v16653_v25  ;;  %v3764_v36 = vpack.c.bf16 %v3759_v38, %v3758_v1  ;;  %v3760_v0 = vmul.f32 %v15204_v32, %v16744_v41 }
 0x526   : > { %v15206_v56 = vpop.eup %15205 }
 0x527   : > { %13112 = vmatprep.mubr.msk.bf16.mxu1 %vm3419_vm4, %v3764_v36  ;;  %v3761_v46 = vmul.f32 %v15206_v56, %v16748_v6 }
 0x529   : > { %v3765_v62 = vpack.c.bf16 %v3761_v46, %v3760_v0 }
 0x52b   : > { %13113 = vmatmul.mubr.msk.bf16.gmra.mrb[76].mxu1 %vm3419_vm4, %v3765_v62 }
 0x52c   : > { %13119 = vmatpush3.bf16.xpose.msra.mxu1 %v16653_v25  ;;  %13124 = vmatprep.mubr.bf16.mxu1 %v18510_v52  ;;  %v18512_v25 = vpack.c.bf16 %v16629_v5, %v16625_v59 }
 0x52d   : > { %13120 = vmatprep.subr.bf16.mxu1 %v16657_v50 }
 0x534   : > { %13121 = vmatpush3.bf16.xpose.msra.mxu1 %v16657_v50 }
 0x535   : > { %13122 = vmatprep.subr.bf16.mxu1 %v16661_v10 }
 0x53c   : > { %13123 = vmatpush3.bf16.xpose.msra.mxu1 %v16661_v10 }
 0x53d   : > { %13164 = vmatprep.subr.bf16.mxu1 %v16706_v42 }
 0x543   : > { %13125 = vmatmul.mubr.bf16.vlgmr.msra.gmra.mrb[80].mxu1 %v18511_v4 }
 0x544   : > { %13128 = vmatprep.mubr.bf16.mxu1 %v18512_v25  ;;  %13165 = vmatpush3.bf16.msra.mxu1 %v16706_v42 }
 0x545   : > { %13166 = vmatprep.subr.bf16.mxu1 %v16717_v30 }
 0x548   : > { %13167 = vmatpush3.bf16.msra.mxu1 %v16717_v30 }
 0x549   : > { %13168 = vmatprep.subr.bf16.mxu1 %v16730_v34 }
 0x54b   : > { %13129 = vmatmul.mubr.bf16.gmra.mrb[84].mxu1 %v18513_v17 }
 0x54c   : > { %13169 = vmatpush3.bf16.msra.mxu1 %v16730_v34 }
 0x54d   : > { %13170 = vmatprep.subr.bf16.mxu1 %v16752_v3 }
 0x550   : > { %13171 = vmatpush3.bf16.msra.mxu1 %v16752_v3 }
 0x5d8   : > { %v13078_v33 = vpop.f32.mrb[64].mxu1 }
 0x5d9   : > { %v3558_v44 = vpop.f32.mrb[65].mxu1 }
 0x5da   : > { %v13079_v24 = vpop.f32.mrb[66].mxu1 }
 0x5db   : > { %v16813_v59 = vpack.c.bf16 %v13079_v24, %v13078_v33  ;;  %v3561_v5 = vpop.f32.mrb[67].mxu1 }
 0x5dc   : > { %v16815_v50 = vpack.c.bf16 %v3561_v5, %v3558_v44 }
 0x5e0   : > { %v13082_v10 = vpop.f32.mrb[68].mxu1 }
 0x5e1   : > { %v3574_v42 = vpop.f32.mrb[69].mxu1 }
 0x5e2   : > { %v13083_v30 = vpop.f32.mrb[70].mxu1 }
 0x5e3   : > { %v16817_v47 = vpack.c.bf16 %v13083_v30, %v13082_v10  ;;  %v3577_v45 = vpop.f32.mrb[71].mxu1 }
 0x5e4   : > { %v16819_v27 = vpack.c.bf16 %v3577_v45, %v3574_v42 }
 0x5f6   : > { %v13110_v34 = vpop.f32.mrb[72].mxu1 }
 0x5f7   : > { %v3812_v41 = vpop.f32.mrb[73].mxu1 }
 0x5f8   : > { %v13111_v6 = vpop.f32.mrb[74].mxu1 }
 0x5f9   : > { %v16821_v3 = vpack.c.bf16 %v13111_v6, %v13110_v34  ;;  %v3815_v7 = vpop.f32.mrb[75].mxu1 }
 0x5fa   : > { %v16823_v37 = vpack.c.bf16 %v3815_v7, %v3812_v41 }
 0x5fe   : > { %v13114_v35 = vpop.f32.mrb[76].mxu1 }
 0x5ff   : > { %v3828_v51 = vpop.f32.mrb[77].mxu1 }
 0x600   : > { %v13115_v28 = vpop.f32.mrb[78].mxu1 }
 0x601   : > { %v16825_v39 = vpack.c.bf16 %v13115_v28, %v13114_v35  ;;  %v3831_v2 = vpop.f32.mrb[79].mxu1 }
 0x602   : > { %v16827_v20 = vpack.c.bf16 %v3831_v2, %v3828_v51 }
 0x616   : > { %v13126_v48 = vpop.f32.mrb[80].mxu1 }
 0x617   : > { %v3897_v60 = vpop.f32.mrb[81].mxu1  ;;  %v3906_v11 = vadd.f32 %v13126_v48, %v16501_v13 }
 0x618   : > { %v3898_v58 = vadd.f32 %v3897_v60, %v16503_v16  ;;  %v13127_v18 = vpop.f32.mrb[82].mxu1 }
 0x619   : > { %v3900_v19 = vpop.f32.mrb[83].mxu1  ;;  %v3909_v21 = vadd.f32 %v13127_v18, %v16505_v12  ;;  %v3934_v63 = vsel %vm3419_vm4, %v3906_v11, -inf }
 0x61a   : > { %v3901_v22 = vadd.f32 %v3900_v19, %v16511_v29  ;;  %v3928_v9 = vsel %vm3419_vm4, %v3898_v58, -inf }
 0x61b   : > { %3929 = vmax.xlane.f32.xlu0 %v3928_v9  ;;  %v3937_v38 = vsel %vm3419_vm4, %v3909_v21, -inf }
 0x61c   : > { %v3931_v26 = vsel %vm3419_vm4, %v3901_v22, -inf }
 0x61d   : > { %3932 = vmax.xlane.f32.xlu1 %v3931_v26 }
 0x61e   : > { %v13130_v14 = vpop.f32.mrb[84].mxu1 }
 0x61f   : > { %v3913_v8 = vpop.f32.mrb[85].mxu1  ;;  %3935 = vmax.xlane.f32.xlu0 %v3934_v63  ;;  %v3922_v36 = vadd.f32 %v13130_v14, %v16535_v53 }
 0x620   : > { %v3914_v55 = vadd.f32 %v3913_v8, %v16531_v49  ;;  %v13131_v1 = vpop.f32.mrb[86].mxu1 }
 0x621   : > { %v3916_v32 = vpop.f32.mrb[87].mxu1  ;;  %3938 = vmax.xlane.f32.xlu1 %v3937_v38  ;;  %v3925_v46 = vadd.f32 %v13131_v1, %v16542_v61  ;;  %v3946_v52 = vsel %vm3419_vm4, %v3922_v36, -inf }
 0x622   : > { %v3917_v56 = vadd.f32 %v3916_v32, %v16537_v57  ;;  %v3940_v0 = vsel %vm3419_vm4, %v3914_v55, -inf }
 0x623   : > { %3941 = vmax.xlane.f32.xlu0 %v3940_v0  ;;  %v3949_v4 = vsel %vm3419_vm4, %v3925_v46, -inf }
 0x624   : > { %v3943_v62 = vsel %vm3419_vm4, %v3917_v56, -inf }
 0x625   : > { %3944 = vmax.xlane.f32.xlu1 %v3943_v62 }
 0x627   : > { %3947 = vmax.xlane.f32.xlu0 %v3946_v52 }
 0x629   : > { %3950 = vmax.xlane.f32.xlu1 %v3949_v4 }
 0x6a8   : > { %v3930_v25 = vpop.xlane.xlu0 %3929 }
 0x6a9   : > { %v3952_v17 = vsub.f32 %v3898_v58, %v3930_v25 }
 0x6aa   : > { %v3933_v33 = vpop.xlane.xlu1 %3932 }
 0x6ab   : > { %v3960_v44 = vmul.f32 1.442695, %v3952_v17  ;;  %v3953_v24 = vsub.f32 %v3901_v22, %v3933_v33 }
 0x6ac   : > { %v3936_v5 = vpop.xlane.xlu0 %3935 }
 0x6ad   : > { %15207 = vpow2.f32 %v3960_v44  ;;  %v3962_v10 = vmul.f32 1.442695, %v3953_v24  ;;  %v3954_v42 = vsub.f32 %v3906_v11, %v3936_v5 }
 0x6ae   : > { %v3939_v30 = vpop.xlane.xlu1 %3938 }
 0x6af   : > { %15209 = vpow2.f32 %v3962_v10  ;;  %v3964_v45 = vmul.f32 1.442695, %v3954_v42  ;;  %v3955_v34 = vsub.f32 %v3909_v21, %v3939_v30 }
 0x6b0   : > { %v3942_v41 = vpop.xlane.xlu0 %3941 }
 0x6b1   : > { %15211 = vpow2.f32 %v3964_v45  ;;  %v3966_v6 = vmul.f32 1.442695, %v3955_v34  ;;  %v3956_v7 = vsub.f32 %v3914_v55, %v3942_v41 }
 0x6b2   : > { %v3945_v35 = vpop.xlane.xlu1 %3944 }
 0x6b3   : > { %15213 = vpow2.f32 %v3966_v6  ;;  %v3968_v51 = vmul.f32 1.442695, %v3956_v7  ;;  %v3957_v28 = vsub.f32 %v3917_v56, %v3945_v35 }
 0x6b4   : > { %v3948_v2 = vpop.xlane.xlu0 %3947 }
 0x6b5   : > { %15215 = vpow2.f32 %v3968_v51  ;;  %v3970_v48 = vmul.f32 1.442695, %v3957_v28  ;;  %v3958_v60 = vsub.f32 %v3922_v36, %v3948_v2 }
 0x6b6   : > { %v3951_v58 = vpop.xlane.xlu1 %3950 }
 0x6b7   : > { %v15208_v18 = vpop.eup %15207  ;;  %15217 = vpow2.f32 %v3970_v48  ;;  %v3972_v19 = vmul.f32 1.442695, %v3958_v60  ;;  %v3959_v11 = vsub.f32 %v3925_v46, %v3951_v58 }
 0x6b8   : > { %v3976_v22 = vsel %vm3419_vm4, %v15208_v18, 0.0 }
 0x6b9   : > { %v15210_v9 = vpop.eup %15209  ;;  %15219 = vpow2.f32 %v3972_v19  ;;  %v3974_v21 = vmul.f32 1.442695, %v3959_v11  ;;  %3977 = vadd.xlane.f32.xlu0 %v3976_v22 }
 0x6ba   : > { %v3979_v26 = vsel %vm3419_vm4, %v15210_v9, 0.0 }
 0x6bb   : > { %v15212_v14 = vpop.eup %15211  ;;  %15221 = vpow2.f32 %v3974_v21  ;;  %3980 = vadd.xlane.f32.xlu1 %v3979_v26  ;;  %v18514_v21 = vpack.c.bf16 %v16609_v40, %v16603_v31  ;;  %v14200_v26 = vld [vmem:[#allocation9 + $0x8] ss:$12 sps:$4 sm:$0xff]   ;;  %v14202_v40 = vld [vmem:[#allocation9 + $0x20] ss:$12 sps:$4 sm:$0xff]  }
 0x6bc   : > { %v3982_v63 = vsel %vm3419_vm4, %v15212_v14, 0.0 }
 0x6bd   : > { %v15214_v8 = vpop.eup %15213  ;;  %3983 = vadd.xlane.f32.xlu0 %v3982_v63  ;;  %v18515_v63 = vld [vmem:[#allocation37_spill] sm:$0xff] }
 0x6be   : > { %v3985_v55 = vsel %vm3419_vm4, %v15214_v8, 0.0 }
 0x6bf   : > { %v15216_v1 = vpop.eup %15215  ;;  %3986 = vadd.xlane.f32.xlu1 %v3985_v55 }
 0x6c0   : > { %v3988_v38 = vsel %vm3419_vm4, %v15216_v1, 0.0 }
 0x6c1   : > { %v15218_v32 = vpop.eup %15217  ;;  %3989 = vadd.xlane.f32.xlu0 %v3988_v38  ;;  %v14204_v38 = vld [vmem:[#allocation9 + $0x38] ss:$12 sps:$4 sm:$0xff]  }
 0x6c2   : > { %v3991_v36 = vsel %vm3419_vm4, %v15218_v32, 0.0 }
 0x6c3   : > { %v15220_v56 = vpop.eup %15219  ;;  %3992 = vadd.xlane.f32.xlu1 %v3991_v36  ;;  %v18522_v36 = vld [vmem:[#allocation40_spill] sm:$0xff] }
 0x6c4   : > { %v3994_v0 = vsel %vm3419_vm4, %v15220_v56, 0.0 }
 0x6c5   : > { %v15222_v46 = vpop.eup %15221  ;;  %3995 = vadd.xlane.f32.xlu0 %v3994_v0  ;;  %v14206_v0 = vld [vmem:[#allocation9 + $0x50] ss:$12 sps:$4 sm:$0xff]  }
 0x6c6   : > { %v3997_v62 = vsel %vm3419_vm4, %v15222_v46, 0.0 }
 0x6c7   : > { %3998 = vadd.xlane.f32.xlu1 %v3997_v62  ;;  %v14208_v62 = vld [vmem:[#allocation9 + $0x68] ss:$12 sps:$4 sm:$0xff]  }
 0x746   : > { %v3978_v52 = vpop.xlane.xlu0 %3977 }
 0x747   : > { %15223 = vrcp.f32 %v3978_v52  ;;  %v14209_v52 = vld [vmem:[#allocation9 + $0x140] ss:$12 sps:$4 sm:$0xff]  }
 0x748   : > { %v3981_v4 = vpop.xlane.xlu1 %3980 }
 0x749   : > { %15225 = vrcp.f32 %v3981_v4  ;;  %v14210_v4 = vld [vmem:[#allocation9 + $0x80] ss:$12 sps:$4 sm:$0xff]  }
 0x74a   : > { %v3984_v25 = vpop.xlane.xlu0 %3983 }
 0x74b   : > { %15227 = vrcp.f32 %v3984_v25  ;;  %v14211_v25 = vld [vmem:[#allocation9 + $0x158] ss:$12 sps:$4 sm:$0xff]  }
 0x74c   : > { %v3987_v17 = vpop.xlane.xlu1 %3986 }
 0x74d   : > { %15229 = vrcp.f32 %v3987_v17  ;;  %v14212_v17 = vld [vmem:[#allocation9 + $0x98] ss:$12 sps:$4 sm:$0xff]  }
 0x74e   : > { %v3990_v33 = vpop.xlane.xlu0 %3989 }
 0x74f   : > { %15231 = vrcp.f32 %v3990_v33  ;;  %v14213_v33 = vld [vmem:[#allocation9 + $0x170] ss:$12 sps:$4 sm:$0xff]  }
 0x750   : > { %v3993_v44 = vpop.xlane.xlu1 %3992 }
 0x751   : > { %v15224_v24 = vpop.eup %15223  ;;  %15233 = vrcp.f32 %v3993_v44  ;;  %v14214_v44 = vld [vmem:[#allocation9 + $0xb0] ss:$12 sps:$4 sm:$0xff]  }
 0x752   : > { %v3996_v5 = vpop.xlane.xlu0 %3995  ;;  %v4008_v30 = vmul.f32 %v15224_v24, %v15208_v18 }
 0x753   : > { %v15226_v10 = vpop.eup %15225  ;;  %15235 = vrcp.f32 %v3996_v5 }
 0x754   : > { %v3999_v42 = vpop.xlane.xlu1 %3998  ;;  %v4009_v45 = vmul.f32 %v15226_v10, %v15210_v9 }
 0x755   : > { %v15228_v34 = vpop.eup %15227  ;;  %15237 = vrcp.f32 %v3999_v42 }
 0x756   : > { %v4016_v41 = vpack.c.bf16 %v4009_v45, %v4008_v30  ;;  %v4010_v7 = vmul.f32 %v15228_v34, %v15212_v14  ;;  %v14201_v14 = vld [vmem:[#allocation9 + $0xe0] ss:$12 sps:$4 sm:$0xff]  }
 0x757   : > { %v15230_v6 = vpop.eup %15229 }
 0x758   : > { %v4011_v35 = vmul.f32 %v15230_v6, %v15214_v8  ;;  %13140 = vmatprep.mubr.msk.bf16.mxu0 %vm3419_vm4, %v4016_v41  ;;  %v18516_v8 = vld [vmem:[#allocation36_spill] sm:$0xff] }
 0x759   : > { %v15232_v51 = vpop.eup %15231  ;;  %v18517_v55 = vpack.c.bf16 %v18515_v63, %v18516_v8 }
 0x75a   : > { %v4017_v28 = vpack.c.bf16 %v4011_v35, %v4010_v7  ;;  %v4012_v48 = vmul.f32 %v15232_v51, %v15216_v1  ;;  %v18519_v1 = vld [vmem:[#allocation38_spill] sm:$0xff] }
 0x75b   : > { %v15234_v2 = vpop.eup %15233 }
 0x75c   : > { %13141 = vmatmul.mubr.msk.bf16.vlgmr.msra.gmra.mrb[64].mxu0 %vm3419_vm4, %v4017_v28  ;;  %v4013_v60 = vmul.f32 %v15234_v2, %v15218_v32  ;;  %v14205_v32 = vld [vmem:[#allocation9 + $0x110] ss:$12 sps:$4 sm:$0xff]  }
 0x75d   : > { %v15236_v58 = vpop.eup %15235  ;;  %13149 = vmatpush3.bf16.xpose.msra.mxu0 %v16651_v15  ;;  %v14199_v15 = vld [vmem:[#allocation9 + $0xc8] ss:$12 sps:$4 sm:$0xff]  }
 0x75e   : > { %13150 = vmatprep.subr.bf16.mxu0 %v16655_v43  ;;  %v4018_v18 = vpack.c.bf16 %v4013_v60, %v4012_v48  ;;  %v4014_v11 = vmul.f32 %v15236_v58, %v15220_v56 }
 0x75f   : > { %v15238_v19 = vpop.eup %15237 }
 0x760   : > { %13144 = vmatprep.mubr.msk.bf16.mxu0 %vm3419_vm4, %v4018_v18  ;;  %v4015_v22 = vmul.f32 %v15238_v19, %v15222_v46  ;;  %v14207_v46 = vld [vmem:[#allocation9 + $0x128] ss:$12 sps:$4 sm:$0xff]  }
 0x762   : > { %v4019_v9 = vpack.c.bf16 %v4015_v22, %v4014_v11 }
 0x764   : > { %13145 = vmatmul.mubr.msk.bf16.gmra.mrb[68].mxu0 %vm3419_vm4, %v4019_v9 }
 0x765   : > { %13151 = vmatpush3.bf16.xpose.msra.mxu0 %v16655_v43  ;;  %13156 = vmatprep.mubr.bf16.mxu0 %v18514_v21  ;;  %v18518_v43 = vld [vmem:[#allocation39_spill] sm:$0xff] }
 0x766   : > { %13152 = vmatprep.subr.bf16.mxu0 %v16659_v54  ;;  %v18520_v31 = vpack.c.bf16 %v18518_v43, %v18519_v1 }
 0x76d   : > { %13153 = vmatpush3.bf16.xpose.msra.mxu0 %v16659_v54  ;;  %v14203_v54 = vld [vmem:[#allocation9 + $0xf8] ss:$12 sps:$4 sm:$0xff]  }
 0x76e   : > { %13154 = vmatprep.subr.bf16.mxu0 %v16663_v23 }
 0x775   : > { %13155 = vmatpush3.bf16.xpose.msra.mxu0 %v16663_v23  ;;  %v18521_v23 = vld [vmem:[#allocation41_spill] sm:$0xff] }
 0x776   : > { %12732 = vmatprep.subr.bf16.mxu0 %v14199_v15  ;;  %v18523_v56 = vpack.c.bf16 %v18521_v23, %v18522_v36 }
 0x77c   : > { %13157 = vmatmul.mubr.bf16.vlgmr.msra.gmra.mrb[72].mxu0 %v18517_v55 }
 0x77d   : > { %13160 = vmatprep.mubr.bf16.mxu0 %v18520_v31  ;;  %12733 = vmatpush3.bf16.msra.mxu0 %v14200_v26 }
 0x77e   : > { %12734 = vmatprep.subr.bf16.mxu0 %v14201_v14 }
 0x781   : > { %12735 = vmatpush3.bf16.msra.mxu0 %v14202_v40 }
 0x782   : > { %12736 = vmatprep.subr.bf16.mxu0 %v14203_v54 }
 0x784   : > { %13161 = vmatmul.mubr.bf16.gmra.mrb[76].mxu0 %v18523_v56 }
 0x785   : > { %12737 = vmatpush3.bf16.msra.mxu0 %v14204_v38  ;;  %5210 = vmatprep.mubr.bf16.mxu0 %v16823_v37 }
 0x786   : > { %12738 = vmatprep.subr.bf16.mxu0 %v14205_v32 }
 0x789   : > { %12739 = vmatpush3.bf16.msra.mxu0 %v14206_v0 }
 0x78a   : > { %12740 = vmatprep.subr.bf16.mxu0 %v14207_v46 }
 0x78d   : > { %12741 = vmatpush3.bf16.msra.mxu0 %v14208_v62 }
 0x78e   : > { %12742 = vmatprep.subr.bf16.mxu0 %v14209_v52 }
 0x791   : > { %12743 = vmatpush3.bf16.msra.mxu0 %v14210_v4 }
 0x792   : > { %12744 = vmatprep.subr.bf16.mxu0 %v14211_v25 }
 0x795   : > { %12745 = vmatpush3.bf16.msra.mxu0 %v14212_v17 }
 0x796   : > { %12746 = vmatprep.subr.bf16.mxu0 %v14213_v33 }
 0x799   : > { %12747 = vmatpush3.bf16.msra.mxu0 %v14214_v44 }
 0x79c   : > { %5211 = vmatmul.mubr.bf16.vlgmr.msra.gmra.mrb[80].mxu0 %v16815_v50 }
 0x79d   : > { %5218 = vmatprep.mubr.bf16.mxu0 %v16821_v3 }
 0x7a4   : > { %5219 = vmatmul.mubr.bf16.gmra.mrb[84].mxu0 %v16813_v59 }
 0x7a5   : > { %5226 = vmatprep.mubr.bf16.mxu0 %v16827_v20 }
 0x7ac   : > { %5227 = vmatmul.mubr.bf16.gmra.mrb[88].mxu0 %v16819_v27 }
 0x7ad   : > { %5234 = vmatprep.mubr.bf16.mxu0 %v16825_v39 }
 0x7b4   : > { %5235 = vmatmul.mubr.bf16.gmra.mrb[92].mxu0 %v16817_v47 }
 0x82f   : > { %v13142_v24 = vpop.f32.mrb[64].mxu0 }
 0x830   : > { %v4066_v5 = vpop.f32.mrb[65].mxu0 }
 0x831   : > { %v13143_v10 = vpop.f32.mrb[66].mxu0 }
 0x832   : > { %v16884_v42 = vpack.c.bf16 %v13143_v10, %v13142_v24  ;;  %v4069_v30 = vpop.f32.mrb[67].mxu0 }
 0x833   : > { %v16886_v45 = vpack.c.bf16 %v4069_v30, %v4066_v5 }
 0x837   : > { %v13146_v34 = vpop.f32.mrb[68].mxu0 }
 0x838   : > { %v4082_v41 = vpop.f32.mrb[69].mxu0 }
 0x839   : > { %v13147_v6 = vpop.f32.mrb[70].mxu0 }
 0x83a   : > { %v16888_v7 = vpack.c.bf16 %v13147_v6, %v13146_v34  ;;  %v4085_v35 = vpop.f32.mrb[71].mxu0 }
 0x83b   : > { %v16890_v51 = vpack.c.bf16 %v4085_v35, %v4082_v41 }
 0x84f   : > { %v13158_v28 = vpop.f32.mrb[72].mxu0 }
 0x850   : > { %v4151_v2 = vpop.f32.mrb[73].mxu0  ;;  %v4160_v18 = vadd.f32 %v13158_v28, %v16501_v13 }
 0x851   : > { %v4152_v48 = vadd.f32 %v4151_v2, %v16503_v16  ;;  %v13159_v60 = vpop.f32.mrb[74].mxu0 }
 0x852   : > { %v4154_v58 = vpop.f32.mrb[75].mxu0  ;;  %v4163_v22 = vadd.f32 %v13159_v60, %v16505_v12  ;;  %v4188_v15 = vsel %vm3419_vm4, %v4160_v18, -inf }
 0x853   : > { %v4155_v19 = vadd.f32 %v4154_v58, %v16511_v29  ;;  %v4182_v11 = vsel %vm3419_vm4, %v4152_v48, -inf }
 0x854   : > { %4183 = vmax.xlane.f32.xlu0 %v4182_v11  ;;  %v4191_v13 = vsel %vm3419_vm4, %v4163_v22, -inf }
 0x855   : > { %v4185_v9 = vsel %vm3419_vm4, %v4155_v19, -inf }
 0x856   : > { %4186 = vmax.xlane.f32.xlu1 %v4185_v9 }
 0x857   : > { %v13162_v21 = vpop.f32.mrb[76].mxu0 }
 0x858   : > { %v4167_v26 = vpop.f32.mrb[77].mxu0  ;;  %4189 = vmax.xlane.f32.xlu0 %v4188_v15  ;;  %v16902_v29 = vadd.f32 %v13162_v21, %v16535_v53 }
 0x859   : > { %v4168_v16 = vadd.f32 %v4167_v26, %v16531_v49  ;;  %v13163_v14 = vpop.f32.mrb[78].mxu0 }
 0x85a   : > { %v4170_v63 = vpop.f32.mrb[79].mxu0  ;;  %4192 = vmax.xlane.f32.xlu1 %v4191_v13  ;;  %v16907_v55 = vadd.f32 %v13163_v14, %v16542_v61  ;;  %v4200_v49 = vsel %vm3419_vm4, %v16902_v29, -inf }
 0x85b   : > { %v4171_v12 = vadd.f32 %v4170_v63, %v16537_v57  ;;  %v4194_v8 = vsel %vm3419_vm4, %v4168_v16, -inf }
 0x85c   : > { %4195 = vmax.xlane.f32.xlu0 %v4194_v8  ;;  %v4203_v1 = vsel %vm3419_vm4, %v16907_v55, -inf }
 0x85d   : > { %v4197_v43 = vsel %vm3419_vm4, %v4171_v12, -inf }
 0x85e   : > { %4198 = vmax.xlane.f32.xlu1 %v4197_v43 }
 0x860   : > { %4201 = vmax.xlane.f32.xlu0 %v4200_v49 }
 0x862   : > { %4204 = vmax.xlane.f32.xlu1 %v4203_v1 }
 0x86f   : > { %v12748_v53 = vpop.f32.mrb[80].mxu0 }
 0x870   : > { %v12749_v31 = vpop.f32.mrb[81].mxu0 }
 0x871   : > { %v16914_v57 = vadd.f32 %v12749_v31, %v12748_v53  ;;  %v12751_v40 = vpop.f32.mrb[82].mxu0 }
 0x872   : > { %v12752_v54 = vpop.f32.mrb[83].mxu0 }
 0x873   : > { %v16916_v38 = vadd.f32 %v12752_v54, %v12751_v40 }
 0x877   : > { %v12754_v61 = vpop.f32.mrb[84].mxu0 }
 0x878   : > { %v12755_v32 = vpop.f32.mrb[85].mxu0 }
 0x879   : > { %v16918_v23 = vadd.f32 %v12755_v32, %v12754_v61  ;;  %v12757_v36 = vpop.f32.mrb[86].mxu0 }
 0x87a   : > { %v12758_v56 = vpop.f32.mrb[87].mxu0 }
 0x87b   : > { %v16920_v0 = vadd.f32 %v12758_v56, %v12757_v36 }
 0x87f   : > { %v12760_v46 = vpop.f32.mrb[88].mxu0 }
 0x880   : > { %v12761_v62 = vpop.f32.mrb[89].mxu0 }
 0x881   : > { %v16922_v52 = vadd.f32 %v12761_v62, %v12760_v46  ;;  %v12763_v4 = vpop.f32.mrb[90].mxu0 }
 0x882   : > { %v12764_v25 = vpop.f32.mrb[91].mxu0 }
 0x883   : > { %v16924_v17 = vadd.f32 %v12764_v25, %v12763_v4 }
 0x887   : > { %v12766_v33 = vpop.f32.mrb[92].mxu0 }
 0x888   : > { %v12767_v44 = vpop.f32.mrb[93].mxu0 }
 0x889   : > { %v16926_v24 = vadd.f32 %v12767_v44, %v12766_v33  ;;  %v12769_v5 = vpop.f32.mrb[94].mxu0  ;;  %v14217_v33 = vld [vmem:[#allocation9 + $0x4] ss:$12 sps:$4 sm:$0xff]   ;;  %v14290_v44 = vld [vmem:[#allocation9 + $0x248] ss:$12 sps:$4 sm:$0xff]  }
 0x88a   : > { %v12770_v10 = vpop.f32.mrb[95].mxu0  ;;  %5032 = vmatprep.subr.bf16.mxu1 %v14217_v33  ;;  %12772 = vmatprep.subr.bf16.mxu0 %v14290_v44  ;;  %v14218_v44 = vld [vmem:[#allocation9 + $0x18] ss:$12 sps:$4 sm:$0xff]  }
 0x88b   : > { %v16928_v30 = vadd.f32 %v12770_v10, %v12769_v5  ;;  %v14291_v5 = vld [vmem:[#allocation9 + $0x188] ss:$12 sps:$4 sm:$0xff]   ;;  %v14295_v10 = vld [vmem:[#allocation9 + $0x260] ss:$12 sps:$4 sm:$0xff]  }
 0x88c   : > { %12773 = vmatpush3.bf16.msra.mxu0 %v14291_v5  ;;  %v14223_v5 = vld [vmem:[#allocation9 + $0x34] ss:$12 sps:$4 sm:$0xff]  }
 0x88d   : > { %12774 = vmatprep.subr.bf16.mxu0 %v14295_v10 }
 0x8e1   : > { %v4184_v34 = vpop.xlane.xlu0 %4183 }
 0x8e2   : > { %v4206_v41 = vsub.f32 %v4152_v48, %v4184_v34  ;;  %v14296_v34 = vld [vmem:[#allocation9 + $0x1a0] ss:$12 sps:$4 sm:$0xff]  }
 0x8e3   : > { %v4187_v6 = vpop.xlane.xlu1 %4186  ;;  %12775 = vmatpush3.bf16.msra.mxu0 %v14296_v34 }
 0x8e4   : > { %v4214_v35 = vmul.f32 1.442695, %v4206_v41  ;;  %v4207_v28 = vsub.f32 %v4155_v19, %v4187_v6  ;;  %v14300_v41 = vld [vmem:[#allocation9 + $0x278] ss:$12 sps:$4 sm:$0xff]  }
 0x8e5   : > { %v4190_v2 = vpop.xlane.xlu0 %4189  ;;  %12776 = vmatprep.subr.bf16.mxu0 %v14300_v41  ;;  %v14301_v6 = vld [vmem:[#allocation9 + $0x1b8] ss:$12 sps:$4 sm:$0xff]   ;;  %v14221_v41 = vld [vmem:[#allocation9 + $0x30] ss:$12 sps:$4 sm:$0xff]  }
 0x8e6   : > { %15239 = vpow2.f32 %v4214_v35  ;;  %v4216_v60 = vmul.f32 1.442695, %v4207_v28  ;;  %v4208_v58 = vsub.f32 %v4160_v18, %v4190_v2  ;;  %v14305_v28 = vld [vmem:[#allocation9 + $0x290] ss:$12 sps:$4 sm:$0xff]  }
 0x8e7   : > { %v4193_v11 = vpop.xlane.xlu1 %4192  ;;  %12777 = vmatpush3.bf16.msra.mxu0 %v14301_v6 }
 0x8e8   : > { %15241 = vpow2.f32 %v4216_v60  ;;  %v4218_v9 = vmul.f32 1.442695, %v4208_v58  ;;  %v4209_v21 = vsub.f32 %v4163_v22, %v4193_v11  ;;  %12778 = vmatprep.subr.bf16.mxu0 %v14305_v28  ;;  %v14306_v60 = vld [vmem:[#allocation9 + $0x1d0] ss:$12 sps:$4 sm:$0xff]   ;;  %v14310_v11 = vld [vmem:[#allocation9 + $0x2a8] ss:$12 sps:$4 sm:$0xff]  }
 0x8e9   : > { %v4196_v15 = vpop.xlane.xlu0 %4195  ;;  %v14227_v28 = vld [vmem:[#allocation9 + $0x60] ss:$12 sps:$4 sm:$0xff]  }
 0x8ea   : > { %15243 = vpow2.f32 %v4218_v9  ;;  %v4220_v26 = vmul.f32 1.442695, %v4209_v21  ;;  %v4210_v14 = vsub.f32 %v4168_v16, %v4196_v15  ;;  %v14311_v21 = vld [vmem:[#allocation9 + $0x1e8] ss:$12 sps:$4 sm:$0xff]  }
 0x8eb   : > { %v4199_v13 = vpop.xlane.xlu1 %4198  ;;  %12779 = vmatpush3.bf16.msra.mxu0 %v14306_v60  ;;  %v14233_v60 = vld [vmem:[#allocation9 + $0x90] ss:$12 sps:$4 sm:$0xff]  }
 0x8ec   : > { %15245 = vpow2.f32 %v4220_v26  ;;  %v4222_v63 = vmul.f32 1.442695, %v4210_v14  ;;  %v4211_v8 = vsub.f32 %v4171_v12, %v4199_v13  ;;  %12780 = vmatprep.subr.bf16.mxu0 %v14310_v11  ;;  %v14315_v26 = vld [vmem:[#allocation9 + $0x2c0] ss:$12 sps:$4 sm:$0xff]   ;;  %v14236_v11 = vld [vmem:[#allocation9 + $0xa8] ss:$12 sps:$4 sm:$0xff]  }
 0x8ed   : > { %v4202_v48 = vpop.xlane.xlu0 %4201 }
 0x8ee   : > { %15247 = vpow2.f32 %v4222_v63  ;;  %v4224_v43 = vmul.f32 1.442695, %v4211_v8  ;;  %v4212_v19 = vsub.f32 %v16902_v29, %v4202_v48  ;;  %v14316_v63 = vld [vmem:[#allocation9 + $0x200] ss:$12 sps:$4 sm:$0xff]   ;;  %v14320_v48 = vld [vmem:[#allocation9 + $0x2d8] ss:$12 sps:$4 sm:$0xff]  }
 0x8ef   : > { %v4205_v49 = vpop.xlane.xlu1 %4204  ;;  %12781 = vmatpush3.bf16.msra.mxu0 %v14311_v21  ;;  %v14244_v21 = vld [vmem:[#allocation9 + $0xdc] ss:$12 sps:$4 sm:$0xff]  }
 0x8f0   : > { %v16931_v1 = vpop.eup %15239  ;;  %15249 = vpow2.f32 %v4224_v43  ;;  %v4226_v18 = vmul.f32 1.442695, %v4212_v19  ;;  %v4213_v22 = vsub.f32 %v16907_v55, %v4205_v49  ;;  %12782 = vmatprep.subr.bf16.mxu0 %v14315_v26  ;;  %v14247_v26 = vld [vmem:[#allocation9 + $0xf4] ss:$12 sps:$4 sm:$0xff]  }
 0x8f1   : > { %v4230_v53 = vsel %vm3419_vm4, %v16931_v1, 0.0 }
 0x8f2   : > { %v16936_v16 = vpop.eup %15241  ;;  %15251 = vpow2.f32 %v4226_v18  ;;  %v4228_v31 = vmul.f32 1.442695, %v4213_v22  ;;  %4231 = vadd.xlane.f32.xlu0 %v4230_v53 }
 0x8f3   : > { %v4233_v12 = vsel %vm3419_vm4, %v16936_v16, 0.0  ;;  %12783 = vmatpush3.bf16.msra.mxu0 %v14316_v63  ;;  %v14248_v63 = vld [vmem:[#allocation9 + $0x108] ss:$12 sps:$4 sm:$0xff]  }
 0x8f4   : > { %v16940_v40 = vpop.eup %15243  ;;  %15253 = vpow2.f32 %v4228_v31  ;;  %4234 = vadd.xlane.f32.xlu1 %v4233_v12  ;;  %12784 = vmatprep.subr.bf16.mxu0 %v14320_v48  ;;  %v14251_v48 = vld [vmem:[#allocation9 + $0x120] ss:$12 sps:$4 sm:$0xff]  }
 0x8f5   : > { %v4236_v29 = vsel %vm3419_vm4, %v16940_v40, 0.0 }
 0x8f6   : > { %v16944_v54 = vpop.eup %15245  ;;  %4237 = vadd.xlane.f32.xlu0 %v4236_v29 }
 0x8f7   : > { %v4239_v55 = vsel %vm3419_vm4, %v16944_v54, 0.0 }
 0x8f8   : > { %v16948_v61 = vpop.eup %15247  ;;  %4240 = vadd.xlane.f32.xlu1 %v4239_v55 }
 0x8f9   : > { %v4242_v32 = vsel %vm3419_vm4, %v16948_v61, 0.0 }
 0x8fa   : > { %v16952_v36 = vpop.eup %15249  ;;  %4243 = vadd.xlane.f32.xlu0 %v4242_v32  ;;  %v14215_v32 = vld [vmem:[#allocation9] ss:$12 sps:$4 sm:$0xff]  }
 0x8fb   : > { %v4245_v56 = vsel %vm3419_vm4, %v16952_v36, 0.0 }
 0x8fc   : > { %v16956_v46 = vpop.eup %15251  ;;  %4246 = vadd.xlane.f32.xlu1 %v4245_v56 }
 0x8fd   : > { %v4248_v62 = vsel %vm3419_vm4, %v16956_v46, 0.0 }
 0x8fe   : > { %v16960_v4 = vpop.eup %15253  ;;  %4249 = vadd.xlane.f32.xlu0 %v4248_v62  ;;  %v14220_v62 = vld [vmem:[#allocation9 + $0x1c] ss:$12 sps:$4 sm:$0xff]  }
 0x8ff   : > { %v4251_v25 = vsel %vm3419_vm4, %v16960_v4, 0.0 }
 0x900   : > { %4252 = vadd.xlane.f32.xlu1 %v4251_v25 }
 0x97f   : > { %v4232_v35 = vpop.xlane.xlu0 %4231 }
 0x980   : > { %15255 = vrcp.f32 %v4232_v35  ;;  %v14229_v35 = vld [vmem:[#allocation9 + $0x64] ss:$12 sps:$4 sm:$0xff]  }
 0x981   : > { %v4235_v2 = vpop.xlane.xlu1 %4234 }
 0x982   : > { %15257 = vrcp.f32 %v4235_v2  ;;  %v14232_v2 = vld [vmem:[#allocation9 + $0x7c] ss:$12 sps:$4 sm:$0xff]  }
 0x983   : > { %v4238_v58 = vpop.xlane.xlu0 %4237 }
 0x984   : > { %15259 = vrcp.f32 %v4238_v58  ;;  %v14238_v58 = vld [vmem:[#allocation9 + $0xac] ss:$12 sps:$4 sm:$0xff]  }
 0x985   : > { %v4241_v9 = vpop.xlane.xlu1 %4240 }
 0x986   : > { %15261 = vrcp.f32 %v4241_v9  ;;  %v14241_v9 = vld [vmem:[#allocation9 + $0xc4] ss:$12 sps:$4 sm:$0xff]  }
 0x987   : > { %v4244_v15 = vpop.xlane.xlu0 %4243 }
 0x988   : > { %15263 = vrcp.f32 %v4244_v15  ;;  %v14242_v15 = vld [vmem:[#allocation9 + $0xd8] ss:$12 sps:$4 sm:$0xff]  }
 0x989   : > { %v4247_v14 = vpop.xlane.xlu1 %4246 }
 0x98a   : > { %v15256_v13 = vpop.eup %15255  ;;  %15265 = vrcp.f32 %v4247_v14  ;;  %v14245_v14 = vld [vmem:[#allocation9 + $0xf0] ss:$12 sps:$4 sm:$0xff]  }
 0x98b   : > { %v4250_v8 = vpop.xlane.xlu0 %4249  ;;  %v4262_v49 = vmul.f32 %v15256_v13, %v16931_v1  ;;  %v14250_v13 = vld [vmem:[#allocation9 + $0x10c] ss:$12 sps:$4 sm:$0xff]  }
 0x98c   : > { %v15258_v43 = vpop.eup %15257  ;;  %15267 = vrcp.f32 %v4250_v8  ;;  %v14253_v8 = vld [vmem:[#allocation9 + $0x124] ss:$12 sps:$4 sm:$0xff]  }
 0x98d   : > { %v4253_v19 = vpop.xlane.xlu1 %4252  ;;  %v4263_v18 = vmul.f32 %v15258_v43, %v16936_v16  ;;  %v14256_v43 = vld [vmem:[#allocation9 + $0x13c] ss:$12 sps:$4 sm:$0xff]  }
 0x98e   : > { %v15260_v22 = vpop.eup %15259  ;;  %15269 = vrcp.f32 %v4253_v19  ;;  %v14254_v19 = vld [vmem:[#allocation9 + $0x138] ss:$12 sps:$4 sm:$0xff]  }
 0x98f   : > { %v4270_v53 = vpack.c.bf16 %v4263_v18, %v4262_v49  ;;  %v4264_v12 = vmul.f32 %v15260_v22, %v16940_v40  ;;  %v14259_v49 = vld [vmem:[#allocation9 + $0x154] ss:$12 sps:$4 sm:$0xff]   ;;  %v14257_v18 = vld [vmem:[#allocation9 + $0x150] ss:$12 sps:$4 sm:$0xff]   ;;  %v14262_v22 = vld [vmem:[#allocation9 + $0x16c] ss:$12 sps:$4 sm:$0xff]  }
 0x990   : > { %v15262_v31 = vpop.eup %15261 }
 0x991   : > { %v4265_v29 = vmul.f32 %v15262_v31, %v16944_v54  ;;  %13172 = vmatprep.mubr.msk.bf16.mxu1 %vm3419_vm4, %v4270_v53  ;;  %v14260_v53 = vld [vmem:[#allocation9 + $0x168] ss:$12 sps:$4 sm:$0xff]   ;;  %v14265_v31 = vld [vmem:[#allocation9 + $0x184] ss:$12 sps:$4 sm:$0xff]  }
 0x992   : > { %v15264_v55 = vpop.eup %15263 }
 0x993   : > { %v4271_v56 = vpack.c.bf16 %v4265_v29, %v4264_v12  ;;  %v4266_v1 = vmul.f32 %v15264_v55, %v16948_v61  ;;  %v14226_v61 = vld [vmem:[#allocation9 + $0x4c] ss:$12 sps:$4 sm:$0xff]   ;;  %v14268_v29 = vld [vmem:[#allocation9 + $0x19c] ss:$12 sps:$4 sm:$0xff]  }
 0x994   : > { %v15266_v25 = vpop.eup %15265  ;;  %v14263_v12 = vld [vmem:[#allocation9 + $0x180] ss:$12 sps:$4 sm:$0xff]   ;;  %v14266_v55 = vld [vmem:[#allocation9 + $0x198] ss:$12 sps:$4 sm:$0xff]  }
 0x995   : > { %13173 = vmatmul.mubr.msk.bf16.vlgmr.msra.gmra.mrb[88].mxu1 %vm3419_vm4, %v4271_v56  ;;  %v4267_v16 = vmul.f32 %v15266_v25, %v16952_v36  ;;  %v14224_v36 = vld [vmem:[#allocation9 + $0x48] ss:$12 sps:$4 sm:$0xff]   ;;  %v14269_v56 = vld [vmem:[#allocation9 + $0x1b0] ss:$12 sps:$4 sm:$0xff]  }
 0x996   : > { %v15268_v33 = vpop.eup %15267  ;;  %5033 = vmatpush1.bf16.msra.mxu1 %v14215_v32  ;;  %v14271_v32 = vld [vmem:[#allocation9 + $0x1b4] ss:$12 sps:$4 sm:$0xff]  }
 0x997   : > { %5034 = vmatprep.subr.bf16.mxu1 %v14220_v62  ;;  %v4272_v40 = vpack.c.bf16 %v4267_v16, %v4266_v1  ;;  %v4268_v10 = vmul.f32 %v15268_v33, %v16956_v46  ;;  %v14230_v46 = vld [vmem:[#allocation9 + $0x78] ss:$12 sps:$4 sm:$0xff]   ;;  %v14272_v25 = vld [vmem:[#allocation9 + $0x1c8] ss:$12 sps:$4 sm:$0xff]  }
 0x998   : > { %v15270_v54 = vpop.eup %15269  ;;  %v14274_v62 = vld [vmem:[#allocation9 + $0x1cc] ss:$12 sps:$4 sm:$0xff]   ;;  %v14277_v1 = vld [vmem:[#allocation9 + $0x1e4] ss:$12 sps:$4 sm:$0xff]   ;;  %v14283_v33 = vld [vmem:[#allocation9 + $0x214] ss:$12 sps:$4 sm:$0xff]  }
 0x999   : > { %13176 = vmatprep.mubr.msk.bf16.mxu1 %vm3419_vm4, %v4272_v40  ;;  %v4269_v34 = vmul.f32 %v15270_v54, %v16960_v4  ;;  %v14235_v4 = vld [vmem:[#allocation9 + $0x94] ss:$12 sps:$4 sm:$0xff]   ;;  %v14278_v16 = vld [vmem:[#allocation9 + $0x1f8] ss:$12 sps:$4 sm:$0xff]  }
 0x99a   : > { %5035 = vmatpush1.bf16.msra.mxu1 %v14218_v44  ;;  %v14321_v44 = vld [vmem:[#allocation9 + $0x218] ss:$12 sps:$4 sm:$0xff]   ;;  %v14287_v54 = vld [vmem:[#allocation9 + $0x240] ss:$12 sps:$4 sm:$0xff]  }
 0x99b   : > { %5036 = vmatprep.subr.bf16.mxu1 %v14223_v5  ;;  %v4273_v6 = vpack.c.bf16 %v4269_v34, %v4268_v10  ;;  %12785 = vmatpush3.bf16.msra.mxu0 %v14321_v44  ;;  %v14286_v40 = vld [vmem:[#allocation9 + $0x22c] ss:$12 sps:$4 sm:$0xff]   ;;  %v14326_v5 = vld [vmem:[#allocation9 + $0x230] ss:$12 sps:$4 sm:$0xff]  }
 0x99c   : > { %v14294_v10 = vld [vmem:[#allocation9 + $0x25c] ss:$12 sps:$4 sm:$0xff]   ;;  %v14292_v34 = vld [vmem:[#allocation9 + $0x258] ss:$12 sps:$4 sm:$0xff]  }
 0x99d   : > { %13177 = vmatmul.mubr.msk.bf16.gmra.mrb[92].mxu1 %vm3419_vm4, %v4273_v6  ;;  %v14297_v6 = vld [vmem:[#allocation9 + $0x270] ss:$12 sps:$4 sm:$0xff]  }
 0x99e   : > { %5037 = vmatpush1.bf16.msra.mxu1 %v14221_v41  ;;  %5064 = vmatprep.mubr.bf16.mxu1 %v16823_v37  ;;  %v14239_v37 = vld [vmem:[#allocation9 + $0xc0] ss:$12 sps:$4 sm:$0xff]  }
 0x99f   : > { %5038 = vmatprep.subr.bf16.mxu1 %v14226_v61  ;;  %v14299_v41 = vld [vmem:[#allocation9 + $0x274] ss:$12 sps:$4 sm:$0xff]   ;;  %v14304_v61 = vld [vmem:[#allocation9 + $0x28c] ss:$12 sps:$4 sm:$0xff]  }
 0x9a2   : > { %5039 = vmatpush1.bf16.msra.mxu1 %v14224_v36  ;;  %v14302_v36 = vld [vmem:[#allocation9 + $0x288] ss:$12 sps:$4 sm:$0xff]  }
 0x9a3   : > { %5040 = vmatprep.subr.bf16.mxu1 %v14229_v35  ;;  %v14307_v35 = vld [vmem:[#allocation9 + $0x2a0] ss:$12 sps:$4 sm:$0xff]  }
 0x9a6   : > { %5041 = vmatpush1.bf16.msra.mxu1 %v14227_v28  ;;  %v14314_v28 = vld [vmem:[#allocation9 + $0x2bc] ss:$12 sps:$4 sm:$0xff]  }
 0x9a7   : > { %5042 = vmatprep.subr.bf16.mxu1 %v14232_v2  ;;  %v14312_v2 = vld [vmem:[#allocation9 + $0x2b8] ss:$12 sps:$4 sm:$0xff]  }
 0x9aa   : > { %5043 = vmatpush1.bf16.msra.mxu1 %v14230_v46  ;;  %v14319_v46 = vld [vmem:[#allocation9 + $0x2d4] ss:$12 sps:$4 sm:$0xff]  }
 0x9ab   : > { %5044 = vmatprep.subr.bf16.mxu1 %v14235_v4  ;;  %v14317_v4 = vld [vmem:[#allocation9 + $0x2d0] ss:$12 sps:$4 sm:$0xff]  }
 0x9ae   : > { %5045 = vmatpush1.bf16.msra.mxu1 %v14233_v60  ;;  %v14324_v60 = vld [vmem:[#allocation9 + $0x2ec] ss:$12 sps:$4 sm:$0xff]  }
 0x9af   : > { %5046 = vmatprep.subr.bf16.mxu1 %v14238_v58  ;;  %v14322_v58 = vld [vmem:[#allocation9 + $0x2e8] ss:$12 sps:$4 sm:$0xff]  }
 0x9b2   : > { %5047 = vmatpush1.bf16.msra.mxu1 %v14236_v11 }
 0x9b3   : > { %5048 = vmatprep.subr.bf16.mxu1 %v14241_v9 }
 0x9b6   : > { %5049 = vmatpush1.bf16.msra.mxu1 %v14239_v37 }
 0x9b7   : > { %5050 = vmatprep.subr.bf16.mxu1 %v14244_v21 }
 0x9ba   : > { %5051 = vmatpush1.bf16.msra.mxu1 %v14242_v15 }
 0x9bb   : > { %5052 = vmatprep.subr.bf16.mxu1 %v14247_v26 }
 0x9be   : > { %5053 = vmatpush1.bf16.msra.mxu1 %v14245_v14 }
 0x9bf   : > { %5054 = vmatprep.subr.bf16.mxu1 %v14250_v13 }
 0x9c2   : > { %5055 = vmatpush1.bf16.msra.mxu1 %v14248_v63 }
 0x9c3   : > { %5056 = vmatprep.subr.bf16.mxu1 %v14253_v8 }
 0x9c6   : > { %5057 = vmatpush1.bf16.msra.mxu1 %v14251_v48 }
 0x9c7   : > { %5058 = vmatprep.subr.bf16.mxu1 %v14256_v43 }
 0x9ca   : > { %5059 = vmatpush1.bf16.msra.mxu1 %v14254_v19 }
 0x9cb   : > { %5060 = vmatprep.subr.bf16.mxu1 %v14259_v49 }
 0x9ce   : > { %5061 = vmatpush1.bf16.msra.mxu1 %v14257_v18  ;;  %v4503_v18 = vld [vmem:[#allocation10] sm:$0x7] }
 0x9cf   : > { %5062 = vmatprep.subr.bf16.mxu1 %v14262_v22 }
 0x9d2   : > { %5063 = vmatpush1.bf16.msra.mxu1 %v14260_v53 }
 0x9d3   : > { %5105 = vmatprep.subr.bf16.mxu1 %v14265_v31 }
 0x9d5   : > { %5065 = vmatmul.mubr.bf16.vlgmr.msra.gmra.mrb[96].mxu1 %v16815_v50  ;;  %v14275_v50 = vld [vmem:[#allocation9 + $0x1e0] ss:$12 sps:$4 sm:$0xff]  }
 0x9d6   : > { %5074 = vmatprep.mubr.bf16.mxu1 %v16821_v3  ;;  %5106 = vmatpush1.bf16.msra.mxu1 %v14263_v12  ;;  %v14280_v3 = vld [vmem:[#allocation9 + $0x1fc] ss:$12 sps:$4 sm:$0xff]  }
 0x9d7   : > { %5107 = vmatprep.subr.bf16.mxu1 %v14268_v29 }
 0x9da   : > { %5108 = vmatpush1.bf16.msra.mxu1 %v14266_v55 }
 0x9db   : > { %5109 = vmatprep.subr.bf16.mxu1 %v14271_v32 }
 0x9dd   : > { %5075 = vmatmul.mubr.bf16.gmra.mrb[100].mxu1 %v16813_v59  ;;  %v14281_v59 = vld [vmem:[#allocation9 + $0x210] ss:$12 sps:$4 sm:$0xff]  }
 0x9de   : > { %5084 = vmatprep.mubr.bf16.mxu1 %v16827_v20  ;;  %5110 = vmatpush1.bf16.msra.mxu1 %v14269_v56  ;;  %v14325_v20 = vld [vmem:[#allocation9 + $0x2f0] ss:$12 sps:$4 sm:$0xff]  }
 0x9df   : > { %5111 = vmatprep.subr.bf16.mxu1 %v14274_v62  ;;  %12786 = vmatprep.subr.bf16.mxu0 %v14325_v20  ;;  %v15304_v20 = vld [vmem:[%s16218_s14 + $0x8] sm:$0xff] }
 0x9e0   : > { %12787 = vmatpush3.bf16.msra.mxu0 %v14326_v5 }
 0x9e2   : > { %5112 = vmatpush1.bf16.msra.mxu1 %v14272_v25 }
 0x9e3   : > { %5113 = vmatprep.subr.bf16.mxu1 %v14277_v1 }
 0x9e5   : > { %5085 = vmatmul.mubr.bf16.gmra.mrb[104].mxu1 %v16819_v27  ;;  %v14284_v27 = vld [vmem:[#allocation9 + $0x228] ss:$12 sps:$4 sm:$0xff]  }
 0x9e6   : > { %5094 = vmatprep.mubr.bf16.mxu1 %v16825_v39  ;;  %5114 = vmatpush1.bf16.msra.mxu1 %v14275_v50  ;;  %v14289_v39 = vld [vmem:[#allocation9 + $0x244] ss:$12 sps:$4 sm:$0xff]  }
 0x9e7   : > { %5115 = vmatprep.subr.bf16.mxu1 %v14280_v3  ;;  %v15303_v3 = vld [vmem:[%s16218_s14] sm:$0xff] }
 0x9ea   : > { %5116 = vmatpush1.bf16.msra.mxu1 %v14278_v16 }
 0x9eb   : > { %5117 = vmatprep.subr.bf16.mxu1 %v14283_v33 }
 0x9ed   : > { %5095 = vmatmul.mubr.bf16.gmra.mrb[108].mxu1 %v16817_v47  ;;  %v14309_v47 = vld [vmem:[#allocation9 + $0x2a4] ss:$12 sps:$4 sm:$0xff]  }
 0x9ee   : > { %5118 = vmatpush1.bf16.msra.mxu1 %v14281_v59 }
 0x9ef   : > { %5119 = vmatprep.subr.bf16.mxu1 %v14286_v40 }
 0x9f2   : > { %5120 = vmatpush1.bf16.msra.mxu1 %v14284_v27 }
 0x9f3   : > { %5121 = vmatprep.subr.bf16.mxu1 %v14289_v39  ;;  %v15305_v39 = vld [vmem:[%s16218_s14 + $0x18] sm:$0xff] }
 0x9f6   : > { %5122 = vmatpush1.bf16.msra.mxu1 %v14287_v54 }
 0x9f7   : > { %5123 = vmatprep.subr.bf16.mxu1 %v14294_v10 }
 0x9fa   : > { %5124 = vmatpush1.bf16.msra.mxu1 %v14292_v34 }
 0x9fb   : > { %5125 = vmatprep.subr.bf16.mxu1 %v14299_v41  ;;  %v15307_v41 = vld [vmem:[%s16218_s14 + $0x10] sm:$0xff] }
 0x9fe   : > { %5126 = vmatpush1.bf16.msra.mxu1 %v14297_v6 }
 0x9ff   : > { %5127 = vmatprep.subr.bf16.mxu1 %v14304_v61 }
 0xa02   : > { %5128 = vmatpush1.bf16.msra.mxu1 %v14302_v36 }
 0xa03   : > { %5129 = vmatprep.subr.bf16.mxu1 %v14309_v47 }
 0xa06   : > { %5130 = vmatpush1.bf16.msra.mxu1 %v14307_v35 }
 0xa07   : > { %5131 = vmatprep.subr.bf16.mxu1 %v14314_v28  ;;  %v15308_v28 = vld [vmem:[%s16218_s14 + $0x28] sm:$0xff] }
 0xa0a   : > { %5132 = vmatpush1.bf16.msra.mxu1 %v14312_v2 }
 0xa0b   : > { %5133 = vmatprep.subr.bf16.mxu1 %v14319_v46 }
 0xa0e   : > { %5134 = vmatpush1.bf16.msra.mxu1 %v14317_v4 }
 0xa0f   : > { %5135 = vmatprep.subr.bf16.mxu1 %v14324_v60 }
 0xa12   : > { %5136 = vmatpush1.bf16.msra.mxu1 %v14322_v58 }
 0xa68   : > { %v13174_v11 = vpop.f32.mrb[88].mxu1 }
 0xa69   : > { %v4320_v9 = vpop.f32.mrb[89].mxu1 }
 0xa6a   : > { %v13175_v37 = vpop.f32.mrb[90].mxu1 }
 0xa6b   : > { %v4352_v21 = vpack.c.bf16 %v13175_v37, %v13174_v11  ;;  %v4323_v15 = vpop.f32.mrb[91].mxu1 }
 0xa6c   : > { %v4351_v26 = vpack.c.bf16 %v4323_v15, %v4320_v9 }
 0xa6e   : > { %5137 = vmatprep.mubr.bf16.mxu1 %v4351_v26  ;;  %5275 = vmatprep.mubr.bf16.mxu0 %v4351_v26 }
 0xa6f   : > { %5138 = vmatmul.mubr.bf16.vlgmr.msra.gmra.mrb[96].mxu1 %v16886_v45  ;;  %5276 = vmatmul.mubr.bf16.vlgmr.msra.gmra.mrb[96].mxu0 %v16886_v45  ;;  %v18524_v45 = vld [vmem:[#allocation35_spill] sm:$0xff] }
 0xa70   : > { %v13178_v14 = vpop.f32.mrb[92].mxu1  ;;  %5147 = vmatprep.mubr.bf16.mxu1 %v4352_v21  ;;  %5283 = vmatprep.mubr.bf16.mxu0 %v4352_v21  ;;  %v16993_v19 = vsub.s32 0, %v18524_v45  ;;  %v16996_v49 = vsub.s32 2, %v18524_v45 }
 0xa71   : > { %v4336_v13 = vpop.f32.mrb[93].mxu1 }
 0xa72   : > { %v13179_v63 = vpop.f32.mrb[94].mxu1  ;;  %v17002_v22 = vrot.slane %v4503_v18, %v16993_v19 }
 0xa73   : > { %v4354_v8 = vpack.c.bf16 %v13179_v63, %v13178_v14  ;;  %v4339_v48 = vpop.f32.mrb[95].mxu1 }
 0xa74   : > { %v4353_v43 = vpack.c.bf16 %v4339_v48, %v4336_v13  ;;  %v15309_v13 = vld [vmem:[%s16218_s14 + $0x30] sm:$0xff] }
 0xa77   : > { %5148 = vmatmul.mubr.bf16.gmra.mrb[100].mxu1 %v16884_v42  ;;  %5284 = vmatmul.mubr.bf16.gmra.mrb[100].mxu0 %v16884_v42  ;;  %v16999_v42 = vsub.s32 1, %v18524_v45 }
 0xa78   : > { %5157 = vmatprep.mubr.bf16.mxu1 %v4353_v43  ;;  %5291 = vmatprep.mubr.bf16.mxu0 %v4353_v43  ;;  %v15310_v43 = vld [vmem:[%s16218_s14 + $0x38] sm:$0xff] }
 0xa79   : > { %v17008_v53 = vrot.slane %v4503_v18, %v16999_v42 }
 0xa7f   : > { %5158 = vmatmul.mubr.bf16.gmra.mrb[104].mxu1 %v16890_v51  ;;  %5292 = vmatmul.mubr.bf16.gmra.mrb[104].mxu0 %v16890_v51  ;;  %v17005_v51 = vrot.slane %v4503_v18, %v16996_v49 }
 0xa80   : > { %5167 = vmatprep.mubr.bf16.mxu1 %v4354_v8  ;;  %5299 = vmatprep.mubr.bf16.mxu0 %v4354_v8 }
 0xa81   : > { %v5213_v32 = vadd.f32 %v16914_v57, %v17005_v51  ;;  %v5216_v50 = vadd.f32 %v16916_v38, %v17005_v51  ;;  %v15306_v38 = vld [vmem:[%s16218_s14 + $0x20] sm:$0xff]  ;;  %v5221_v11 = vadd.f32 %v16918_v23, %v17005_v51  ;;  %v5224_v14 = vadd.f32 %v16920_v0, %v17005_v51  ;;  %v15312_v0 = vld [vmem:[%s16218_s14 + $0x50] sm:$0xff] }
 0xa87   : > { %5168 = vmatmul.mubr.bf16.gmra.mrb[108].mxu1 %v16888_v7  ;;  %5300 = vmatmul.mubr.bf16.gmra.mrb[108].mxu0 %v16888_v7 }
 0xb42   : > { %v5139_v7 = vpop.f32.mrb[96].mxu1  ;;  %v12788_v31 = vpop.f32.mrb[96].mxu0 }
 0xb43   : > { %v13196_v12 = vadd.f32 %v5139_v7, %v17002_v22  ;;  %v5141_v29 = vpop.f32.mrb[97].mxu1  ;;  %v12789_v55 = vpop.f32.mrb[97].mxu0 }
 0xb44   : > { %v13197_v56 = vadd.f32 %v5141_v29, %v17008_v53  ;;  %v12790_v62 = vadd.f32 %v12789_v55, %v12788_v31  ;;  %v5143_v25 = vpop.f32.mrb[98].mxu1  ;;  %v12791_v1 = vpop.f32.mrb[98].mxu0  ;;  %v15311_v29 = vld [vmem:[%s16218_s14 + $0x48] sm:$0xff] }
 0xb45   : > { %v17017_v16 = vadd.f32 %v15303_v3, %v13196_v12  ;;  %v13198_v33 = vadd.f32 %v5143_v25, %v17002_v22  ;;  %v5145_v44 = vpop.f32.mrb[99].mxu1  ;;  %v12792_v59 = vpop.f32.mrb[99].mxu0 }
 0xb46   : > { %v17021_v57 = vadd.f32 %v15304_v20, %v13197_v56  ;;  %v5278_v40 = vadd.f32 %v12790_v62, %v5213_v32  ;;  %v13199_v5 = vadd.f32 %v5145_v44, %v17008_v53  ;;  %v12793_v27 = vadd.f32 %v12792_v59, %v12791_v1  ;;  %v15313_v62 = vld [vmem:[%s16218_s14 + $0x40] sm:$0xff]  ;;  %v15314_v44 = vld [vmem:[%s16218_s14 + $0x58] sm:$0xff] }
 0xb47   : > { %v17025_v54 = vadd.f32 %v15305_v39, %v13198_v33  ;;  %v5229_v39 = vadd.f32 %v16922_v52, %v17005_v51 }
 0xb48   : > { %v17028_v10 = vadd.f32 %v15306_v38, %v13199_v5  ;;  %v5281_v34 = vadd.f32 %v12793_v27, %v5216_v50  ;;  %v17031_v6 = vadd.f32 %v15307_v41, %v5278_v40  ;;  %v5334_v61 = vadd.f32 %v17021_v57, %v17017_v16 }
 0xb4a   : > { %v5149_v36 = vpop.f32.mrb[100].mxu1  ;;  %v12794_v47 = vpop.f32.mrb[100].mxu0  ;;  %v5335_v35 = vadd.f32 %v5334_v61, %v17031_v6  ;;  %v17037_v2 = vadd.f32 %v15308_v28, %v5281_v34  ;;  %v5338_v46 = vadd.f32 %v17028_v10, %v17025_v54 }
 0xb4b   : > { %v13200_v4 = vadd.f32 %v5149_v36, %v17002_v22  ;;  %v5151_v60 = vpop.f32.mrb[101].mxu1  ;;  %v12795_v58 = vpop.f32.mrb[101].mxu0 }
 0xb4c   : > { %v13201_v9 = vadd.f32 %v5151_v60, %v17008_v53  ;;  %v12796_v37 = vadd.f32 %v12795_v58, %v12794_v47  ;;  %v5153_v21 = vpop.f32.mrb[102].mxu1  ;;  %v12797_v15 = vpop.f32.mrb[102].mxu0  ;;  %5336 = vadd.xlane.f32.xlu0 %v5335_v35  ;;  %v5339_v26 = vadd.f32 %v5338_v46, %v17037_v2  ;;  %v5232_v47 = vadd.f32 %v16924_v17, %v17005_v51  ;;  %v15315_v35 = vld [vmem:[%s16218_s14 + $0x60] sm:$0xff]  ;;  %v15316_v60 = vld [vmem:[%s16218_s14 + $0x68] sm:$0xff] }
 0xb4d   : > { %v17049_v63 = vadd.f32 %v15309_v13, %v13200_v4  ;;  %v13202_v8 = vadd.f32 %v5153_v21, %v17002_v22  ;;  %v5155_v23 = vpop.f32.mrb[103].mxu1  ;;  %v12798_v48 = vpop.f32.mrb[103].mxu0  ;;  %v15317_v21 = vld [vmem:[%s16218_s14 + $0x78] sm:$0xff]  ;;  %v15318_v17 = vld [vmem:[%s16218_s14 + $0x80] sm:$0xff]  ;;  %v15319_v13 = vld [vmem:[%s16218_s14 + $0x70] sm:$0xff] }
 0xb4e   : > { %v17053_v18 = vadd.f32 %v15310_v43, %v13201_v9  ;;  %v5286_v7 = vadd.f32 %v12796_v37, %v5221_v11  ;;  %v13203_v31 = vadd.f32 %v5155_v23, %v17008_v53  ;;  %v12799_v12 = vadd.f32 %v12798_v48, %v12797_v15  ;;  %5340 = vadd.xlane.f32.xlu1 %v5339_v26 }
 0xb4f   : > { %v17057_v55 = vadd.f32 %v15311_v29, %v13202_v8 }
 0xb50   : > { %v17060_v32 = vadd.f32 %v15312_v0, %v13203_v31  ;;  %v5289_v56 = vadd.f32 %v12799_v12, %v5224_v14  ;;  %v17063_v25 = vadd.f32 %v15313_v62, %v5286_v7  ;;  %v5342_v1 = vadd.f32 %v17053_v18, %v17049_v63  ;;  %v15320_v31 = vld [vmem:[%s16218_s14 + $0x88] sm:$0xff] }
 0xb52   : > { %v5159_v50 = vpop.f32.mrb[104].mxu1  ;;  %v12800_v3 = vpop.f32.mrb[104].mxu0  ;;  %v5343_v33 = vadd.f32 %v5342_v1, %v17063_v25  ;;  %v17069_v59 = vadd.f32 %v15314_v44, %v5289_v56  ;;  %v5346_v20 = vadd.f32 %v17060_v32, %v17057_v55  ;;  %v5237_v1 = vadd.f32 %v16926_v24, %v17005_v51 }
 0xb53   : > { %v13204_v40 = vadd.f32 %v5159_v50, %v17002_v22  ;;  %v5161_v5 = vpop.f32.mrb[105].mxu1  ;;  %v12801_v27 = vpop.f32.mrb[105].mxu0 }
 0xb54   : > { %v13205_v38 = vadd.f32 %v5161_v5, %v17008_v53  ;;  %v12802_v34 = vadd.f32 %v12801_v27, %v12800_v3  ;;  %v5163_v41 = vpop.f32.mrb[106].mxu1  ;;  %v12803_v61 = vpop.f32.mrb[106].mxu0  ;;  %5344 = vadd.xlane.f32.xlu0 %v5343_v33  ;;  %v5347_v36 = vadd.f32 %v5346_v20, %v17069_v59  ;;  %v15321_v5 = vld [vmem:[%s16218_s14 + $0x90] sm:$0xff] }
 0xb55   : > { %v17081_v28 = vadd.f32 %v15315_v35, %v13204_v40  ;;  %v13206_v46 = vadd.f32 %v5163_v41, %v17002_v22  ;;  %v5165_v52 = vpop.f32.mrb[107].mxu1  ;;  %v12804_v4 = vpop.f32.mrb[107].mxu0  ;;  %v5240_v40 = vadd.f32 %v16928_v30, %v17005_v51  ;;  %v15323_v35 = vld [vmem:[%s16218_s14 + $0xa8] sm:$0xff]  ;;  %v15324_v30 = vld [vmem:[%s16218_s14 + $0xb0] sm:$0xff] }
 0xb56   : > { %v17085_v58 = vadd.f32 %v15316_v60, %v13205_v38  ;;  %v5294_v11 = vadd.f32 %v12802_v34, %v5229_v39  ;;  %v13207_v9 = vadd.f32 %v5165_v52, %v17008_v53  ;;  %v12805_v37 = vadd.f32 %v12804_v4, %v12803_v61  ;;  %5348 = vadd.xlane.f32.xlu1 %v5347_v36  ;;  %v15322_v34 = vld [vmem:[%s16218_s14 + $0x98] sm:$0xff]  ;;  %v15325_v4 = vld [vmem:[%s16218_s14 + $0xa0] sm:$0xff] }
 0xb57   : > { %v17089_v15 = vadd.f32 %v15317_v21, %v13206_v46 }
 0xb58   : > { %v17092_v26 = vadd.f32 %v15318_v17, %v13207_v9  ;;  %v5297_v14 = vadd.f32 %v12805_v37, %v5232_v47  ;;  %v17095_v8 = vadd.f32 %v15319_v13, %v5294_v11  ;;  %v5350_v23 = vadd.f32 %v17085_v58, %v17081_v28  ;;  %v15326_v9 = vld [vmem:[%s16218_s14 + $0xb8] sm:$0xff]  ;;  %v14327_v17 = vld [vmem:[#allocation12] ss:$48 sps:$4 sm:$0xff]   ;;  %s15671_s14 = scalar_lea.vmem %s15670_s17, 6144 }
 0xb59   : > { %v14330_v13 = vld [vmem:[#allocation12 + $0x8] ss:$48 sps:$4 sm:$0xff]   ;;  %p15673_p0 = scmp.lt.s32.totalorder %s15671_s14, %s15665_s15 }
 0xb5a   : > { %v5169_v48 = vpop.f32.mrb[108].mxu1  ;;  %v12806_v43 = vpop.f32.mrb[108].mxu0  ;;  %v5351_v7 = vadd.f32 %v5350_v23, %v17095_v8  ;;  %v17101_v12 = vadd.f32 %v15320_v31, %v5297_v14  ;;  %v5354_v29 = vadd.f32 %v17092_v26, %v17089_v15  ;;  %v14329_v14 = vld [vmem:[#allocation12 + $0x4] ss:$48 sps:$4 sm:$0xff]   ;;  %v14332_v23 = vld [vmem:[#allocation12 + $0xc] ss:$48 sps:$4 sm:$0xff]  }
 0xb5b   : > { %v13208_v0 = vadd.f32 %v5169_v48, %v17002_v22  ;;  %v5171_v56 = vpop.f32.mrb[109].mxu1  ;;  %v12807_v62 = vpop.f32.mrb[109].mxu0  ;;  %v14335_v48 = vld [vmem:[#allocation12 + $0x64] ss:$48 sps:$4 sm:$0xff]   ;;  %7387 = vmatprep.subr.bf16.mxu0 %v14329_v14  ;;  %7533 = vmatprep.subr.bf16.mxu1 %v14332_v23  ;;  %v14336_v31 = vld [vmem:[#allocation12 + $0x68] ss:$48 sps:$4 sm:$0xff]   ;;  %p15674_p5 = por %p15673_p0, %p15672_p11 }
 0xb5c   : > { %v13209_v50 = vadd.f32 %v5171_v56, %v17008_v53  ;;  %v12808_v3 = vadd.f32 %v12807_v62, %v12806_v43  ;;  %v5173_v33 = vpop.f32.mrb[110].mxu1  ;;  %v12809_v44 = vpop.f32.mrb[110].mxu0  ;;  %5352 = vadd.xlane.f32.xlu0 %v5351_v7  ;;  %v5355_v20 = vadd.f32 %v5354_v29, %v17101_v12  ;;  %v14338_v43 = vld [vmem:[#allocation12 + $0x6c] ss:$48 sps:$4 sm:$0xff]   ;;  %7388 = vmatpush1.bf16.msra.mxu0 %v14327_v17  ;;  %v14333_v7 = vld [vmem:[#allocation12 + $0x60] ss:$48 sps:$4 sm:$0xff]  }
 0xb5d   : > { %v17113_v27 = vadd.f32 %v15321_v5, %v13208_v0  ;;  %v13210_v39 = vadd.f32 %v5173_v33, %v17002_v22  ;;  %v5175_v24 = vpop.f32.mrb[111].mxu1  ;;  %v12810_v38 = vpop.f32.mrb[111].mxu0  ;;  %7534 = vmatpush1.bf16.msra.mxu1 %v14330_v13  ;;  %7389 = vmatprep.subr.bf16.mxu0 %v14335_v48  ;;  %v14341_v29 = vld [vmem:[#allocation12 + $0xc4] ss:$48 sps:$4 sm:$0xff]   ;;  %v14344_v0 = vld [vmem:[#allocation12 + $0xcc] ss:$48 sps:$4 sm:$0xff]   ;;  %p15675_p9 = pnand %p15674_p5, %p15668_p10 }
 0xb5e   : > { %v17117_v41 = vadd.f32 %v15322_v34, %v13209_v50  ;;  %v5302_v61 = vadd.f32 %v12808_v3, %v5237_v1  ;;  %v13211_v36 = vadd.f32 %v5175_v24, %v17008_v53  ;;  %v12811_v47 = vadd.f32 %v12810_v38, %v12809_v44  ;;  %5356 = vadd.xlane.f32.xlu1 %v5355_v20  ;;  %v14339_v56 = vld [vmem:[#allocation12 + $0xc0] ss:$48 sps:$4 sm:$0xff]   ;;  %v14342_v62 = vld [vmem:[#allocation12 + $0xc8] ss:$48 sps:$4 sm:$0xff]   ;;  %v14347_v1 = vld [vmem:[#allocation12 + $0x124] ss:$48 sps:$4 sm:$0xff]  }
 0xb5f   : > { %v17121_v46 = vadd.f32 %v15323_v35, %v13210_v39  ;;  %7535 = vmatprep.subr.bf16.mxu1 %v14338_v43  ;;  %v14350_v50 = vld [vmem:[#allocation12 + $0x12c] ss:$48 sps:$4 sm:$0xff]   ;;  %v14345_v3 = vld [vmem:[#allocation12 + $0x120] ss:$48 sps:$4 sm:$0xff]   ;;  %v14348_v33 = vld [vmem:[#allocation12 + $0x128] ss:$48 sps:$4 sm:$0xff]  }
 0xb60   : > { %v17124_v51 = vadd.f32 %v15324_v30, %v13211_v36  ;;  %v5305_v52 = vadd.f32 %v12811_v47, %v5240_v40  ;;  %v17127_v22 = vadd.f32 %v15325_v4, %v5302_v61  ;;  %v5358_v60 = vadd.f32 %v17117_v41, %v17113_v27  ;;  %7390 = vmatpush1.bf16.msra.mxu0 %v14333_v7  ;;  %v14353_v44 = vld [vmem:[#allocation12 + $0x184] ss:$48 sps:$4 sm:$0xff]   ;;  %v14356_v20 = vld [vmem:[#allocation12 + $0x18c] ss:$48 sps:$4 sm:$0xff]   ;;  %v14351_v40 = vld [vmem:[#allocation12 + $0x180] ss:$48 sps:$4 sm:$0xff]  }
 0xb61   : > { %7536 = vmatpush1.bf16.msra.mxu1 %v14336_v31  ;;  %7391 = vmatprep.subr.bf16.mxu0 %v14341_v29  ;;  %v14354_v5 = vld [vmem:[#allocation12 + $0x188] ss:$48 sps:$4 sm:$0xff]   ;;  %v14359_v39 = vld [vmem:[#allocation12 + $0x1e4] ss:$48 sps:$4 sm:$0xff]   ;;  %v14362_v24 = vld [vmem:[#allocation12 + $0x1ec] ss:$48 sps:$4 sm:$0xff]  }
 0xb62   : > { %v5359_v11 = vadd.f32 %v5358_v60, %v17127_v22  ;;  %v17133_v37 = vadd.f32 %v15326_v9, %v5305_v52  ;;  %v5362_v53 = vadd.f32 %v17124_v51, %v17121_v46  ;;  %7537 = vmatprep.subr.bf16.mxu1 %v14344_v0  ;;  %v14357_v38 = vld [vmem:[#allocation12 + $0x1e0] ss:$48 sps:$4 sm:$0xff]   ;;  %v14360_v34 = vld [vmem:[#allocation12 + $0x1e8] ss:$48 sps:$4 sm:$0xff]   ;;  %v14365_v61 = vld [vmem:[#allocation12 + $0x244] ss:$48 sps:$4 sm:$0xff]  }
 0xb63   : > { %v14368_v36 = vld [vmem:[#allocation12 + $0x24c] ss:$48 sps:$4 sm:$0xff]   ;;  %v14363_v47 = vld [vmem:[#allocation12 + $0x240] ss:$48 sps:$4 sm:$0xff]   ;;  %v14366_v35 = vld [vmem:[#allocation12 + $0x248] ss:$48 sps:$4 sm:$0xff]  }
 0xb64   : > { %5360 = vadd.xlane.f32.xlu0 %v5359_v11  ;;  %v5363_v21 = vadd.f32 %v5362_v53, %v17133_v37  ;;  %7392 = vmatpush1.bf16.msra.mxu0 %v14339_v56  ;;  %v14371_v30 = vld [vmem:[#allocation12 + $0x2a4] ss:$48 sps:$4 sm:$0xff]   ;;  %v14374_v52 = vld [vmem:[#allocation12 + $0x2ac] ss:$48 sps:$4 sm:$0xff]   ;;  %v14369_v4 = vld [vmem:[#allocation12 + $0x2a0] ss:$48 sps:$4 sm:$0xff]  }
 0xb65   : > { %7538 = vmatpush1.bf16.msra.mxu1 %v14342_v62  ;;  %7393 = vmatprep.subr.bf16.mxu0 %v14347_v1  ;;  %v14372_v60 = vld [vmem:[#allocation12 + $0x2a8] ss:$48 sps:$4 sm:$0xff]   ;;  %v14377_v11 = vld [vmem:[#allocation12 + $0x304] ss:$48 sps:$4 sm:$0xff]   ;;  %v14380_v9 = vld [vmem:[#allocation12 + $0x30c] ss:$48 sps:$4 sm:$0xff]  }
 0xb66   : > { %5364 = vadd.xlane.f32.xlu1 %v5363_v21  ;;  %7539 = vmatprep.subr.bf16.mxu1 %v14350_v50  ;;  %v14375_v53 = vld [vmem:[#allocation12 + $0x300] ss:$48 sps:$4 sm:$0xff]   ;;  %v14378_v21 = vld [vmem:[#allocation12 + $0x308] ss:$48 sps:$4 sm:$0xff]   ;;  %v14383_v17 = vld [vmem:[#allocation12 + $0x364] ss:$48 sps:$4 sm:$0xff]  }
 0xb67   : > { %v14386_v14 = vld [vmem:[#allocation12 + $0x36c] ss:$48 sps:$4 sm:$0xff]   ;;  %v14381_v13 = vld [vmem:[#allocation12 + $0x360] ss:$48 sps:$4 sm:$0xff]   ;;  %v14384_v23 = vld [vmem:[#allocation12 + $0x368] ss:$48 sps:$4 sm:$0xff]  }
 0xb68   : > { %7394 = vmatpush1.bf16.msra.mxu0 %v14345_v3 }
 0xb69   : > { %7540 = vmatpush1.bf16.msra.mxu1 %v14348_v33  ;;  %7395 = vmatprep.subr.bf16.mxu0 %v14353_v44 }
 0xb6a   : > { %7541 = vmatprep.subr.bf16.mxu1 %v14356_v20 }
 0xb6c   : > { %7396 = vmatpush1.bf16.msra.mxu0 %v14351_v40 }
 0xb6d   : > { %7542 = vmatpush1.bf16.msra.mxu1 %v14354_v5  ;;  %7397 = vmatprep.subr.bf16.mxu0 %v14359_v39 }
 0xb6e   : > { %7543 = vmatprep.subr.bf16.mxu1 %v14362_v24 }
 0xb70   : > { %7398 = vmatpush1.bf16.msra.mxu0 %v14357_v38 }
 0xb71   : > { %7544 = vmatpush1.bf16.msra.mxu1 %v14360_v34  ;;  %7399 = vmatprep.subr.bf16.mxu0 %v14365_v61 }
 0xb72   : > { %7545 = vmatprep.subr.bf16.mxu1 %v14368_v36 }
 0xb74   : > { %7400 = vmatpush1.bf16.msra.mxu0 %v14363_v47 }
 0xb75   : > { %7546 = vmatpush1.bf16.msra.mxu1 %v14366_v35  ;;  %7401 = vmatprep.subr.bf16.mxu0 %v14371_v30 }
 0xb76   : > { %7547 = vmatprep.subr.bf16.mxu1 %v14374_v52 }
 0xb78   : > { %7402 = vmatpush1.bf16.msra.mxu0 %v14369_v4 }
 0xb79   : > { %7548 = vmatpush1.bf16.msra.mxu1 %v14372_v60  ;;  %7403 = vmatprep.subr.bf16.mxu0 %v14377_v11 }
 0xb7a   : > { %7549 = vmatprep.subr.bf16.mxu1 %v14380_v9 }
 0xb7c   : > { %7404 = vmatpush1.bf16.msra.mxu0 %v14375_v53 }
 0xb7d   : > { %7550 = vmatpush1.bf16.msra.mxu1 %v14378_v21  ;;  %7405 = vmatprep.subr.bf16.mxu0 %v14383_v17 }
 0xb7e   : > { %7551 = vmatprep.subr.bf16.mxu1 %v14386_v14 }
 0xb80   : > { %7406 = vmatpush1.bf16.msra.mxu0 %v14381_v13 }
 0xb81   : > { %7552 = vmatpush1.bf16.msra.mxu1 %v14384_v23 }
 0xbd9   : > { %v5337_v48 = vpop.xlane.xlu0 %5336 }
 0xbda   : > { %v5367_v43 = vmul.f32 0.0026041667, %v5337_v48 }
 0xbdb   : > { %v5341_v7 = vpop.xlane.xlu1 %5340 }
 0xbdc   : > { %v17139_v31 = vsub.f32 %v17017_v16, %v5367_v43  ;;  %v17142_v29 = vsub.f32 %v17021_v57, %v5367_v43  ;;  %v5368_v0 = vmul.f32 0.0026041667, %v5341_v7  ;;  %v17145_v56 = vsub.f32 %v17031_v6, %v5367_v43 }
 0xbde   : > { %v17148_v62 = vsub.f32 %v17025_v54, %v5368_v0  ;;  %v17151_v1 = vsub.f32 %v17028_v10, %v5368_v0  ;;  %v5399_v50 = vmul.f32 %v17139_v31, %v17139_v31  ;;  %v17156_v3 = vsub.f32 %v17037_v2, %v5368_v0 }
 0xbdf   : > { %v5400_v16 = vmul.f32 %v17142_v29, %v17142_v29  ;;  %v5401_v10 = vmul.f32 %v17145_v56, %v17145_v56 }
 0xbe0   : > { %v5402_v57 = vmul.f32 %v17148_v62, %v17148_v62  ;;  %v5403_v6 = vmul.f32 %v17151_v1, %v17151_v1  ;;  %v5404_v2 = vmul.f32 %v17156_v3, %v17156_v3 }
 0xbe1   : > { %v5345_v54 = vpop.xlane.xlu0 %5344  ;;  %v5423_v33 = vadd.f32 %v5400_v16, %v5399_v50 }
 0xbe2   : > { %v5369_v44 = vmul.f32 0.0026041667, %v5345_v54  ;;  %v5427_v20 = vadd.f32 %v5403_v6, %v5402_v57  ;;  %v14389_v57 = vld [vmem:[#allocation12 + $0x3c4] ss:$48 sps:$4 sm:$0xff]  }
 0xbe3   : > { %v5349_v40 = vpop.xlane.xlu1 %5348  ;;  %v5424_v5 = vadd.f32 %v5423_v33, %v5401_v10  ;;  %v14387_v33 = vld [vmem:[#allocation12 + $0x3c0] ss:$48 sps:$4 sm:$0xff]   ;;  %7407 = vmatprep.subr.bf16.mxu0 %v14389_v57  ;;  %v14422_v57 = vld [vmem:[#allocation12 + $0x5ac] ss:$48 sps:$4 sm:$0xff]  }
 0xbe4   : > { %v17169_v39 = vsub.f32 %v17049_v63, %v5369_v44  ;;  %v17172_v24 = vsub.f32 %v17053_v18, %v5369_v44  ;;  %v5370_v38 = vmul.f32 0.0026041667, %v5349_v40  ;;  %v17175_v34 = vsub.f32 %v17063_v25, %v5369_v44  ;;  %v14390_v44 = vld [vmem:[#allocation12 + $0x3c8] ss:$48 sps:$4 sm:$0xff]   ;;  %7408 = vmatpush1.bf16.msra.mxu0 %v14387_v33 }
 0xbe5   : > { %5425 = vadd.xlane.f32.xlu0 %v5424_v5  ;;  %v5428_v61 = vadd.f32 %v5427_v20, %v5404_v2 }
 0xbe6   : > { %v17178_v36 = vsub.f32 %v17057_v55, %v5370_v38  ;;  %v17181_v47 = vsub.f32 %v17060_v32, %v5370_v38  ;;  %v5405_v35 = vmul.f32 %v17169_v39, %v17169_v39  ;;  %v17186_v63 = vsub.f32 %v17069_v59, %v5370_v38 }
 0xbe7   : > { %5429 = vadd.xlane.f32.xlu1 %v5428_v61  ;;  %v5406_v18 = vmul.f32 %v17172_v24, %v17172_v24  ;;  %v5407_v32 = vmul.f32 %v17175_v34, %v17175_v34 }
 0xbe8   : > { %v5408_v25 = vmul.f32 %v17178_v36, %v17178_v36  ;;  %v5409_v55 = vmul.f32 %v17181_v47, %v17181_v47  ;;  %v5410_v9 = vmul.f32 %v17186_v63, %v17186_v63 }
 0xbe9   : > { %v5353_v30 = vpop.xlane.xlu0 %5352  ;;  %v5431_v52 = vadd.f32 %v5406_v18, %v5405_v35  ;;  %v14395_v18 = vld [vmem:[#allocation12 + $0x424] ss:$48 sps:$4 sm:$0xff]  }
 0xbea   : > { %v5371_v4 = vmul.f32 0.0026041667, %v5353_v30  ;;  %v5435_v60 = vadd.f32 %v5409_v55, %v5408_v25  ;;  %v14398_v25 = vld [vmem:[#allocation12 + $0x42c] ss:$48 sps:$4 sm:$0xff]   ;;  %v14393_v55 = vld [vmem:[#allocation12 + $0x420] ss:$48 sps:$4 sm:$0xff]   ;;  %7409 = vmatprep.subr.bf16.mxu0 %v14395_v18 }
 0xbeb   : > { %v5357_v11 = vpop.xlane.xlu1 %5356  ;;  %v5432_v59 = vadd.f32 %v5431_v52, %v5407_v32  ;;  %v14396_v30 = vld [vmem:[#allocation12 + $0x428] ss:$48 sps:$4 sm:$0xff]   ;;  %7410 = vmatpush1.bf16.msra.mxu0 %v14393_v55 }
 0xbec   : > { %v17199_v53 = vsub.f32 %v17081_v28, %v5371_v4  ;;  %v17202_v21 = vsub.f32 %v17085_v58, %v5371_v4  ;;  %v5372_v17 = vmul.f32 0.0026041667, %v5357_v11  ;;  %v17205_v14 = vsub.f32 %v17095_v8, %v5371_v4  ;;  %v14404_v11 = vld [vmem:[#allocation12 + $0x48c] ss:$48 sps:$4 sm:$0xff]  }
 0xbed   : > { %5433 = vadd.xlane.f32.xlu0 %v5432_v59  ;;  %v5436_v13 = vadd.f32 %v5435_v60, %v5410_v9  ;;  %v14401_v60 = vld [vmem:[#allocation12 + $0x484] ss:$48 sps:$4 sm:$0xff]   ;;  %v14399_v9 = vld [vmem:[#allocation12 + $0x480] ss:$48 sps:$4 sm:$0xff]  }
 0xbee   : > { %v17208_v23 = vsub.f32 %v17089_v15, %v5372_v17  ;;  %v17211_v48 = vsub.f32 %v17092_v26, %v5372_v17  ;;  %v5411_v43 = vmul.f32 %v17199_v53, %v17199_v53  ;;  %v17216_v28 = vsub.f32 %v17101_v12, %v5372_v17  ;;  %v14392_v12 = vld [vmem:[#allocation12 + $0x3cc] ss:$48 sps:$4 sm:$0xff]   ;;  %v14402_v17 = vld [vmem:[#allocation12 + $0x488] ss:$48 sps:$4 sm:$0xff]   ;;  %7411 = vmatprep.subr.bf16.mxu0 %v14401_v60 }
 0xbef   : > { %5437 = vadd.xlane.f32.xlu1 %v5436_v13  ;;  %v5412_v58 = vmul.f32 %v17202_v21, %v17202_v21  ;;  %v5413_v26 = vmul.f32 %v17205_v14, %v17205_v14  ;;  %7553 = vmatprep.subr.bf16.mxu1 %v14392_v12  ;;  %v14417_v12 = vld [vmem:[#allocation12 + $0x5a0] ss:$48 sps:$4 sm:$0xff]  }
 0xbf0   : > { %v5414_v8 = vmul.f32 %v17208_v23, %v17208_v23  ;;  %v5415_v15 = vmul.f32 %v17211_v48, %v17211_v48  ;;  %v5416_v10 = vmul.f32 %v17216_v28, %v17216_v28  ;;  %7554 = vmatpush1.bf16.msra.mxu1 %v14390_v44  ;;  %7412 = vmatpush1.bf16.msra.mxu0 %v14399_v9 }
 0xbf1   : > { %v5361_v7 = vpop.xlane.xlu0 %5360  ;;  %v5439_v0 = vadd.f32 %v5412_v58, %v5411_v43  ;;  %7555 = vmatprep.subr.bf16.mxu1 %v14398_v25  ;;  %v14407_v43 = vld [vmem:[#allocation12 + $0x4e4] ss:$48 sps:$4 sm:$0xff]   ;;  %v14410_v58 = vld [vmem:[#allocation12 + $0x4ec] ss:$48 sps:$4 sm:$0xff]  }
 0xbf2   : > { %v5373_v50 = vmul.f32 0.0026041667, %v5361_v7  ;;  %v5443_v16 = vadd.f32 %v5415_v15, %v5414_v8  ;;  %v14405_v8 = vld [vmem:[#allocation12 + $0x4e0] ss:$48 sps:$4 sm:$0xff]   ;;  %v14408_v15 = vld [vmem:[#allocation12 + $0x4e8] ss:$48 sps:$4 sm:$0xff]   ;;  %7413 = vmatprep.subr.bf16.mxu0 %v14407_v43 }
 0xbf3   : > { %v5365_v6 = vpop.xlane.xlu1 %5364  ;;  %v5440_v54 = vadd.f32 %v5439_v0, %v5413_v26  ;;  %v14413_v7 = vld [vmem:[#allocation12 + $0x544] ss:$48 sps:$4 sm:$0xff]   ;;  %v14416_v26 = vld [vmem:[#allocation12 + $0x54c] ss:$48 sps:$4 sm:$0xff]   ;;  %v14411_v0 = vld [vmem:[#allocation12 + $0x540] ss:$48 sps:$4 sm:$0xff]  }
 0xbf4   : > { %v17229_v20 = vsub.f32 %v17113_v27, %v5373_v50  ;;  %v17232_v40 = vsub.f32 %v17117_v41, %v5373_v50  ;;  %v5374_v5 = vmul.f32 0.0026041667, %v5365_v6  ;;  %v17235_v2 = vsub.f32 %v17127_v22, %v5373_v50  ;;  %7556 = vmatpush1.bf16.msra.mxu1 %v14396_v30  ;;  %7414 = vmatpush1.bf16.msra.mxu0 %v14405_v8  ;;  %v14414_v50 = vld [vmem:[#allocation12 + $0x548] ss:$48 sps:$4 sm:$0xff]  }
 0xbf5   : > { %5441 = vadd.xlane.f32.xlu0 %v5440_v54  ;;  %v5444_v38 = vadd.f32 %v5443_v16, %v5416_v10  ;;  %7557 = vmatprep.subr.bf16.mxu1 %v14404_v11  ;;  %v14419_v16 = vld [vmem:[#allocation12 + $0x5a4] ss:$48 sps:$4 sm:$0xff]   ;;  %v14420_v6 = vld [vmem:[#allocation12 + $0x5a8] ss:$48 sps:$4 sm:$0xff]   ;;  %v14428_v10 = vld [vmem:[#allocation12 + $0x60c] ss:$48 sps:$4 sm:$0xff]  }
 0xbf6   : > { %v17238_v61 = vsub.f32 %v17121_v46, %v5374_v5  ;;  %v17241_v35 = vsub.f32 %v17124_v51, %v5374_v5  ;;  %v17244_v27 = vsub.f32 %v17133_v37, %v5374_v5  ;;  %v5417_v41 = vmul.f32 %v17229_v20, %v17229_v20  ;;  %7415 = vmatprep.subr.bf16.mxu0 %v14413_v7  ;;  %v14425_v54 = vld [vmem:[#allocation12 + $0x604] ss:$48 sps:$4 sm:$0xff]  }
 0xbf7   : > { %5445 = vadd.xlane.f32.xlu1 %v5444_v38  ;;  %v5418_v22 = vmul.f32 %v17232_v40, %v17232_v40  ;;  %v5419_v37 = vmul.f32 %v17235_v2, %v17235_v2 }
 0xbf8   : > { %v5420_v46 = vmul.f32 %v17238_v61, %v17238_v61  ;;  %v5421_v51 = vmul.f32 %v17241_v35, %v17241_v35  ;;  %v5422_v52 = vmul.f32 %v17244_v27, %v17244_v27  ;;  %7558 = vmatpush1.bf16.msra.mxu1 %v14402_v17  ;;  %7416 = vmatpush1.bf16.msra.mxu0 %v14411_v0 }
 0xbf9   : > { %v5447_v32 = vadd.f32 %v5418_v22, %v5417_v41  ;;  %7559 = vmatprep.subr.bf16.mxu1 %v14410_v58  ;;  %7417 = vmatprep.subr.bf16.mxu0 %v14419_v16 }
 0xbfa   : > { %v5451_v4 = vadd.f32 %v5421_v51, %v5420_v46  ;;  %v17258_v51 = vld [vmem:[#allocation18] sm:$0x7] }
 0xbfb   : > { %v5448_v59 = vadd.f32 %v5447_v32, %v5419_v37  ;;  %v17260_v32 = vld [vmem:[#allocation19] sm:$0x7] }
 0xbfc   : > { %v5452_v13 = vadd.f32 %v5451_v4, %v5422_v52  ;;  %7560 = vmatpush1.bf16.msra.mxu1 %v14408_v15  ;;  %7418 = vmatpush1.bf16.msra.mxu0 %v14417_v12  ;;  %v17264_v52 = vrot.slane %v17258_v51, %v16999_v42  ;;  %v17268_v4 = vrot.slane %v17258_v51, %v16993_v19 }
 0xbfd   : > { %5449 = vadd.xlane.f32.xlu0 %v5448_v59  ;;  %7561 = vmatprep.subr.bf16.mxu1 %v14416_v26  ;;  %v17280_v43 = vrot.slane %v17260_v32, %v16999_v42  ;;  %v17284_v58 = vrot.slane %v17260_v32, %v16993_v19 }
 0xbfe   : > { %5453 = vadd.xlane.f32.xlu1 %v5452_v13  ;;  %7460 = vmatprep.subr.bf16.mxu0 %v14425_v54 }
 0xc00   : > { %7562 = vmatpush1.bf16.msra.mxu1 %v14414_v50 }
 0xc01   : > { %7563 = vmatprep.subr.bf16.mxu1 %v14422_v57 }
 0xc04   : > { %7564 = vmatpush1.bf16.msra.mxu1 %v14420_v6 }
 0xc05   : > { %7606 = vmatprep.subr.bf16.mxu1 %v14428_v10 }
 0xc72   : > { %v5426_v33 = vpop.xlane.xlu0 %5425 }
 0xc73   : > { %v5455_v44 = vmul.f32 0.0026041667, %v5426_v33  ;;  %v14423_v33 = vld [vmem:[#allocation12 + $0x600] ss:$48 sps:$4 sm:$0xff]  }
 0xc74   : > { %v5430_v5 = vpop.xlane.xlu1 %5429 }
 0xc75   : > { %v5463_v38 = vadd.f32 1e-05, %v5455_v44  ;;  %v5456_v41 = vmul.f32 0.0026041667, %v5430_v5  ;;  %v14426_v44 = vld [vmem:[#allocation12 + $0x608] ss:$48 sps:$4 sm:$0xff]  }
 0xc77   : > { %15271 = vrsqrt.f32 %v5463_v38  ;;  %v5464_v18 = vadd.f32 1e-05, %v5456_v41 }
 0xc79   : > { %15273 = vrsqrt.f32 %v5464_v18 }
 0xc7a   : > { %v5434_v25 = vpop.xlane.xlu0 %5433 }
 0xc7b   : > { %v5457_v22 = vmul.f32 0.0026041667, %v5434_v25 }
 0xc7c   : > { %v5438_v55 = vpop.xlane.xlu1 %5437 }
 0xc7d   : > { %v5465_v30 = vadd.f32 1e-05, %v5457_v22  ;;  %v5458_v46 = vmul.f32 0.0026041667, %v5438_v55 }
 0xc7f   : > { %15275 = vrsqrt.f32 %v5465_v30  ;;  %v5466_v37 = vadd.f32 1e-05, %v5458_v46  ;;  %v14431_v30 = vld [vmem:[#allocation12 + $0x664] ss:$48 sps:$4 sm:$0xff]   ;;  %v14434_v46 = vld [vmem:[#allocation12 + $0x66c] ss:$48 sps:$4 sm:$0xff]  }
 0xc81   : > { %v17270_v60 = vpop.eup %15271  ;;  %15277 = vrsqrt.f32 %v5466_v37 }
 0xc82   : > { %v5442_v11 = vpop.xlane.xlu0 %5441  ;;  %v5480_v59 = vmul.f32 %v17270_v60, %v17142_v29  ;;  %v5479_v9 = vmul.f32 %v17270_v60, %v17139_v31 }
 0xc83   : > { %v17276_v17 = vpop.eup %15273  ;;  %v5459_v13 = vmul.f32 0.0026041667, %v5442_v11 }
 0xc84   : > { %v5446_v8 = vpop.xlane.xlu1 %5445  ;;  %v5483_v15 = vmul.f32 %v17276_v17, %v17151_v1  ;;  %v5520_v29 = vmul.f32 %v17264_v52, %v5480_v59  ;;  %v5482_v31 = vmul.f32 %v17276_v17, %v17148_v62  ;;  %v5519_v7 = vmul.f32 %v17268_v4, %v5479_v9 }
 0xc85   : > { %v5467_v26 = vadd.f32 1e-05, %v5459_v13  ;;  %v5460_v0 = vmul.f32 0.0026041667, %v5446_v8  ;;  %v14429_v8 = vld [vmem:[#allocation12 + $0x660] ss:$48 sps:$4 sm:$0xff]  }
 0xc86   : > { %v5523_v50 = vmul.f32 %v17264_v52, %v5483_v15  ;;  %v5522_v16 = vmul.f32 %v17268_v4, %v5482_v31  ;;  %v17295_v12 = vadd.f32 %v17280_v43, %v5520_v29  ;;  %v17301_v6 = vadd.f32 %v17284_v58, %v5519_v7  ;;  %v14432_v15 = vld [vmem:[#allocation12 + $0x668] ss:$48 sps:$4 sm:$0xff]   ;;  %v14437_v31 = vld [vmem:[#allocation12 + $0x6c4] ss:$48 sps:$4 sm:$0xff]   ;;  %v14440_v7 = vld [vmem:[#allocation12 + $0x6cc] ss:$48 sps:$4 sm:$0xff]  }
 0xc87   : > { %15279 = vrsqrt.f32 %v5467_v26  ;;  %v5468_v57 = vadd.f32 1e-05, %v5460_v0 }
 0xc88   : > { %v17298_v1 = vadd.f32 %v17280_v43, %v5523_v50  ;;  %v17304_v62 = vadd.f32 %v17284_v58, %v5522_v16 }
 0xc89   : > { %v17306_v54 = vpop.eup %15275  ;;  %15281 = vrsqrt.f32 %v5468_v57 }
 0xc8a   : > { %v5450_v10 = vpop.xlane.xlu0 %5449  ;;  %v17310_v5 = vpack.c.bf16 %v17298_v1, %v17295_v12  ;;  %v17314_v38 = vpack.c.bf16 %v17304_v62, %v17301_v6  ;;  %v5486_v41 = vmul.f32 %v17306_v54, %v17172_v24  ;;  %v5485_v18 = vmul.f32 %v17306_v54, %v17169_v39 }
 0xc8b   : > { %v17320_v25 = vpop.eup %15277  ;;  %v5461_v22 = vmul.f32 0.0026041667, %v5450_v10  ;;  %v5454_v55 = vpop.xlane.xlu1 %5453  ;;  %v14435_v10 = vld [vmem:[#allocation12 + $0x6c0] ss:$48 sps:$4 sm:$0xff]  }
 0xc8c   : > { %v5462_v37 = vmul.f32 0.0026041667, %v5454_v55  ;;  %7419 = vmatprep.mubr.bf16.mxu0 %v17310_v5  ;;  %7565 = vmatprep.mubr.bf16.mxu1 %v17310_v5  ;;  %v5489_v11 = vmul.f32 %v17320_v25, %v17181_v47  ;;  %v5526_v59 = vmul.f32 %v17264_v52, %v5486_v41  ;;  %v5488_v24 = vmul.f32 %v17320_v25, %v17178_v36  ;;  %v14446_v55 = vld [vmem:[#allocation12 + $0x72c] ss:$48 sps:$4 sm:$0xff]  }
 0xc8d   : > { %v5469_v39 = vadd.f32 1e-05, %v5461_v22  ;;  %7420 = vmatmul.mubr.bf16.vlgmr.msra.gmra.mrb[112].mxu0 %v17314_v38  ;;  %7566 = vmatmul.mubr.bf16.vlgmr.msra.gmra.mrb[112].mxu1 %v17314_v38  ;;  %v5525_v9 = vmul.f32 %v17268_v4, %v5485_v18  ;;  %v14443_v22 = vld [vmem:[#allocation12 + $0x724] ss:$48 sps:$4 sm:$0xff]  }
 0xc8e   : > { %v5470_v13 = vadd.f32 1e-05, %v5462_v37  ;;  %7461 = vmatpush1.bf16.msra.mxu0 %v14423_v33  ;;  %7607 = vmatpush1.bf16.msra.mxu1 %v14426_v44  ;;  %v5529_v29 = vmul.f32 %v17264_v52, %v5489_v11  ;;  %v5528_v47 = vmul.f32 %v17268_v4, %v5488_v24  ;;  %v17335_v36 = vadd.f32 %v17280_v43, %v5526_v59  ;;  %v14438_v33 = vld [vmem:[#allocation12 + $0x6c8] ss:$48 sps:$4 sm:$0xff]  }
 0xc8f   : > { %15283 = vrsqrt.f32 %v5469_v39  ;;  %7462 = vmatprep.subr.bf16.mxu0 %v14431_v30  ;;  %7608 = vmatprep.subr.bf16.mxu1 %v14434_v46  ;;  %v17341_v0 = vadd.f32 %v17284_v58, %v5525_v9  ;;  %v14444_v59 = vld [vmem:[#allocation12 + $0x728] ss:$48 sps:$4 sm:$0xff]   ;;  %v14452_v9 = vld [vmem:[#allocation12 + $0x78c] ss:$48 sps:$4 sm:$0xff]  }
 0xc90   : > { %15285 = vrsqrt.f32 %v5470_v13  ;;  %v17338_v26 = vadd.f32 %v17280_v43, %v5529_v29  ;;  %v17344_v50 = vadd.f32 %v17284_v58, %v5528_v47 }
 0xc91   : > { %v17346_v16 = vpop.eup %15279 }
 0xc92   : > { %7463 = vmatpush1.bf16.msra.mxu0 %v14429_v8  ;;  %7609 = vmatpush1.bf16.msra.mxu1 %v14432_v15  ;;  %v17350_v57 = vpack.c.bf16 %v17338_v26, %v17335_v36  ;;  %v17354_v44 = vpack.c.bf16 %v17344_v50, %v17341_v0  ;;  %v5492_v41 = vmul.f32 %v17346_v16, %v17202_v21 }
 0xc93   : > { %v17358_v18 = vpop.eup %15281  ;;  %7464 = vmatprep.subr.bf16.mxu0 %v14437_v31  ;;  %7610 = vmatprep.subr.bf16.mxu1 %v14440_v7  ;;  %v5491_v30 = vmul.f32 %v17346_v16, %v17199_v53  ;;  %v14441_v53 = vld [vmem:[#allocation12 + $0x720] ss:$48 sps:$4 sm:$0xff]  }
 0xc94   : > { %7429 = vmatprep.mubr.bf16.mxu0 %v17350_v57  ;;  %7575 = vmatprep.mubr.bf16.mxu1 %v17350_v57  ;;  %v5495_v46 = vmul.f32 %v17358_v18, %v17211_v48  ;;  %v5532_v37 = vmul.f32 %v17264_v52, %v5492_v41  ;;  %v5494_v21 = vmul.f32 %v17358_v18, %v17208_v23  ;;  %v14449_v48 = vld [vmem:[#allocation12 + $0x784] ss:$48 sps:$4 sm:$0xff]   ;;  %v14447_v7 = vld [vmem:[#allocation12 + $0x780] ss:$48 sps:$4 sm:$0xff]  }
 0xc95   : > { %7430 = vmatmul.mubr.bf16.gmra.mrb[116].mxu0 %v17354_v44  ;;  %7576 = vmatmul.mubr.bf16.gmra.mrb[116].mxu1 %v17354_v44  ;;  %v5531_v11 = vmul.f32 %v17268_v4, %v5491_v30 }
 0xc96   : > { %7465 = vmatpush1.bf16.msra.mxu0 %v14435_v10  ;;  %7611 = vmatpush1.bf16.msra.mxu1 %v14438_v33  ;;  %v5535_v24 = vmul.f32 %v17264_v52, %v5495_v46  ;;  %v5534_v39 = vmul.f32 %v17268_v4, %v5494_v21  ;;  %v17375_v23 = vadd.f32 %v17280_v43, %v5532_v37  ;;  %v14450_v10 = vld [vmem:[#allocation12 + $0x788] ss:$48 sps:$4 sm:$0xff]  }
 0xc97   : > { %7466 = vmatprep.subr.bf16.mxu0 %v14443_v22  ;;  %7612 = vmatprep.subr.bf16.mxu1 %v14446_v55  ;;  %v17381_v8 = vadd.f32 %v17284_v58, %v5531_v11  ;;  %v14455_v22 = vld [vmem:[#allocation12 + $0x7e4] ss:$48 sps:$4 sm:$0xff]   ;;  %v14458_v55 = vld [vmem:[#allocation12 + $0x7ec] ss:$48 sps:$4 sm:$0xff]  }
 0xc98   : > { %18525 = vst [vmem:[#allocation37_spill] sm:$0xff] %v17375_v23  ;;  %v17378_v13 = vadd.f32 %v17280_v43, %v5535_v24  ;;  %v17384_v15 = vadd.f32 %v17284_v58, %v5534_v39 }
 0xc99   : > { %v17386_v29 = vpop.eup %15283 }
 0xc9a   : > { %18526 = vst [vmem:[#allocation36_spill] sm:$0xff] %v17378_v13  ;;  %18527 = vst [vmem:[#allocation39_spill] sm:$0xff] %v17384_v15  ;;  %v17388_v47 = vpop.eup %15285  ;;  %7467 = vmatpush1.bf16.msra.mxu0 %v14441_v53  ;;  %7613 = vmatpush1.bf16.msra.mxu1 %v14444_v59  ;;  %v17392_v31 = vpack.c.bf16 %v17378_v13, %v17375_v23  ;;  %v17396_v33 = vpack.c.bf16 %v17384_v15, %v17381_v8 }
 0xc9b   : > { %v5498_v41 = vmul.f32 %v17386_v29, %v17232_v40  ;;  %7468 = vmatprep.subr.bf16.mxu0 %v14449_v48  ;;  %7614 = vmatprep.subr.bf16.mxu1 %v14452_v9  ;;  %v5501_v30 = vmul.f32 %v17388_v47, %v17241_v35  ;;  %v5497_v46 = vmul.f32 %v17386_v29, %v17229_v20  ;;  %v14453_v20 = vld [vmem:[#allocation12 + $0x7e0] ss:$48 sps:$4 sm:$0xff]   ;;  %v14464_v48 = vld [vmem:[#allocation12 + $0x84c] ss:$48 sps:$4 sm:$0xff]  }
 0xc9c   : > { %v5500_v37 = vmul.f32 %v17388_v47, %v17238_v61  ;;  %7439 = vmatprep.mubr.bf16.mxu0 %v17392_v31  ;;  %7585 = vmatprep.mubr.bf16.mxu1 %v17392_v31  ;;  %v14456_v61 = vld [vmem:[#allocation12 + $0x7e8] ss:$48 sps:$4 sm:$0xff]   ;;  %v5484_v59 = vmul.f32 %v17276_v17, %v17156_v3  ;;  %v5481_v17 = vmul.f32 %v17270_v60, %v17145_v56  ;;  %v14465_v60 = vld [vmem:[#allocation12 + $0x8a0] ss:$48 sps:$4 sm:$0xff]  }
 0xc9d   : > { %v5538_v21 = vmul.f32 %v17264_v52, %v5498_v41  ;;  %7440 = vmatmul.mubr.bf16.gmra.mrb[120].mxu0 %v17396_v33  ;;  %7586 = vmatmul.mubr.bf16.gmra.mrb[120].mxu1 %v17396_v33  ;;  %v5541_v40 = vmul.f32 %v17264_v52, %v5501_v30  ;;  %v5537_v35 = vmul.f32 %v17268_v4, %v5497_v46  ;;  %v14461_v52 = vld [vmem:[#allocation12 + $0x844] ss:$48 sps:$4 sm:$0xff]   ;;  %v14470_v41 = vld [vmem:[#allocation12 + $0x8ac] ss:$48 sps:$4 sm:$0xff]  }
 0xc9e   : > { %v5540_v11 = vmul.f32 %v17268_v4, %v5500_v37  ;;  %7469 = vmatpush1.bf16.msra.mxu0 %v14447_v7  ;;  %7615 = vmatpush1.bf16.msra.mxu1 %v14450_v10  ;;  %v14462_v7 = vld [vmem:[#allocation12 + $0x848] ss:$48 sps:$4 sm:$0xff]   ;;  %v14467_v10 = vld [vmem:[#allocation12 + $0x8a4] ss:$48 sps:$4 sm:$0xff]   ;;  %v14476_v46 = vld [vmem:[#allocation12 + $0x1c] ss:$48 sps:$4 sm:$0xff]  }
 0xc9f   : > { %v17415_v53 = vadd.f32 %v17280_v43, %v5538_v21  ;;  %7470 = vmatprep.subr.bf16.mxu0 %v14455_v22  ;;  %7616 = vmatprep.subr.bf16.mxu1 %v14458_v55  ;;  %v17420_v24 = vadd.f32 %v17280_v43, %v5541_v40  ;;  %v17423_v39 = vadd.f32 %v17284_v58, %v5537_v35  ;;  %v14468_v55 = vld [vmem:[#allocation12 + $0x8a8] ss:$48 sps:$4 sm:$0xff]   ;;  %v14473_v30 = vld [vmem:[#allocation12 + $0x14] ss:$48 sps:$4 sm:$0xff]   ;;  %v18532_v40 = vmov 0  }
 0xca0   : > { %v17426_v4 = vadd.f32 %v17284_v58, %v5540_v11  ;;  %v17440_v43 = vrot.slane %v17258_v51, %v16996_v49  ;;  %v14459_v58 = vld [vmem:[#allocation12 + $0x840] ss:$48 sps:$4 sm:$0xff]   ;;  %v17450_v51 = vrot.slane %v17260_v32, %v16996_v49  ;;  %v5490_v21 = vmul.f32 %v17320_v25, %v17186_v63  ;;  %v14479_v63 = vld [vmem:[#allocation12 + $0x74] ss:$48 sps:$4 sm:$0xff]   ;;  %v14482_v25 = vld [vmem:[#allocation12 + $0x7c] ss:$48 sps:$4 sm:$0xff]  }
 0xca1   : > { %18528 = vst [vmem:[#allocation38_spill] sm:$0xff] %v17415_v53  ;;  %18529 = vst [vmem:[#allocation41_spill] sm:$0xff] %v17420_v24  ;;  %v17430_v9 = vpack.c.bf16 %v17420_v24, %v17415_v53  ;;  %v5487_v35 = vmul.f32 %v17306_v54, %v17175_v34  ;;  %v14471_v11 = vld [vmem:[#allocation12 + $0x10] ss:$48 sps:$4 sm:$0xff]  }
 0xca2   : > { %18530 = vst [vmem:[#allocation40_spill] sm:$0xff] %v17423_v39  ;;  %18531 = vst [vmem:[#allocation35_spill] sm:$0xff] %v17426_v4  ;;  %v17434_v3 = vpack.c.bf16 %v17426_v4, %v17423_v39  ;;  %7471 = vmatpush1.bf16.msra.mxu0 %v14453_v20  ;;  %7617 = vmatpush1.bf16.msra.mxu1 %v14456_v61  ;;  %v5524_v22 = vmul.f32 %v17440_v43, %v5484_v59  ;;  %v14474_v20 = vld [vmem:[#allocation12 + $0x18] ss:$48 sps:$4 sm:$0xff]   ;;  %v14477_v54 = vld [vmem:[#allocation12 + $0x70] ss:$48 sps:$4 sm:$0xff]  }
 0xca3   : > { %7449 = vmatprep.mubr.bf16.mxu0 %v17430_v9  ;;  %7472 = vmatprep.subr.bf16.mxu0 %v14461_v52  ;;  %v5521_v56 = vmul.f32 %v17440_v43, %v5481_v17  ;;  %v5530_v59 = vmul.f32 %v17440_v43, %v5490_v21  ;;  %v5527_v34 = vmul.f32 %v17440_v43, %v5487_v35  ;;  %v14480_v52 = vld [vmem:[#allocation12 + $0x78] ss:$48 sps:$4 sm:$0xff]   ;;  %v14488_v17 = vld [vmem:[#allocation12 + $0xdc] ss:$48 sps:$4 sm:$0xff]   ;;  %v14923_v39 = vld [vmem:[#allocation15 + $0x5a8] ss:$12 sps:$4 sm:$0xff]  }
 0xca4   : > { %7595 = vmatprep.mubr.bf16.mxu1 %v17430_v9  ;;  %7618 = vmatprep.subr.bf16.mxu1 %v14464_v48  ;;  %v17453_v37 = vadd.f32 %v17450_v51, %v5524_v22  ;;  %v14485_v48 = vld [vmem:[#allocation12 + $0xd4] ss:$48 sps:$4 sm:$0xff]   ;;  %v14483_v22 = vld [vmem:[#allocation12 + $0xd0] ss:$48 sps:$4 sm:$0xff]   ;;  %v14500_v21 = vld [vmem:[#allocation12 + $0x19c] ss:$48 sps:$4 sm:$0xff]  }
 0xca5   : > { %7450 = vmatmul.mubr.bf16.gmra.mrb[124].mxu0 %v17434_v3  ;;  %7596 = vmatmul.mubr.bf16.gmra.mrb[124].mxu1 %v17434_v3  ;;  %v17460_v32 = vadd.f32 %v17450_v51, %v5521_v56  ;;  %v14486_v56 = vld [vmem:[#allocation12 + $0xd8] ss:$48 sps:$4 sm:$0xff]  }
 0xca6   : > { %7473 = vmatpush1.bf16.msra.mxu0 %v14459_v58  ;;  %7619 = vmatpush1.bf16.msra.mxu1 %v14462_v7  ;;  %v17473_v58 = vadd.f32 %v17450_v51, %v5530_v59  ;;  %v5496_v7 = vmul.f32 %v17358_v18, %v17216_v28  ;;  %v14491_v28 = vld [vmem:[#allocation12 + $0x134] ss:$48 sps:$4 sm:$0xff]   ;;  %v14494_v18 = vld [vmem:[#allocation12 + $0x13c] ss:$48 sps:$4 sm:$0xff]   ;;  %v14498_v59 = vld [vmem:[#allocation12 + $0x198] ss:$48 sps:$4 sm:$0xff]  }
 0xca7   : > { %7474 = vmatprep.subr.bf16.mxu0 %v14467_v10  ;;  %7620 = vmatprep.subr.bf16.mxu1 %v14470_v41  ;;  %v17466_v61 = vpack.c.bf16 %v17453_v37, %v17460_v32  ;;  %v17480_v10 = vadd.f32 %v17450_v51, %v5527_v34  ;;  %v5493_v41 = vmul.f32 %v17346_v16, %v17205_v14  ;;  %v14489_v16 = vld [vmem:[#allocation12 + $0x130] ss:$48 sps:$4 sm:$0xff]  }
 0xca8   : > { %7492 = vmatprep.mubr.bf16.mxu0 %v18532_v40  ;;  %7638 = vmatprep.mubr.bf16.mxu1 %v18532_v40 }
 0xca9   : > { %v5533_v14 = vmul.f32 %v17440_v43, %v5493_v41 }
 0xcaa   : > { %7475 = vmatpush1.bf16.msra.mxu0 %v14465_v60  ;;  %7621 = vmatpush1.bf16.msra.mxu1 %v14468_v55  ;;  %v17486_v60 = vpack.c.bf16 %v17473_v58, %v17480_v10  ;;  %v5536_v55 = vmul.f32 %v17440_v43, %v5496_v7 }
 0xcab   : > { %7679 = vmatprep.subr.bf16.mxu0 %v14473_v30  ;;  %7825 = vmatprep.subr.bf16.mxu1 %v14476_v46  ;;  %v14492_v30 = vld [vmem:[#allocation12 + $0x138] ss:$48 sps:$4 sm:$0xff]   ;;  %v14497_v46 = vld [vmem:[#allocation12 + $0x194] ss:$48 sps:$4 sm:$0xff]  }
 0xcac   : > { %v17493_v35 = vadd.f32 %v17450_v51, %v5536_v55  ;;  %v14516_v55 = vld [vmem:[#allocation12 + $0x2b8] ss:$48 sps:$4 sm:$0xff]  }
 0xcad   : > { %7493 = vmatmul.mubr.bf16.vlgmr.msra.gmra.mrb[112].mxu0 %v17466_v61  ;;  %7639 = vmatmul.mubr.bf16.vlgmr.msra.gmra.mrb[112].mxu1 %v17466_v61 }
 0xcae   : > { %7680 = vmatpush1.bf16.msra.mxu0 %v14471_v11  ;;  %7826 = vmatpush1.bf16.msra.mxu1 %v14474_v20  ;;  %18533 = vst [vmem:[#allocation42_spill] sm:$0xff] %v17493_v35  ;;  %v5502_v11 = vmul.f32 %v17388_v47, %v17244_v27  ;;  %v17500_v20 = vadd.f32 %v17450_v51, %v5533_v14  ;;  %v14503_v27 = vld [vmem:[#allocation12 + $0x1f4] ss:$48 sps:$4 sm:$0xff]   ;;  %v14506_v47 = vld [vmem:[#allocation12 + $0x1fc] ss:$48 sps:$4 sm:$0xff]  }
 0xcaf   : > { %7681 = vmatprep.subr.bf16.mxu0 %v14479_v63  ;;  %7827 = vmatprep.subr.bf16.mxu1 %v14482_v25  ;;  %v5499_v63 = vmul.f32 %v17386_v29, %v17235_v2  ;;  %v14495_v25 = vld [vmem:[#allocation12 + $0x190] ss:$48 sps:$4 sm:$0xff]   ;;  %v14521_v14 = vld [vmem:[#allocation12 + $0x314] ss:$48 sps:$4 sm:$0xff]  }
 0xcb0   : > { %7502 = vmatprep.mubr.bf16.mxu0 %v18532_v40  ;;  %7648 = vmatprep.mubr.bf16.mxu1 %v18532_v40  ;;  %18534 = vst [vmem:[#allocation43_spill] sm:$0xff] %v17500_v20  ;;  %v17506_v34 = vpack.c.bf16 %v17493_v35, %v17500_v20  ;;  %v14501_v29 = vld [vmem:[#allocation12 + $0x1f0] ss:$48 sps:$4 sm:$0xff]  }
 0xcb1   : > { %v5539_v2 = vmul.f32 %v17440_v43, %v5499_v63  ;;  %v14525_v63 = vld [vmem:[#allocation12 + $0x370] ss:$48 sps:$4 sm:$0xff]  }
 0xcb2   : > { %7682 = vmatpush1.bf16.msra.mxu0 %v14477_v54  ;;  %7828 = vmatpush1.bf16.msra.mxu1 %v14480_v52  ;;  %v5542_v54 = vmul.f32 %v17440_v43, %v5502_v11  ;;  %v14504_v52 = vld [vmem:[#allocation12 + $0x1f8] ss:$48 sps:$4 sm:$0xff]   ;;  %v14507_v43 = vld [vmem:[#allocation12 + $0x250] ss:$48 sps:$4 sm:$0xff]   ;;  %v14530_v11 = vld [vmem:[#allocation12 + $0x37c] ss:$48 sps:$4 sm:$0xff]  }
 0xcb3   : > { %7683 = vmatprep.subr.bf16.mxu0 %v14485_v48  ;;  %7829 = vmatprep.subr.bf16.mxu1 %v14488_v17  ;;  %v14509_v48 = vld [vmem:[#allocation12 + $0x254] ss:$48 sps:$4 sm:$0xff]   ;;  %v14512_v17 = vld [vmem:[#allocation12 + $0x25c] ss:$48 sps:$4 sm:$0xff]   ;;  %v17518_v41 = vadd.f32 %v17450_v51, %v5539_v2 }
 0xcb4   : > { %v17513_v7 = vadd.f32 %v17450_v51, %v5542_v54  ;;  %v14513_v51 = vld [vmem:[#allocation12 + $0x2b0] ss:$48 sps:$4 sm:$0xff]   ;;  %v14534_v54 = vld [vmem:[#allocation12 + $0x3d8] ss:$48 sps:$4 sm:$0xff]   ;;  %v14539_v2 = vld [vmem:[#allocation12 + $0x434] ss:$48 sps:$4 sm:$0xff]  }
 0xcb5   : > { %7503 = vmatmul.mubr.bf16.gmra.mrb[116].mxu0 %v17486_v60  ;;  %7649 = vmatmul.mubr.bf16.gmra.mrb[116].mxu1 %v17486_v60  ;;  %18536 = vst [vmem:[#allocation45_spill] sm:$0xff] %v17518_v41  ;;  %v14933_v35 = vld [vmem:[#allocation15 + $0x5d8] ss:$12 sps:$4 sm:$0xff]  }
 0xcb6   : > { %7684 = vmatpush1.bf16.msra.mxu0 %v14483_v22  ;;  %7830 = vmatpush1.bf16.msra.mxu1 %v14486_v56  ;;  %18535 = vst [vmem:[#allocation44_spill] sm:$0xff] %v17513_v7  ;;  %v14510_v22 = vld [vmem:[#allocation12 + $0x258] ss:$48 sps:$4 sm:$0xff]   ;;  %v17522_v56 = vpack.c.bf16 %v17513_v7, %v17518_v41 }
 0xcb7   : > { %7685 = vmatprep.subr.bf16.mxu0 %v14491_v28  ;;  %7831 = vmatprep.subr.bf16.mxu1 %v14494_v18  ;;  %v14515_v28 = vld [vmem:[#allocation12 + $0x2b4] ss:$48 sps:$4 sm:$0xff]   ;;  %v14518_v18 = vld [vmem:[#allocation12 + $0x2bc] ss:$48 sps:$4 sm:$0xff]  }
 0xcb8   : > { %7512 = vmatprep.mubr.bf16.mxu0 %v18532_v40  ;;  %7658 = vmatprep.mubr.bf16.mxu1 %v18532_v40 }
 0xcba   : > { %7686 = vmatpush1.bf16.msra.mxu0 %v14489_v16  ;;  %7832 = vmatpush1.bf16.msra.mxu1 %v14492_v30  ;;  %v14524_v16 = vld [vmem:[#allocation12 + $0x31c] ss:$48 sps:$4 sm:$0xff]   ;;  %v14519_v30 = vld [vmem:[#allocation12 + $0x310] ss:$48 sps:$4 sm:$0xff]  }
 0xcbb   : > { %7687 = vmatprep.subr.bf16.mxu0 %v14497_v46  ;;  %7833 = vmatprep.subr.bf16.mxu1 %v14500_v21  ;;  %v14522_v46 = vld [vmem:[#allocation12 + $0x318] ss:$48 sps:$4 sm:$0xff]   ;;  %v14527_v21 = vld [vmem:[#allocation12 + $0x374] ss:$48 sps:$4 sm:$0xff]  }
 0xcbd   : > { %7513 = vmatmul.mubr.bf16.gmra.mrb[120].mxu0 %v17506_v34  ;;  %7659 = vmatmul.mubr.bf16.gmra.mrb[120].mxu1 %v17506_v34 }
 0xcbe   : > { %7688 = vmatpush1.bf16.msra.mxu0 %v14495_v25  ;;  %7834 = vmatpush1.bf16.msra.mxu1 %v14498_v59  ;;  %v14528_v25 = vld [vmem:[#allocation12 + $0x378] ss:$48 sps:$4 sm:$0xff]   ;;  %v14533_v59 = vld [vmem:[#allocation12 + $0x3d4] ss:$48 sps:$4 sm:$0xff]  }
 0xcbf   : > { %7689 = vmatprep.subr.bf16.mxu0 %v14503_v27  ;;  %7835 = vmatprep.subr.bf16.mxu1 %v14506_v47  ;;  %v14536_v27 = vld [vmem:[#allocation12 + $0x3dc] ss:$48 sps:$4 sm:$0xff]   ;;  %v14531_v47 = vld [vmem:[#allocation12 + $0x3d0] ss:$48 sps:$4 sm:$0xff]  }
 0xcc0   : > { %7522 = vmatprep.mubr.bf16.mxu0 %v18532_v40  ;;  %7668 = vmatprep.mubr.bf16.mxu1 %v18532_v40 }
 0xcc2   : > { %7690 = vmatpush1.bf16.msra.mxu0 %v14501_v29  ;;  %7836 = vmatpush1.bf16.msra.mxu1 %v14504_v52  ;;  %v14542_v29 = vld [vmem:[#allocation12 + $0x43c] ss:$48 sps:$4 sm:$0xff]   ;;  %v14537_v52 = vld [vmem:[#allocation12 + $0x430] ss:$48 sps:$4 sm:$0xff]  }
 0xcc3   : > { %7691 = vmatprep.subr.bf16.mxu0 %v14509_v48  ;;  %7837 = vmatprep.subr.bf16.mxu1 %v14512_v17  ;;  %v14540_v48 = vld [vmem:[#allocation12 + $0x438] ss:$48 sps:$4 sm:$0xff]   ;;  %v14545_v17 = vld [vmem:[#allocation12 + $0x494] ss:$48 sps:$4 sm:$0xff]  }
 0xcc5   : > { %7523 = vmatmul.mubr.bf16.gmra.mrb[124].mxu0 %v17522_v56  ;;  %7669 = vmatmul.mubr.bf16.gmra.mrb[124].mxu1 %v17522_v56 }
 0xcc6   : > { %7692 = vmatpush1.bf16.msra.mxu0 %v14507_v43  ;;  %7838 = vmatpush1.bf16.msra.mxu1 %v14510_v22  ;;  %v14548_v43 = vld [vmem:[#allocation12 + $0x49c] ss:$48 sps:$4 sm:$0xff]   ;;  %v14543_v22 = vld [vmem:[#allocation12 + $0x490] ss:$48 sps:$4 sm:$0xff]  }
 0xcc7   : > { %7711 = vmatprep.mubr.bf16.mxu0 %v17310_v5  ;;  %7857 = vmatprep.mubr.bf16.mxu1 %v17310_v5 }
 0xcc8   : > { %7693 = vmatprep.subr.bf16.mxu0 %v14515_v28  ;;  %7839 = vmatprep.subr.bf16.mxu1 %v14518_v18  ;;  %v14546_v28 = vld [vmem:[#allocation12 + $0x498] ss:$48 sps:$4 sm:$0xff]   ;;  %v14551_v18 = vld [vmem:[#allocation12 + $0x4f4] ss:$48 sps:$4 sm:$0xff]  }
 0xcca   : > { %7694 = vmatpush1.bf16.msra.mxu0 %v14513_v51  ;;  %7840 = vmatpush1.bf16.msra.mxu1 %v14516_v55  ;;  %v14554_v51 = vld [vmem:[#allocation12 + $0x4fc] ss:$48 sps:$4 sm:$0xff]   ;;  %v14549_v55 = vld [vmem:[#allocation12 + $0x4f0] ss:$48 sps:$4 sm:$0xff]  }
 0xccb   : > { %7695 = vmatprep.subr.bf16.mxu0 %v14521_v14  ;;  %7841 = vmatprep.subr.bf16.mxu1 %v14524_v16  ;;  %v14552_v14 = vld [vmem:[#allocation12 + $0x4f8] ss:$48 sps:$4 sm:$0xff]   ;;  %v14557_v16 = vld [vmem:[#allocation12 + $0x554] ss:$48 sps:$4 sm:$0xff]  }
 0xcce   : > { %7696 = vmatpush1.bf16.msra.mxu0 %v14519_v30  ;;  %7842 = vmatpush1.bf16.msra.mxu1 %v14522_v46  ;;  %v14560_v30 = vld [vmem:[#allocation12 + $0x55c] ss:$48 sps:$4 sm:$0xff]   ;;  %v14555_v46 = vld [vmem:[#allocation12 + $0x550] ss:$48 sps:$4 sm:$0xff]  }
 0xccf   : > { %7697 = vmatprep.subr.bf16.mxu0 %v14527_v21  ;;  %7843 = vmatprep.subr.bf16.mxu1 %v14530_v11  ;;  %v14558_v21 = vld [vmem:[#allocation12 + $0x558] ss:$48 sps:$4 sm:$0xff]   ;;  %v14563_v11 = vld [vmem:[#allocation12 + $0x5b4] ss:$48 sps:$4 sm:$0xff]  }
 0xcd2   : > { %7698 = vmatpush1.bf16.msra.mxu0 %v14525_v63  ;;  %7844 = vmatpush1.bf16.msra.mxu1 %v14528_v25  ;;  %v14566_v63 = vld [vmem:[#allocation12 + $0x5bc] ss:$48 sps:$4 sm:$0xff]   ;;  %v14561_v25 = vld [vmem:[#allocation12 + $0x5b0] ss:$48 sps:$4 sm:$0xff]  }
 0xcd3   : > { %7699 = vmatprep.subr.bf16.mxu0 %v14533_v59  ;;  %7845 = vmatprep.subr.bf16.mxu1 %v14536_v27  ;;  %v14564_v59 = vld [vmem:[#allocation12 + $0x5b8] ss:$48 sps:$4 sm:$0xff]   ;;  %v14569_v27 = vld [vmem:[#allocation12 + $0x614] ss:$48 sps:$4 sm:$0xff]  }
 0xcd6   : > { %7700 = vmatpush1.bf16.msra.mxu0 %v14531_v47  ;;  %7846 = vmatpush1.bf16.msra.mxu1 %v14534_v54  ;;  %v14572_v47 = vld [vmem:[#allocation12 + $0x61c] ss:$48 sps:$4 sm:$0xff]   ;;  %v14567_v54 = vld [vmem:[#allocation12 + $0x610] ss:$48 sps:$4 sm:$0xff]  }
 0xcd7   : > { %7701 = vmatprep.subr.bf16.mxu0 %v14539_v2  ;;  %7847 = vmatprep.subr.bf16.mxu1 %v14542_v29  ;;  %v14570_v2 = vld [vmem:[#allocation12 + $0x618] ss:$48 sps:$4 sm:$0xff]   ;;  %v14575_v29 = vld [vmem:[#allocation12 + $0x674] ss:$48 sps:$4 sm:$0xff]  }
 0xcda   : > { %7702 = vmatpush1.bf16.msra.mxu0 %v14537_v52  ;;  %7848 = vmatpush1.bf16.msra.mxu1 %v14540_v48  ;;  %v14578_v52 = vld [vmem:[#allocation12 + $0x67c] ss:$48 sps:$4 sm:$0xff]   ;;  %v14573_v48 = vld [vmem:[#allocation12 + $0x670] ss:$48 sps:$4 sm:$0xff]  }
 0xcdb   : > { %7703 = vmatprep.subr.bf16.mxu0 %v14545_v17  ;;  %7849 = vmatprep.subr.bf16.mxu1 %v14548_v43  ;;  %v14576_v17 = vld [vmem:[#allocation12 + $0x678] ss:$48 sps:$4 sm:$0xff]   ;;  %v14581_v43 = vld [vmem:[#allocation12 + $0x6d4] ss:$48 sps:$4 sm:$0xff]  }
 0xcde   : > { %7704 = vmatpush1.bf16.msra.mxu0 %v14543_v22  ;;  %7850 = vmatpush1.bf16.msra.mxu1 %v14546_v28  ;;  %v14584_v22 = vld [vmem:[#allocation12 + $0x6dc] ss:$48 sps:$4 sm:$0xff]   ;;  %v14579_v28 = vld [vmem:[#allocation12 + $0x6d0] ss:$48 sps:$4 sm:$0xff]  }
 0xcdf   : > { %7705 = vmatprep.subr.bf16.mxu0 %v14551_v18  ;;  %7851 = vmatprep.subr.bf16.mxu1 %v14554_v51  ;;  %v14582_v18 = vld [vmem:[#allocation12 + $0x6d8] ss:$48 sps:$4 sm:$0xff]   ;;  %v14587_v51 = vld [vmem:[#allocation12 + $0x734] ss:$48 sps:$4 sm:$0xff]  }
 0xce2   : > { %7706 = vmatpush1.bf16.msra.mxu0 %v14549_v55  ;;  %7852 = vmatpush1.bf16.msra.mxu1 %v14552_v14  ;;  %v14590_v55 = vld [vmem:[#allocation12 + $0x73c] ss:$48 sps:$4 sm:$0xff]   ;;  %v14585_v14 = vld [vmem:[#allocation12 + $0x730] ss:$48 sps:$4 sm:$0xff]  }
 0xce3   : > { %7707 = vmatprep.subr.bf16.mxu0 %v14557_v16  ;;  %7853 = vmatprep.subr.bf16.mxu1 %v14560_v30  ;;  %v14588_v16 = vld [vmem:[#allocation12 + $0x738] ss:$48 sps:$4 sm:$0xff]   ;;  %v14593_v30 = vld [vmem:[#allocation12 + $0x794] ss:$48 sps:$4 sm:$0xff]  }
 0xce6   : > { %7708 = vmatpush1.bf16.msra.mxu0 %v14555_v46  ;;  %7854 = vmatpush1.bf16.msra.mxu1 %v14558_v21  ;;  %v14596_v46 = vld [vmem:[#allocation12 + $0x79c] ss:$48 sps:$4 sm:$0xff]   ;;  %v14591_v21 = vld [vmem:[#allocation12 + $0x790] ss:$48 sps:$4 sm:$0xff]  }
 0xce7   : > { %7709 = vmatprep.subr.bf16.mxu0 %v14563_v11  ;;  %7855 = vmatprep.subr.bf16.mxu1 %v14566_v63  ;;  %v14594_v11 = vld [vmem:[#allocation12 + $0x798] ss:$48 sps:$4 sm:$0xff]   ;;  %v14599_v63 = vld [vmem:[#allocation12 + $0x7f4] ss:$48 sps:$4 sm:$0xff]  }
 0xcea   : > { %7710 = vmatpush1.bf16.msra.mxu0 %v14561_v25  ;;  %7856 = vmatpush1.bf16.msra.mxu1 %v14564_v59  ;;  %v14602_v25 = vld [vmem:[#allocation12 + $0x7fc] ss:$48 sps:$4 sm:$0xff]   ;;  %v14597_v59 = vld [vmem:[#allocation12 + $0x7f0] ss:$48 sps:$4 sm:$0xff]  }
 0xceb   : > { %7752 = vmatprep.subr.bf16.mxu0 %v14569_v27  ;;  %7898 = vmatprep.subr.bf16.mxu1 %v14572_v47  ;;  %v14600_v27 = vld [vmem:[#allocation12 + $0x7f8] ss:$48 sps:$4 sm:$0xff]   ;;  %v14605_v47 = vld [vmem:[#allocation12 + $0x854] ss:$48 sps:$4 sm:$0xff]  }
 0xced   : > { %7712 = vmatmul.mubr.bf16.vlgmr.msra.gmra.mrb[128].mxu0 %v17314_v38  ;;  %7858 = vmatmul.mubr.bf16.vlgmr.msra.gmra.mrb[128].mxu1 %v17314_v38 }
 0xcee   : > { %7721 = vmatprep.mubr.bf16.mxu0 %v17350_v57  ;;  %7753 = vmatpush1.bf16.msra.mxu0 %v14567_v54  ;;  %v14608_v54 = vld [vmem:[#allocation12 + $0x85c] ss:$48 sps:$4 sm:$0xff]  }
 0xcef   : > { %7867 = vmatprep.mubr.bf16.mxu1 %v17350_v57  ;;  %7899 = vmatpush1.bf16.msra.mxu1 %v14570_v2  ;;  %v14603_v2 = vld [vmem:[#allocation12 + $0x850] ss:$48 sps:$4 sm:$0xff]  }
 0xcf0   : > { %7754 = vmatprep.subr.bf16.mxu0 %v14575_v29  ;;  %7900 = vmatprep.subr.bf16.mxu1 %v14578_v52  ;;  %v14606_v29 = vld [vmem:[#allocation12 + $0x858] ss:$48 sps:$4 sm:$0xff]   ;;  %v14611_v52 = vld [vmem:[#allocation12 + $0x8b4] ss:$48 sps:$4 sm:$0xff]  }
 0xcf2   : > { %7755 = vmatpush1.bf16.msra.mxu0 %v14573_v48  ;;  %v14614_v48 = vld [vmem:[#allocation12 + $0x8bc] ss:$48 sps:$4 sm:$0xff]  }
 0xcf3   : > { %7901 = vmatpush1.bf16.msra.mxu1 %v14576_v17  ;;  %7756 = vmatprep.subr.bf16.mxu0 %v14581_v43  ;;  %v14609_v17 = vld [vmem:[#allocation12 + $0x8b0] ss:$48 sps:$4 sm:$0xff]   ;;  %v14612_v43 = vld [vmem:[#allocation12 + $0x8b8] ss:$48 sps:$4 sm:$0xff]  }
 0xcf4   : > { %7902 = vmatprep.subr.bf16.mxu1 %v14584_v22  ;;  %v14617_v22 = vld [vmem:[#allocation12 + $0x24] ss:$48 sps:$4 sm:$0xff]  }
 0xcf5   : > { %7722 = vmatmul.mubr.bf16.gmra.mrb[132].mxu0 %v17354_v44  ;;  %7868 = vmatmul.mubr.bf16.gmra.mrb[132].mxu1 %v17354_v44 }
 0xcf6   : > { %7731 = vmatprep.mubr.bf16.mxu0 %v17392_v31  ;;  %7757 = vmatpush1.bf16.msra.mxu0 %v14579_v28  ;;  %v14620_v28 = vld [vmem:[#allocation12 + $0x2c] ss:$48 sps:$4 sm:$0xff]  }
 0xcf7   : > { %7877 = vmatprep.mubr.bf16.mxu1 %v17392_v31  ;;  %7903 = vmatpush1.bf16.msra.mxu1 %v14582_v18  ;;  %v14615_v18 = vld [vmem:[#allocation12 + $0x20] ss:$48 sps:$4 sm:$0xff]  }
 0xcf8   : > { %7758 = vmatprep.subr.bf16.mxu0 %v14587_v51  ;;  %7904 = vmatprep.subr.bf16.mxu1 %v14590_v55  ;;  %v14618_v51 = vld [vmem:[#allocation12 + $0x28] ss:$48 sps:$4 sm:$0xff]   ;;  %v14623_v55 = vld [vmem:[#allocation12 + $0x84] ss:$48 sps:$4 sm:$0xff]  }
 0xcfa   : > { %7759 = vmatpush1.bf16.msra.mxu0 %v14585_v14  ;;  %v14626_v14 = vld [vmem:[#allocation12 + $0x8c] ss:$48 sps:$4 sm:$0xff]  }
 0xcfb   : > { %7905 = vmatpush1.bf16.msra.mxu1 %v14588_v16  ;;  %7760 = vmatprep.subr.bf16.mxu0 %v14593_v30  ;;  %v14621_v16 = vld [vmem:[#allocation12 + $0x80] ss:$48 sps:$4 sm:$0xff]   ;;  %v14624_v30 = vld [vmem:[#allocation12 + $0x88] ss:$48 sps:$4 sm:$0xff]  }
 0xcfc   : > { %7906 = vmatprep.subr.bf16.mxu1 %v14596_v46  ;;  %v14629_v46 = vld [vmem:[#allocation12 + $0xe4] ss:$48 sps:$4 sm:$0xff]  }
 0xcfd   : > { %7732 = vmatmul.mubr.bf16.gmra.mrb[136].mxu0 %v17396_v33  ;;  %7878 = vmatmul.mubr.bf16.gmra.mrb[136].mxu1 %v17396_v33 }
 0xcfe   : > { %7741 = vmatprep.mubr.bf16.mxu0 %v17430_v9  ;;  %7761 = vmatpush1.bf16.msra.mxu0 %v14591_v21  ;;  %v14632_v21 = vld [vmem:[#allocation12 + $0xec] ss:$48 sps:$4 sm:$0xff]  }
 0xcff   : > { %7887 = vmatprep.mubr.bf16.mxu1 %v17430_v9  ;;  %7907 = vmatpush1.bf16.msra.mxu1 %v14594_v11  ;;  %v14627_v11 = vld [vmem:[#allocation12 + $0xe0] ss:$48 sps:$4 sm:$0xff]  }
 0xd00   : > { %7762 = vmatprep.subr.bf16.mxu0 %v14599_v63  ;;  %7908 = vmatprep.subr.bf16.mxu1 %v14602_v25  ;;  %v14630_v63 = vld [vmem:[#allocation12 + $0xe8] ss:$48 sps:$4 sm:$0xff]   ;;  %v14635_v25 = vld [vmem:[#allocation12 + $0x144] ss:$48 sps:$4 sm:$0xff]  }
 0xd02   : > { %7763 = vmatpush1.bf16.msra.mxu0 %v14597_v59  ;;  %v14638_v59 = vld [vmem:[#allocation12 + $0x14c] ss:$48 sps:$4 sm:$0xff]  }
 0xd03   : > { %7909 = vmatpush1.bf16.msra.mxu1 %v14600_v27  ;;  %7764 = vmatprep.subr.bf16.mxu0 %v14605_v47  ;;  %v14633_v27 = vld [vmem:[#allocation12 + $0x140] ss:$48 sps:$4 sm:$0xff]   ;;  %v14636_v47 = vld [vmem:[#allocation12 + $0x148] ss:$48 sps:$4 sm:$0xff]  }
 0xd04   : > { %7910 = vmatprep.subr.bf16.mxu1 %v14608_v54  ;;  %v14641_v54 = vld [vmem:[#allocation12 + $0x1a4] ss:$48 sps:$4 sm:$0xff]  }
 0xd05   : > { %7742 = vmatmul.mubr.bf16.gmra.mrb[140].mxu0 %v17434_v3  ;;  %7888 = vmatmul.mubr.bf16.gmra.mrb[140].mxu1 %v17434_v3 }
 0xd06   : > { %7765 = vmatpush1.bf16.msra.mxu0 %v14603_v2  ;;  %7784 = vmatprep.mubr.bf16.mxu0 %v18532_v40  ;;  %v14644_v2 = vld [vmem:[#allocation12 + $0x1ac] ss:$48 sps:$4 sm:$0xff]  }
 0xd07   : > { %7911 = vmatpush1.bf16.msra.mxu1 %v14606_v29  ;;  %7766 = vmatprep.subr.bf16.mxu0 %v14611_v52  ;;  %v14639_v29 = vld [vmem:[#allocation12 + $0x1a0] ss:$48 sps:$4 sm:$0xff]   ;;  %v14642_v52 = vld [vmem:[#allocation12 + $0x1a8] ss:$48 sps:$4 sm:$0xff]  }
 0xd08   : > { %7912 = vmatprep.subr.bf16.mxu1 %v14614_v48  ;;  %7930 = vmatprep.mubr.bf16.mxu1 %v18532_v40  ;;  %v14647_v48 = vld [vmem:[#allocation12 + $0x204] ss:$48 sps:$4 sm:$0xff]  }
 0xd0a   : > { %7767 = vmatpush1.bf16.msra.mxu0 %v14609_v17  ;;  %v14650_v17 = vld [vmem:[#allocation12 + $0x20c] ss:$48 sps:$4 sm:$0xff]  }
 0xd0b   : > { %7913 = vmatpush1.bf16.msra.mxu1 %v14612_v43  ;;  %7971 = vmatprep.subr.bf16.mxu0 %v14617_v22  ;;  %v14645_v43 = vld [vmem:[#allocation12 + $0x200] ss:$48 sps:$4 sm:$0xff]   ;;  %v14648_v22 = vld [vmem:[#allocation12 + $0x208] ss:$48 sps:$4 sm:$0xff]  }
 0xd0c   : > { %8117 = vmatprep.subr.bf16.mxu1 %v14620_v28  ;;  %v14653_v28 = vld [vmem:[#allocation12 + $0x264] ss:$48 sps:$4 sm:$0xff]  }
 0xd0d   : > { %7785 = vmatmul.mubr.bf16.vlgmr.msra.gmra.mrb[128].mxu0 %v17466_v61 }
 0xd0e   : > { %7931 = vmatmul.mubr.bf16.vlgmr.msra.gmra.mrb[128].mxu1 %v17466_v61  ;;  %7972 = vmatpush1.bf16.msra.mxu0 %v14615_v18  ;;  %v14656_v18 = vld [vmem:[#allocation12 + $0x26c] ss:$48 sps:$4 sm:$0xff]  }
 0xd0f   : > { %8118 = vmatpush1.bf16.msra.mxu1 %v14618_v51  ;;  %7973 = vmatprep.subr.bf16.mxu0 %v14623_v55  ;;  %v14651_v51 = vld [vmem:[#allocation12 + $0x260] ss:$48 sps:$4 sm:$0xff]   ;;  %v14654_v55 = vld [vmem:[#allocation12 + $0x268] ss:$48 sps:$4 sm:$0xff]  }
 0xd10   : > { %8119 = vmatprep.subr.bf16.mxu1 %v14626_v14  ;;  %7794 = vmatprep.mubr.bf16.mxu0 %v18532_v40  ;;  %v14659_v14 = vld [vmem:[#allocation12 + $0x2c4] ss:$48 sps:$4 sm:$0xff]  }
 0xd11   : > { %7940 = vmatprep.mubr.bf16.mxu1 %v18532_v40 }
 0xd12   : > { %7974 = vmatpush1.bf16.msra.mxu0 %v14621_v16  ;;  %v14662_v16 = vld [vmem:[#allocation12 + $0x2cc] ss:$48 sps:$4 sm:$0xff]  }
 0xd13   : > { %8120 = vmatpush1.bf16.msra.mxu1 %v14624_v30  ;;  %7975 = vmatprep.subr.bf16.mxu0 %v14629_v46  ;;  %v14657_v30 = vld [vmem:[#allocation12 + $0x2c0] ss:$48 sps:$4 sm:$0xff]   ;;  %v14660_v46 = vld [vmem:[#allocation12 + $0x2c8] ss:$48 sps:$4 sm:$0xff]  }
 0xd14   : > { %8121 = vmatprep.subr.bf16.mxu1 %v14632_v21  ;;  %v14665_v21 = vld [vmem:[#allocation12 + $0x324] ss:$48 sps:$4 sm:$0xff]  }
 0xd15   : > { %7795 = vmatmul.mubr.bf16.gmra.mrb[132].mxu0 %v17486_v60 }
 0xd16   : > { %7941 = vmatmul.mubr.bf16.gmra.mrb[132].mxu1 %v17486_v60  ;;  %7976 = vmatpush1.bf16.msra.mxu0 %v14627_v11  ;;  %v14668_v11 = vld [vmem:[#allocation12 + $0x32c] ss:$48 sps:$4 sm:$0xff]  }
 0xd17   : > { %8122 = vmatpush1.bf16.msra.mxu1 %v14630_v63  ;;  %7977 = vmatprep.subr.bf16.mxu0 %v14635_v25  ;;  %v14663_v63 = vld [vmem:[#allocation12 + $0x320] ss:$48 sps:$4 sm:$0xff]   ;;  %v14666_v25 = vld [vmem:[#allocation12 + $0x328] ss:$48 sps:$4 sm:$0xff]  }
 0xd18   : > { %8123 = vmatprep.subr.bf16.mxu1 %v14638_v59  ;;  %7804 = vmatprep.mubr.bf16.mxu0 %v18532_v40  ;;  %v14671_v59 = vld [vmem:[#allocation12 + $0x384] ss:$48 sps:$4 sm:$0xff]  }
 0xd19   : > { %7950 = vmatprep.mubr.bf16.mxu1 %v18532_v40 }
 0xd1a   : > { %7978 = vmatpush1.bf16.msra.mxu0 %v14633_v27  ;;  %v14674_v27 = vld [vmem:[#allocation12 + $0x38c] ss:$48 sps:$4 sm:$0xff]  }
 0xd1b   : > { %8124 = vmatpush1.bf16.msra.mxu1 %v14636_v47  ;;  %7979 = vmatprep.subr.bf16.mxu0 %v14641_v54  ;;  %v14669_v47 = vld [vmem:[#allocation12 + $0x380] ss:$48 sps:$4 sm:$0xff]   ;;  %v14672_v54 = vld [vmem:[#allocation12 + $0x388] ss:$48 sps:$4 sm:$0xff]  }
 0xd1c   : > { %8125 = vmatprep.subr.bf16.mxu1 %v14644_v2  ;;  %v14677_v2 = vld [vmem:[#allocation12 + $0x3e4] ss:$48 sps:$4 sm:$0xff]  }
 0xd1d   : > { %7805 = vmatmul.mubr.bf16.gmra.mrb[136].mxu0 %v17506_v34 }
 0xd1e   : > { %7951 = vmatmul.mubr.bf16.gmra.mrb[136].mxu1 %v17506_v34  ;;  %7980 = vmatpush1.bf16.msra.mxu0 %v14639_v29  ;;  %v14680_v29 = vld [vmem:[#allocation12 + $0x3ec] ss:$48 sps:$4 sm:$0xff]  }
 0xd1f   : > { %8126 = vmatpush1.bf16.msra.mxu1 %v14642_v52  ;;  %7981 = vmatprep.subr.bf16.mxu0 %v14647_v48  ;;  %v14678_v52 = vld [vmem:[#allocation12 + $0x3e8] ss:$48 sps:$4 sm:$0xff]   ;;  %v14683_v48 = vld [vmem:[#allocation12 + $0x444] ss:$48 sps:$4 sm:$0xff]  }
 0xd20   : > { %8127 = vmatprep.subr.bf16.mxu1 %v14650_v17  ;;  %7814 = vmatprep.mubr.bf16.mxu0 %v18532_v40  ;;  %v14686_v17 = vld [vmem:[#allocation12 + $0x44c] ss:$48 sps:$4 sm:$0xff]  }
 0xd21   : > { %7960 = vmatprep.mubr.bf16.mxu1 %v18532_v40 }
 0xd22   : > { %7982 = vmatpush1.bf16.msra.mxu0 %v14645_v43  ;;  %v14681_v43 = vld [vmem:[#allocation12 + $0x440] ss:$48 sps:$4 sm:$0xff]  }
 0xd23   : > { %8128 = vmatpush1.bf16.msra.mxu1 %v14648_v22  ;;  %7983 = vmatprep.subr.bf16.mxu0 %v14653_v28  ;;  %v14684_v22 = vld [vmem:[#allocation12 + $0x448] ss:$48 sps:$4 sm:$0xff]   ;;  %v14689_v28 = vld [vmem:[#allocation12 + $0x4a4] ss:$48 sps:$4 sm:$0xff]  }
 0xd24   : > { %8129 = vmatprep.subr.bf16.mxu1 %v14656_v18  ;;  %v14692_v18 = vld [vmem:[#allocation12 + $0x4ac] ss:$48 sps:$4 sm:$0xff]  }
 0xd25   : > { %7815 = vmatmul.mubr.bf16.gmra.mrb[140].mxu0 %v17522_v56 }
 0xd26   : > { %7961 = vmatmul.mubr.bf16.gmra.mrb[140].mxu1 %v17522_v56  ;;  %7984 = vmatpush1.bf16.msra.mxu0 %v14651_v51  ;;  %v14687_v51 = vld [vmem:[#allocation12 + $0x4a0] ss:$48 sps:$4 sm:$0xff]  }
 0xd27   : > { %8003 = vmatprep.mubr.bf16.mxu0 %v17310_v5  ;;  %8130 = vmatpush1.bf16.msra.mxu1 %v14654_v55  ;;  %v14690_v55 = vld [vmem:[#allocation12 + $0x4a8] ss:$48 sps:$4 sm:$0xff]  }
 0xd28   : > { %8149 = vmatprep.mubr.bf16.mxu1 %v17310_v5  ;;  %7985 = vmatprep.subr.bf16.mxu0 %v14659_v14  ;;  %v14675_v5 = vld [vmem:[#allocation12 + $0x3e0] ss:$48 sps:$4 sm:$0xff]   ;;  %v14695_v14 = vld [vmem:[#allocation12 + $0x504] ss:$48 sps:$4 sm:$0xff]  }
 0xd29   : > { %8131 = vmatprep.subr.bf16.mxu1 %v14662_v16  ;;  %v14698_v16 = vld [vmem:[#allocation12 + $0x50c] ss:$48 sps:$4 sm:$0xff]  }
 0xd2a   : > { %7986 = vmatpush1.bf16.msra.mxu0 %v14657_v30  ;;  %v14693_v30 = vld [vmem:[#allocation12 + $0x500] ss:$48 sps:$4 sm:$0xff]  }
 0xd2b   : > { %8132 = vmatpush1.bf16.msra.mxu1 %v14660_v46  ;;  %7987 = vmatprep.subr.bf16.mxu0 %v14665_v21  ;;  %v14696_v46 = vld [vmem:[#allocation12 + $0x508] ss:$48 sps:$4 sm:$0xff]   ;;  %v14701_v21 = vld [vmem:[#allocation12 + $0x564] ss:$48 sps:$4 sm:$0xff]  }
 0xd2c   : > { %8133 = vmatprep.subr.bf16.mxu1 %v14668_v11  ;;  %v14704_v11 = vld [vmem:[#allocation12 + $0x56c] ss:$48 sps:$4 sm:$0xff]  }
 0xd2e   : > { %7988 = vmatpush1.bf16.msra.mxu0 %v14663_v63  ;;  %v14699_v63 = vld [vmem:[#allocation12 + $0x560] ss:$48 sps:$4 sm:$0xff]  }
 0xd2f   : > { %8134 = vmatpush1.bf16.msra.mxu1 %v14666_v25  ;;  %7989 = vmatprep.subr.bf16.mxu0 %v14671_v59  ;;  %v14702_v25 = vld [vmem:[#allocation12 + $0x568] ss:$48 sps:$4 sm:$0xff]   ;;  %v14707_v59 = vld [vmem:[#allocation12 + $0x5c4] ss:$48 sps:$4 sm:$0xff]  }
 0xd30   : > { %8135 = vmatprep.subr.bf16.mxu1 %v14674_v27  ;;  %v14710_v27 = vld [vmem:[#allocation12 + $0x5cc] ss:$48 sps:$4 sm:$0xff]  }
 0xd32   : > { %7990 = vmatpush1.bf16.msra.mxu0 %v14669_v47  ;;  %v14705_v47 = vld [vmem:[#allocation12 + $0x5c0] ss:$48 sps:$4 sm:$0xff]  }
 0xd33   : > { %8136 = vmatpush1.bf16.msra.mxu1 %v14672_v54  ;;  %7991 = vmatprep.subr.bf16.mxu0 %v14677_v2  ;;  %v14708_v54 = vld [vmem:[#allocation12 + $0x5c8] ss:$48 sps:$4 sm:$0xff]   ;;  %v14713_v2 = vld [vmem:[#allocation12 + $0x624] ss:$48 sps:$4 sm:$0xff]  }
 0xd34   : > { %8137 = vmatprep.subr.bf16.mxu1 %v14680_v29  ;;  %v14716_v29 = vld [vmem:[#allocation12 + $0x62c] ss:$48 sps:$4 sm:$0xff]  }
 0xd36   : > { %7992 = vmatpush1.bf16.msra.mxu0 %v14675_v5  ;;  %v14711_v5 = vld [vmem:[#allocation12 + $0x620] ss:$48 sps:$4 sm:$0xff]  }
 0xd37   : > { %8138 = vmatpush1.bf16.msra.mxu1 %v14678_v52  ;;  %7993 = vmatprep.subr.bf16.mxu0 %v14683_v48  ;;  %v14714_v52 = vld [vmem:[#allocation12 + $0x628] ss:$48 sps:$4 sm:$0xff]   ;;  %v14719_v48 = vld [vmem:[#allocation12 + $0x684] ss:$48 sps:$4 sm:$0xff]  }
 0xd38   : > { %8139 = vmatprep.subr.bf16.mxu1 %v14686_v17  ;;  %v14722_v17 = vld [vmem:[#allocation12 + $0x68c] ss:$48 sps:$4 sm:$0xff]  }
 0xd3a   : > { %7994 = vmatpush1.bf16.msra.mxu0 %v14681_v43  ;;  %v14717_v43 = vld [vmem:[#allocation12 + $0x680] ss:$48 sps:$4 sm:$0xff]  }
 0xd3b   : > { %8140 = vmatpush1.bf16.msra.mxu1 %v14684_v22  ;;  %7995 = vmatprep.subr.bf16.mxu0 %v14689_v28  ;;  %v14720_v22 = vld [vmem:[#allocation12 + $0x688] ss:$48 sps:$4 sm:$0xff]   ;;  %v14725_v28 = vld [vmem:[#allocation12 + $0x6e4] ss:$48 sps:$4 sm:$0xff]  }
 0xd3c   : > { %8141 = vmatprep.subr.bf16.mxu1 %v14692_v18  ;;  %v14728_v18 = vld [vmem:[#allocation12 + $0x6ec] ss:$48 sps:$4 sm:$0xff]  }
 0xd3e   : > { %7996 = vmatpush1.bf16.msra.mxu0 %v14687_v51  ;;  %v14723_v51 = vld [vmem:[#allocation12 + $0x6e0] ss:$48 sps:$4 sm:$0xff]  }
 0xd3f   : > { %8142 = vmatpush1.bf16.msra.mxu1 %v14690_v55  ;;  %7997 = vmatprep.subr.bf16.mxu0 %v14695_v14  ;;  %v14726_v55 = vld [vmem:[#allocation12 + $0x6e8] ss:$48 sps:$4 sm:$0xff]   ;;  %v14731_v14 = vld [vmem:[#allocation12 + $0x744] ss:$48 sps:$4 sm:$0xff]  }
 0xd40   : > { %8143 = vmatprep.subr.bf16.mxu1 %v14698_v16  ;;  %v14732_v16 = vld [vmem:[#allocation12 + $0x748] ss:$48 sps:$4 sm:$0xff]  }
 0xd42   : > { %7998 = vmatpush1.bf16.msra.mxu0 %v14693_v30  ;;  %v14737_v30 = vld [vmem:[#allocation12 + $0x7a4] ss:$48 sps:$4 sm:$0xff]  }
 0xd43   : > { %8144 = vmatpush1.bf16.msra.mxu1 %v14696_v46  ;;  %7999 = vmatprep.subr.bf16.mxu0 %v14701_v21  ;;  %v14740_v46 = vld [vmem:[#allocation12 + $0x7ac] ss:$48 sps:$4 sm:$0xff]   ;;  %v14735_v21 = vld [vmem:[#allocation12 + $0x7a0] ss:$48 sps:$4 sm:$0xff]  }
 0xd44   : > { %8145 = vmatprep.subr.bf16.mxu1 %v14704_v11  ;;  %v14738_v11 = vld [vmem:[#allocation12 + $0x7a8] ss:$48 sps:$4 sm:$0xff]  }
 0xd46   : > { %8000 = vmatpush1.bf16.msra.mxu0 %v14699_v63  ;;  %v14743_v63 = vld [vmem:[#allocation12 + $0x804] ss:$48 sps:$4 sm:$0xff]  }
 0xd47   : > { %8146 = vmatpush1.bf16.msra.mxu1 %v14702_v25  ;;  %8001 = vmatprep.subr.bf16.mxu0 %v14707_v59  ;;  %v14744_v25 = vld [vmem:[#allocation12 + $0x808] ss:$48 sps:$4 sm:$0xff]   ;;  %v14749_v59 = vld [vmem:[#allocation12 + $0x864] ss:$48 sps:$4 sm:$0xff]  }
 0xd48   : > { %8147 = vmatprep.subr.bf16.mxu1 %v14710_v27  ;;  %v14752_v27 = vld [vmem:[#allocation12 + $0x86c] ss:$48 sps:$4 sm:$0xff]  }
 0xd4a   : > { %8002 = vmatpush1.bf16.msra.mxu0 %v14705_v47  ;;  %v14747_v47 = vld [vmem:[#allocation12 + $0x860] ss:$48 sps:$4 sm:$0xff]  }
 0xd4b   : > { %8148 = vmatpush1.bf16.msra.mxu1 %v14708_v54  ;;  %8044 = vmatprep.subr.bf16.mxu0 %v14713_v2  ;;  %v14750_v54 = vld [vmem:[#allocation12 + $0x868] ss:$48 sps:$4 sm:$0xff]   ;;  %v14755_v2 = vld [vmem:[#allocation12 + $0x8c4] ss:$48 sps:$4 sm:$0xff]  }
 0xd4c   : > { %8190 = vmatprep.subr.bf16.mxu1 %v14716_v29  ;;  %v14756_v29 = vld [vmem:[#allocation12 + $0x8c8] ss:$48 sps:$4 sm:$0xff]  }
 0xd4d   : > { %8004 = vmatmul.mubr.bf16.vlgmr.msra.gmra.mrb[144].mxu0 %v17314_v38 }
 0xd4e   : > { %8150 = vmatmul.mubr.bf16.vlgmr.msra.gmra.mrb[144].mxu1 %v17314_v38  ;;  %8013 = vmatprep.mubr.bf16.mxu0 %v17350_v57  ;;  %v14734_v38 = vld [vmem:[#allocation12 + $0x74c] ss:$48 sps:$4 sm:$0xff]  }
 0xd4f   : > { %8045 = vmatpush1.bf16.msra.mxu0 %v14711_v5  ;;  %8159 = vmatprep.mubr.bf16.mxu1 %v17350_v57  ;;  %v14729_v57 = vld [vmem:[#allocation12 + $0x740] ss:$48 sps:$4 sm:$0xff]  }
 0xd50   : > { %8191 = vmatpush1.bf16.msra.mxu1 %v14714_v52  ;;  %8046 = vmatprep.subr.bf16.mxu0 %v14719_v48  ;;  %v14761_v5 = vld [vmem:[#allocation15 + $0x4] ss:$12 sps:$4 sm:$0xff]   ;;  %v14762_v52 = vld [vmem:[#allocation15 + $0xc8] ss:$12 sps:$4 sm:$0xff]   ;;  %v14759_v48 = vld [vmem:[#allocation15] ss:$12 sps:$4 sm:$0xff]  }
 0xd51   : > { %8192 = vmatprep.subr.bf16.mxu1 %v14722_v17  ;;  %v14763_v17 = vld [vmem:[#allocation15 + $0x8] ss:$12 sps:$4 sm:$0xff]  }
 0xd53   : > { %8047 = vmatpush1.bf16.msra.mxu0 %v14717_v43  ;;  %v14766_v43 = vld [vmem:[#allocation15 + $0x1c] ss:$12 sps:$4 sm:$0xff]  }
 0xd54   : > { %8193 = vmatpush1.bf16.msra.mxu1 %v14720_v22  ;;  %8048 = vmatprep.subr.bf16.mxu0 %v14725_v28  ;;  %v14764_v22 = vld [vmem:[#allocation15 + $0x18] ss:$12 sps:$4 sm:$0xff]   ;;  %v14768_v28 = vld [vmem:[#allocation15 + $0x20] ss:$12 sps:$4 sm:$0xff]  }
 0xd55   : > { %8014 = vmatmul.mubr.bf16.gmra.mrb[148].mxu0 %v17354_v44  ;;  %8194 = vmatprep.subr.bf16.mxu1 %v14728_v18  ;;  %v14771_v18 = vld [vmem:[#allocation15 + $0x34] ss:$12 sps:$4 sm:$0xff]  }
 0xd56   : > { %8160 = vmatmul.mubr.bf16.gmra.mrb[148].mxu1 %v17354_v44  ;;  %8023 = vmatprep.mubr.bf16.mxu0 %v17392_v31  ;;  %v14746_v44 = vld [vmem:[#allocation12 + $0x80c] ss:$48 sps:$4 sm:$0xff]  }
 0xd57   : > { %8049 = vmatpush1.bf16.msra.mxu0 %v14723_v51  ;;  %8169 = vmatprep.mubr.bf16.mxu1 %v17392_v31  ;;  %v14741_v31 = vld [vmem:[#allocation12 + $0x800] ss:$48 sps:$4 sm:$0xff]  }
 0xd58   : > { %8195 = vmatpush1.bf16.msra.mxu1 %v14726_v55  ;;  %8050 = vmatprep.subr.bf16.mxu0 %v14731_v14  ;;  %v14772_v51 = vld [vmem:[#allocation15 + $0xf8] ss:$12 sps:$4 sm:$0xff]   ;;  %v14769_v55 = vld [vmem:[#allocation15 + $0x30] ss:$12 sps:$4 sm:$0xff]  }
 0xd59   : > { %8196 = vmatprep.subr.bf16.mxu1 %v14734_v38  ;;  %v14773_v14 = vld [vmem:[#allocation15 + $0x38] ss:$12 sps:$4 sm:$0xff]  }
 0xd5a   : > { %v14776_v38 = vld [vmem:[#allocation15 + $0x4c] ss:$12 sps:$4 sm:$0xff]  }
 0xd5b   : > { %8051 = vmatpush1.bf16.msra.mxu0 %v14729_v57  ;;  %v14774_v57 = vld [vmem:[#allocation15 + $0x48] ss:$12 sps:$4 sm:$0xff]  }
 0xd5c   : > { %8197 = vmatpush1.bf16.msra.mxu1 %v14732_v16  ;;  %8052 = vmatprep.subr.bf16.mxu0 %v14737_v30  ;;  %v14778_v16 = vld [vmem:[#allocation15 + $0x50] ss:$12 sps:$4 sm:$0xff]  }
 0xd5d   : > { %8024 = vmatmul.mubr.bf16.gmra.mrb[152].mxu0 %v17396_v33  ;;  %8198 = vmatprep.subr.bf16.mxu1 %v14740_v46  ;;  %v14781_v30 = vld [vmem:[#allocation15 + $0x64] ss:$12 sps:$4 sm:$0xff]   ;;  %v14782_v46 = vld [vmem:[#allocation15 + $0x128] ss:$12 sps:$4 sm:$0xff]  }
 0xd5e   : > { %8170 = vmatmul.mubr.bf16.gmra.mrb[152].mxu1 %v17396_v33  ;;  %8033 = vmatprep.mubr.bf16.mxu0 %v17430_v9  ;;  %v14758_v33 = vld [vmem:[#allocation12 + $0x8cc] ss:$48 sps:$4 sm:$0xff]  }
 0xd5f   : > { %8053 = vmatpush1.bf16.msra.mxu0 %v14735_v21  ;;  %8179 = vmatprep.mubr.bf16.mxu1 %v17430_v9  ;;  %v14753_v9 = vld [vmem:[#allocation12 + $0x8c0] ss:$48 sps:$4 sm:$0xff]  }
 0xd60   : > { %8199 = vmatpush1.bf16.msra.mxu1 %v14738_v11  ;;  %8054 = vmatprep.subr.bf16.mxu0 %v14743_v63  ;;  %v17584_v21 = vld [vmem:[#allocation13] sm:$0xff]  ;;  %v18453_v11 = vsub.s32 3, %v18524_v45  ;;  %v14779_v63 = vld [vmem:[#allocation15 + $0x60] ss:$12 sps:$4 sm:$0xff]  }
 0xd61   : > { %8200 = vmatprep.subr.bf16.mxu1 %v14746_v44  ;;  %v14786_v44 = vld [vmem:[#allocation15 + $0x7c] ss:$12 sps:$4 sm:$0xff]  }
 0xd63   : > { %8055 = vmatpush1.bf16.msra.mxu0 %v14741_v31  ;;  %v17589_v31 = vrot.slane %v17584_v21, %v16993_v19 }
 0xd64   : > { %8201 = vmatpush1.bf16.msra.mxu1 %v14744_v25  ;;  %8056 = vmatprep.subr.bf16.mxu0 %v14749_v59  ;;  %v17593_v25 = vrot.slane %v17584_v21, %v16996_v49  ;;  %v14787_v59 = vld [vmem:[#allocation15 + $0x140] ss:$12 sps:$4 sm:$0xff]  }
 0xd65   : > { %8034 = vmatmul.mubr.bf16.gmra.mrb[156].mxu0 %v17434_v3  ;;  %8202 = vmatprep.subr.bf16.mxu1 %v14752_v27  ;;  %v17598_v27 = vrot.slane %v17584_v21, %v16999_v42 }
 0xd66   : > { %8180 = vmatmul.mubr.bf16.gmra.mrb[156].mxu1 %v17434_v3  ;;  %8076 = vmatprep.mubr.bf16.mxu0 %v18532_v40  ;;  %v14767_v3 = vld [vmem:[#allocation15 + $0xe0] ss:$12 sps:$4 sm:$0xff]  }
 0xd67   : > { %8057 = vmatpush1.bf16.msra.mxu0 %v14747_v47  ;;  %8222 = vmatprep.mubr.bf16.mxu1 %v18532_v40  ;;  %v17603_v47 = vrot.slane %v17584_v21, %v18453_v11 }
 0xd68   : > { %8203 = vmatpush1.bf16.msra.mxu1 %v14750_v54  ;;  %8058 = vmatprep.subr.bf16.mxu0 %v14755_v2  ;;  %v14784_v54 = vld [vmem:[#allocation15 + $0x78] ss:$12 sps:$4 sm:$0xff]  }
 0xd69   : > { %8204 = vmatprep.subr.bf16.mxu1 %v14758_v33 }
 0xd6b   : > { %8059 = vmatpush1.bf16.msra.mxu0 %v14753_v9  ;;  %v14788_v9 = vld [vmem:[#allocation15 + $0x80] ss:$12 sps:$4 sm:$0xff]  }
 0xd6c   : > { %8205 = vmatpush1.bf16.msra.mxu1 %v14756_v29  ;;  %10344 = vmatprep.subr.bf16.mxu0 %v14761_v5  ;;  %v14791_v29 = vld [vmem:[#allocation15 + $0x94] ss:$12 sps:$4 sm:$0xff]  }
 0xd6d   : > { %12812 = vmatprep.subr.bf16.mxu1 %v14762_v52 }
 0xd6e   : > { %8077 = vmatmul.mubr.bf16.vlgmr.msra.gmra.mrb[144].mxu0 %v17466_v61 }
 0xd6f   : > { %8223 = vmatmul.mubr.bf16.vlgmr.msra.gmra.mrb[144].mxu1 %v17466_v61  ;;  %10345 = vmatpush1.bf16.msra.mxu0 %v14759_v48  ;;  %v14777_v61 = vld [vmem:[#allocation15 + $0x110] ss:$12 sps:$4 sm:$0xff]  }
 0xd70   : > { %12813 = vmatpush3.bf16.msra.mxu1 %v14763_v17  ;;  %10346 = vmatprep.subr.bf16.mxu0 %v14766_v43  ;;  %v14792_v43 = vld [vmem:[#allocation15 + $0x158] ss:$12 sps:$4 sm:$0xff]  }
 0xd71   : > { %12814 = vmatprep.subr.bf16.mxu1 %v14767_v3  ;;  %8086 = vmatprep.mubr.bf16.mxu0 %v18532_v40 }
 0xd72   : > { %8232 = vmatprep.mubr.bf16.mxu1 %v18532_v40 }
 0xd73   : > { %10347 = vmatpush1.bf16.msra.mxu0 %v14764_v22 }
 0xd74   : > { %12815 = vmatpush3.bf16.msra.mxu1 %v14768_v28  ;;  %10348 = vmatprep.subr.bf16.mxu0 %v14771_v18 }
 0xd75   : > { %12816 = vmatprep.subr.bf16.mxu1 %v14772_v51 }
 0xd76   : > { %8087 = vmatmul.mubr.bf16.gmra.mrb[148].mxu0 %v17486_v60 }
 0xd77   : > { %8233 = vmatmul.mubr.bf16.gmra.mrb[148].mxu1 %v17486_v60  ;;  %10349 = vmatpush1.bf16.msra.mxu0 %v14769_v55  ;;  %v14783_v60 = vld [vmem:[#allocation15 + $0x68] ss:$12 sps:$4 sm:$0xff]  }
 0xd78   : > { %12817 = vmatpush3.bf16.msra.mxu1 %v14773_v14  ;;  %10350 = vmatprep.subr.bf16.mxu0 %v14776_v38  ;;  %v14789_v38 = vld [vmem:[#allocation15 + $0x90] ss:$12 sps:$4 sm:$0xff]  }
 0xd79   : > { %12818 = vmatprep.subr.bf16.mxu1 %v14777_v61  ;;  %8096 = vmatprep.mubr.bf16.mxu0 %v18532_v40 }
 0xd7a   : > { %8242 = vmatprep.mubr.bf16.mxu1 %v18532_v40 }
 0xd7b   : > { %10351 = vmatpush1.bf16.msra.mxu0 %v14774_v57 }
 0xd7c   : > { %12819 = vmatpush3.bf16.msra.mxu1 %v14778_v16  ;;  %10352 = vmatprep.subr.bf16.mxu0 %v14781_v30  ;;  %v14793_v16 = vld [vmem:[#allocation15 + $0x98] ss:$12 sps:$4 sm:$0xff]  }
 0xd7d   : > { %12820 = vmatprep.subr.bf16.mxu1 %v14782_v46  ;;  %v14796_v30 = vld [vmem:[#allocation15 + $0xac] ss:$12 sps:$4 sm:$0xff]  }
 0xd7e   : > { %8097 = vmatmul.mubr.bf16.gmra.mrb[152].mxu0 %v17506_v34 }
 0xd7f   : > { %8243 = vmatmul.mubr.bf16.gmra.mrb[152].mxu1 %v17506_v34  ;;  %10353 = vmatpush1.bf16.msra.mxu0 %v14779_v63 }
 0xd80   : > { %12821 = vmatpush3.bf16.msra.mxu1 %v14783_v60  ;;  %v7494_v2 = vpop.f32.mrb[112].mxu0  ;;  %v7640_v33 = vpop.f32.mrb[112].mxu1  ;;  %10354 = vmatprep.subr.bf16.mxu0 %v14786_v44  ;;  %v14797_v44 = vld [vmem:[#allocation15 + $0x170] ss:$12 sps:$4 sm:$0xff]  }
 0xd81   : > { %v13212_v5 = vadd.f32 %v7494_v2, %v17589_v31  ;;  %v13228_v52 = vadd.f32 %v7640_v33, %v17593_v25  ;;  %12822 = vmatprep.subr.bf16.mxu1 %v14787_v59  ;;  %v7496_v48 = vpop.f32.mrb[113].mxu0  ;;  %v7642_v17 = vpop.f32.mrb[113].mxu1  ;;  %8106 = vmatprep.mubr.bf16.mxu0 %v18532_v40 }
 0xd82   : > { %v13213_v34 = vadd.f32 %v7496_v48, %v17598_v27  ;;  %v13229_v3 = vadd.f32 %v7642_v17, %v17603_v47  ;;  %v7498_v22 = vpop.f32.mrb[114].mxu0  ;;  %v7644_v28 = vpop.f32.mrb[114].mxu1  ;;  %8252 = vmatprep.mubr.bf16.mxu1 %v18532_v40 }
 0xd83   : > { %10355 = vmatpush1.bf16.msra.mxu0 %v14784_v54  ;;  %v13214_v18 = vadd.f32 %v7498_v22, %v17589_v31  ;;  %v13230_v51 = vadd.f32 %v7644_v28, %v17593_v25  ;;  %v7500_v55 = vpop.f32.mrb[115].mxu0  ;;  %v7646_v14 = vpop.f32.mrb[115].mxu1  ;;  %v8263_v46 = vmax.f32 %v13212_v5, 0.0  ;;  %v8265_v63 = vmax.f32 %v13228_v52, 0.0 }
 0xd84   : > { %12823 = vmatpush3.bf16.msra.mxu1 %v14788_v9  ;;  %v13215_v61 = vadd.f32 %v7500_v55, %v17598_v27  ;;  %v13231_v57 = vadd.f32 %v7646_v14, %v17603_v47  ;;  %10356 = vmatprep.subr.bf16.mxu0 %v14791_v29  ;;  %v8264_v59 = vmax.f32 %v13213_v34, 0.0  ;;  %v8266_v54 = vmax.f32 %v13229_v3, 0.0  ;;  %v14794_v29 = vld [vmem:[#allocation15 + $0xa8] ss:$12 sps:$4 sm:$0xff]   ;;  %v14798_v34 = vld [vmem:[#allocation15 + $0xb0] ss:$12 sps:$4 sm:$0xff]  }
 0xd85   : > { %v8275_v60 = vmax.f32 %v13214_v18, 0.0  ;;  %v8277_v40 = vmax.f32 %v13230_v51, 0.0  ;;  %12824 = vmatprep.subr.bf16.mxu1 %v14792_v43  ;;  %v14801_v3 = vld [vmem:[#allocation15 + $0xc4] ss:$12 sps:$4 sm:$0xff]   ;;  %v14802_v55 = vld [vmem:[#allocation15 + $0x248] ss:$12 sps:$4 sm:$0xff]  }
 0xd86   : > { %v8276_v2 = vmax.f32 %v13215_v61, 0.0  ;;  %v8278_v33 = vmax.f32 %v13231_v57, 0.0  ;;  %8107 = vmatmul.mubr.bf16.gmra.mrb[156].mxu0 %v17522_v56 }
 0xd87   : > { %v17617_v9 = vpack.c.bf16 %v8275_v60, %v8263_v46  ;;  %v17619_v48 = vpack.c.bf16 %v8277_v40, %v8265_v63  ;;  %8253 = vmatmul.mubr.bf16.gmra.mrb[156].mxu1 %v17522_v56  ;;  %10357 = vmatpush1.bf16.msra.mxu0 %v14789_v38  ;;  %v14799_v63 = vld [vmem:[#allocation15 + $0xc0] ss:$12 sps:$4 sm:$0xff]  }
 0xd88   : > { %v8360_v5 = vpack.c.bf16 %v8276_v2, %v8264_v59  ;;  %v17622_v52 = vpack.c.bf16 %v8278_v33, %v8266_v54  ;;  %12825 = vmatpush3.bf16.msra.mxu1 %v14793_v16  ;;  %v7504_v17 = vpop.f32.mrb[116].mxu0  ;;  %v7650_v43 = vpop.f32.mrb[116].mxu1  ;;  %10358 = vmatprep.subr.bf16.mxu0 %v14796_v30  ;;  %v14806_v59 = vld [vmem:[#allocation15 + $0xdc] ss:$12 sps:$4 sm:$0xff]  }
 0xd89   : > { %v13216_v22 = vadd.f32 %v7504_v17, %v17589_v31  ;;  %v13232_v28 = vadd.f32 %v7650_v43, %v17593_v25  ;;  %12826 = vmatprep.subr.bf16.mxu1 %v14797_v44  ;;  %v7506_v18 = vpop.f32.mrb[117].mxu0  ;;  %v7652_v51 = vpop.f32.mrb[117].mxu1  ;;  %v14803_v44 = vld [vmem:[#allocation15 + $0x188] ss:$12 sps:$4 sm:$0xff]  }
 0xd8a   : > { %v13217_v56 = vadd.f32 %v7506_v18, %v17598_v27  ;;  %v13233_v14 = vadd.f32 %v7652_v51, %v17603_v47  ;;  %v7508_v38 = vpop.f32.mrb[118].mxu0  ;;  %v7654_v61 = vpop.f32.mrb[118].mxu1  ;;  %10376 = vmatprep.mubr.bf16.mxu0 %v8360_v5  ;;  %10814 = vmatprep.mubr.bf16.mxu1 %v8360_v5 }
 0xd8b   : > { %10359 = vmatpush1.bf16.msra.mxu0 %v14794_v29  ;;  %v13218_v57 = vadd.f32 %v7508_v38, %v17589_v31  ;;  %v13234_v16 = vadd.f32 %v7654_v61, %v17593_v25  ;;  %v7510_v30 = vpop.f32.mrb[119].mxu0  ;;  %v7656_v46 = vpop.f32.mrb[119].mxu1  ;;  %v8287_v54 = vmax.f32 %v13216_v22, 0.0  ;;  %v8289_v2 = vmax.f32 %v13232_v28, 0.0  ;;  %v14807_v29 = vld [vmem:[#allocation15 + $0x260] ss:$12 sps:$4 sm:$0xff]  }
 0xd8c   : > { %12827 = vmatpush3.bf16.msra.mxu1 %v14798_v34  ;;  %v13219_v60 = vadd.f32 %v7510_v30, %v17598_v27  ;;  %v13235_v40 = vadd.f32 %v7656_v46, %v17603_v47  ;;  %10360 = vmatprep.subr.bf16.mxu0 %v14801_v3  ;;  %v8288_v17 = vmax.f32 %v13217_v56, 0.0  ;;  %v8290_v43 = vmax.f32 %v13233_v14, 0.0  ;;  %v14804_v3 = vld [vmem:[#allocation15 + $0xd8] ss:$12 sps:$4 sm:$0xff]   ;;  %v14808_v56 = vld [vmem:[#allocation15 + $0x1a0] ss:$12 sps:$4 sm:$0xff]  }
 0xd8d   : > { %v8299_v33 = vmax.f32 %v13218_v57, 0.0  ;;  %v8301_v5 = vmax.f32 %v13234_v16, 0.0  ;;  %12852 = vmatprep.subr.bf16.mxu1 %v14802_v55  ;;  %v14811_v14 = vld [vmem:[#allocation15 + $0xf4] ss:$12 sps:$4 sm:$0xff]  }
 0xd8e   : > { %v8300_v18 = vmax.f32 %v13219_v60, 0.0  ;;  %v8302_v51 = vmax.f32 %v13235_v40, 0.0  ;;  %v14812_v60 = vld [vmem:[#allocation15 + $0x278] ss:$12 sps:$4 sm:$0xff]  }
 0xd8f   : > { %v17632_v38 = vpack.c.bf16 %v8299_v33, %v8287_v54  ;;  %v17634_v34 = vpack.c.bf16 %v8301_v5, %v8289_v2  ;;  %10815 = vmatmul.mubr.bf16.vlgmr.msra.gmra.mrb[160].mxu1 %v17617_v9  ;;  %10361 = vmatpush1.bf16.msra.mxu0 %v14799_v63 }
 0xd90   : > { %v17637_v61 = vpack.c.bf16 %v8300_v18, %v8288_v17  ;;  %v17639_v22 = vpack.c.bf16 %v8302_v51, %v8290_v43  ;;  %12853 = vmatpush3.bf16.msra.mxu1 %v14803_v44  ;;  %v7514_v28 = vpop.f32.mrb[120].mxu0  ;;  %v7660_v55 = vpop.f32.mrb[120].mxu1  ;;  %10362 = vmatprep.subr.bf16.mxu0 %v14806_v59  ;;  %v14809_v17 = vld [vmem:[#allocation15 + $0xf0] ss:$12 sps:$4 sm:$0xff]   ;;  %v14813_v18 = vld [vmem:[#allocation15 + $0x1b8] ss:$12 sps:$4 sm:$0xff]  }
 0xd91   : > { %v13220_v57 = vadd.f32 %v7514_v28, %v17589_v31  ;;  %v13236_v16 = vadd.f32 %v7660_v55, %v17593_v25  ;;  %12854 = vmatprep.subr.bf16.mxu1 %v14807_v29  ;;  %v7516_v30 = vpop.f32.mrb[121].mxu0  ;;  %v7662_v46 = vpop.f32.mrb[121].mxu1  ;;  %v14816_v51 = vld [vmem:[#allocation15 + $0x10c] ss:$12 sps:$4 sm:$0xff]  }
 0xd92   : > { %v13221_v63 = vadd.f32 %v7516_v30, %v17598_v27  ;;  %v13237_v40 = vadd.f32 %v7662_v46, %v17603_v47  ;;  %v7518_v54 = vpop.f32.mrb[122].mxu0  ;;  %v7664_v2 = vpop.f32.mrb[122].mxu1  ;;  %10822 = vmatprep.mubr.bf16.mxu1 %v17637_v61 }
 0xd93   : > { %10363 = vmatpush1.bf16.msra.mxu0 %v14804_v3  ;;  %v13222_v44 = vadd.f32 %v7518_v54, %v17589_v31  ;;  %v13238_v59 = vadd.f32 %v7664_v2, %v17593_v25  ;;  %v7520_v33 = vpop.f32.mrb[123].mxu0  ;;  %v7666_v5 = vpop.f32.mrb[123].mxu1  ;;  %v8311_v28 = vmax.f32 %v13220_v57, 0.0  ;;  %v8313_v55 = vmax.f32 %v13236_v16, 0.0  ;;  %v14817_v3 = vld [vmem:[#allocation15 + $0x290] ss:$12 sps:$4 sm:$0xff]  }
 0xd94   : > { %12855 = vmatpush3.bf16.msra.mxu1 %v14808_v56  ;;  %v13223_v29 = vadd.f32 %v7520_v33, %v17598_v27  ;;  %v13239_v43 = vadd.f32 %v7666_v5, %v17603_v47  ;;  %10364 = vmatprep.subr.bf16.mxu0 %v14811_v14  ;;  %v8312_v54 = vmax.f32 %v13221_v63, 0.0  ;;  %v8314_v11 = vmax.f32 %v13237_v40, 0.0  ;;  %v14814_v14 = vld [vmem:[#allocation15 + $0x108] ss:$12 sps:$4 sm:$0xff]   ;;  %v14818_v63 = vld [vmem:[#allocation15 + $0x1d0] ss:$12 sps:$4 sm:$0xff]  }
 0xd95   : > { %v8323_v30 = vmax.f32 %v13222_v44, 0.0  ;;  %v8325_v46 = vmax.f32 %v13238_v59, 0.0  ;;  %12856 = vmatprep.subr.bf16.mxu1 %v14812_v60  ;;  %v14821_v40 = vld [vmem:[#allocation15 + $0x124] ss:$12 sps:$4 sm:$0xff]  }
 0xd96   : > { %v8324_v2 = vmax.f32 %v13223_v29, 0.0  ;;  %v8326_v7 = vmax.f32 %v13239_v43, 0.0  ;;  %v14822_v43 = vld [vmem:[#allocation15 + $0x2a8] ss:$12 sps:$4 sm:$0xff]  }
 0xd97   : > { %v17650_v41 = vpack.c.bf16 %v8323_v30, %v8311_v28  ;;  %v17652_v56 = vpack.c.bf16 %v8325_v46, %v8313_v55  ;;  %10823 = vmatmul.mubr.bf16.gmra.mrb[164].mxu1 %v17632_v38  ;;  %10365 = vmatpush1.bf16.msra.mxu0 %v14809_v17  ;;  %v14819_v46 = vld [vmem:[#allocation15 + $0x120] ss:$12 sps:$4 sm:$0xff]  }
 0xd98   : > { %v17655_v33 = vpack.c.bf16 %v8324_v2, %v8312_v54  ;;  %v17657_v57 = vpack.c.bf16 %v8326_v7, %v8314_v11  ;;  %12857 = vmatpush3.bf16.msra.mxu1 %v14813_v18  ;;  %v7524_v16 = vpop.f32.mrb[124].mxu0  ;;  %v7670_v60 = vpop.f32.mrb[124].mxu1  ;;  %10366 = vmatprep.subr.bf16.mxu0 %v14816_v51  ;;  %v14823_v2 = vld [vmem:[#allocation15 + $0x1e8] ss:$12 sps:$4 sm:$0xff]  }
 0xd99   : > { %v13224_v44 = vadd.f32 %v7524_v16, %v17589_v31  ;;  %v13240_v59 = vadd.f32 %v7670_v60, %v17593_v25  ;;  %12858 = vmatprep.subr.bf16.mxu1 %v14817_v3  ;;  %v7526_v5 = vpop.f32.mrb[125].mxu0  ;;  %v7672_v29 = vpop.f32.mrb[125].mxu1  ;;  %v14826_v16 = vld [vmem:[#allocation15 + $0x13c] ss:$12 sps:$4 sm:$0xff]  }
 0xd9a   : > { %v13225_v17 = vadd.f32 %v7526_v5, %v17598_v27  ;;  %v13241_v28 = vadd.f32 %v7672_v29, %v17603_v47  ;;  %v7528_v7 = vpop.f32.mrb[126].mxu0  ;;  %v7674_v11 = vpop.f32.mrb[126].mxu1  ;;  %10830 = vmatprep.mubr.bf16.mxu1 %v17655_v33 }
 0xd9b   : > { %10367 = vmatpush1.bf16.msra.mxu0 %v14814_v14  ;;  %v13226_v18 = vadd.f32 %v7528_v7, %v17589_v31  ;;  %v13242_v51 = vadd.f32 %v7674_v11, %v17593_v25  ;;  %v7530_v55 = vpop.f32.mrb[127].mxu0  ;;  %v7676_v30 = vpop.f32.mrb[127].mxu1  ;;  %v8335_v60 = vmax.f32 %v13224_v44, 0.0  ;;  %v8337_v5 = vmax.f32 %v13240_v59, 0.0  ;;  %v14827_v14 = vld [vmem:[#allocation15 + $0x2c0] ss:$12 sps:$4 sm:$0xff]  }
 0xd9c   : > { %12859 = vmatpush3.bf16.msra.mxu1 %v14818_v63  ;;  %v13227_v3 = vadd.f32 %v7530_v55, %v17598_v27  ;;  %v13243_v54 = vadd.f32 %v7676_v30, %v17603_v47  ;;  %10368 = vmatprep.subr.bf16.mxu0 %v14821_v40  ;;  %v8336_v31 = vmax.f32 %v13225_v17, 0.0  ;;  %v8338_v7 = vmax.f32 %v13241_v28, 0.0  ;;  %v14824_v27 = vld [vmem:[#allocation15 + $0x138] ss:$12 sps:$4 sm:$0xff]   ;;  %v14828_v44 = vld [vmem:[#allocation15 + $0x200] ss:$12 sps:$4 sm:$0xff]  }
 0xd9d   : > { %v8347_v29 = vmax.f32 %v13226_v18, 0.0  ;;  %v8349_v24 = vmax.f32 %v13242_v51, 0.0  ;;  %12860 = vmatprep.subr.bf16.mxu1 %v14822_v43  ;;  %v14831_v59 = vld [vmem:[#allocation15 + $0x154] ss:$12 sps:$4 sm:$0xff]   ;;  %v14832_v43 = vld [vmem:[#allocation15 + $0x2d8] ss:$12 sps:$4 sm:$0xff]  }
 0xd9e   : > { %v8348_v25 = vmax.f32 %v13227_v3, 0.0  ;;  %v8350_v11 = vmax.f32 %v13243_v54, 0.0  ;;  %v14829_v17 = vld [vmem:[#allocation15 + $0x150] ss:$12 sps:$4 sm:$0xff]   ;;  %v14836_v28 = vld [vmem:[#allocation15 + $0x16c] ss:$12 sps:$4 sm:$0xff]  }
 0xd9f   : > { %v17668_v4 = vpack.c.bf16 %v8347_v29, %v8335_v60  ;;  %v17670_v63 = vpack.c.bf16 %v8349_v24, %v8337_v5  ;;  %10831 = vmatmul.mubr.bf16.gmra.mrb[168].mxu1 %v17650_v41  ;;  %10369 = vmatpush1.bf16.msra.mxu0 %v14819_v46  ;;  %v14833_v24 = vld [vmem:[#allocation15 + $0x218] ss:$12 sps:$4 sm:$0xff]   ;;  %v14837_v18 = vld [vmem:[#allocation15 + $0x2f0] ss:$12 sps:$4 sm:$0xff]   ;;  %v14834_v51 = vld [vmem:[#allocation15 + $0x168] ss:$12 sps:$4 sm:$0xff]  }
 0xda0   : > { %v17673_v47 = vpack.c.bf16 %v8348_v25, %v8336_v31  ;;  %v17675_v40 = vpack.c.bf16 %v8350_v11, %v8338_v7  ;;  %12861 = vmatpush3.bf16.msra.mxu1 %v14823_v2  ;;  %10370 = vmatprep.subr.bf16.mxu0 %v14826_v16  ;;  %v14838_v55 = vld [vmem:[#allocation15 + $0x230] ss:$12 sps:$4 sm:$0xff]   ;;  %v14863_v46 = vld [vmem:[#allocation15 + $0x3c8] ss:$12 sps:$4 sm:$0xff]   ;;  %v14839_v3 = vld [vmem:[#allocation15 + $0x180] ss:$12 sps:$4 sm:$0xff]  }
 0xda1   : > { %12862 = vmatprep.subr.bf16.mxu1 %v14827_v14  ;;  %v14841_v30 = vld [vmem:[#allocation15 + $0x184] ss:$12 sps:$4 sm:$0xff]   ;;  %v14844_v54 = vld [vmem:[#allocation15 + $0x19c] ss:$12 sps:$4 sm:$0xff]   ;;  %v14868_v16 = vld [vmem:[#allocation15 + $0x3e0] ss:$12 sps:$4 sm:$0xff]  }
 0xda2   : > { %10838 = vmatprep.mubr.bf16.mxu1 %v17673_v47  ;;  %v14864_v2 = vld [vmem:[#allocation15 + $0x308] ss:$12 sps:$4 sm:$0xff]   ;;  %v14842_v60 = vld [vmem:[#allocation15 + $0x198] ss:$12 sps:$4 sm:$0xff]   ;;  %v14869_v29 = vld [vmem:[#allocation15 + $0x320] ss:$12 sps:$4 sm:$0xff]  }
 0xda3   : > { %10371 = vmatpush1.bf16.msra.mxu0 %v14824_v27  ;;  %v14847_v5 = vld [vmem:[#allocation15 + $0x1b4] ss:$12 sps:$4 sm:$0xff]   ;;  %v14873_v14 = vld [vmem:[#allocation15 + $0x3f8] ss:$12 sps:$4 sm:$0xff]   ;;  %v14845_v31 = vld [vmem:[#allocation15 + $0x1b0] ss:$12 sps:$4 sm:$0xff]  }
 0xda4   : > { %12863 = vmatpush3.bf16.msra.mxu1 %v14828_v44  ;;  %10372 = vmatprep.subr.bf16.mxu0 %v14831_v59  ;;  %v14850_v7 = vld [vmem:[#allocation15 + $0x1cc] ss:$12 sps:$4 sm:$0xff]   ;;  %v14848_v25 = vld [vmem:[#allocation15 + $0x1c8] ss:$12 sps:$4 sm:$0xff]   ;;  %v14853_v11 = vld [vmem:[#allocation15 + $0x1e4] ss:$12 sps:$4 sm:$0xff]  }
 0xda5   : > { %12864 = vmatprep.subr.bf16.mxu1 %v14832_v43  ;;  %v14879_v27 = vld [vmem:[#allocation15 + $0x350] ss:$12 sps:$4 sm:$0xff]   ;;  %v14883_v44 = vld [vmem:[#allocation15 + $0x428] ss:$12 sps:$4 sm:$0xff]   ;;  %v14851_v59 = vld [vmem:[#allocation15 + $0x1e0] ss:$12 sps:$4 sm:$0xff]  }
 0xda6   : > { %v14884_v43 = vld [vmem:[#allocation15 + $0x368] ss:$12 sps:$4 sm:$0xff]  }
 0xda7   : > { %10839 = vmatmul.mubr.bf16.gmra.mrb[172].mxu1 %v17668_v4  ;;  %10373 = vmatpush1.bf16.msra.mxu0 %v14829_v17  ;;  %v14854_v17 = vld [vmem:[#allocation15 + $0x1f8] ss:$12 sps:$4 sm:$0xff]  }
 0xda8   : > { %12865 = vmatpush3.bf16.msra.mxu1 %v14833_v24  ;;  %10879 = vmatprep.mubr.bf16.mxu1 %v17622_v52  ;;  %v14859_v24 = vld [vmem:[#allocation15 + $0x214] ss:$12 sps:$4 sm:$0xff]  }
 0xda9   : > { %10374 = vmatprep.subr.bf16.mxu0 %v14836_v28  ;;  %12866 = vmatprep.subr.bf16.mxu1 %v14837_v18  ;;  %v14889_v28 = vld [vmem:[#allocation15 + $0x380] ss:$12 sps:$4 sm:$0xff]   ;;  %v14893_v18 = vld [vmem:[#allocation15 + $0x458] ss:$12 sps:$4 sm:$0xff]  }
 0xdab   : > { %10375 = vmatpush1.bf16.msra.mxu0 %v14834_v51  ;;  %v14857_v51 = vld [vmem:[#allocation15 + $0x210] ss:$12 sps:$4 sm:$0xff]  }
 0xdac   : > { %12867 = vmatpush3.bf16.msra.mxu1 %v14838_v55  ;;  %10417 = vmatprep.subr.bf16.mxu0 %v14841_v30  ;;  %v14894_v55 = vld [vmem:[#allocation15 + $0x398] ss:$12 sps:$4 sm:$0xff]   ;;  %v14860_v30 = vld [vmem:[#allocation15 + $0x228] ss:$12 sps:$4 sm:$0xff]  }
 0xdad   : > { %12892 = vmatprep.subr.bf16.mxu1 %v14863_v46  ;;  %v14867_v46 = vld [vmem:[#allocation15 + $0x244] ss:$12 sps:$4 sm:$0xff]  }
 0xdae   : > { %10377 = vmatmul.mubr.bf16.vlgmr.msra.gmra.mrb[160].mxu0 %v17617_v9  ;;  %v14874_v9 = vld [vmem:[#allocation15 + $0x338] ss:$12 sps:$4 sm:$0xff]  }
 0xdaf   : > { %10880 = vmatmul.mubr.bf16.vlgmr.msra.gmra.mrb[176].mxu1 %v17619_v48  ;;  %10386 = vmatprep.mubr.bf16.mxu0 %v17637_v61  ;;  %v14878_v61 = vld [vmem:[#allocation15 + $0x410] ss:$12 sps:$4 sm:$0xff]  }
 0xdb0   : > { %10418 = vmatpush1.bf16.msra.mxu0 %v14839_v3  ;;  %10887 = vmatprep.mubr.bf16.mxu1 %v17639_v22  ;;  %v14899_v3 = vld [vmem:[#allocation15 + $0x3b0] ss:$12 sps:$4 sm:$0xff]  }
 0xdb1   : > { %10419 = vmatprep.subr.bf16.mxu0 %v14844_v54  ;;  %12893 = vmatpush3.bf16.msra.mxu1 %v14864_v2  ;;  %v14903_v54 = vld [vmem:[#allocation15 + $0x548] ss:$12 sps:$4 sm:$0xff]   ;;  %v14865_v2 = vld [vmem:[#allocation15 + $0x240] ss:$12 sps:$4 sm:$0xff]  }
 0xdb2   : > { %12894 = vmatprep.subr.bf16.mxu1 %v14868_v16  ;;  %v14872_v16 = vld [vmem:[#allocation15 + $0x25c] ss:$12 sps:$4 sm:$0xff]  }
 0xdb4   : > { %10420 = vmatpush1.bf16.msra.mxu0 %v14842_v60  ;;  %v14877_v60 = vld [vmem:[#allocation15 + $0x274] ss:$12 sps:$4 sm:$0xff]  }
 0xdb5   : > { %10421 = vmatprep.subr.bf16.mxu0 %v14847_v5  ;;  %12895 = vmatpush3.bf16.msra.mxu1 %v14869_v29  ;;  %v14882_v5 = vld [vmem:[#allocation15 + $0x28c] ss:$12 sps:$4 sm:$0xff]   ;;  %v14880_v29 = vld [vmem:[#allocation15 + $0x288] ss:$12 sps:$4 sm:$0xff]  }
 0xdb6   : > { %10387 = vmatmul.mubr.bf16.gmra.mrb[164].mxu0 %v17632_v38  ;;  %12896 = vmatprep.subr.bf16.mxu1 %v14873_v14  ;;  %v14856_v38 = vld [vmem:[#allocation15 + $0x1fc] ss:$12 sps:$4 sm:$0xff]   ;;  %v14887_v14 = vld [vmem:[#allocation15 + $0x2a4] ss:$12 sps:$4 sm:$0xff]  }
 0xdb7   : > { %10888 = vmatmul.mubr.bf16.gmra.mrb[180].mxu1 %v17634_v34  ;;  %10396 = vmatprep.mubr.bf16.mxu0 %v17655_v33  ;;  %v14888_v33 = vld [vmem:[#allocation15 + $0x440] ss:$12 sps:$4 sm:$0xff]  }
 0xdb8   : > { %10422 = vmatpush1.bf16.msra.mxu0 %v14845_v31  ;;  %10895 = vmatprep.mubr.bf16.mxu1 %v17657_v57  ;;  %v5905_v31 = vsub.s32 4, %v18524_v45 }
 0xdb9   : > { %10423 = vmatprep.subr.bf16.mxu0 %v14850_v7  ;;  %12897 = vmatpush3.bf16.msra.mxu1 %v14874_v9  ;;  %v5913_v7 = vsub.s32 6, %v18524_v45  ;;  %v5909_v9 = vsub.s32 5, %v18524_v45 }
 0xdba   : > { %12898 = vmatprep.subr.bf16.mxu1 %v14878_v61  ;;  %v5917_v61 = vsub.s32 7, %v18524_v45 }
 0xdbc   : > { %10424 = vmatpush1.bf16.msra.mxu0 %v14848_v25  ;;  %v14885_v25 = vld [vmem:[#allocation15 + $0x2a0] ss:$12 sps:$4 sm:$0xff]  }
 0xdbd   : > { %10425 = vmatprep.subr.bf16.mxu0 %v14853_v11  ;;  %12899 = vmatpush3.bf16.msra.mxu1 %v14879_v27  ;;  %v17700_v11 = vrot.slane %v17584_v21, %v5905_v31  ;;  %v14892_v27 = vld [vmem:[#allocation15 + $0x2bc] ss:$12 sps:$4 sm:$0xff]  }
 0xdbe   : > { %10397 = vmatmul.mubr.bf16.gmra.mrb[168].mxu0 %v17650_v41  ;;  %12900 = vmatprep.subr.bf16.mxu1 %v14883_v44  ;;  %v14862_v41 = vld [vmem:[#allocation15 + $0x22c] ss:$12 sps:$4 sm:$0xff]   ;;  %v17703_v44 = vrot.slane %v17584_v21, %v5913_v7 }
 0xdbf   : > { %10896 = vmatmul.mubr.bf16.gmra.mrb[184].mxu1 %v17652_v56  ;;  %10406 = vmatprep.mubr.bf16.mxu0 %v17673_v47  ;;  %v14898_v47 = vld [vmem:[#allocation15 + $0x470] ss:$12 sps:$4 sm:$0xff]  }
 0xdc0   : > { %10426 = vmatpush1.bf16.msra.mxu0 %v14851_v59  ;;  %10903 = vmatprep.mubr.bf16.mxu1 %v17675_v40  ;;  %v17706_v59 = vrot.slane %v17584_v21, %v5909_v9 }
 0xdc1   : > { %10427 = vmatprep.subr.bf16.mxu0 %v14856_v38  ;;  %12901 = vmatpush3.bf16.msra.mxu1 %v14884_v43  ;;  %v17709_v38 = vrot.slane %v17584_v21, %v5917_v61 }
 0xdc2   : > { %12902 = vmatprep.subr.bf16.mxu1 %v14888_v33  ;;  %v14890_v33 = vld [vmem:[#allocation15 + $0x2b8] ss:$12 sps:$4 sm:$0xff]  }
 0xdc4   : > { %10428 = vmatpush1.bf16.msra.mxu0 %v14854_v17 }
 0xdc5   : > { %10429 = vmatprep.subr.bf16.mxu0 %v14859_v24  ;;  %12903 = vmatpush3.bf16.msra.mxu1 %v14889_v28 }
 0xdc6   : > { %10407 = vmatmul.mubr.bf16.gmra.mrb[172].mxu0 %v17668_v4  ;;  %12904 = vmatprep.subr.bf16.mxu1 %v14893_v18  ;;  %v14870_v4 = vld [vmem:[#allocation15 + $0x258] ss:$12 sps:$4 sm:$0xff]   ;;  %v14897_v18 = vld [vmem:[#allocation15 + $0x2d4] ss:$12 sps:$4 sm:$0xff]  }
 0xdc7   : > { %10904 = vmatmul.mubr.bf16.gmra.mrb[188].mxu1 %v17670_v63  ;;  %10449 = vmatprep.mubr.bf16.mxu0 %v17622_v52  ;;  %v14875_v52 = vld [vmem:[#allocation15 + $0x270] ss:$12 sps:$4 sm:$0xff]  }
 0xdc8   : > { %10430 = vmatpush1.bf16.msra.mxu0 %v14857_v51 }
 0xdc9   : > { %10431 = vmatprep.subr.bf16.mxu0 %v14862_v41  ;;  %12905 = vmatpush3.bf16.msra.mxu1 %v14894_v55 }
 0xdca   : > { %12906 = vmatprep.subr.bf16.mxu1 %v14898_v47 }
 0xdcc   : > { %10432 = vmatpush1.bf16.msra.mxu0 %v14860_v30 }
 0xdcd   : > { %10433 = vmatprep.subr.bf16.mxu0 %v14867_v46  ;;  %12907 = vmatpush3.bf16.msra.mxu1 %v14899_v3 }
 0xdce   : > { %12932 = vmatprep.subr.bf16.mxu1 %v14903_v54 }
 0xdd0   : > { %10434 = vmatpush1.bf16.msra.mxu0 %v14865_v2 }
 0xdd1   : > { %10435 = vmatprep.subr.bf16.mxu0 %v14872_v16 }
 0xdd4   : > { %10436 = vmatpush1.bf16.msra.mxu0 %v14870_v4  ;;  %v14895_v4 = vld [vmem:[#allocation15 + $0x2d0] ss:$12 sps:$4 sm:$0xff]  }
 0xdd5   : > { %10437 = vmatprep.subr.bf16.mxu0 %v14877_v60 }
 0xdd8   : > { %10438 = vmatpush1.bf16.msra.mxu0 %v14875_v52 }
 0xdd9   : > { %10439 = vmatprep.subr.bf16.mxu0 %v14882_v5 }
 0xddc   : > { %10440 = vmatpush1.bf16.msra.mxu0 %v14880_v29  ;;  %v14902_v29 = vld [vmem:[#allocation15 + $0x2ec] ss:$12 sps:$4 sm:$0xff]  }
 0xddd   : > { %10441 = vmatprep.subr.bf16.mxu0 %v14887_v14 }
 0xde0   : > { %10442 = vmatpush1.bf16.msra.mxu0 %v14885_v25  ;;  %v7786_v43 = vpop.f32.mrb[128].mxu0 }
 0xde1   : > { %v13244_v17 = vadd.f32 %v7786_v43, %v17700_v11  ;;  %v7932_v24 = vpop.f32.mrb[128].mxu1  ;;  %v7788_v28 = vpop.f32.mrb[129].mxu0  ;;  %10443 = vmatprep.subr.bf16.mxu0 %v14892_v27 }
 0xde2   : > { %v13260_v51 = vadd.f32 %v7932_v24, %v17703_v44  ;;  %v13245_v41 = vadd.f32 %v7788_v28, %v17706_v59  ;;  %v7934_v55 = vpop.f32.mrb[129].mxu1  ;;  %v7790_v47 = vpop.f32.mrb[130].mxu0  ;;  %v14904_v28 = vld [vmem:[#allocation15 + $0x488] ss:$12 sps:$4 sm:$0xff]  }
 0xde3   : > { %v13261_v30 = vadd.f32 %v7934_v55, %v17709_v38  ;;  %v13246_v21 = vadd.f32 %v7790_v47, %v17700_v11  ;;  %v7936_v46 = vpop.f32.mrb[130].mxu1  ;;  %v7792_v3 = vpop.f32.mrb[131].mxu0  ;;  %v8267_v60 = vmax.f32 %v13244_v17, 0.0  ;;  %v14900_v17 = vld [vmem:[#allocation15 + $0x2e8] ss:$12 sps:$4 sm:$0xff]  }
 0xde4   : > { %v13262_v54 = vadd.f32 %v7936_v46, %v17703_v44  ;;  %10444 = vmatpush1.bf16.msra.mxu0 %v14890_v33  ;;  %v13247_v2 = vadd.f32 %v7792_v3, %v17706_v59  ;;  %v7938_v16 = vpop.f32.mrb[131].mxu1  ;;  %v8269_v14 = vmax.f32 %v13260_v51, 0.0  ;;  %v8268_v31 = vmax.f32 %v13245_v41, 0.0  ;;  %v14907_v47 = vld [vmem:[#allocation15 + $0x304] ss:$12 sps:$4 sm:$0xff]  }
 0xde5   : > { %v8279_v52 = vmax.f32 %v13246_v21, 0.0  ;;  %v13263_v5 = vadd.f32 %v7938_v16, %v17709_v38  ;;  %10445 = vmatprep.subr.bf16.mxu0 %v14897_v18  ;;  %v8270_v61 = vmax.f32 %v13261_v30, 0.0  ;;  %v14908_v30 = vld [vmem:[#allocation15 + $0x560] ss:$12 sps:$4 sm:$0xff]  }
 0xde6   : > { %v8281_v7 = vmax.f32 %v13262_v54, 0.0  ;;  %v8280_v9 = vmax.f32 %v13247_v2, 0.0 }
 0xde7   : > { %v17719_v25 = vpack.c.bf16 %v8279_v52, %v8267_v60  ;;  %v8282_v27 = vmax.f32 %v13263_v5, 0.0 }
 0xde8   : > { %v17721_v43 = vpack.c.bf16 %v8281_v7, %v8269_v14  ;;  %v17723_v33 = vpack.c.bf16 %v8280_v9, %v8268_v31  ;;  %10446 = vmatpush1.bf16.msra.mxu0 %v14895_v4  ;;  %v7796_v24 = vpop.f32.mrb[132].mxu0  ;;  %v14905_v14 = vld [vmem:[#allocation15 + $0x300] ss:$12 sps:$4 sm:$0xff]  }
 0xde9   : > { %v17725_v55 = vpack.c.bf16 %v8282_v27, %v8270_v61  ;;  %v13248_v18 = vadd.f32 %v7796_v24, %v17700_v11  ;;  %v7942_v51 = vpop.f32.mrb[132].mxu1  ;;  %v7798_v41 = vpop.f32.mrb[133].mxu0  ;;  %10447 = vmatprep.subr.bf16.mxu0 %v14902_v29  ;;  %v14909_v61 = vld [vmem:[#allocation15 + $0x4a0] ss:$12 sps:$4 sm:$0xff]   ;;  %v14912_v27 = vld [vmem:[#allocation15 + $0x31c] ss:$12 sps:$4 sm:$0xff]  }
 0xdea   : > { %v13264_v21 = vadd.f32 %v7942_v51, %v17703_v44  ;;  %v13249_v46 = vadd.f32 %v7798_v41, %v17706_v59  ;;  %v7944_v3 = vpop.f32.mrb[133].mxu1  ;;  %v7800_v54 = vpop.f32.mrb[134].mxu0  ;;  %10944 = vmatprep.mubr.bf16.mxu1 %v17723_v33 }
 0xdeb   : > { %v13265_v2 = vadd.f32 %v7944_v3, %v17709_v38  ;;  %v13250_v16 = vadd.f32 %v7800_v54, %v17700_v11  ;;  %v7946_v4 = vpop.f32.mrb[134].mxu1  ;;  %v7802_v60 = vpop.f32.mrb[135].mxu0  ;;  %10945 = vmatmul.mubr.bf16.vlgmr.msra.gmra.mrb[192].mxu1 %v17719_v25  ;;  %v8291_v31 = vmax.f32 %v13248_v18, 0.0  ;;  %v14913_v54 = vld [vmem:[#allocation15 + $0x578] ss:$12 sps:$4 sm:$0xff]  }
 0xdec   : > { %v13266_v52 = vadd.f32 %v7946_v4, %v17703_v44  ;;  %10448 = vmatpush1.bf16.msra.mxu0 %v14900_v17  ;;  %v13251_v5 = vadd.f32 %v7802_v60, %v17706_v59  ;;  %v7948_v29 = vpop.f32.mrb[135].mxu1  ;;  %12933 = vmatpush3.bf16.msra.mxu1 %v14904_v28  ;;  %v8293_v24 = vmax.f32 %v13264_v21, 0.0  ;;  %v8292_v51 = vmax.f32 %v13249_v46, 0.0 }
 0xded   : > { %v8303_v7 = vmax.f32 %v13250_v16, 0.0  ;;  %v13267_v9 = vadd.f32 %v7948_v29, %v17709_v38  ;;  %10490 = vmatprep.subr.bf16.mxu0 %v14907_v47  ;;  %12934 = vmatprep.subr.bf16.mxu1 %v14908_v30  ;;  %v8294_v4 = vmax.f32 %v13265_v2, 0.0  ;;  %v14910_v30 = vld [vmem:[#allocation15 + $0x318] ss:$12 sps:$4 sm:$0xff]  }
 0xdee   : > { %v8305_v41 = vmax.f32 %v13266_v52, 0.0  ;;  %v8304_v3 = vmax.f32 %v13251_v5, 0.0  ;;  %v14914_v52 = vld [vmem:[#allocation15 + $0x4b8] ss:$12 sps:$4 sm:$0xff]   ;;  %v14917_v5 = vld [vmem:[#allocation15 + $0x334] ss:$12 sps:$4 sm:$0xff]  }
 0xdef   : > { %v17737_v17 = vpack.c.bf16 %v8303_v7, %v8291_v31  ;;  %v8306_v60 = vmax.f32 %v13267_v9, 0.0  ;;  %10450 = vmatmul.mubr.bf16.vlgmr.msra.gmra.mrb[160].mxu0 %v17619_v48 }
 0xdf0   : > { %v17740_v28 = vpack.c.bf16 %v8305_v41, %v8293_v24  ;;  %v17742_v18 = vpack.c.bf16 %v8304_v3, %v8292_v51  ;;  %10459 = vmatprep.mubr.bf16.mxu0 %v17639_v22  ;;  %10491 = vmatpush1.bf16.msra.mxu0 %v14905_v14  ;;  %v7806_v47 = vpop.f32.mrb[136].mxu0  ;;  %v14918_v22 = vld [vmem:[#allocation15 + $0x590] ss:$12 sps:$4 sm:$0xff]  }
 0xdf1   : > { %v17745_v21 = vpack.c.bf16 %v8306_v60, %v8294_v4  ;;  %v13252_v46 = vadd.f32 %v7806_v47, %v17700_v11  ;;  %v7952_v16 = vpop.f32.mrb[136].mxu1  ;;  %12935 = vmatpush3.bf16.msra.mxu1 %v14909_v61  ;;  %v7808_v2 = vpop.f32.mrb[137].mxu0  ;;  %10492 = vmatprep.subr.bf16.mxu0 %v14912_v27  ;;  %v14915_v3 = vld [vmem:[#allocation15 + $0x330] ss:$12 sps:$4 sm:$0xff]  }
 0xdf2   : > { %v13268_v48 = vadd.f32 %v7952_v16, %v17703_v44  ;;  %v13253_v29 = vadd.f32 %v7808_v2, %v17706_v59  ;;  %v7954_v31 = vpop.f32.mrb[137].mxu1  ;;  %v7810_v7 = vpop.f32.mrb[138].mxu0  ;;  %10952 = vmatprep.mubr.bf16.mxu1 %v17742_v18  ;;  %12936 = vmatprep.subr.bf16.mxu1 %v14913_v54  ;;  %v14919_v47 = vld [vmem:[#allocation15 + $0x4d0] ss:$12 sps:$4 sm:$0xff]   ;;  %v14922_v16 = vld [vmem:[#allocation15 + $0x34c] ss:$12 sps:$4 sm:$0xff]  }
 0xdf3   : > { %v13269_v14 = vadd.f32 %v7954_v31, %v17709_v38  ;;  %v13254_v9 = vadd.f32 %v7810_v7, %v17700_v11  ;;  %v7956_v24 = vpop.f32.mrb[138].mxu1  ;;  %v7812_v61 = vpop.f32.mrb[139].mxu0  ;;  %10953 = vmatmul.mubr.bf16.gmra.mrb[196].mxu1 %v17737_v17  ;;  %v8315_v4 = vmax.f32 %v13252_v46, 0.0 }
 0xdf4   : > { %v13270_v27 = vadd.f32 %v7956_v24, %v17703_v44  ;;  %10493 = vmatpush1.bf16.msra.mxu0 %v14910_v30  ;;  %v13255_v51 = vadd.f32 %v7812_v61, %v17706_v59  ;;  %v7958_v41 = vpop.f32.mrb[139].mxu1  ;;  %v8317_v2 = vmax.f32 %v13268_v48, 0.0  ;;  %v8316_v31 = vmax.f32 %v13253_v29, 0.0 }
 0xdf5   : > { %v8327_v60 = vmax.f32 %v13254_v9, 0.0  ;;  %v13271_v54 = vadd.f32 %v7958_v41, %v17709_v38  ;;  %12937 = vmatpush3.bf16.msra.mxu1 %v14914_v52  ;;  %10494 = vmatprep.subr.bf16.mxu0 %v14917_v5  ;;  %v8318_v24 = vmax.f32 %v13269_v14, 0.0  ;;  %v14920_v5 = vld [vmem:[#allocation15 + $0x348] ss:$12 sps:$4 sm:$0xff]  }
 0xdf6   : > { %v8329_v7 = vmax.f32 %v13270_v27, 0.0  ;;  %v8328_v53 = vmax.f32 %v13255_v51, 0.0  ;;  %12938 = vmatprep.subr.bf16.mxu1 %v14918_v22  ;;  %v14924_v27 = vld [vmem:[#allocation15 + $0x4e8] ss:$12 sps:$4 sm:$0xff]   ;;  %v14927_v51 = vld [vmem:[#allocation15 + $0x364] ss:$12 sps:$4 sm:$0xff]  }
 0xdf7   : > { %v17757_v30 = vpack.c.bf16 %v8327_v60, %v8315_v4  ;;  %v8330_v61 = vmax.f32 %v13271_v54, 0.0  ;;  %10460 = vmatmul.mubr.bf16.gmra.mrb[164].mxu0 %v17634_v34 }
 0xdf8   : > { %v17760_v46 = vpack.c.bf16 %v8329_v7, %v8317_v2  ;;  %v17762_v9 = vpack.c.bf16 %v8328_v53, %v8316_v31  ;;  %10469 = vmatprep.mubr.bf16.mxu0 %v17657_v57  ;;  %10495 = vmatpush1.bf16.msra.mxu0 %v14915_v3  ;;  %v7816_v52 = vpop.f32.mrb[140].mxu0  ;;  %v14928_v57 = vld [vmem:[#allocation15 + $0x5c0] ss:$12 sps:$4 sm:$0xff]  }
 0xdf9   : > { %v17765_v48 = vpack.c.bf16 %v8330_v61, %v8318_v24  ;;  %v13256_v29 = vadd.f32 %v7816_v52, %v17700_v11  ;;  %v7962_v22 = vpop.f32.mrb[140].mxu1  ;;  %12939 = vmatpush3.bf16.msra.mxu1 %v14919_v47  ;;  %v7818_v14 = vpop.f32.mrb[141].mxu0  ;;  %10496 = vmatprep.subr.bf16.mxu0 %v14922_v16  ;;  %v14925_v7 = vld [vmem:[#allocation15 + $0x360] ss:$12 sps:$4 sm:$0xff]  }
 0xdfa   : > { %v13272_v34 = vadd.f32 %v7962_v22, %v17703_v44  ;;  %v13257_v53 = vadd.f32 %v7818_v14, %v17706_v59  ;;  %v7964_v41 = vpop.f32.mrb[141].mxu1  ;;  %v7820_v4 = vpop.f32.mrb[142].mxu0  ;;  %10960 = vmatprep.mubr.bf16.mxu1 %v17762_v9  ;;  %12940 = vmatprep.subr.bf16.mxu1 %v14923_v39  ;;  %v14929_v52 = vld [vmem:[#allocation15 + $0x500] ss:$12 sps:$4 sm:$0xff]   ;;  %v14932_v22 = vld [vmem:[#allocation15 + $0x37c] ss:$12 sps:$4 sm:$0xff]  }
 0xdfb   : > { %v13273_v3 = vadd.f32 %v7964_v41, %v17709_v38  ;;  %v13258_v60 = vadd.f32 %v7820_v4, %v17700_v11  ;;  %v7966_v54 = vpop.f32.mrb[142].mxu1  ;;  %v7822_v47 = vpop.f32.mrb[143].mxu0  ;;  %10961 = vmatmul.mubr.bf16.gmra.mrb[200].mxu1 %v17757_v30  ;;  %v8339_v24 = vmax.f32 %v13256_v29, 0.0 }
 0xdfc   : > { %v13274_v16 = vadd.f32 %v7966_v54, %v17703_v44  ;;  %10497 = vmatpush1.bf16.msra.mxu0 %v14920_v5  ;;  %v13259_v2 = vadd.f32 %v7822_v47, %v17706_v59  ;;  %v7968_v31 = vpop.f32.mrb[143].mxu1  ;;  %v8341_v11 = vmax.f32 %v13272_v34, 0.0  ;;  %v8340_v14 = vmax.f32 %v13257_v53, 0.0  ;;  %v14937_v34 = vld [vmem:[#allocation15 + $0x394] ss:$12 sps:$4 sm:$0xff]  }
 0xdfd   : > { %v8351_v61 = vmax.f32 %v13258_v60, 0.0  ;;  %v13275_v39 = vadd.f32 %v7968_v31, %v17709_v38  ;;  %12941 = vmatpush3.bf16.msra.mxu1 %v14924_v27  ;;  %10498 = vmatprep.subr.bf16.mxu0 %v14927_v51  ;;  %v8342_v44 = vmax.f32 %v13273_v3, 0.0  ;;  %v14930_v38 = vld [vmem:[#allocation15 + $0x378] ss:$12 sps:$4 sm:$0xff]   ;;  %v14938_v53 = vld [vmem:[#allocation15 + $0x5f0] ss:$12 sps:$4 sm:$0xff]  }
 0xdfe   : > { %v8353_v41 = vmax.f32 %v13274_v16, 0.0  ;;  %v8352_v4 = vmax.f32 %v13259_v2, 0.0  ;;  %12942 = vmatprep.subr.bf16.mxu1 %v14928_v57  ;;  %v14934_v51 = vld [vmem:[#allocation15 + $0x518] ss:$12 sps:$4 sm:$0xff]   ;;  %v14967_v3 = vld [vmem:[#allocation15 + $0x6c8] ss:$12 sps:$4 sm:$0xff]  }
 0xdff   : > { %v17777_v5 = vpack.c.bf16 %v8351_v61, %v8339_v24  ;;  %v8354_v59 = vmax.f32 %v13275_v39, 0.0  ;;  %10470 = vmatmul.mubr.bf16.gmra.mrb[168].mxu0 %v17652_v56  ;;  %v14935_v56 = vld [vmem:[#allocation15 + $0x390] ss:$12 sps:$4 sm:$0xff]   ;;  %v14942_v57 = vld [vmem:[#allocation15 + $0x3ac] ss:$12 sps:$4 sm:$0xff]  }
 0xe00   : > { %v17780_v29 = vpack.c.bf16 %v8353_v41, %v8341_v11  ;;  %v17782_v60 = vpack.c.bf16 %v8352_v4, %v8340_v14  ;;  %10479 = vmatprep.mubr.bf16.mxu0 %v17675_v40  ;;  %10499 = vmatpush1.bf16.msra.mxu0 %v14925_v7  ;;  %v14939_v40 = vld [vmem:[#allocation15 + $0x530] ss:$12 sps:$4 sm:$0xff]   ;;  %v14940_v54 = vld [vmem:[#allocation15 + $0x3a8] ss:$12 sps:$4 sm:$0xff]   ;;  %v14972_v16 = vld [vmem:[#allocation15 + $0x6e0] ss:$12 sps:$4 sm:$0xff]  }
 0xe01   : > { %v17785_v27 = vpack.c.bf16 %v8354_v59, %v8342_v44  ;;  %12943 = vmatpush3.bf16.msra.mxu1 %v14929_v52  ;;  %10500 = vmatprep.subr.bf16.mxu0 %v14932_v22  ;;  %v14968_v47 = vld [vmem:[#allocation15 + $0x608] ss:$12 sps:$4 sm:$0xff]   ;;  %v14943_v2 = vld [vmem:[#allocation15 + $0x3c0] ss:$12 sps:$4 sm:$0xff]   ;;  %v14977_v7 = vld [vmem:[#allocation15 + $0x6f8] ss:$12 sps:$4 sm:$0xff]  }
 0xe02   : > { %10968 = vmatprep.mubr.bf16.mxu1 %v17782_v60  ;;  %12944 = vmatprep.subr.bf16.mxu1 %v14933_v35  ;;  %v14945_v35 = vld [vmem:[#allocation15 + $0x3c4] ss:$12 sps:$4 sm:$0xff]   ;;  %v14948_v31 = vld [vmem:[#allocation15 + $0x3dc] ss:$12 sps:$4 sm:$0xff]   ;;  %v14951_v24 = vld [vmem:[#allocation15 + $0x3f4] ss:$12 sps:$4 sm:$0xff]  }
 0xe03   : > { %10969 = vmatmul.mubr.bf16.gmra.mrb[204].mxu1 %v17777_v5  ;;  %v14978_v61 = vld [vmem:[#allocation15 + $0x638] ss:$12 sps:$4 sm:$0xff]   ;;  %v14982_v39 = vld [vmem:[#allocation15 + $0x710] ss:$12 sps:$4 sm:$0xff]   ;;  %v14987_v14 = vld [vmem:[#allocation15 + $0x728] ss:$12 sps:$4 sm:$0xff]  }
 0xe04   : > { %10501 = vmatpush1.bf16.msra.mxu0 %v14930_v38  ;;  %11009 = vmatprep.mubr.bf16.mxu1 %v17725_v55  ;;  %v14949_v52 = vld [vmem:[#allocation15 + $0x3f0] ss:$12 sps:$4 sm:$0xff]   ;;  %v14954_v22 = vld [vmem:[#allocation15 + $0x40c] ss:$12 sps:$4 sm:$0xff]   ;;  %v14952_v41 = vld [vmem:[#allocation15 + $0x408] ss:$12 sps:$4 sm:$0xff]  }
 0xe05   : > { %12945 = vmatpush3.bf16.msra.mxu1 %v14934_v51  ;;  %10502 = vmatprep.subr.bf16.mxu0 %v14937_v34  ;;  %v14983_v11 = vld [vmem:[#allocation15 + $0x650] ss:$12 sps:$4 sm:$0xff]   ;;  %v14988_v44 = vld [vmem:[#allocation15 + $0x668] ss:$12 sps:$4 sm:$0xff]   ;;  %v14992_v59 = vld [vmem:[#allocation15 + $0x740] ss:$12 sps:$4 sm:$0xff]  }
 0xe06   : > { %12946 = vmatprep.subr.bf16.mxu1 %v14938_v53  ;;  %v14957_v4 = vld [vmem:[#allocation15 + $0x424] ss:$12 sps:$4 sm:$0xff]   ;;  %v14955_v38 = vld [vmem:[#allocation15 + $0x420] ss:$12 sps:$4 sm:$0xff]   ;;  %v14960_v51 = vld [vmem:[#allocation15 + $0x43c] ss:$12 sps:$4 sm:$0xff]  }
 0xe07   : > { %10480 = vmatmul.mubr.bf16.gmra.mrb[172].mxu0 %v17670_v63  ;;  %v14973_v63 = vld [vmem:[#allocation15 + $0x620] ss:$12 sps:$4 sm:$0xff]   ;;  %v14997_v53 = vld [vmem:[#allocation15 + $0x758] ss:$12 sps:$4 sm:$0xff]  }
 0xe08   : > { %10503 = vmatpush1.bf16.msra.mxu0 %v14935_v56  ;;  %10522 = vmatprep.mubr.bf16.mxu0 %v17723_v33  ;;  %v14946_v33 = vld [vmem:[#allocation15 + $0x3d8] ss:$12 sps:$4 sm:$0xff]   ;;  %v14993_v34 = vld [vmem:[#allocation15 + $0x680] ss:$12 sps:$4 sm:$0xff]  }
 0xe09   : > { %12947 = vmatpush3.bf16.msra.mxu1 %v14939_v40  ;;  %10504 = vmatprep.subr.bf16.mxu0 %v14942_v57  ;;  %v14958_v56 = vld [vmem:[#allocation15 + $0x438] ss:$12 sps:$4 sm:$0xff]   ;;  %v14963_v40 = vld [vmem:[#allocation15 + $0x454] ss:$12 sps:$4 sm:$0xff]  }
 0xe0a   : > { %12972 = vmatprep.subr.bf16.mxu1 %v14967_v3  ;;  %v14998_v57 = vld [vmem:[#allocation15 + $0x698] ss:$12 sps:$4 sm:$0xff]   ;;  %v15002_v3 = vld [vmem:[#allocation15 + $0x770] ss:$12 sps:$4 sm:$0xff]  }
 0xe0c   : > { %10505 = vmatpush1.bf16.msra.mxu0 %v14940_v54  ;;  %11010 = vmatmul.mubr.bf16.vlgmr.msra.gmra.mrb[208].mxu1 %v17721_v43  ;;  %v14961_v54 = vld [vmem:[#allocation15 + $0x450] ss:$12 sps:$4 sm:$0xff]  }
 0xe0d   : > { %11017 = vmatprep.mubr.bf16.mxu1 %v17745_v21  ;;  %10506 = vmatprep.subr.bf16.mxu0 %v14945_v35  ;;  %v14966_v35 = vld [vmem:[#allocation15 + $0x46c] ss:$12 sps:$4 sm:$0xff]  }
 0xe0e   : > { %12973 = vmatpush3.bf16.msra.mxu1 %v14968_v47  ;;  %v15003_v47 = vld [vmem:[#allocation15 + $0x6b0] ss:$12 sps:$4 sm:$0xff]  }
 0xe0f   : > { %12974 = vmatprep.subr.bf16.mxu1 %v14972_v16  ;;  %v15007_v16 = vld [vmem:[#allocation15 + $0x848] ss:$12 sps:$4 sm:$0xff]  }
 0xe10   : > { %10507 = vmatpush1.bf16.msra.mxu0 %v14943_v2  ;;  %v14964_v2 = vld [vmem:[#allocation15 + $0x468] ss:$12 sps:$4 sm:$0xff]  }
 0xe11   : > { %10508 = vmatprep.subr.bf16.mxu0 %v14948_v31  ;;  %v14971_v31 = vld [vmem:[#allocation15 + $0x484] ss:$12 sps:$4 sm:$0xff]  }
 0xe12   : > { %12975 = vmatpush3.bf16.msra.mxu1 %v14973_v63  ;;  %v14969_v63 = vld [vmem:[#allocation15 + $0x480] ss:$12 sps:$4 sm:$0xff]  }
 0xe13   : > { %12976 = vmatprep.subr.bf16.mxu1 %v14977_v7  ;;  %v14976_v7 = vld [vmem:[#allocation15 + $0x49c] ss:$12 sps:$4 sm:$0xff]  }
 0xe14   : > { %10509 = vmatpush1.bf16.msra.mxu0 %v14946_v33  ;;  %11018 = vmatmul.mubr.bf16.gmra.mrb[212].mxu1 %v17740_v28  ;;  %v14974_v33 = vld [vmem:[#allocation15 + $0x498] ss:$12 sps:$4 sm:$0xff]  }
 0xe15   : > { %11025 = vmatprep.mubr.bf16.mxu1 %v17765_v48  ;;  %10510 = vmatprep.subr.bf16.mxu0 %v14951_v24  ;;  %v14981_v24 = vld [vmem:[#allocation15 + $0x4b4] ss:$12 sps:$4 sm:$0xff]  }
 0xe16   : > { %12977 = vmatpush3.bf16.msra.mxu1 %v14978_v61  ;;  %v14979_v61 = vld [vmem:[#allocation15 + $0x4b0] ss:$12 sps:$4 sm:$0xff]  }
 0xe17   : > { %12978 = vmatprep.subr.bf16.mxu1 %v14982_v39  ;;  %v14986_v39 = vld [vmem:[#allocation15 + $0x4cc] ss:$12 sps:$4 sm:$0xff]  }
 0xe18   : > { %10511 = vmatpush1.bf16.msra.mxu0 %v14949_v52  ;;  %v14984_v52 = vld [vmem:[#allocation15 + $0x4c8] ss:$12 sps:$4 sm:$0xff]  }
 0xe19   : > { %10512 = vmatprep.subr.bf16.mxu0 %v14954_v22  ;;  %v14991_v22 = vld [vmem:[#allocation15 + $0x4e4] ss:$12 sps:$4 sm:$0xff]  }
 0xe1a   : > { %12979 = vmatpush3.bf16.msra.mxu1 %v14983_v11  ;;  %v5884_v11 = vld [vmem:[#allocation13 + $0x8] sm:$0xf] }
 0xe1b   : > { %12980 = vmatprep.subr.bf16.mxu1 %v14987_v14  ;;  %v17804_v14 = vrot.slane %v5884_v11, %v16993_v19 }
 0xe1c   : > { %10513 = vmatpush1.bf16.msra.mxu0 %v14952_v41  ;;  %11026 = vmatmul.mubr.bf16.gmra.mrb[216].mxu1 %v17760_v46  ;;  %v17808_v41 = vrot.slane %v5884_v11, %v16996_v49 }
 0xe1d   : > { %11033 = vmatprep.mubr.bf16.mxu1 %v17785_v27  ;;  %10514 = vmatprep.subr.bf16.mxu0 %v14957_v4 }
 0xe1e   : > { %12981 = vmatpush3.bf16.msra.mxu1 %v14988_v44  ;;  %v14994_v44 = vld [vmem:[#allocation15 + $0x4f8] ss:$12 sps:$4 sm:$0xff]  }
 0xe1f   : > { %12982 = vmatprep.subr.bf16.mxu1 %v14992_v59 }
 0xe20   : > { %10515 = vmatpush1.bf16.msra.mxu0 %v14955_v38  ;;  %v15001_v38 = vld [vmem:[#allocation15 + $0x514] ss:$12 sps:$4 sm:$0xff]  }
 0xe21   : > { %10516 = vmatprep.subr.bf16.mxu0 %v14960_v51 }
 0xe22   : > { %12983 = vmatpush3.bf16.msra.mxu1 %v14993_v34 }
 0xe23   : > { %12984 = vmatprep.subr.bf16.mxu1 %v14997_v53 }
 0xe24   : > { %10517 = vmatpush1.bf16.msra.mxu0 %v14958_v56  ;;  %11034 = vmatmul.mubr.bf16.gmra.mrb[220].mxu1 %v17780_v29 }
 0xe25   : > { %10518 = vmatprep.subr.bf16.mxu0 %v14963_v40 }
 0xe26   : > { %12985 = vmatpush3.bf16.msra.mxu1 %v14998_v57 }
 0xe27   : > { %12986 = vmatprep.subr.bf16.mxu1 %v15002_v3 }
 0xe28   : > { %10519 = vmatpush1.bf16.msra.mxu0 %v14961_v54 }
 0xe29   : > { %10520 = vmatprep.subr.bf16.mxu0 %v14966_v35  ;;  %v14999_v35 = vld [vmem:[#allocation15 + $0x510] ss:$12 sps:$4 sm:$0xff]  }
 0xe2a   : > { %12987 = vmatpush3.bf16.msra.mxu1 %v15003_v47 }
 0xe2b   : > { %13012 = vmatprep.subr.bf16.mxu1 %v15007_v16 }
 0xe2c   : > { %10521 = vmatpush1.bf16.msra.mxu0 %v14964_v2 }
 0xe2d   : > { %10563 = vmatprep.subr.bf16.mxu0 %v14971_v31  ;;  %v15006_v31 = vld [vmem:[#allocation15 + $0x52c] ss:$12 sps:$4 sm:$0xff]  }
 0xe2f   : > { %10523 = vmatmul.mubr.bf16.vlgmr.msra.gmra.mrb[160].mxu0 %v17719_v25  ;;  %v14989_v25 = vld [vmem:[#allocation15 + $0x4e0] ss:$12 sps:$4 sm:$0xff]  }
 0xe30   : > { %10532 = vmatprep.mubr.bf16.mxu0 %v17742_v18  ;;  %10564 = vmatpush1.bf16.msra.mxu0 %v14969_v63  ;;  %v14996_v18 = vld [vmem:[#allocation15 + $0x4fc] ss:$12 sps:$4 sm:$0xff]  }
 0xe31   : > { %10565 = vmatprep.subr.bf16.mxu0 %v14976_v7 }
 0xe34   : > { %10566 = vmatpush1.bf16.msra.mxu0 %v14974_v33 }
 0xe35   : > { %10567 = vmatprep.subr.bf16.mxu0 %v14981_v24 }
 0xe37   : > { %10533 = vmatmul.mubr.bf16.gmra.mrb[164].mxu0 %v17737_v17  ;;  %v17811_v17 = vrot.slane %v5884_v11, %v16999_v42 }
 0xe38   : > { %10542 = vmatprep.mubr.bf16.mxu0 %v17762_v9  ;;  %10568 = vmatpush1.bf16.msra.mxu0 %v14979_v61  ;;  %v18537_v9 = vsub.s32 3, %v18524_v45 }
 0xe39   : > { %10569 = vmatprep.subr.bf16.mxu0 %v14986_v39 }
 0xe3a   : > { %v17816_v4 = vrot.slane %v5884_v11, %v18537_v9 }
 0xe3c   : > { %10570 = vmatpush1.bf16.msra.mxu0 %v14984_v52 }
 0xe3d   : > { %10571 = vmatprep.subr.bf16.mxu0 %v14991_v22 }
 0xe3f   : > { %10543 = vmatmul.mubr.bf16.gmra.mrb[168].mxu0 %v17757_v30 }
 0xe40   : > { %10552 = vmatprep.mubr.bf16.mxu0 %v17782_v60  ;;  %10572 = vmatpush1.bf16.msra.mxu0 %v14989_v25 }
 0xe41   : > { %v8078_v59 = vpop.f32.mrb[144].mxu0  ;;  %10573 = vmatprep.subr.bf16.mxu0 %v14996_v18  ;;  %v15004_v18 = vld [vmem:[#allocation15 + $0x528] ss:$12 sps:$4 sm:$0xff]  }
 0xe42   : > { %v13276_v51 = vadd.f32 %v8078_v59, %v17804_v14  ;;  %v8224_v30 = vpop.f32.mrb[144].mxu1  ;;  %v8080_v34 = vpop.f32.mrb[145].mxu0 }
 0xe43   : > { %v13292_v53 = vadd.f32 %v8224_v30, %v17808_v41  ;;  %v13277_v56 = vadd.f32 %v8080_v34, %v17811_v17  ;;  %v8226_v40 = vpop.f32.mrb[145].mxu1  ;;  %v8082_v57 = vpop.f32.mrb[146].mxu0 }
 0xe44   : > { %v13293_v60 = vadd.f32 %v8226_v40, %v17816_v4  ;;  %v13278_v45 = vadd.f32 %v8082_v57, %v17804_v14  ;;  %v8228_v3 = vpop.f32.mrb[146].mxu1  ;;  %10574 = vmatpush1.bf16.msra.mxu0 %v14994_v44  ;;  %v8084_v54 = vpop.f32.mrb[147].mxu0  ;;  %v8271_v63 = vmax.f32 %v13276_v51, 0.0  ;;  %v15011_v51 = vld [vmem:[#allocation15 + $0x544] ss:$12 sps:$4 sm:$0xff]  }
 0xe45   : > { %v13294_v47 = vadd.f32 %v8228_v3, %v17808_v41  ;;  %v13279_v16 = vadd.f32 %v8084_v54, %v17811_v17  ;;  %v8230_v2 = vpop.f32.mrb[147].mxu1  ;;  %10575 = vmatprep.subr.bf16.mxu0 %v15001_v38  ;;  %v8273_v24 = vmax.f32 %v13292_v53, 0.0  ;;  %v8272_v61 = vmax.f32 %v13277_v56, 0.0  ;;  %v15008_v38 = vld [vmem:[#allocation15 + $0x788] ss:$12 sps:$4 sm:$0xff]  }
 0xe46   : > { %v8283_v7 = vmax.f32 %v13278_v45, 0.0  ;;  %v13295_v33 = vadd.f32 %v8230_v2, %v17816_v4  ;;  %v8274_v22 = vmax.f32 %v13293_v60, 0.0  ;;  %v15012_v56 = vld [vmem:[#allocation15 + $0x860] ss:$12 sps:$4 sm:$0xff]  }
 0xe47   : > { %v8285_v39 = vmax.f32 %v13294_v47, 0.0  ;;  %v8284_v52 = vmax.f32 %v13279_v16, 0.0  ;;  %10553 = vmatmul.mubr.bf16.gmra.mrb[172].mxu0 %v17777_v5  ;;  %v15009_v47 = vld [vmem:[#allocation15 + $0x540] ss:$12 sps:$4 sm:$0xff]  }
 0xe48   : > { %v17827_v11 = vpack.c.bf16 %v8283_v7, %v8271_v63  ;;  %v8286_v25 = vmax.f32 %v13295_v33, 0.0  ;;  %10576 = vmatpush1.bf16.msra.mxu0 %v14999_v35  ;;  %10595 = vmatprep.mubr.bf16.mxu0 %v17725_v55  ;;  %v15013_v63 = vld [vmem:[#allocation15 + $0x7a0] ss:$12 sps:$4 sm:$0xff]   ;;  %v15016_v7 = vld [vmem:[#allocation15 + $0x55c] ss:$12 sps:$4 sm:$0xff]  }
 0xe49   : > { %v17830_v9 = vpack.c.bf16 %v8285_v39, %v8273_v24  ;;  %v17832_v44 = vpack.c.bf16 %v8284_v52, %v8272_v61  ;;  %v8088_v59 = vpop.f32.mrb[148].mxu0  ;;  %10577 = vmatprep.subr.bf16.mxu0 %v15006_v31  ;;  %v15017_v39 = vld [vmem:[#allocation15 + $0x878] ss:$12 sps:$4 sm:$0xff]  }
 0xe4a   : > { %v17834_v30 = vpack.c.bf16 %v8286_v25, %v8274_v22  ;;  %v13280_v5 = vadd.f32 %v8088_v59, %v17804_v14  ;;  %v8234_v34 = vpop.f32.mrb[148].mxu1  ;;  %v8090_v53 = vpop.f32.mrb[149].mxu0 }
 0xe4b   : > { %v13296_v40 = vadd.f32 %v8234_v34, %v17808_v41  ;;  %v13281_v55 = vadd.f32 %v8090_v53, %v17811_v17  ;;  %v8236_v57 = vpop.f32.mrb[149].mxu1  ;;  %v8092_v60 = vpop.f32.mrb[150].mxu0  ;;  %11074 = vmatprep.mubr.bf16.mxu1 %v17832_v44 }
 0xe4c   : > { %v13297_v45 = vadd.f32 %v8236_v57, %v17816_v4  ;;  %v13282_v3 = vadd.f32 %v8092_v60, %v17804_v14  ;;  %v8238_v54 = vpop.f32.mrb[150].mxu1  ;;  %10578 = vmatpush1.bf16.msra.mxu0 %v15004_v18  ;;  %v8094_v35 = vpop.f32.mrb[151].mxu0  ;;  %11075 = vmatmul.mubr.bf16.vlgmr.msra.gmra.mrb[224].mxu1 %v17827_v11  ;;  %v8295_v33 = vmax.f32 %v13280_v5, 0.0  ;;  %v15014_v57 = vld [vmem:[#allocation15 + $0x558] ss:$12 sps:$4 sm:$0xff]  }
 0xe4d   : > { %v13298_v16 = vadd.f32 %v8238_v54, %v17808_v41  ;;  %v13283_v2 = vadd.f32 %v8094_v35, %v17811_v17  ;;  %v8240_v31 = vpop.f32.mrb[151].mxu1  ;;  %13013 = vmatpush3.bf16.msra.mxu1 %v15008_v38  ;;  %10579 = vmatprep.subr.bf16.mxu0 %v15011_v51  ;;  %v8297_v52 = vmax.f32 %v13296_v40, 0.0  ;;  %v8296_v22 = vmax.f32 %v13281_v55, 0.0  ;;  %v15018_v60 = vld [vmem:[#allocation15 + $0x7b8] ss:$12 sps:$4 sm:$0xff]  }
 0xe4e   : > { %v8307_v24 = vmax.f32 %v13282_v3, 0.0  ;;  %v13299_v61 = vadd.f32 %v8240_v31, %v17816_v4  ;;  %13014 = vmatprep.subr.bf16.mxu1 %v15012_v56  ;;  %v8298_v59 = vmax.f32 %v13297_v45, 0.0  ;;  %v15021_v56 = vld [vmem:[#allocation15 + $0x574] ss:$12 sps:$4 sm:$0xff]   ;;  %v15022_v54 = vld [vmem:[#allocation15 + $0x890] ss:$12 sps:$4 sm:$0xff]  }
 0xe4f   : > { %v8309_v25 = vmax.f32 %v13298_v16, 0.0  ;;  %v8308_v18 = vmax.f32 %v13283_v2, 0.0 }
 0xe50   : > { %v17846_v34 = vpack.c.bf16 %v8307_v24, %v8295_v33  ;;  %v8310_v53 = vmax.f32 %v13299_v61, 0.0  ;;  %10580 = vmatpush1.bf16.msra.mxu0 %v15009_v47  ;;  %v15019_v24 = vld [vmem:[#allocation15 + $0x570] ss:$12 sps:$4 sm:$0xff]  }
 0xe51   : > { %v17848_v38 = vpack.c.bf16 %v8309_v25, %v8297_v52  ;;  %v17850_v51 = vpack.c.bf16 %v8308_v18, %v8296_v22  ;;  %v8098_v5 = vpop.f32.mrb[152].mxu0  ;;  %13015 = vmatpush3.bf16.msra.mxu1 %v15013_v63  ;;  %10581 = vmatprep.subr.bf16.mxu0 %v15016_v7  ;;  %v15023_v22 = vld [vmem:[#allocation15 + $0x7d0] ss:$12 sps:$4 sm:$0xff]   ;;  %v15026_v25 = vld [vmem:[#allocation15 + $0x58c] ss:$12 sps:$4 sm:$0xff]  }
 0xe52   : > { %v17852_v3 = vpack.c.bf16 %v8310_v53, %v8298_v59  ;;  %v13284_v40 = vadd.f32 %v8098_v5, %v17804_v14  ;;  %v8244_v55 = vpop.f32.mrb[152].mxu1  ;;  %v8100_v45 = vpop.f32.mrb[153].mxu0  ;;  %13016 = vmatprep.subr.bf16.mxu1 %v15017_v39  ;;  %v15027_v5 = vld [vmem:[#allocation15 + $0x8a8] ss:$12 sps:$4 sm:$0xff]  }
 0xe53   : > { %v13300_v35 = vadd.f32 %v8244_v55, %v17808_v41  ;;  %v13285_v47 = vadd.f32 %v8100_v45, %v17811_v17  ;;  %v8246_v16 = vpop.f32.mrb[153].mxu1  ;;  %v8102_v2 = vpop.f32.mrb[154].mxu0  ;;  %11082 = vmatprep.mubr.bf16.mxu1 %v17850_v51 }
 0xe54   : > { %v13301_v31 = vadd.f32 %v8246_v16, %v17816_v4  ;;  %v13286_v63 = vadd.f32 %v8102_v2, %v17804_v14  ;;  %v8248_v7 = vpop.f32.mrb[154].mxu1  ;;  %10582 = vmatpush1.bf16.msra.mxu0 %v15014_v57  ;;  %v8104_v33 = vpop.f32.mrb[155].mxu0  ;;  %11083 = vmatmul.mubr.bf16.gmra.mrb[228].mxu1 %v17846_v34  ;;  %v8319_v18 = vmax.f32 %v13284_v40, 0.0 }
 0xe55   : > { %v13302_v61 = vadd.f32 %v8248_v7, %v17808_v41  ;;  %v13287_v39 = vadd.f32 %v8104_v33, %v17811_v17  ;;  %v8250_v52 = vpop.f32.mrb[155].mxu1  ;;  %13017 = vmatpush3.bf16.msra.mxu1 %v15018_v60  ;;  %10583 = vmatprep.subr.bf16.mxu0 %v15021_v56  ;;  %v8321_v57 = vmax.f32 %v13300_v35, 0.0  ;;  %v8320_v55 = vmax.f32 %v13285_v47, 0.0  ;;  %v15024_v33 = vld [vmem:[#allocation15 + $0x588] ss:$12 sps:$4 sm:$0xff]  }
 0xe56   : > { %v8331_v59 = vmax.f32 %v13286_v63, 0.0  ;;  %v13303_v53 = vadd.f32 %v8250_v52, %v17816_v4  ;;  %13018 = vmatprep.subr.bf16.mxu1 %v15022_v54  ;;  %v8322_v2 = vmax.f32 %v13301_v31, 0.0  ;;  %v15028_v63 = vld [vmem:[#allocation15 + $0x7e8] ss:$12 sps:$4 sm:$0xff]   ;;  %v15031_v54 = vld [vmem:[#allocation15 + $0x5a4] ss:$12 sps:$4 sm:$0xff]  }
 0xe57   : > { %v8333_v45 = vmax.f32 %v13302_v61, 0.0  ;;  %v8332_v16 = vmax.f32 %v13287_v39, 0.0  ;;  %v15032_v61 = vld [vmem:[#allocation15 + $0x8c0] ss:$12 sps:$4 sm:$0xff]  }
 0xe58   : > { %v17864_v20 = vpack.c.bf16 %v8331_v59, %v8319_v18  ;;  %v8334_v7 = vmax.f32 %v13303_v53, 0.0  ;;  %10584 = vmatpush1.bf16.msra.mxu0 %v15019_v24 }
 0xe59   : > { %v17866_v60 = vpack.c.bf16 %v8333_v45, %v8321_v57  ;;  %v17868_v56 = vpack.c.bf16 %v8332_v16, %v8320_v55  ;;  %v8108_v40 = vpop.f32.mrb[156].mxu0  ;;  %13019 = vmatpush3.bf16.msra.mxu1 %v15023_v22  ;;  %10585 = vmatprep.subr.bf16.mxu0 %v15026_v25  ;;  %v15029_v55 = vld [vmem:[#allocation15 + $0x5a0] ss:$12 sps:$4 sm:$0xff]  }
 0xe5a   : > { %v17870_v52 = vpack.c.bf16 %v8334_v7, %v8322_v2  ;;  %v13288_v35 = vadd.f32 %v8108_v40, %v17804_v14  ;;  %v8254_v47 = vpop.f32.mrb[156].mxu1  ;;  %v8110_v31 = vpop.f32.mrb[157].mxu0  ;;  %13020 = vmatprep.subr.bf16.mxu1 %v15027_v5  ;;  %v15033_v2 = vld [vmem:[#allocation15 + $0x800] ss:$12 sps:$4 sm:$0xff]   ;;  %v15036_v7 = vld [vmem:[#allocation15 + $0x5bc] ss:$12 sps:$4 sm:$0xff]  }
 0xe5b   : > { %v13304_v24 = vadd.f32 %v8254_v47, %v17808_v41  ;;  %v13289_v39 = vadd.f32 %v8110_v31, %v17811_v17  ;;  %v8256_v18 = vpop.f32.mrb[157].mxu1  ;;  %v8112_v59 = vpop.f32.mrb[158].mxu0  ;;  %11090 = vmatprep.mubr.bf16.mxu1 %v17868_v56 }
 0xe5c   : > { %v13305_v22 = vadd.f32 %v8256_v18, %v17816_v4  ;;  %v13290_v25 = vadd.f32 %v8112_v59, %v17804_v14  ;;  %v8258_v53 = vpop.f32.mrb[158].mxu1  ;;  %10586 = vmatpush1.bf16.msra.mxu0 %v15024_v33  ;;  %v8114_v57 = vpop.f32.mrb[159].mxu0  ;;  %11091 = vmatmul.mubr.bf16.gmra.mrb[232].mxu1 %v17864_v20  ;;  %v8343_v40 = vmax.f32 %v13288_v35, 0.0  ;;  %v15037_v14 = vld [vmem:[#allocation15 + $0x8d8] ss:$12 sps:$4 sm:$0xff]  }
 0xe5d   : > { %v13306_v5 = vadd.f32 %v8258_v53, %v17808_v41  ;;  %v13291_v45 = vadd.f32 %v8114_v57, %v17811_v17  ;;  %v8260_v16 = vpop.f32.mrb[159].mxu1  ;;  %13021 = vmatpush3.bf16.msra.mxu1 %v15028_v63  ;;  %10587 = vmatprep.subr.bf16.mxu0 %v15031_v54  ;;  %v8345_v33 = vmax.f32 %v13304_v24, 0.0  ;;  %v8344_v18 = vmax.f32 %v13289_v39, 0.0  ;;  %v15034_v17 = vld [vmem:[#allocation15 + $0x5b8] ss:$12 sps:$4 sm:$0xff]  }
 0xe5e   : > { %v8355_v47 = vmax.f32 %v13290_v25, 0.0  ;;  %v13307_v31 = vadd.f32 %v8260_v16, %v17816_v4  ;;  %13022 = vmatprep.subr.bf16.mxu1 %v15032_v61  ;;  %v8346_v15 = vmax.f32 %v13305_v22, 0.0  ;;  %v15038_v35 = vld [vmem:[#allocation15 + $0x818] ss:$12 sps:$4 sm:$0xff]   ;;  %v15041_v24 = vld [vmem:[#allocation15 + $0x5d4] ss:$12 sps:$4 sm:$0xff]  }
 0xe5f   : > { %v8357_v59 = vmax.f32 %v13306_v5, 0.0  ;;  %v8356_v13 = vmax.f32 %v13291_v45, 0.0  ;;  %v15042_v39 = vld [vmem:[#allocation15 + $0x8f0] ss:$12 sps:$4 sm:$0xff]   ;;  %v15044_v45 = vld [vmem:[#allocation15 + $0x5e8] ss:$12 sps:$4 sm:$0xff]  }
 0xe60   : > { %v17882_v23 = vpack.c.bf16 %v8355_v47, %v8343_v40  ;;  %v8358_v41 = vmax.f32 %v13307_v31, 0.0  ;;  %10588 = vmatpush1.bf16.msra.mxu0 %v15029_v55  ;;  %v15046_v55 = vld [vmem:[#allocation15 + $0x5ec] ss:$12 sps:$4 sm:$0xff]   ;;  %v15049_v16 = vld [vmem:[#allocation15 + $0x604] ss:$12 sps:$4 sm:$0xff]  }
 0xe61   : > { %v17884_v63 = vpack.c.bf16 %v8357_v59, %v8345_v33  ;;  %v17886_v54 = vpack.c.bf16 %v8356_v13, %v8344_v18  ;;  %13023 = vmatpush3.bf16.msra.mxu1 %v15033_v2  ;;  %10589 = vmatprep.subr.bf16.mxu0 %v15036_v7  ;;  %v15039_v13 = vld [vmem:[#allocation15 + $0x5d0] ss:$12 sps:$4 sm:$0xff]   ;;  %v15047_v31 = vld [vmem:[#allocation15 + $0x600] ss:$12 sps:$4 sm:$0xff]   ;;  %v15050_v59 = vld [vmem:[#allocation15 + $0x618] ss:$12 sps:$4 sm:$0xff]  }
 0xe62   : > { %v17888_v4 = vpack.c.bf16 %v8358_v41, %v8346_v15  ;;  %v12828_v61 = vpop.f32.mrb[160].mxu1  ;;  %13024 = vmatprep.subr.bf16.mxu1 %v15037_v14  ;;  %v15043_v15 = vld [vmem:[#allocation15 + $0x830] ss:$12 sps:$4 sm:$0xff]   ;;  %v15055_v41 = vld [vmem:[#allocation15 + $0x634] ss:$12 sps:$4 sm:$0xff]  }
 0xe63   : > { %v12829_v25 = vpop.f32.mrb[161].mxu1  ;;  %11098 = vmatprep.mubr.bf16.mxu1 %v17886_v54  ;;  %v15052_v33 = vld [vmem:[#allocation15 + $0x61c] ss:$12 sps:$4 sm:$0xff]  }
 0xe64   : > { %v17891_v22 = vadd.f32 %v12829_v25, %v12828_v61  ;;  %10590 = vmatpush1.bf16.msra.mxu0 %v15034_v17  ;;  %v12831_v53 = vpop.f32.mrb[162].mxu1  ;;  %11099 = vmatmul.mubr.bf16.gmra.mrb[236].mxu1 %v17882_v23 }
 0xe65   : > { %v12832_v57 = vpop.f32.mrb[163].mxu1  ;;  %13025 = vmatpush3.bf16.msra.mxu1 %v15038_v35  ;;  %11139 = vmatprep.mubr.bf16.mxu1 %v17834_v30 }
 0xe66   : > { %v17895_v5 = vadd.f32 %v12832_v57, %v12831_v53  ;;  %10591 = vmatprep.subr.bf16.mxu0 %v15041_v24  ;;  %13026 = vmatprep.subr.bf16.mxu1 %v15042_v39  ;;  %v15053_v39 = vld [vmem:[#allocation15 + $0x630] ss:$12 sps:$4 sm:$0xff]  }
 0xe68   : > { %10592 = vmatpush1.bf16.msra.mxu0 %v15039_v13  ;;  %v15061_v13 = vld [vmem:[#allocation15 + $0x664] ss:$12 sps:$4 sm:$0xff]  }
 0xe69   : > { %13027 = vmatpush3.bf16.msra.mxu1 %v15043_v15  ;;  %10593 = vmatprep.subr.bf16.mxu0 %v15046_v55 }
 0xe6a   : > { %v12834_v2 = vpop.f32.mrb[164].mxu1 }
 0xe6b   : > { %v12835_v7 = vpop.f32.mrb[165].mxu1 }
 0xe6c   : > { %v17897_v40 = vadd.f32 %v12835_v7, %v12834_v2  ;;  %10594 = vmatpush1.bf16.msra.mxu0 %v15044_v45  ;;  %v12837_v47 = vpop.f32.mrb[166].mxu1  ;;  %11140 = vmatmul.mubr.bf16.vlgmr.msra.gmra.mrb[240].mxu1 %v17830_v9  ;;  %v17916_v2 = vld [vmem:[#allocation16] sm:$0x7] }
 0xe6d   : > { %v12838_v14 = vpop.f32.mrb[167].mxu1  ;;  %11147 = vmatprep.mubr.bf16.mxu1 %v17852_v3  ;;  %10636 = vmatprep.subr.bf16.mxu0 %v15049_v16  ;;  %v15059_v16 = vld [vmem:[#allocation15 + $0x660] ss:$12 sps:$4 sm:$0xff]  }
 0xe6e   : > { %v17901_v18 = vadd.f32 %v12838_v14, %v12837_v47  ;;  %v17924_v47 = vrot.slane %v17916_v2, %v16996_v49  ;;  %v15067_v14 = vld [vmem:[#allocation15 + $0x694] ss:$12 sps:$4 sm:$0xff]  }
 0xe6f   : > { %10596 = vmatmul.mubr.bf16.vlgmr.msra.gmra.mrb[160].mxu0 %v17721_v43  ;;  %v15058_v43 = vld [vmem:[#allocation15 + $0x64c] ss:$12 sps:$4 sm:$0xff]  }
 0xe70   : > { %10605 = vmatprep.mubr.bf16.mxu0 %v17745_v21  ;;  %10637 = vmatpush1.bf16.msra.mxu0 %v15047_v31  ;;  %v15056_v21 = vld [vmem:[#allocation15 + $0x648] ss:$12 sps:$4 sm:$0xff]   ;;  %v15062_v31 = vld [vmem:[#allocation15 + $0x678] ss:$12 sps:$4 sm:$0xff]  }
 0xe71   : > { %10638 = vmatprep.subr.bf16.mxu0 %v15052_v33 }
 0xe72   : > { %v12840_v17 = vpop.f32.mrb[168].mxu1 }
 0xe73   : > { %v12841_v35 = vpop.f32.mrb[169].mxu1 }
 0xe74   : > { %v17905_v61 = vadd.f32 %v12841_v35, %v12840_v17  ;;  %10639 = vmatpush1.bf16.msra.mxu0 %v15050_v59  ;;  %v12843_v24 = vpop.f32.mrb[170].mxu1  ;;  %11148 = vmatmul.mubr.bf16.gmra.mrb[244].mxu1 %v17848_v38 }
 0xe75   : > { %v12844_v25 = vpop.f32.mrb[171].mxu1  ;;  %11155 = vmatprep.mubr.bf16.mxu1 %v17870_v52  ;;  %10640 = vmatprep.subr.bf16.mxu0 %v15055_v41  ;;  %v10817_v41 = vadd.f32 %v17891_v22, %v17924_v47  ;;  %v15068_v22 = vld [vmem:[#allocation15 + $0x6a8] ss:$12 sps:$4 sm:$0xff]  }
 0xe76   : > { %v17909_v53 = vadd.f32 %v12844_v25, %v12843_v24 }
 0xe77   : > { %10606 = vmatmul.mubr.bf16.gmra.mrb[164].mxu0 %v17740_v28  ;;  %v15064_v28 = vld [vmem:[#allocation15 + $0x67c] ss:$12 sps:$4 sm:$0xff]  }
 0xe78   : > { %10615 = vmatprep.mubr.bf16.mxu0 %v17765_v48  ;;  %10641 = vmatpush1.bf16.msra.mxu0 %v15053_v39  ;;  %v15070_v39 = vld [vmem:[#allocation15 + $0x6ac] ss:$12 sps:$4 sm:$0xff]  }
 0xe79   : > { %10642 = vmatprep.subr.bf16.mxu0 %v15058_v43 }
 0xe7a   : > { %v12846_v57 = vpop.f32.mrb[172].mxu1 }
 0xe7b   : > { %v12847_v15 = vpop.f32.mrb[173].mxu1 }
 0xe7c   : > { %v17913_v55 = vadd.f32 %v12847_v15, %v12846_v57  ;;  %10643 = vmatpush1.bf16.msra.mxu0 %v15056_v21  ;;  %v12849_v45 = vpop.f32.mrb[174].mxu1  ;;  %11156 = vmatmul.mubr.bf16.gmra.mrb[248].mxu1 %v17866_v60 }
 0xe7d   : > { %v12850_v7 = vpop.f32.mrb[175].mxu1  ;;  %11163 = vmatprep.mubr.bf16.mxu1 %v17888_v4  ;;  %10644 = vmatprep.subr.bf16.mxu0 %v15061_v13  ;;  %v15073_v13 = vld [vmem:[#allocation15 + $0x6c4] ss:$12 sps:$4 sm:$0xff]  }
 0xe7e   : > { %v17919_v48 = vadd.f32 %v12850_v7, %v12849_v45  ;;  %v10825_v45 = vadd.f32 %v17897_v40, %v17924_v47  ;;  %v15071_v7 = vld [vmem:[#allocation15 + $0x6c0] ss:$12 sps:$4 sm:$0xff]  }
 0xe7f   : > { %10616 = vmatmul.mubr.bf16.gmra.mrb[168].mxu0 %v17760_v46  ;;  %v15065_v46 = vld [vmem:[#allocation15 + $0x690] ss:$12 sps:$4 sm:$0xff]  }
 0xe80   : > { %10625 = vmatprep.mubr.bf16.mxu0 %v17785_v27  ;;  %10645 = vmatpush1.bf16.msra.mxu0 %v15059_v16  ;;  %v10820_v27 = vadd.f32 %v17895_v5, %v17924_v47 }
 0xe81   : > { %10646 = vmatprep.subr.bf16.mxu0 %v15064_v28 }
 0xe82   : > { %v12868_v33 = vpop.f32.mrb[176].mxu1 }
 0xe83   : > { %v12869_v59 = vpop.f32.mrb[177].mxu1 }
 0xe84   : > { %v12870_v17 = vadd.f32 %v12869_v59, %v12868_v33  ;;  %10647 = vmatpush1.bf16.msra.mxu0 %v15062_v31  ;;  %v12871_v35 = vpop.f32.mrb[178].mxu1  ;;  %11164 = vmatmul.mubr.bf16.gmra.mrb[252].mxu1 %v17884_v63  ;;  %v10828_v31 = vadd.f32 %v17901_v18, %v17924_v47  ;;  %v15074_v59 = vld [vmem:[#allocation15 + $0x6d8] ss:$12 sps:$4 sm:$0xff]  }
 0xe85   : > { %v12872_v24 = vpop.f32.mrb[179].mxu1  ;;  %10648 = vmatprep.subr.bf16.mxu0 %v15067_v14  ;;  %v15082_v18 = vld [vmem:[#allocation15 + $0x70c] ss:$12 sps:$4 sm:$0xff]  }
 0xe86   : > { %v17932_v25 = vadd.f32 %v12870_v17, %v10817_v41  ;;  %v12873_v43 = vadd.f32 %v12872_v24, %v12871_v35  ;;  %v15079_v41 = vld [vmem:[#allocation15 + $0x6f4] ss:$12 sps:$4 sm:$0xff]   ;;  %v10833_v35 = vadd.f32 %v17905_v61, %v17924_v47 }
 0xe87   : > { %10626 = vmatmul.mubr.bf16.gmra.mrb[172].mxu0 %v17780_v29  ;;  %v15076_v29 = vld [vmem:[#allocation15 + $0x6dc] ss:$12 sps:$4 sm:$0xff]  }
 0xe88   : > { %v17935_v21 = vadd.f32 %v12873_v43, %v10820_v27  ;;  %10649 = vmatpush1.bf16.msra.mxu0 %v15065_v46  ;;  %10668 = vmatprep.mubr.bf16.mxu0 %v17832_v44  ;;  %v10836_v43 = vadd.f32 %v17909_v53, %v17924_v47  ;;  %v15088_v53 = vld [vmem:[#allocation15 + $0x73c] ss:$12 sps:$4 sm:$0xff]  }
 0xe89   : > { %10650 = vmatprep.subr.bf16.mxu0 %v15070_v39  ;;  %v15077_v39 = vld [vmem:[#allocation15 + $0x6f0] ss:$12 sps:$4 sm:$0xff]  }
 0xe8a   : > { %v12874_v57 = vpop.f32.mrb[180].mxu1 }
 0xe8b   : > { %v12875_v15 = vpop.f32.mrb[181].mxu1 }
 0xe8c   : > { %v12876_v16 = vadd.f32 %v12875_v15, %v12874_v57  ;;  %10651 = vmatpush1.bf16.msra.mxu0 %v15068_v22  ;;  %v12877_v5 = vpop.f32.mrb[182].mxu1  ;;  %v15080_v15 = vld [vmem:[#allocation15 + $0x708] ss:$12 sps:$4 sm:$0xff]  }
 0xe8d   : > { %v12878_v28 = vpop.f32.mrb[183].mxu1  ;;  %10652 = vmatprep.subr.bf16.mxu0 %v15073_v13 }
 0xe8e   : > { %v17942_v14 = vadd.f32 %v12876_v16, %v10825_v45  ;;  %v12879_v44 = vadd.f32 %v12878_v28, %v12877_v5  ;;  %v15085_v45 = vld [vmem:[#allocation15 + $0x724] ss:$12 sps:$4 sm:$0xff]   ;;  %v10841_v5 = vadd.f32 %v17913_v55, %v17924_v47 }
 0xe8f   : > { %v15089_v55 = vld [vmem:[#allocation15 + $0x750] ss:$12 sps:$4 sm:$0xff]  }
 0xe90   : > { %v17944_v33 = vadd.f32 %v12879_v44, %v10828_v31  ;;  %10653 = vmatpush1.bf16.msra.mxu0 %v15071_v7  ;;  %v10844_v44 = vadd.f32 %v17919_v48, %v17924_v47  ;;  %v15100_v48 = vld [vmem:[#allocation15 + $0x79c] ss:$12 sps:$4 sm:$0xff]   ;;  %v15098_v47 = vld [vmem:[#allocation15 + $0x798] ss:$12 sps:$4 sm:$0xff]  }
 0xe91   : > { %10654 = vmatprep.subr.bf16.mxu0 %v15076_v29  ;;  %v15083_v29 = vld [vmem:[#allocation15 + $0x720] ss:$12 sps:$4 sm:$0xff]  }
 0xe92   : > { %v12880_v40 = vpop.f32.mrb[184].mxu1 }
 0xe93   : > { %v12881_v17 = vpop.f32.mrb[185].mxu1 }
 0xe94   : > { %v12882_v46 = vadd.f32 %v12881_v17, %v12880_v40  ;;  %10655 = vmatpush1.bf16.msra.mxu0 %v15074_v59  ;;  %v12883_v24 = vpop.f32.mrb[186].mxu1  ;;  %v15086_v17 = vld [vmem:[#allocation15 + $0x738] ss:$12 sps:$4 sm:$0xff]  }
 0xe95   : > { %v12884_v27 = vpop.f32.mrb[187].mxu1  ;;  %10656 = vmatprep.subr.bf16.mxu0 %v15079_v41 }
 0xe96   : > { %v17950_v22 = vadd.f32 %v12882_v46, %v10833_v35  ;;  %v12885_v13 = vadd.f32 %v12884_v27, %v12883_v24  ;;  %v15091_v35 = vld [vmem:[#allocation15 + $0x754] ss:$12 sps:$4 sm:$0xff]   ;;  %v15094_v46 = vld [vmem:[#allocation15 + $0x76c] ss:$12 sps:$4 sm:$0xff]  }
 0xe97   : > { %v15092_v24 = vld [vmem:[#allocation15 + $0x768] ss:$12 sps:$4 sm:$0xff]   ;;  %v15095_v27 = vld [vmem:[#allocation15 + $0x780] ss:$12 sps:$4 sm:$0xff]  }
 0xe98   : > { %v17952_v57 = vadd.f32 %v12885_v13, %v10836_v43  ;;  %10657 = vmatpush1.bf16.msra.mxu0 %v15077_v39  ;;  %v15097_v39 = vld [vmem:[#allocation15 + $0x784] ss:$12 sps:$4 sm:$0xff]   ;;  %v15106_v13 = vld [vmem:[#allocation15 + $0x7cc] ss:$12 sps:$4 sm:$0xff]  }
 0xe99   : > { %10658 = vmatprep.subr.bf16.mxu0 %v15082_v18  ;;  %v15103_v18 = vld [vmem:[#allocation15 + $0x7b4] ss:$12 sps:$4 sm:$0xff]   ;;  %v15101_v43 = vld [vmem:[#allocation15 + $0x7b0] ss:$12 sps:$4 sm:$0xff]  }
 0xe9a   : > { %v12886_v61 = vpop.f32.mrb[188].mxu1 }
 0xe9b   : > { %v12887_v16 = vpop.f32.mrb[189].mxu1 }
 0xe9c   : > { %v12888_v7 = vadd.f32 %v12887_v16, %v12886_v61  ;;  %10659 = vmatpush1.bf16.msra.mxu0 %v15080_v15  ;;  %v12889_v28 = vpop.f32.mrb[190].mxu1  ;;  %v15104_v15 = vld [vmem:[#allocation15 + $0x7c8] ss:$12 sps:$4 sm:$0xff]  }
 0xe9d   : > { %v12890_v31 = vpop.f32.mrb[191].mxu1  ;;  %10660 = vmatprep.subr.bf16.mxu0 %v15085_v45  ;;  %v15109_v45 = vld [vmem:[#allocation15 + $0x7e4] ss:$12 sps:$4 sm:$0xff]  }
 0xe9e   : > { %v17958_v59 = vadd.f32 %v12888_v7, %v10841_v5  ;;  %v12891_v41 = vadd.f32 %v12890_v31, %v12889_v28  ;;  %v15115_v28 = vld [vmem:[#allocation15 + $0x814] ss:$12 sps:$4 sm:$0xff]  }
 0xea0   : > { %v17960_v40 = vadd.f32 %v12891_v41, %v10844_v44  ;;  %10661 = vmatpush1.bf16.msra.mxu0 %v15083_v29  ;;  %v15113_v44 = vld [vmem:[#allocation15 + $0x810] ss:$12 sps:$4 sm:$0xff]  }
 0xea1   : > { %10662 = vmatprep.subr.bf16.mxu0 %v15088_v53 }
 0xea4   : > { %10663 = vmatpush1.bf16.msra.mxu0 %v15086_v17 }
 0xea5   : > { %10664 = vmatprep.subr.bf16.mxu0 %v15091_v35 }
 0xea8   : > { %10665 = vmatpush1.bf16.msra.mxu0 %v15089_v55  ;;  %v15116_v55 = vld [vmem:[#allocation15 + $0x828] ss:$12 sps:$4 sm:$0xff]  }
 0xea9   : > { %10666 = vmatprep.subr.bf16.mxu0 %v15094_v46  ;;  %v15121_v46 = vld [vmem:[#allocation15 + $0x844] ss:$12 sps:$4 sm:$0xff]  }
 0xeac   : > { %10667 = vmatpush1.bf16.msra.mxu0 %v15092_v24 }
 0xead   : > { %10709 = vmatprep.subr.bf16.mxu0 %v15097_v39 }
 0xeaf   : > { %10669 = vmatmul.mubr.bf16.vlgmr.msra.gmra.mrb[160].mxu0 %v17827_v11  ;;  %v15107_v11 = vld [vmem:[#allocation15 + $0x7e0] ss:$12 sps:$4 sm:$0xff]  }
 0xeb0   : > { %10678 = vmatprep.mubr.bf16.mxu0 %v17850_v51  ;;  %10710 = vmatpush1.bf16.msra.mxu0 %v15095_v27  ;;  %v15112_v51 = vld [vmem:[#allocation15 + $0x7fc] ss:$12 sps:$4 sm:$0xff]   ;;  %v15119_v27 = vld [vmem:[#allocation15 + $0x840] ss:$12 sps:$4 sm:$0xff]  }
 0xeb1   : > { %10711 = vmatprep.subr.bf16.mxu0 %v15100_v48 }
 0xeb4   : > { %10712 = vmatpush1.bf16.msra.mxu0 %v15098_v47 }
 0xeb5   : > { %10713 = vmatprep.subr.bf16.mxu0 %v15103_v18 }
 0xeb7   : > { %10679 = vmatmul.mubr.bf16.gmra.mrb[164].mxu0 %v17846_v34  ;;  %v15110_v34 = vld [vmem:[#allocation15 + $0x7f8] ss:$12 sps:$4 sm:$0xff]  }
 0xeb8   : > { %10688 = vmatprep.mubr.bf16.mxu0 %v17868_v56  ;;  %10714 = vmatpush1.bf16.msra.mxu0 %v15101_v43  ;;  %v15122_v43 = vld [vmem:[#allocation15 + $0x858] ss:$12 sps:$4 sm:$0xff]  }
 0xeb9   : > { %10715 = vmatprep.subr.bf16.mxu0 %v15106_v13 }
 0xebc   : > { %10716 = vmatpush1.bf16.msra.mxu0 %v15104_v15  ;;  %v15127_v15 = vld [vmem:[#allocation15 + $0x874] ss:$12 sps:$4 sm:$0xff]  }
 0xebd   : > { %10717 = vmatprep.subr.bf16.mxu0 %v15109_v45 }
 0xebe   : > { %v12908_v61 = vpop.f32.mrb[192].mxu1 }
 0xebf   : > { %10689 = vmatmul.mubr.bf16.gmra.mrb[168].mxu0 %v17864_v20  ;;  %v12909_v16 = vpop.f32.mrb[193].mxu1  ;;  %v15118_v20 = vld [vmem:[#allocation15 + $0x82c] ss:$12 sps:$4 sm:$0xff]  }
 0xec0   : > { %10698 = vmatprep.mubr.bf16.mxu0 %v17886_v54  ;;  %10718 = vmatpush1.bf16.msra.mxu0 %v15107_v11  ;;  %v12910_v5 = vadd.f32 %v12909_v16, %v12908_v61  ;;  %v12911_v7 = vpop.f32.mrb[194].mxu1 }
 0xec1   : > { %10719 = vmatprep.subr.bf16.mxu0 %v15112_v51  ;;  %v12912_v56 = vpop.f32.mrb[195].mxu1  ;;  %v15130_v51 = vld [vmem:[#allocation15 + $0x88c] ss:$12 sps:$4 sm:$0xff]  }
 0xec2   : > { %v17969_v29 = vadd.f32 %v12910_v5, %v17932_v25  ;;  %v12913_v31 = vadd.f32 %v12912_v56, %v12911_v7 }
 0xec4   : > { %v17972_v53 = vadd.f32 %v12913_v31, %v17935_v21  ;;  %10720 = vmatpush1.bf16.msra.mxu0 %v15110_v34  ;;  %v15128_v34 = vld [vmem:[#allocation15 + $0x888] ss:$12 sps:$4 sm:$0xff]  }
 0xec5   : > { %10721 = vmatprep.subr.bf16.mxu0 %v15115_v28  ;;  %v15133_v28 = vld [vmem:[#allocation15 + $0x8a4] ss:$12 sps:$4 sm:$0xff]  }
 0xec6   : > { %v12914_v41 = vpop.f32.mrb[196].mxu1 }
 0xec7   : > { %10699 = vmatmul.mubr.bf16.gmra.mrb[172].mxu0 %v17882_v23  ;;  %v12915_v54 = vpop.f32.mrb[197].mxu1  ;;  %v15124_v23 = vld [vmem:[#allocation15 + $0x85c] ss:$12 sps:$4 sm:$0xff]  }
 0xec8   : > { %10722 = vmatpush1.bf16.msra.mxu0 %v15113_v44  ;;  %10741 = vmatprep.mubr.bf16.mxu0 %v17834_v30  ;;  %v12916_v17 = vadd.f32 %v12915_v54, %v12914_v41  ;;  %v12917_v35 = vpop.f32.mrb[198].mxu1 }
 0xec9   : > { %10723 = vmatprep.subr.bf16.mxu0 %v15118_v20  ;;  %v12918_v25 = vpop.f32.mrb[199].mxu1  ;;  %v15136_v20 = vld [vmem:[#allocation15 + $0x8bc] ss:$12 sps:$4 sm:$0xff]  }
 0xeca   : > { %v17977_v21 = vadd.f32 %v12916_v17, %v17942_v14  ;;  %v12919_v24 = vadd.f32 %v12918_v25, %v12917_v35  ;;  %v15134_v17 = vld [vmem:[#allocation15 + $0x8b8] ss:$12 sps:$4 sm:$0xff]   ;;  %v15139_v25 = vld [vmem:[#allocation15 + $0x8d4] ss:$12 sps:$4 sm:$0xff]  }
 0xecc   : > { %v17980_v39 = vadd.f32 %v12919_v24, %v17944_v33  ;;  %10724 = vmatpush1.bf16.msra.mxu0 %v15116_v55  ;;  %v15125_v33 = vld [vmem:[#allocation15 + $0x870] ss:$12 sps:$4 sm:$0xff]  }
 0xecd   : > { %10725 = vmatprep.subr.bf16.mxu0 %v15121_v46 }
 0xece   : > { %v12920_v48 = vpop.f32.mrb[200].mxu1 }
 0xecf   : > { %v12921_v47 = vpop.f32.mrb[201].mxu1 }
 0xed0   : > { %10726 = vmatpush1.bf16.msra.mxu0 %v15119_v27  ;;  %v12922_v30 = vadd.f32 %v12921_v47, %v12920_v48  ;;  %v12923_v18 = vpop.f32.mrb[202].mxu1 }
 0xed1   : > { %10727 = vmatprep.subr.bf16.mxu0 %v15124_v23  ;;  %v12924_v13 = vpop.f32.mrb[203].mxu1  ;;  %v15142_v23 = vld [vmem:[#allocation15 + $0x8ec] ss:$12 sps:$4 sm:$0xff]  }
 0xed2   : > { %v10963_v14 = vadd.f32 %v12922_v30, %v17950_v22  ;;  %v12925_v45 = vadd.f32 %v12924_v13, %v12923_v18  ;;  %v15140_v30 = vld [vmem:[#allocation15 + $0x8e8] ss:$12 sps:$4 sm:$0xff]  }
 0xed4   : > { %v10966_v11 = vadd.f32 %v12925_v45, %v17952_v57  ;;  %10728 = vmatpush1.bf16.msra.mxu0 %v15122_v43  ;;  %v15131_v57 = vld [vmem:[#allocation15 + $0x8a0] ss:$12 sps:$4 sm:$0xff]  }
 0xed5   : > { %10729 = vmatprep.subr.bf16.mxu0 %v15127_v15 }
 0xed6   : > { %v12926_v61 = vpop.f32.mrb[204].mxu1 }
 0xed7   : > { %v12927_v16 = vpop.f32.mrb[205].mxu1 }
 0xed8   : > { %10730 = vmatpush1.bf16.msra.mxu0 %v15125_v33  ;;  %v12928_v5 = vadd.f32 %v12927_v16, %v12926_v61  ;;  %v12929_v7 = vpop.f32.mrb[206].mxu1 }
 0xed9   : > { %10731 = vmatprep.subr.bf16.mxu0 %v15130_v51  ;;  %v12930_v56 = vpop.f32.mrb[207].mxu1 }
 0xeda   : > { %v10971_v31 = vadd.f32 %v12928_v5, %v17958_v59  ;;  %v12931_v44 = vadd.f32 %v12930_v56, %v12929_v7  ;;  %v15137_v59 = vld [vmem:[#allocation15 + $0x8d0] ss:$12 sps:$4 sm:$0xff]  }
 0xedc   : > { %v10974_v22 = vadd.f32 %v12931_v44, %v17960_v40  ;;  %10732 = vmatpush1.bf16.msra.mxu0 %v15128_v34 }
 0xedd   : > { %10733 = vmatprep.subr.bf16.mxu0 %v15133_v28 }
 0xedf   : > { %v12948_v41 = vpop.f32.mrb[208].mxu1 }
 0xee0   : > { %10734 = vmatpush1.bf16.msra.mxu0 %v15131_v57  ;;  %v12949_v54 = vpop.f32.mrb[209].mxu1 }
 0xee1   : > { %v12950_v35 = vadd.f32 %v12949_v54, %v12948_v41  ;;  %v12951_v55 = vpop.f32.mrb[210].mxu1  ;;  %10735 = vmatprep.subr.bf16.mxu0 %v15136_v20 }
 0xee2   : > { %v12952_v46 = vpop.f32.mrb[211].mxu1 }
 0xee3   : > { %v11012_v24 = vadd.f32 %v12950_v35, %v17969_v29  ;;  %v12953_v27 = vadd.f32 %v12952_v46, %v12951_v55 }
 0xee4   : > { %10736 = vmatpush1.bf16.msra.mxu0 %v15134_v17 }
 0xee5   : > { %v11015_v40 = vadd.f32 %v12953_v27, %v17972_v53  ;;  %10737 = vmatprep.subr.bf16.mxu0 %v15139_v25 }
 0xee7   : > { %v12954_v48 = vpop.f32.mrb[212].mxu1 }
 0xee8   : > { %10738 = vmatpush1.bf16.msra.mxu0 %v15137_v59  ;;  %v12955_v47 = vpop.f32.mrb[213].mxu1 }
 0xee9   : > { %v12956_v18 = vadd.f32 %v12955_v47, %v12954_v48  ;;  %v12957_v43 = vpop.f32.mrb[214].mxu1  ;;  %10739 = vmatprep.subr.bf16.mxu0 %v15142_v23 }
 0xeea   : > { %v12958_v13 = vpop.f32.mrb[215].mxu1 }
 0xeeb   : > { %v11020_v15 = vadd.f32 %v12956_v18, %v17977_v21  ;;  %v12959_v45 = vadd.f32 %v12958_v13, %v12957_v43 }
 0xeec   : > { %10740 = vmatpush1.bf16.msra.mxu0 %v15140_v30 }
 0xeed   : > { %v11023_v29 = vadd.f32 %v12959_v45, %v17980_v39 }
 0xeef   : > { %10742 = vmatmul.mubr.bf16.vlgmr.msra.gmra.mrb[160].mxu0 %v17830_v9  ;;  %v12960_v33 = vpop.f32.mrb[216].mxu1 }
 0xef0   : > { %10751 = vmatprep.mubr.bf16.mxu0 %v17852_v3  ;;  %v12961_v53 = vpop.f32.mrb[217].mxu1 }
 0xef1   : > { %v12962_v51 = vadd.f32 %v12961_v53, %v12960_v33  ;;  %v12963_v61 = vpop.f32.mrb[218].mxu1 }
 0xef2   : > { %v12964_v16 = vpop.f32.mrb[219].mxu1 }
 0xef3   : > { %v11028_v5 = vadd.f32 %v12962_v51, %v10963_v14  ;;  %v12965_v7 = vadd.f32 %v12964_v16, %v12963_v61 }
 0xef5   : > { %v11031_v34 = vadd.f32 %v12965_v7, %v10966_v11 }
 0xef7   : > { %10752 = vmatmul.mubr.bf16.gmra.mrb[164].mxu0 %v17848_v38  ;;  %v12966_v56 = vpop.f32.mrb[220].mxu1 }
 0xef8   : > { %10761 = vmatprep.mubr.bf16.mxu0 %v17870_v52  ;;  %v12967_v21 = vpop.f32.mrb[221].mxu1 }
 0xef9   : > { %v12968_v28 = vadd.f32 %v12967_v21, %v12966_v56  ;;  %v12969_v39 = vpop.f32.mrb[222].mxu1 }
 0xefa   : > { %v12970_v44 = vpop.f32.mrb[223].mxu1 }
 0xefb   : > { %v11036_v9 = vadd.f32 %v12968_v28, %v10971_v31  ;;  %v12971_v57 = vadd.f32 %v12970_v44, %v12969_v39 }
 0xefd   : > { %v11039_v20 = vadd.f32 %v12971_v57, %v10974_v22 }
 0xeff   : > { %10762 = vmatmul.mubr.bf16.gmra.mrb[168].mxu0 %v17866_v60 }
 0xf00   : > { %10771 = vmatprep.mubr.bf16.mxu0 %v17888_v4 }
 0xf07   : > { %10772 = vmatmul.mubr.bf16.gmra.mrb[172].mxu0 %v17884_v63 }
 0xf1f   : > { %v12988_v3 = vpop.f32.mrb[224].mxu1 }
 0xf20   : > { %v12989_v14 = vpop.f32.mrb[225].mxu1 }
 0xf21   : > { %v12990_v11 = vadd.f32 %v12989_v14, %v12988_v3  ;;  %v12991_v38 = vpop.f32.mrb[226].mxu1 }
 0xf22   : > { %v12992_v41 = vpop.f32.mrb[227].mxu1 }
 0xf23   : > { %v11077_v54 = vadd.f32 %v12990_v11, %v11012_v24  ;;  %v12993_v52 = vadd.f32 %v12992_v41, %v12991_v38 }
 0xf25   : > { %v11080_v17 = vadd.f32 %v12993_v52, %v11015_v40 }
 0xf27   : > { %v12994_v35 = vpop.f32.mrb[228].mxu1 }
 0xf28   : > { %v12995_v55 = vpop.f32.mrb[229].mxu1 }
 0xf29   : > { %v12996_v25 = vadd.f32 %v12995_v55, %v12994_v35  ;;  %v12997_v31 = vpop.f32.mrb[230].mxu1 }
 0xf2a   : > { %v12998_v46 = vpop.f32.mrb[231].mxu1 }
 0xf2b   : > { %v11085_v22 = vadd.f32 %v12996_v25, %v11020_v15  ;;  %v12999_v27 = vadd.f32 %v12998_v46, %v12997_v31 }
 0xf2d   : > { %v11088_v60 = vadd.f32 %v12999_v27, %v11023_v29 }
 0xf2f   : > { %v13000_v59 = vpop.f32.mrb[232].mxu1 }
 0xf30   : > { %v13001_v4 = vpop.f32.mrb[233].mxu1 }
 0xf31   : > { %v13002_v23 = vadd.f32 %v13001_v4, %v13000_v59  ;;  %v13003_v63 = vpop.f32.mrb[234].mxu1 }
 0xf32   : > { %v13004_v48 = vpop.f32.mrb[235].mxu1 }
 0xf33   : > { %v11093_v47 = vadd.f32 %v13002_v23, %v11028_v5  ;;  %v13005_v30 = vadd.f32 %v13004_v48, %v13003_v63  ;;  %v18011_v23 = vrot.slane %v17916_v2, %v16999_v42 }
 0xf35   : > { %v11096_v18 = vadd.f32 %v13005_v30, %v11031_v34 }
 0xf37   : > { %v13006_v43 = vpop.f32.mrb[236].mxu1 }
 0xf38   : > { %v13007_v24 = vpop.f32.mrb[237].mxu1 }
 0xf39   : > { %v13008_v13 = vadd.f32 %v13007_v24, %v13006_v43  ;;  %v13009_v40 = vpop.f32.mrb[238].mxu1 }
 0xf3a   : > { %v13010_v45 = vpop.f32.mrb[239].mxu1 }
 0xf3b   : > { %v11101_v33 = vadd.f32 %v13008_v13, %v11036_v9  ;;  %v13011_v53 = vadd.f32 %v13010_v45, %v13009_v40 }
 0xf3d   : > { %v11104_v51 = vadd.f32 %v13011_v53, %v11039_v20 }
 0xf3f   : > { %v13028_v61 = vpop.f32.mrb[240].mxu1 }
 0xf40   : > { %v13029_v15 = vpop.f32.mrb[241].mxu1 }
 0xf41   : > { %v13030_v16 = vadd.f32 %v13029_v15, %v13028_v61  ;;  %v13031_v29 = vpop.f32.mrb[242].mxu1 }
 0xf42   : > { %v13032_v7 = vpop.f32.mrb[243].mxu1 }
 0xf43   : > { %v11142_v56 = vadd.f32 %v13030_v16, %v11077_v54  ;;  %v13033_v21 = vadd.f32 %v13032_v7, %v13031_v29 }
 0xf45   : > { %v11145_v28 = vadd.f32 %v13033_v21, %v11080_v17  ;;  %v18030_v53 = vadd.f32 %v11142_v56, %v17460_v32 }
 0xf47   : > { %v13034_v39 = vpop.f32.mrb[244].mxu1 }
 0xf48   : > { %v13035_v5 = vpop.f32.mrb[245].mxu1 }
 0xf49   : > { %v13036_v44 = vadd.f32 %v13035_v5, %v13034_v39  ;;  %v13037_v34 = vpop.f32.mrb[246].mxu1 }
 0xf4a   : > { %v13038_v57 = vpop.f32.mrb[247].mxu1 }
 0xf4b   : > { %v11150_v3 = vadd.f32 %v13036_v44, %v11085_v22  ;;  %v13039_v14 = vadd.f32 %v13038_v57, %v13037_v34 }
 0xf4d   : > { %v11153_v11 = vadd.f32 %v13039_v14, %v11088_v60  ;;  %v18007_v60 = vrot.slane %v17916_v2, %v16993_v19  ;;  %v18058_v44 = vadd.f32 %v11150_v3, %v17480_v10 }
 0xf4f   : > { %v13040_v38 = vpop.f32.mrb[248].mxu1 }
 0xf50   : > { %v13041_v9 = vpop.f32.mrb[249].mxu1 }
 0xf51   : > { %v13042_v41 = vadd.f32 %v13041_v9, %v13040_v38  ;;  %v13043_v20 = vpop.f32.mrb[250].mxu1 }
 0xf52   : > { %v13044_v52 = vpop.f32.mrb[251].mxu1 }
 0xf53   : > { %v17997_v35 = vadd.f32 %v13042_v41, %v11093_v47  ;;  %v13045_v55 = vadd.f32 %v13044_v52, %v13043_v20 }
 0xf55   : > { %v17999_v25 = vadd.f32 %v13045_v55, %v11096_v18  ;;  %v18539_v55 = vld [vmem:[#allocation39_spill] sm:$0xff] }
 0xf57   : > { %v13046_v54 = vpop.f32.mrb[252].mxu1 }
 0xf58   : > { %v13047_v17 = vpop.f32.mrb[253].mxu1 }
 0xf59   : > { %v13048_v31 = vadd.f32 %v13047_v17, %v13046_v54  ;;  %v13049_v46 = vpop.f32.mrb[254].mxu1  ;;  %v18540_v17 = vld [vmem:[#allocation36_spill] sm:$0xff] }
 0xf5a   : > { %v13050_v27 = vpop.f32.mrb[255].mxu1 }
 0xf5b   : > { %v18001_v59 = vadd.f32 %v13048_v31, %v11101_v33  ;;  %v13051_v22 = vadd.f32 %v13050_v27, %v13049_v46  ;;  %v18541_v46 = vld [vmem:[#allocation43_spill] sm:$0xff] }
 0xf5c   : > { %v18087_v27 = vadd.f32 %v17997_v35, %v18541_v46 }
 0xf5d   : > { %v18003_v4 = vadd.f32 %v13051_v22, %v11104_v51 }
 0xfc2   : > { %v10743_v63 = vpop.f32.mrb[160].mxu0 }
 0xfc3   : > { %v13308_v48 = vadd.f32 %v10743_v63, %v18007_v60  ;;  %v10745_v47 = vpop.f32.mrb[161].mxu0 }
 0xfc4   : > { %v13309_v30 = vadd.f32 %v10745_v47, %v18011_v23  ;;  %v10747_v18 = vpop.f32.mrb[162].mxu0 }
 0xfc5   : > { %v18016_v43 = vadd.f32 %v13308_v48, %v17301_v6  ;;  %v13310_v24 = vadd.f32 %v10747_v18, %v18007_v60  ;;  %v10749_v13 = vpop.f32.mrb[163].mxu0  ;;  %v18542_v48 = vld [vmem:[#allocation42_spill] sm:$0xff] }
 0xfc6   : > { %v18020_v40 = vadd.f32 %v13309_v30, %v17295_v12  ;;  %v13311_v45 = vadd.f32 %v10749_v13, %v18011_v23  ;;  %v18036_v12 = vadd.f32 %v11145_v28, %v17453_v37  ;;  %v18094_v47 = vadd.f32 %v17999_v25, %v18542_v48  ;;  %v18544_v25 = vld [vmem:[#allocation38_spill] sm:$0xff] }
 0xfc7   : > { %v18024_v2 = vadd.f32 %v13310_v24, %v17304_v62 }
 0xfc8   : > { %v18027_v33 = vadd.f32 %v13311_v45, %v17298_v1  ;;  %v11198_v6 = vadd.f32 %v18020_v40, %v18016_v43 }
 0xfca   : > { %v10753_v51 = vpop.f32.mrb[164].mxu0  ;;  %v11199_v61 = vadd.f32 %v11198_v6, %v18030_v53  ;;  %v11202_v15 = vadd.f32 %v18027_v33, %v18024_v2  ;;  %v18543_v6 = vld [vmem:[#allocation40_spill] sm:$0xff] }
 0xfcb   : > { %v13312_v62 = vadd.f32 %v10753_v51, %v18007_v60  ;;  %v10755_v16 = vpop.f32.mrb[165].mxu0 }
 0xfcc   : > { %v13313_v1 = vadd.f32 %v10755_v16, %v18011_v23  ;;  %v10757_v29 = vpop.f32.mrb[166].mxu0  ;;  %11200 = vadd.xlane.f32.xlu0 %v11199_v61  ;;  %v11203_v32 = vadd.f32 %v11202_v15, %v18036_v12 }
 0xfcd   : > { %v18044_v7 = vadd.f32 %v13312_v62, %v17341_v0  ;;  %v13314_v56 = vadd.f32 %v10757_v29, %v18007_v60  ;;  %v10759_v21 = vpop.f32.mrb[167].mxu0 }
 0xfce   : > { %v18048_v37 = vadd.f32 %v13313_v1, %v17335_v36  ;;  %v13315_v28 = vadd.f32 %v10759_v21, %v18011_v23  ;;  %11204 = vadd.xlane.f32.xlu1 %v11203_v32  ;;  %v18064_v36 = vadd.f32 %v11153_v11, %v17473_v58  ;;  %v18538_v58 = vld [vmem:[#allocation37_spill] sm:$0xff]  ;;  %v18545_v1 = vld [vmem:[#allocation35_spill] sm:$0xff] }
 0xfcf   : > { %v18052_v39 = vadd.f32 %v13314_v56, %v17344_v50  ;;  %v18546_v32 = vld [vmem:[#allocation41_spill] sm:$0xff] }
 0xfd0   : > { %v18055_v5 = vadd.f32 %v13315_v28, %v17338_v26  ;;  %v11206_v0 = vadd.f32 %v18048_v37, %v18044_v7  ;;  %v18547_v21 = vld [vmem:[#allocation45_spill] sm:$0xff] }
 0xfd1   : > { %v18117_v28 = vadd.f32 %v18001_v59, %v18547_v21 }
 0xfd2   : > { %v10763_v34 = vpop.f32.mrb[168].mxu0  ;;  %v11207_v57 = vadd.f32 %v11206_v0, %v18058_v44  ;;  %v11210_v14 = vadd.f32 %v18055_v5, %v18052_v39 }
 0xfd3   : > { %v13316_v50 = vadd.f32 %v10763_v34, %v18007_v60  ;;  %v10765_v38 = vpop.f32.mrb[169].mxu0  ;;  %v18548_v34 = vld [vmem:[#allocation44_spill] sm:$0xff] }
 0xfd4   : > { %v13317_v26 = vadd.f32 %v10765_v38, %v18011_v23  ;;  %v10767_v9 = vpop.f32.mrb[170].mxu0  ;;  %11208 = vadd.xlane.f32.xlu0 %v11207_v57  ;;  %v11211_v10 = vadd.f32 %v11210_v14, %v18064_v36  ;;  %v18124_v57 = vadd.f32 %v18003_v4, %v18548_v34 }
 0xfd5   : > { %v18072_v3 = vadd.f32 %v13316_v50, %v17381_v8  ;;  %v13318_v41 = vadd.f32 %v10767_v9, %v18007_v60  ;;  %v10769_v20 = vpop.f32.mrb[171].mxu0 }
 0xfd6   : > { %v18076_v11 = vadd.f32 %v13317_v26, %v18538_v58  ;;  %v13319_v52 = vadd.f32 %v10769_v20, %v18011_v23  ;;  %11212 = vadd.xlane.f32.xlu1 %v11211_v10 }
 0xfd7   : > { %v18080_v54 = vadd.f32 %v13318_v41, %v18539_v55 }
 0xfd8   : > { %v18083_v31 = vadd.f32 %v13319_v52, %v18540_v17  ;;  %v11214_v8 = vadd.f32 %v18076_v11, %v18072_v3 }
 0xfda   : > { %v10773_v22 = vpop.f32.mrb[172].mxu0  ;;  %v11215_v63 = vadd.f32 %v11214_v8, %v18087_v27  ;;  %v11218_v30 = vadd.f32 %v18083_v31, %v18080_v54 }
 0xfdb   : > { %v13320_v18 = vadd.f32 %v10773_v22, %v18007_v60  ;;  %v10775_v24 = vpop.f32.mrb[173].mxu0 }
 0xfdc   : > { %v13321_v13 = vadd.f32 %v10775_v24, %v18011_v23  ;;  %v10777_v35 = vpop.f32.mrb[174].mxu0  ;;  %11216 = vadd.xlane.f32.xlu0 %v11215_v63  ;;  %v11219_v45 = vadd.f32 %v11218_v30, %v18094_v47 }
 0xfdd   : > { %v18102_v51 = vadd.f32 %v13320_v18, %v18543_v6  ;;  %v13322_v61 = vadd.f32 %v10777_v35, %v18007_v60  ;;  %v10779_v15 = vpop.f32.mrb[175].mxu0 }
 0xfde   : > { %v18106_v62 = vadd.f32 %v13321_v13, %v18544_v25  ;;  %v13323_v16 = vadd.f32 %v10779_v15, %v18011_v23  ;;  %11220 = vadd.xlane.f32.xlu1 %v11219_v45 }
 0xfdf   : > { %v18110_v29 = vadd.f32 %v13322_v61, %v18545_v1 }
 0xfe0   : > { %v18113_v56 = vadd.f32 %v13323_v16, %v18546_v32  ;;  %v11222_v60 = vadd.f32 %v18106_v62, %v18102_v51 }
 0xfe2   : > { %v11223_v0 = vadd.f32 %v11222_v60, %v18117_v28  ;;  %v11226_v23 = vadd.f32 %v18113_v56, %v18110_v29 }
 0xfe4   : > { %11224 = vadd.xlane.f32.xlu0 %v11223_v0  ;;  %v11227_v14 = vadd.f32 %v11226_v23, %v18124_v57 }
 0xfe6   : > { %11228 = vadd.xlane.f32.xlu1 %v11227_v14 }
0x1059   : > { %v11201_v50 = vpop.xlane.xlu0 %11200 }
0x105a   : > { %v11230_v38 = vmul.f32 0.0026041667, %v11201_v50 }
0x105b   : > { %v11205_v59 = vpop.xlane.xlu1 %11204 }
0x105c   : > { %v18130_v26 = vsub.f32 %v18016_v43, %v11230_v38  ;;  %v18133_v9 = vsub.f32 %v18020_v40, %v11230_v38  ;;  %v11231_v10 = vmul.f32 0.0026041667, %v11205_v59  ;;  %v18136_v4 = vsub.f32 %v18030_v53, %v11230_v38 }
0x105e   : > { %v18139_v41 = vsub.f32 %v18024_v2, %v11231_v10  ;;  %v18142_v20 = vsub.f32 %v18027_v33, %v11231_v10  ;;  %v11262_v58 = vmul.f32 %v18130_v26, %v18130_v26  ;;  %v18147_v52 = vsub.f32 %v18036_v12, %v11231_v10 }
0x105f   : > { %v11263_v43 = vmul.f32 %v18133_v9, %v18133_v9  ;;  %v11264_v33 = vmul.f32 %v18136_v4, %v18136_v4 }
0x1060   : > { %v11265_v40 = vmul.f32 %v18139_v41, %v18139_v41  ;;  %v11266_v53 = vmul.f32 %v18142_v20, %v18142_v20  ;;  %v11267_v12 = vmul.f32 %v18147_v52, %v18147_v52 }
0x1061   : > { %v11209_v2 = vpop.xlane.xlu0 %11208  ;;  %v11286_v55 = vadd.f32 %v11263_v43, %v11262_v58 }
0x1062   : > { %v11232_v17 = vmul.f32 0.0026041667, %v11209_v2  ;;  %v11290_v46 = vadd.f32 %v11266_v53, %v11265_v40 }
0x1063   : > { %v11213_v8 = vpop.xlane.xlu1 %11212  ;;  %v11287_v22 = vadd.f32 %v11286_v55, %v11264_v33 }
0x1064   : > { %v18160_v63 = vsub.f32 %v18044_v7, %v11232_v17  ;;  %v18163_v48 = vsub.f32 %v18048_v37, %v11232_v17  ;;  %v11233_v30 = vmul.f32 0.0026041667, %v11213_v8  ;;  %v18166_v18 = vsub.f32 %v18058_v44, %v11232_v17 }
0x1065   : > { %11288 = vadd.xlane.f32.xlu0 %v11287_v22  ;;  %v11291_v24 = vadd.f32 %v11290_v46, %v11267_v12 }
0x1066   : > { %v18169_v13 = vsub.f32 %v18052_v39, %v11233_v30  ;;  %v18172_v35 = vsub.f32 %v18055_v5, %v11233_v30  ;;  %v11268_v45 = vmul.f32 %v18160_v63, %v18160_v63  ;;  %v18177_v7 = vsub.f32 %v18064_v36, %v11233_v30 }
0x1067   : > { %11292 = vadd.xlane.f32.xlu1 %v11291_v24  ;;  %v11269_v37 = vmul.f32 %v18163_v48, %v18163_v48  ;;  %v11270_v5 = vmul.f32 %v18166_v18, %v18166_v18 }
0x1068   : > { %v11271_v44 = vmul.f32 %v18169_v13, %v18169_v13  ;;  %v11272_v39 = vmul.f32 %v18172_v35, %v18172_v35  ;;  %v11273_v1 = vmul.f32 %v18177_v7, %v18177_v7 }
0x1069   : > { %v11217_v6 = vpop.xlane.xlu0 %11216  ;;  %v11294_v61 = vadd.f32 %v11269_v37, %v11268_v45 }
0x106a   : > { %v11234_v15 = vmul.f32 0.0026041667, %v11217_v6  ;;  %v11298_v25 = vadd.f32 %v11272_v39, %v11271_v44 }
0x106b   : > { %v11221_v16 = vpop.xlane.xlu1 %11220  ;;  %v11295_v36 = vadd.f32 %v11294_v61, %v11270_v5 }
0x106c   : > { %v18190_v32 = vsub.f32 %v18072_v3, %v11234_v15  ;;  %v18193_v21 = vsub.f32 %v18076_v11, %v11234_v15  ;;  %v11235_v60 = vmul.f32 0.0026041667, %v11221_v16  ;;  %v18196_v0 = vsub.f32 %v18087_v27, %v11234_v15 }
0x106d   : > { %11296 = vadd.xlane.f32.xlu0 %v11295_v36  ;;  %v11299_v34 = vadd.f32 %v11298_v25, %v11273_v1  ;;  %v11196_v36 = vld [vmem:[#allocation21] sm:$0x7] }
0x106e   : > { %v18199_v23 = vsub.f32 %v18080_v54, %v11235_v60  ;;  %v18202_v14 = vsub.f32 %v18083_v31, %v11235_v60  ;;  %v11274_v50 = vmul.f32 %v18190_v32, %v18190_v32  ;;  %v18207_v3 = vsub.f32 %v18094_v47, %v11235_v60 }
0x106f   : > { %11300 = vadd.xlane.f32.xlu1 %v11299_v34  ;;  %v11275_v11 = vmul.f32 %v18193_v21, %v18193_v21  ;;  %v11276_v31 = vmul.f32 %v18196_v0, %v18196_v0  ;;  %v11197_v34 = vld [vmem:[#allocation22] sm:$0x7] }
0x1070   : > { %v11277_v27 = vmul.f32 %v18199_v23, %v18199_v23  ;;  %v11278_v54 = vmul.f32 %v18202_v14, %v18202_v14  ;;  %v11279_v40 = vmul.f32 %v18207_v3, %v18207_v3 }
0x1071   : > { %v11225_v38 = vpop.xlane.xlu0 %11224  ;;  %v11302_v59 = vadd.f32 %v11275_v11, %v11274_v50  ;;  %v18250_v11 = vrot.slane %v11196_v36, %v16993_v19 }
0x1072   : > { %v11236_v10 = vmul.f32 0.0026041667, %v11225_v38  ;;  %v11306_v58 = vadd.f32 %v11278_v54, %v11277_v27  ;;  %v18253_v27 = vrot.slane %v11196_v36, %v16999_v42  ;;  %v18256_v54 = vrot.slane %v11196_v36, %v16996_v49 }
0x1073   : > { %v11229_v43 = vpop.xlane.xlu1 %11228  ;;  %v11303_v47 = vadd.f32 %v11302_v59, %v11276_v31  ;;  %v18259_v31 = vrot.slane %v11197_v34, %v16993_v19  ;;  %v18262_v59 = vrot.slane %v11197_v34, %v16999_v42 }
0x1074   : > { %v18220_v53 = vsub.f32 %v18102_v51, %v11236_v10  ;;  %v18223_v2 = vsub.f32 %v18106_v62, %v11236_v10  ;;  %v11237_v33 = vmul.f32 0.0026041667, %v11229_v43  ;;  %v18226_v55 = vsub.f32 %v18117_v28, %v11236_v10 }
0x1075   : > { %11304 = vadd.xlane.f32.xlu0 %v11303_v47  ;;  %v11307_v17 = vadd.f32 %v11306_v58, %v11279_v40  ;;  %v18265_v10 = vrot.slane %v11197_v34, %v16996_v49 }
0x1076   : > { %v18229_v46 = vsub.f32 %v18110_v29, %v11237_v33  ;;  %v18232_v8 = vsub.f32 %v18113_v56, %v11237_v33  ;;  %v18235_v22 = vsub.f32 %v18124_v57, %v11237_v33  ;;  %v11280_v51 = vmul.f32 %v18220_v53, %v18220_v53 }
0x1077   : > { %11308 = vadd.xlane.f32.xlu1 %v11307_v17  ;;  %v11281_v62 = vmul.f32 %v18223_v2, %v18223_v2  ;;  %v11282_v56 = vmul.f32 %v18226_v55, %v18226_v55 }
0x1078   : > { %v11283_v28 = vmul.f32 %v18229_v46, %v18229_v46  ;;  %v11284_v29 = vmul.f32 %v18232_v8, %v18232_v8  ;;  %v11285_v57 = vmul.f32 %v18235_v22, %v18235_v22 }
0x1079   : > { %v11310_v12 = vadd.f32 %v11281_v62, %v11280_v51 }
0x107a   : > { %v11314_v30 = vadd.f32 %v11284_v29, %v11283_v28 }
0x107b   : > { %v11311_v24 = vadd.f32 %v11310_v12, %v11282_v56 }
0x107c   : > { %v11315_v45 = vadd.f32 %v11314_v30, %v11285_v57 }
0x107d   : > { %11312 = vadd.xlane.f32.xlu0 %v11311_v24 }
0x107e   : > { %11316 = vadd.xlane.f32.xlu1 %v11315_v45 }
0x10f2   : > { %v11289_v37 = vpop.xlane.xlu0 %11288 }
0x10f3   : > { %v11318_v44 = vmul.f32 0.0026041667, %v11289_v37 }
0x10f4   : > { %v11293_v39 = vpop.xlane.xlu1 %11292 }
0x10f5   : > { %v11326_v6 = vadd.f32 1e-05, %v11318_v44  ;;  %v11319_v5 = vmul.f32 0.0026041667, %v11293_v39 }
0x10f7   : > { %15287 = vrsqrt.f32 %v11326_v6  ;;  %v11327_v61 = vadd.f32 1e-05, %v11319_v5 }
0x10f9   : > { %15289 = vrsqrt.f32 %v11327_v61 }
0x10fa   : > { %v11297_v15 = vpop.xlane.xlu0 %11296 }
0x10fb   : > { %v11320_v25 = vmul.f32 0.0026041667, %v11297_v15 }
0x10fc   : > { %v11301_v16 = vpop.xlane.xlu1 %11300 }
0x10fd   : > { %v11328_v1 = vadd.f32 1e-05, %v11320_v25  ;;  %v11321_v60 = vmul.f32 0.0026041667, %v11301_v16 }
0x10ff   : > { %15291 = vrsqrt.f32 %v11328_v1  ;;  %v11329_v50 = vadd.f32 1e-05, %v11321_v60 }
0x1101   : > { %v15288_v38 = vpop.eup %15287  ;;  %15293 = vrsqrt.f32 %v11329_v50 }
0x1102   : > { %v11342_v58 = vmul.f32 %v15288_v38, %v18130_v26  ;;  %v11343_v43 = vmul.f32 %v15288_v38, %v18133_v9  ;;  %v11344_v47 = vmul.f32 %v15288_v38, %v18136_v4  ;;  %v11305_v40 = vpop.xlane.xlu0 %11304 }
0x1103   : > { %v15290_v33 = vpop.eup %15289  ;;  %v11322_v17 = vmul.f32 0.0026041667, %v11305_v40 }
0x1104   : > { %v11382_v51 = vmul.f32 %v18250_v11, %v11342_v58  ;;  %v11383_v19 = vmul.f32 %v18253_v27, %v11343_v43  ;;  %v11384_v42 = vmul.f32 %v18256_v54, %v11344_v47  ;;  %v11345_v62 = vmul.f32 %v15290_v33, %v18139_v41  ;;  %v11309_v49 = vpop.xlane.xlu1 %11308 }
0x1105   : > { %v11346_v28 = vmul.f32 %v15290_v33, %v18142_v20  ;;  %v11347_v26 = vmul.f32 %v15290_v33, %v18147_v52  ;;  %v11330_v9 = vadd.f32 1e-05, %v11322_v17  ;;  %v11323_v29 = vmul.f32 0.0026041667, %v11309_v49 }
0x1106   : > { %v11422_v4 = vadd.f32 %v18259_v31, %v11382_v51  ;;  %v11423_v56 = vadd.f32 %v18262_v59, %v11383_v19  ;;  %v11424_v12 = vadd.f32 %v18265_v10, %v11384_v42  ;;  %v11385_v57 = vmul.f32 %v18250_v11, %v11345_v62 }
0x1107   : > { %v11386_v30 = vmul.f32 %v18253_v27, %v11346_v28  ;;  %v11387_v24 = vmul.f32 %v18256_v54, %v11347_v26  ;;  %15295 = vrsqrt.f32 %v11330_v9  ;;  %v11331_v41 = vadd.f32 1e-05, %v11323_v29 }
0x1108   : > { %11446 = vst [vmem:[%s18284_s27] sm:$0xff] %v11422_v4  ;;  %11447 = vst [vmem:[%s18284_s27 + $0x8] sm:$0xff] %v11423_v56  ;;  %v11425_v20 = vadd.f32 %v18259_v31, %v11385_v57 }
0x1109   : > { %11448 = vst [vmem:[%s18284_s27 + $0x10] sm:$0xff] %v11424_v12  ;;  %v15292_v52 = vpop.eup %15291  ;;  %v11426_v45 = vadd.f32 %v18262_v59, %v11386_v30  ;;  %v11427_v37 = vadd.f32 %v18265_v10, %v11387_v24  ;;  %15297 = vrsqrt.f32 %v11331_v41 }
0x110a   : > { %11449 = vst [vmem:[%s18284_s27 + $0x18] sm:$0xff] %v11425_v20  ;;  %v11348_v44 = vmul.f32 %v15292_v52, %v18160_v63  ;;  %v11349_v39 = vmul.f32 %v15292_v52, %v18163_v48  ;;  %v11350_v6 = vmul.f32 %v15292_v52, %v18166_v18  ;;  %v11313_v5 = vpop.xlane.xlu0 %11312 }
0x110b   : > { %v15294_v61 = vpop.eup %15293  ;;  %11450 = vst [vmem:[%s18284_s27 + $0x20] sm:$0xff] %v11426_v45  ;;  %11451 = vst [vmem:[%s18284_s27 + $0x28] sm:$0xff] %v11427_v37  ;;  %v11324_v15 = vmul.f32 0.0026041667, %v11313_v5  ;;  %v11317_v25 = vpop.xlane.xlu1 %11316 }
0x110c   : > { %v11388_v16 = vmul.f32 %v18250_v11, %v11348_v44  ;;  %v11389_v36 = vmul.f32 %v18253_v27, %v11349_v39  ;;  %v11390_v1 = vmul.f32 %v18256_v54, %v11350_v6  ;;  %v11351_v63 = vmul.f32 %v15294_v61, %v18169_v13 }
0x110d   : > { %v11352_v48 = vmul.f32 %v15294_v61, %v18172_v35  ;;  %v11353_v18 = vmul.f32 %v15294_v61, %v18177_v7  ;;  %v11332_v60 = vadd.f32 1e-05, %v11324_v15  ;;  %v11325_v34 = vmul.f32 0.0026041667, %v11317_v25 }
0x110e   : > { %v11428_v50 = vadd.f32 %v18259_v31, %v11388_v16  ;;  %v11429_v38 = vadd.f32 %v18262_v59, %v11389_v36  ;;  %v11430_v58 = vadd.f32 %v18265_v10, %v11390_v1  ;;  %v11391_v43 = vmul.f32 %v18250_v11, %v11351_v63 }
0x110f   : > { %v11392_v47 = vmul.f32 %v18253_v27, %v11352_v48  ;;  %v11393_v40 = vmul.f32 %v18256_v54, %v11353_v18  ;;  %15299 = vrsqrt.f32 %v11332_v60  ;;  %v11333_v13 = vadd.f32 1e-05, %v11325_v34 }
0x1110   : > { %11452 = vst [vmem:[%s18284_s27 + $0x30] sm:$0xff] %v11428_v50  ;;  %11453 = vst [vmem:[%s18284_s27 + $0x38] sm:$0xff] %v11429_v38  ;;  %v11431_v35 = vadd.f32 %v18259_v31, %v11391_v43 }
0x1111   : > { %11454 = vst [vmem:[%s18284_s27 + $0x40] sm:$0xff] %v11430_v58  ;;  %v15296_v7 = vpop.eup %15295  ;;  %v11432_v33 = vadd.f32 %v18262_v59, %v11392_v47  ;;  %v11433_v17 = vadd.f32 %v18265_v10, %v11393_v40  ;;  %15301 = vrsqrt.f32 %v11333_v13 }
0x1112   : > { %11455 = vst [vmem:[%s18284_s27 + $0x48] sm:$0xff] %v11431_v35  ;;  %v11354_v51 = vmul.f32 %v15296_v7, %v18190_v32  ;;  %v11355_v19 = vmul.f32 %v15296_v7, %v18193_v21  ;;  %v11356_v42 = vmul.f32 %v15296_v7, %v18196_v0 }
0x1113   : > { %v15298_v62 = vpop.eup %15297  ;;  %11456 = vst [vmem:[%s18284_s27 + $0x50] sm:$0xff] %v11432_v33  ;;  %11457 = vst [vmem:[%s18284_s27 + $0x58] sm:$0xff] %v11433_v17 }
0x1114   : > { %v11394_v49 = vmul.f32 %v18250_v11, %v11354_v51  ;;  %v11395_v28 = vmul.f32 %v18253_v27, %v11355_v19  ;;  %v11396_v26 = vmul.f32 %v18256_v54, %v11356_v42  ;;  %v11357_v9 = vmul.f32 %v15298_v62, %v18199_v23 }
0x1115   : > { %v11358_v32 = vmul.f32 %v15298_v62, %v18202_v14  ;;  %v11359_v21 = vmul.f32 %v15298_v62, %v18207_v3 }
0x1116   : > { %v11434_v0 = vadd.f32 %v18259_v31, %v11394_v49  ;;  %v11435_v29 = vadd.f32 %v18262_v59, %v11395_v28  ;;  %v11436_v4 = vadd.f32 %v18265_v10, %v11396_v26  ;;  %v11397_v56 = vmul.f32 %v18250_v11, %v11357_v9 }
0x1117   : > { %v11398_v12 = vmul.f32 %v18253_v27, %v11358_v32  ;;  %v11399_v57 = vmul.f32 %v18256_v54, %v11359_v21 }
0x1118   : > { %11458 = vst [vmem:[%s18284_s27 + $0x60] sm:$0xff] %v11434_v0  ;;  %11459 = vst [vmem:[%s18284_s27 + $0x68] sm:$0xff] %v11435_v29  ;;  %v11437_v23 = vadd.f32 %v18259_v31, %v11397_v56 }
0x1119   : > { %11460 = vst [vmem:[%s18284_s27 + $0x70] sm:$0xff] %v11436_v4  ;;  %v15300_v14 = vpop.eup %15299  ;;  %v11438_v3 = vadd.f32 %v18262_v59, %v11398_v12  ;;  %v11439_v30 = vadd.f32 %v18265_v10, %v11399_v57 }
0x111a   : > { %11461 = vst [vmem:[%s18284_s27 + $0x78] sm:$0xff] %v11437_v23  ;;  %v11360_v24 = vmul.f32 %v15300_v14, %v18220_v53  ;;  %v11361_v41 = vmul.f32 %v15300_v14, %v18223_v2  ;;  %v11362_v20 = vmul.f32 %v15300_v14, %v18226_v55 }
0x111b   : > { %v15302_v52 = vpop.eup %15301  ;;  %11462 = vst [vmem:[%s18284_s27 + $0x80] sm:$0xff] %v11438_v3  ;;  %11463 = vst [vmem:[%s18284_s27 + $0x88] sm:$0xff] %v11439_v30 }
0x111c   : > { %v11400_v45 = vmul.f32 %v18250_v11, %v11360_v24  ;;  %v11401_v37 = vmul.f32 %v18253_v27, %v11361_v41  ;;  %v11402_v44 = vmul.f32 %v18256_v54, %v11362_v20  ;;  %v11363_v39 = vmul.f32 %v15302_v52, %v18229_v46 }
0x111d   : > { %v11364_v53 = vmul.f32 %v15302_v52, %v18232_v8  ;;  %v11365_v2 = vmul.f32 %v15302_v52, %v18235_v22 }
0x111e   : > { %v11440_v55 = vadd.f32 %v18259_v31, %v11400_v45  ;;  %v11441_v6 = vadd.f32 %v18262_v59, %v11401_v37  ;;  %v11442_v5 = vadd.f32 %v18265_v10, %v11402_v44  ;;  %v11403_v61 = vmul.f32 %v18250_v11, %v11363_v39 }
0x111f   : > { %v11404_v46 = vmul.f32 %v18253_v27, %v11364_v53  ;;  %v11405_v8 = vmul.f32 %v18256_v54, %v11365_v2 }
0x1120   : > { %11464 = vst [vmem:[%s18284_s27 + $0x90] sm:$0xff] %v11440_v55  ;;  %11465 = vst [vmem:[%s18284_s27 + $0x98] sm:$0xff] %v11441_v6  ;;  %v11443_v22 = vadd.f32 %v18259_v31, %v11403_v61 }
0x1121   : > { %11466 = vst [vmem:[%s18284_s27 + $0xa0] sm:$0xff] %v11442_v5  ;;  %v11444_v11 = vadd.f32 %v18262_v59, %v11404_v46  ;;  %v11445_v27 = vadd.f32 %v18265_v10, %v11405_v8 }
0x1122   : > { %11467 = vst [vmem:[%s18284_s27 + $0xa8] sm:$0xff] %v11443_v22 }
0x1123   : > { %11468 = vst [vmem:[%s18284_s27 + $0xb0] sm:$0xff] %v11444_v11  ;;  %11469 = vst [vmem:[%s18284_s27 + $0xb8] sm:$0xff] %v11445_v27 }
0x1124   : > { %15678 = shalt.err (!%p15675_p9)
}
0x1125   : > { %s15679_s18 = scalar_lea.hbm %s18367_s1, 3072  ;;  %s15683_s12 = scalar_lea.hbm %s18549_s2, 6144 }
0x1126   : > { %p15680_p7 = scmp.ne.s32.totalorder %s18367_s1, %s15679_s18  ;;  %p15684_p13 = scmp.lt.u32.totalorder %s18367_s1, %s18549_s2 }
0x1127   : > { %p15685_p1 = scmp.lt.u32.totalorder %s15683_s12, %s15679_s18  ;;  %p15687_p2 = scmp.lt.u32.totalorder %s15679_s18, %s18367_s1 }
0x1128   : > { %p15681_p4 = pnand %p15680_p7, %p18550_p8 }
0x1129   : > { %p15686_p3 = por %p15685_p1, %p15684_p13 }
0x112a   : > { %p15682_p12 = pneg %p15681_p4 }
0x112b   : > { %p15688_p6 = por %p15687_p2, %p15686_p3 }
0x112d   : > { %p15689_p10 = pnand %p15688_p6, %p15682_p12 }
0x112f   : > { %15692 = shalt.err (!%p15689_p10)
}
0x1130   : > { %s15778_s15 = smov 384   ;;  %s15779_s17 = smov 24  }
0x1131   : > { %13646 = dma.vmem_to_hbm [thread:$0]  (%p18550_p8), %s18369_s29, 3072, %s18367_s1, %s11471_s3, %s15778_s15, %s15778_s15, %s15779_s17  }
0x1132 PF: > { %s11499_s14 = sand.u32 1, %s15743_s21   ;;  %p18551_p11 = scmp.ne.s32.totalorder %s18485_s19, 0 }
0x1133   : > { %p18552_p0 = scmp.ge.s32.totalorder %s15755_s24, 2  ;;  %s11500_s18 = scalar_lea.sflag [#allocation6], %s11499_s14 }
0x1135   : > { %p13687_p5 = pnand %p18552_p0, %p18551_p11 }
0x1137   : > { %15738 = dma.done.wait (!%p13687_p5), %s11500_s18, 3072  }
0x1138   : > { %15740 = vsyncadd (!%p13687_p5), %s11500_s18, 4294964224  ;;  %p31_p9 = scmp.ge.s32.totalorder %s16139_s13, 4   ;;  %s18553_s21 = smov %s15747_s22 }
0x1139   : > { %s18554_s22 = smov %s15751_s23  ;;  %s18555_s23 = smov %s16151_s20 }
0x113a   : > { %s18556_s24 = smov %s16139_s13  ;;  %33 = sbr.rel (!%p31_p9) target bundleno = 17 (0x11), region = 157 }
0x1141   :  { %11505 = vsyncpa [#allocation5], 1 }
0x1142   :  { %11507 = vsyncpa [#allocation5 + $0x1], 1 }
0x1143   :  { %11508 = vsyncpa [#allocation8], 1 }
0x1144   :  { %11509 = vsyncpa [#allocation11], 1 }
0x1145   :  { %11510 = vsyncpa [#allocation14], 1 }
0x1146   :  { %11511 = vsyncpa [#allocation17], 1 }
0x1147   :  { %11512 = vsyncpa [#allocation20], 1 }
0x1148   :  { %11513 = vsyncpa [#allocation23], 1 }
0x1149   :  { %11514 = vsyncpa [#allocation6], 1 }
0x114a   :  { %11516 = vsyncpa [#allocation6 + $0x1], 1 }

</bundles_post_ra>
